<compile_context>
chip_gen: v7x
topology: tpu7x:2x2x1
jax: 0.10.0
libtpu: 0.0.40
codegen_flags: <defaults>
</compile_context>

<pallas_src>
import numpy as np
import jax
import jax.numpy as jnp
from jax import lax
from jax.experimental import pallas as pl
from jax.experimental.pallas import tpu as pltpu


# ---------------------------------------------------------------------------
# Geometry (32x32 single-channel input, as implied by Linear(16*5*5, 120))
# ---------------------------------------------------------------------------
H_IN = 32
K = 5
C1_OC, C2_OC = 6, 16
C1_OH = H_IN - K + 1          # 28
P1_OH = C1_OH // 2            # 14
C2_OH = P1_OH - K + 1         # 10
P2_OH = C2_OH // 2            # 5

X_FLAT = H_IN * H_IN          # 1024
X_PAD = 1152                  # lane-aligned; need max_shift + C1_W = 132 + 896 = 1028 <= 1152
C1_W = C1_OH * H_IN           # 896 : conv1 grid = 28 rows x 32 wide cols (flattened on lanes)
P1_ROWW = 16                  # wide row width of the 14x14 pooled map
P1_W = 256                    # 14*16 = 224, padded to 256 (room for conv2 shifts)
C2_ROWW = 16
C2_W = C2_OH * C2_ROWW        # 160 : conv2 grid = 10 rows x 16 wide cols
FC_SPATIAL = P2_OH * P2_OH    # 25
FC_SLOT = 32                  # lanes reserved per channel in the flattened fc1 input
FC1_IN_PAD = C2_OC * FC_SLOT  # 512
STAGE_SUB = 8                 # sublanes reserved per conv2 tap in the im2col staging
STAGE_ROWS = K * K * STAGE_SUB  # 200


# ---------------------------------------------------------------------------
# Fused forward kernel (one grid step = B_SUB images)
# ---------------------------------------------------------------------------
def _lenet_fused_kernel(x_ref, w1_ref, b1_ref, w2p_ref, b2_ref,
                        p1sel_ref, p2sel_ref,
                        fc1w_ref, fc1b_ref, fc2w_ref, fc2b_ref, fc3w_ref, fc3b_ref,
                        out_ref,
                        p1pad_scr, p2pad_scr, stage_scr, fcin_scr):
    f32 = jnp.float32
    bf16 = jnp.bfloat16
    b_sub = x_ref.shape[0]

    # Zero the scratches once per grid step: padded tail columns of the pool buffers and
    # the 2 unused sublanes per tap of the conv2 im2col staging must read as finite zeros.
    p1pad_scr[...] = jnp.zeros_like(p1pad_scr)
    p2pad_scr[...] = jnp.zeros_like(p2pad_scr)
    stage_scr[...] = jnp.zeros_like(stage_scr)

    w1 = w1_ref[...]          # [6, 25]  f32 (VPU path)
    b1 = b1_ref[...]          # [6, 1]
    b2 = b2_ref[...]          # [16, 1]

    for bi in range(b_sub):   # small static sub-batch (<= 8); batch tiling lives on the grid
        # ---- Conv1 (1->6, 5x5), shift trick on the 28x32 wide grid; VPU broadcast-MAC.
        acc1 = jnp.zeros((C1_OC, C1_W), f32)
        for i in range(K):
            for j in range(K):
                tap = i * K + j
                s = i * H_IN + j
                acc1 = acc1 + w1[:, tap:tap + 1] * x_ref[bi:bi + 1, s:s + C1_W]
        c1 = acc1 + b1                                             # [6, 896]

        # ---- MaxPool1 (2x2): pair-max on the VPU via shifted slices of a zero-padded
        #      scratch, then ONE bf16 0/1 gather matmul (was 4 f32 selector matmuls).
        p1pad_scr[:, 0:C1_W] = c1
        mh = jnp.maximum(c1, p1pad_scr[:, 1:1 + C1_W])             # max over column pairs
        p1pad_scr[:, 0:C1_W] = mh
        mp = jnp.maximum(mh, p1pad_scr[:, H_IN:H_IN + C1_W])       # + max over row pairs
        p1 = jnp.dot(mp.astype(bf16), p1sel_ref[...],
                     preferred_element_type=f32)                   # [6, 256]

        # ---- Conv2 (6->16, 5x5) as ONE GEMM: stage the 25 shifted [6,160] slices at an
        #      8-sublane stride (im2col), then a single [16,200] x [200,160] matmul.
        for i in range(K):
            for j in range(K):
                tap = i * K + j
                s = i * P1_ROWW + j
                stage_scr[tap * STAGE_SUB:tap * STAGE_SUB + C1_OC, :] = p1[:, s:s + C2_W]
        c2 = jnp.dot(w2p_ref[...], stage_scr[...],
                     preferred_element_type=f32) + b2              # [16, 160]

        # ---- MaxPool2 (2x2): same pre-max + ONE gather matmul -> [16, 32] (lanes 25..31 = 0)
        p2pad_scr[:, 0:C2_W] = c2
        mh2 = jnp.maximum(c2, p2pad_scr[:, 1:1 + C2_W])
        p2pad_scr[:, 0:C2_W] = mh2
        mp2 = jnp.maximum(mh2, p2pad_scr[:, C2_ROWW:C2_ROWW + C2_W])
        p2 = jnp.dot(mp2.astype(bf16), p2sel_ref[...],
                     preferred_element_type=f32)                   # [16, 32]

        # ---- Flatten (PyTorch C,H,W order): channel c -> lanes [c*32, c*32+25).
        for c in range(C2_OC):
            fcin_scr[bi:bi + 1, c * FC_SLOT:(c + 1) * FC_SLOT] = p2[c:c + 1, :]

    # ---- FC stack, batched over the whole sub-batch (M = b_sub, not 16 tiny M=1 GEMMs).
    #      fc1 runs in bf16 (big operand); fc2/fc3 are a few KB so they stay f32 for margin.
    h = jnp.dot(fcin_scr[...].astype(bf16), fc1w_ref[...],
                preferred_element_type=f32) + fc1b_ref[...]        # [b_sub, 120]
    h = jnp.dot(h, fc2w_ref[...].astype(f32),
                preferred_element_type=f32) + fc2b_ref[...]        # [b_sub, 84]
    out_ref[...] = (jnp.dot(h, fc3w_ref[...].astype(f32),
                            preferred_element_type=f32) + fc3b_ref[...])   # [b_sub, 10]


# ---------------------------------------------------------------------------
# One-time parameter preparation (kernel layouts + 0/1 pool gather matrices)
# ---------------------------------------------------------------------------
def _build_pool_selectors():
    """Single 0/1 gather matrix per pool (applied AFTER the VPU 2x2 max); exact in bf16."""
    p1sel = np.zeros((C1_W, P1_W), np.float32)
    for p in range(P1_OH):
        for q in range(P1_OH):
            p1sel[(2 * p) * H_IN + 2 * q, p * P1_ROWW + q] = 1.0
    p2sel = np.zeros((C2_W, FC_SLOT), np.float32)
    for m in range(P2_OH):
        for n in range(P2_OH):
            p2sel[(2 * m) * C2_ROWW + 2 * n, m * P2_OH + n] = 1.0
    return jnp.asarray(p1sel, jnp.bfloat16), jnp.asarray(p2sel, jnp.bfloat16)


def prepare_kernel_params(params):
    """Repack PyTorch-layout parameters once into the layouts the fused kernel uses."""
    f32, bf16 = jnp.float32, jnp.bfloat16
    p1sel, p2sel = _build_pool_selectors()

    # conv2 weight packed for the single im2col GEMM: [16, 25 taps * 8 sublanes]
    w2t = jnp.transpose(params["conv2_w"], (0, 2, 3, 1)).reshape(C2_OC, K * K, C1_OC)
    w2p = jnp.zeros((C2_OC, K * K, STAGE_SUB), f32).at[:, :, :C1_OC].set(w2t)
    w2p = w2p.reshape(C2_OC, STAGE_ROWS)

    # fc1 weight packed for the 32-lane-per-channel flatten layout: [512, 120]
    fc1t = params["fc1_w"].T.reshape(C2_OC, FC_SPATIAL, 120)
    fc1p = jnp.zeros((C2_OC, FC_SLOT, 120), f32).at[:, :FC_SPATIAL, :].set(fc1t)
    fc1p = fc1p.reshape(FC1_IN_PAD, 120)

    return {
        "w1": params["conv1_w"].reshape(C1_OC, K * K).astype(f32),   # [6, 25]
        "b1": params["conv1_b"].reshape(C1_OC, 1).astype(f32),
        "w2p": w2p,                                                  # [16, 200] f32
        "b2": params["conv2_b"].reshape(C2_OC, 1).astype(f32),
        "p1sel": p1sel,                                              # [896, 256] bf16
        "p2sel": p2sel,                                              # [160, 32]  bf16
        "fc1w": fc1p.astype(bf16),                                   # [512, 120] bf16
        "fc1b": params["fc1_b"].reshape(1, 120).astype(f32),
        "fc2w": params["fc2_w"].T.astype(bf16),                      # [120, 84]  bf16
        "fc2b": params["fc2_b"].reshape(1, 84).astype(f32),
        "fc3w": params["fc3_w"].T.astype(bf16),                      # [84, 10]   bf16
        "fc3b": params["fc3_b"].reshape(1, 10).astype(f32),
    }


# ---------------------------------------------------------------------------
# Forward pass: batch on a parallel grid axis, weights VMEM-resident
# ---------------------------------------------------------------------------
def my_model_forward(kp, x):
    """x: [B, 1, 32, 32] float32 (NCHW) -> [B, 10]."""
    B = x.shape[0]
    assert x.shape[1:] == (1, H_IN, H_IN), x.shape
    xf = x.reshape(B, X_FLAT).astype(jnp.float32)

    b_sub = 8 if B >= 8 else B                      # images per grid step
    b_pad = ((B + b_sub - 1) // b_sub) * b_sub
    xf = jnp.pad(xf, ((0, b_pad - B), (0, X_PAD - X_FLAT)))   # room for conv1 shifts

    weights = (kp["w1"], kp["b1"], kp["w2p"], kp["b2"], kp["p1sel"], kp["p2sel"],
               kp["fc1w"], kp["fc1b"], kp["fc2w"], kp["fc2b"], kp["fc3w"], kp["fc3b"])
    w_specs = [pl.BlockSpec(w.shape, lambda g: (0, 0)) for w in weights]   # resident

    out = pl.pallas_call(
        _lenet_fused_kernel,
        out_shape=jax.ShapeDtypeStruct((b_pad, 10), jnp.float32),
        grid=(b_pad // b_sub,),
        in_specs=[pl.BlockSpec((b_sub, X_PAD), lambda g: (g, 0))] + w_specs,
        out_specs=pl.BlockSpec((b_sub, 10), lambda g: (g, 0)),
        scratch_shapes=[
            pltpu.VMEM((C1_OC, 1024), jnp.float32),        # pool1 shifted-max pad buffer
            pltpu.VMEM((C2_OC, 256), jnp.float32),         # pool2 shifted-max pad buffer
            pltpu.VMEM((STAGE_ROWS, C2_W), jnp.float32),   # conv2 im2col staging
            pltpu.VMEM((b_sub, FC1_IN_PAD), jnp.float32),  # flattened fc1 input (sub-batch)
        ],
        compiler_params=pltpu.CompilerParams(
            dimension_semantics=("parallel",),
            vmem_limit_bytes=32 * 1024 * 1024),
    )(xf, *weights)
    return out[:B]


# ---------------------------------------------------------------------------
# Deterministic synthetic parameters + pure-JAX reference (sanity check)
# ---------------------------------------------------------------------------
def init_params():
    key = jax.random.PRNGKey(42)
    ks = jax.random.split(key, 10)

    def rnd(k, shape, fan_in):
        return (jax.random.normal(k, shape, jnp.float32) / jnp.sqrt(fan_in)).astype(jnp.float32)

    return {
        "conv1_w": rnd(ks[0], (6, 1, 5, 5), 1 * 5 * 5),
        "conv1_b": rnd(ks[1], (6,), 1 * 5 * 5),
        "conv2_w": rnd(ks[2], (16, 6, 5, 5), 6 * 5 * 5),
        "conv2_b": rnd(ks[3], (16,), 6 * 5 * 5),
        "fc1_w": rnd(ks[4], (120, 400), 400),
        "fc1_b": rnd(ks[5], (120,), 400),
        "fc2_w": rnd(ks[6], (84, 120), 120),
        "fc2_b": rnd(ks[7], (84,), 120),
        "fc3_w": rnd(ks[8], (10, 84), 84),
        "fc3_b": rnd(ks[9], (10,), 84),
    }


def reference_forward(params, x):
    hp = lax.Precision.HIGHEST
    y = lax.conv_general_dilated(x, params["conv1_w"], (1, 1), "VALID",
                                 dimension_numbers=("NCHW", "OIHW", "NCHW"), precision=hp)
    y = y + params["conv1_b"].reshape(1, C1_OC, 1, 1)
    y = lax.reduce_window(y, -jnp.inf, lax.max, (1, 1, 2, 2), (1, 1, 2, 2), "VALID")
    y = lax.conv_general_dilated(y, params["conv2_w"], (1, 1), "VALID",
                                 dimension_numbers=("NCHW", "OIHW", "NCHW"), precision=hp)
    y = y + params["conv2_b"].reshape(1, C2_OC, 1, 1)
    y = lax.reduce_window(y, -jnp.inf, lax.max, (1, 1, 2, 2), (1, 1, 2, 2), "VALID")
    y = y.reshape(y.shape[0], -1)
    y = jnp.dot(y, params["fc1_w"].T, precision=hp) + params["fc1_b"]
    y = jnp.dot(y, params["fc2_w"].T, precision=hp) + params["fc2_b"]
    y = jnp.dot(y, params["fc3_w"].T, precision=hp) + params["fc3_b"]
    return y


if __name__ == "__main__":
    params = init_params()
    kernel_params = prepare_kernel_params(params)
    x = jax.random.normal(jax.random.PRNGKey(0), (2, 1, H_IN, H_IN), jnp.float32)

    out = jax.jit(my_model_forward)(kernel_params, x)
    out = jax.block_until_ready(out)

    assert out.shape == (2, 10), out.shape
    assert out.dtype == jnp.float32

    ref = reference_forward(params, x)
    max_err = float(jnp.max(jnp.abs(out - ref)))
    assert jnp.allclose(out, ref, atol=2e-2, rtol=2e-2), (
        "mismatch vs reference, max abs err = %f" % max_err)

    print("KERNEL_OK")
</pallas_src>

<mosaic_0001>
module attributes {stable_mosaic.version = 11 : i64} {
  func.func @_lenet_fused_kernel(%arg0: i32, %arg1: memref<2x1152xf32, #tpu.memory_space<vmem>>, %arg2: memref<6x25xf32, #tpu.memory_space<vmem>>, %arg3: memref<6x1xf32, #tpu.memory_space<vmem>>, %arg4: memref<16x200xf32, #tpu.memory_space<vmem>>, %arg5: memref<16x1xf32, #tpu.memory_space<vmem>>, %arg6: memref<896x256xbf16, #tpu.memory_space<vmem>>, %arg7: memref<160x32xbf16, #tpu.memory_space<vmem>>, %arg8: memref<512x120xbf16, #tpu.memory_space<vmem>>, %arg9: memref<1x120xf32, #tpu.memory_space<vmem>>, %arg10: memref<120x84xbf16, #tpu.memory_space<vmem>>, %arg11: memref<1x84xf32, #tpu.memory_space<vmem>>, %arg12: memref<84x10xbf16, #tpu.memory_space<vmem>>, %arg13: memref<1x10xf32, #tpu.memory_space<vmem>>, %arg14: memref<2x10xf32, #tpu.memory_space<vmem>>, %arg15: memref<6x1024xf32, #tpu.memory_space<vmem>>, %arg16: memref<16x256xf32, #tpu.memory_space<vmem>>, %arg17: memref<200x160xf32, #tpu.memory_space<vmem>>, %arg18: memref<2x512xf32, #tpu.memory_space<vmem>>) attributes {dimension_semantics = [#tpu.dimension_semantics<parallel>], iteration_bounds = array<i64: 1>, scalar_prefetch = 0 : i64, scratch_operands = 4 : i64, tpu.core_type = #tpu.core_type<tc>, window_params = [{transform_indices = @transform_0, window_bounds = array<i64: 2, 1152>}, {pipeline_mode = #tpu.pipeline_mode<synchronous>, transform_indices = @transform_1, window_bounds = array<i64: 6, 25>}, {pipeline_mode = #tpu.pipeline_mode<synchronous>, transform_indices = @transform_2, window_bounds = array<i64: 6, 1>}, {pipeline_mode = #tpu.pipeline_mode<synchronous>, transform_indices = @transform_3, window_bounds = array<i64: 16, 200>}, {pipeline_mode = #tpu.pipeline_mode<synchronous>, transform_indices = @transform_4, window_bounds = array<i64: 16, 1>}, {pipeline_mode = #tpu.pipeline_mode<synchronous>, transform_indices = @transform_5, window_bounds = array<i64: 896, 256>}, {pipeline_mode = #tpu.pipeline_mode<synchronous>, transform_indices = @transform_6, window_bounds = array<i64: 160, 32>}, {pipeline_mode = #tpu.pipeline_mode<synchronous>, transform_indices = @transform_7, window_bounds = array<i64: 512, 120>}, {pipeline_mode = #tpu.pipeline_mode<synchronous>, transform_indices = @transform_8, window_bounds = array<i64: 1, 120>}, {pipeline_mode = #tpu.pipeline_mode<synchronous>, transform_indices = @transform_9, window_bounds = array<i64: 120, 84>}, {pipeline_mode = #tpu.pipeline_mode<synchronous>, transform_indices = @transform_10, window_bounds = array<i64: 1, 84>}, {pipeline_mode = #tpu.pipeline_mode<synchronous>, transform_indices = @transform_11, window_bounds = array<i64: 84, 10>}, {pipeline_mode = #tpu.pipeline_mode<synchronous>, transform_indices = @transform_12, window_bounds = array<i64: 1, 10>}, {transform_indices = @transform_13, window_bounds = array<i64: 2, 10>}]} {
    %cst = arith.constant 0.000000e+00 : f32
    %0 = vector.broadcast %cst : f32 to vector<6x1024xf32>
    %c0 = arith.constant 0 : index
    %c0_0 = arith.constant 0 : index
    %1 = vector.load %arg15[%c0, %c0_0] : memref<6x1024xf32, #tpu.memory_space<vmem>>, vector<6x1024xf32>
    tpu.vector_store %arg15[%c0, %c0_0], %0 {strides = array<i32>} : memref<6x1024xf32, #tpu.memory_space<vmem>>, vector<6x1024xf32>,
    %cst_1 = arith.constant 0.000000e+00 : f32
    %2 = vector.broadcast %cst_1 : f32 to vector<16x256xf32>
    %c0_2 = arith.constant 0 : index
    %c0_3 = arith.constant 0 : index
    %3 = vector.load %arg16[%c0_2, %c0_3] : memref<16x256xf32, #tpu.memory_space<vmem>>, vector<16x256xf32>
    tpu.vector_store %arg16[%c0_2, %c0_3], %2 {strides = array<i32>} : memref<16x256xf32, #tpu.memory_space<vmem>>, vector<16x256xf32>,
    %cst_4 = arith.constant 0.000000e+00 : f32
    %4 = vector.broadcast %cst_4 : f32 to vector<200x160xf32>
    %c0_5 = arith.constant 0 : index
    %c0_6 = arith.constant 0 : index
    %5 = vector.load %arg17[%c0_5, %c0_6] : memref<200x160xf32, #tpu.memory_space<vmem>>, vector<200x160xf32>
    tpu.vector_store %arg17[%c0_5, %c0_6], %4 {strides = array<i32>} : memref<200x160xf32, #tpu.memory_space<vmem>>, vector<200x160xf32>,
    %c0_7 = arith.constant 0 : index
    %c0_8 = arith.constant 0 : index
    %6 = vector.load %arg2[%c0_7, %c0_8] : memref<6x25xf32, #tpu.memory_space<vmem>>, vector<6x25xf32>
    %c0_9 = arith.constant 0 : index
    %c0_10 = arith.constant 0 : index
    %7 = vector.load %arg3[%c0_9, %c0_10] : memref<6x1xf32, #tpu.memory_space<vmem>>, vector<6x1xf32>
    %c0_11 = arith.constant 0 : index
    %c0_12 = arith.constant 0 : index
    %8 = vector.load %arg5[%c0_11, %c0_12] : memref<16x1xf32, #tpu.memory_space<vmem>>, vector<16x1xf32>
    %cst_13 = arith.constant 0.000000e+00 : f32
    %9 = vector.broadcast %cst_13 : f32 to vector<6x896xf32>
    %10 = vector.extract_strided_slice %6 {offsets = [0, 0], sizes = [6, 1], strides = [1, 1]} : vector<6x25xf32> to vector<6x1xf32>
    %c0_14 = arith.constant 0 : index
    %c0_15 = arith.constant 0 : index
    %11 = vector.load %arg1[%c0_14, %c0_15] : memref<2x1152xf32, #tpu.memory_space<vmem>>, vector<1x896xf32>
    %12 = vector.broadcast %10 : vector<6x1xf32> to vector<6x896xf32>
    %13 = vector.broadcast %11 : vector<1x896xf32> to vector<6x896xf32>
    %14 = arith.mulf %12, %13 : vector<6x896xf32>
    %15 = arith.addf %9, %14 : vector<6x896xf32>
    %16 = vector.extract_strided_slice %6 {offsets = [0, 1], sizes = [6, 1], strides = [1, 1]} : vector<6x25xf32> to vector<6x1xf32>
    %c0_16 = arith.constant 0 : index
    %c1 = arith.constant 1 : index
    %17 = vector.load %arg1[%c0_16, %c1] : memref<2x1152xf32, #tpu.memory_space<vmem>>, vector<1x896xf32>
    %18 = vector.broadcast %16 : vector<6x1xf32> to vector<6x896xf32>
    %19 = vector.broadcast %17 : vector<1x896xf32> to vector<6x896xf32>
    %20 = arith.mulf %18, %19 : vector<6x896xf32>
    %21 = arith.addf %15, %20 : vector<6x896xf32>
    %22 = vector.extract_strided_slice %6 {offsets = [0, 2], sizes = [6, 1], strides = [1, 1]} : vector<6x25xf32> to vector<6x1xf32>
    %c0_17 = arith.constant 0 : index
    %c2 = arith.constant 2 : index
    %23 = vector.load %arg1[%c0_17, %c2] : memref<2x1152xf32, #tpu.memory_space<vmem>>, vector<1x896xf32>
    %24 = vector.broadcast %22 : vector<6x1xf32> to vector<6x896xf32>
    %25 = vector.broadcast %23 : vector<1x896xf32> to vector<6x896xf32>
    %26 = arith.mulf %24, %25 : vector<6x896xf32>
    %27 = arith.addf %21, %26 : vector<6x896xf32>
    %28 = vector.extract_strided_slice %6 {offsets = [0, 3], sizes = [6, 1], strides = [1, 1]} : vector<6x25xf32> to vector<6x1xf32>
    %c0_18 = arith.constant 0 : index
    %c3 = arith.constant 3 : index
    %29 = vector.load %arg1[%c0_18, %c3] : memref<2x1152xf32, #tpu.memory_space<vmem>>, vector<1x896xf32>
    %30 = vector.broadcast %28 : vector<6x1xf32> to vector<6x896xf32>
    %31 = vector.broadcast %29 : vector<1x896xf32> to vector<6x896xf32>
    %32 = arith.mulf %30, %31 : vector<6x896xf32>
    %33 = arith.addf %27, %32 : vector<6x896xf32>
    %34 = vector.extract_strided_slice %6 {offsets = [0, 4], sizes = [6, 1], strides = [1, 1]} : vector<6x25xf32> to vector<6x1xf32>
    %c0_19 = arith.constant 0 : index
    %c4 = arith.constant 4 : index
    %35 = vector.load %arg1[%c0_19, %c4] : memref<2x1152xf32, #tpu.memory_space<vmem>>, vector<1x896xf32>
    %36 = vector.broadcast %34 : vector<6x1xf32> to vector<6x896xf32>
    %37 = vector.broadcast %35 : vector<1x896xf32> to vector<6x896xf32>
    %38 = arith.mulf %36, %37 : vector<6x896xf32>
    %39 = arith.addf %33, %38 : vector<6x896xf32>
    %40 = vector.extract_strided_slice %6 {offsets = [0, 5], sizes = [6, 1], strides = [1, 1]} : vector<6x25xf32> to vector<6x1xf32>
    %c0_20 = arith.constant 0 : index
    %c32 = arith.constant 32 : index
    %41 = vector.load %arg1[%c0_20, %c32] : memref<2x1152xf32, #tpu.memory_space<vmem>>, vector<1x896xf32>
    %42 = vector.broadcast %40 : vector<6x1xf32> to vector<6x896xf32>
    %43 = vector.broadcast %41 : vector<1x896xf32> to vector<6x896xf32>
    %44 = arith.mulf %42, %43 : vector<6x896xf32>
    %45 = arith.addf %39, %44 : vector<6x896xf32>
    %46 = vector.extract_strided_slice %6 {offsets = [0, 6], sizes = [6, 1], strides = [1, 1]} : vector<6x25xf32> to vector<6x1xf32>
    %c0_21 = arith.constant 0 : index
    %c33 = arith.constant 33 : index
    %47 = vector.load %arg1[%c0_21, %c33] : memref<2x1152xf32, #tpu.memory_space<vmem>>, vector<1x896xf32>
    %48 = vector.broadcast %46 : vector<6x1xf32> to vector<6x896xf32>
    %49 = vector.broadcast %47 : vector<1x896xf32> to vector<6x896xf32>
    %50 = arith.mulf %48, %49 : vector<6x896xf32>
    %51 = arith.addf %45, %50 : vector<6x896xf32>
    %52 = vector.extract_strided_slice %6 {offsets = [0, 7], sizes = [6, 1], strides = [1, 1]} : vector<6x25xf32> to vector<6x1xf32>
    %c0_22 = arith.constant 0 : index
    %c34 = arith.constant 34 : index
    %53 = vector.load %arg1[%c0_22, %c34] : memref<2x1152xf32, #tpu.memory_space<vmem>>, vector<1x896xf32>
    %54 = vector.broadcast %52 : vector<6x1xf32> to vector<6x896xf32>
    %55 = vector.broadcast %53 : vector<1x896xf32> to vector<6x896xf32>
    %56 = arith.mulf %54, %55 : vector<6x896xf32>
    %57 = arith.addf %51, %56 : vector<6x896xf32>
    %58 = vector.extract_strided_slice %6 {offsets = [0, 8], sizes = [6, 1], strides = [1, 1]} : vector<6x25xf32> to vector<6x1xf32>
    %c0_23 = arith.constant 0 : index
    %c35 = arith.constant 35 : index
    %59 = vector.load %arg1[%c0_23, %c35] : memref<2x1152xf32, #tpu.memory_space<vmem>>, vector<1x896xf32>
    %60 = vector.broadcast %58 : vector<6x1xf32> to vector<6x896xf32>
    %61 = vector.broadcast %59 : vector<1x896xf32> to vector<6x896xf32>
    %62 = arith.mulf %60, %61 : vector<6x896xf32>
    %63 = arith.addf %57, %62 : vector<6x896xf32>
    %64 = vector.extract_strided_slice %6 {offsets = [0, 9], sizes = [6, 1], strides = [1, 1]} : vector<6x25xf32> to vector<6x1xf32>
    %c0_24 = arith.constant 0 : index
    %c36 = arith.constant 36 : index
    %65 = vector.load %arg1[%c0_24, %c36] : memref<2x1152xf32, #tpu.memory_space<vmem>>, vector<1x896xf32>
    %66 = vector.broadcast %64 : vector<6x1xf32> to vector<6x896xf32>
    %67 = vector.broadcast %65 : vector<1x896xf32> to vector<6x896xf32>
    %68 = arith.mulf %66, %67 : vector<6x896xf32>
    %69 = arith.addf %63, %68 : vector<6x896xf32>
    %70 = vector.extract_strided_slice %6 {offsets = [0, 10], sizes = [6, 1], strides = [1, 1]} : vector<6x25xf32> to vector<6x1xf32>
    %c0_25 = arith.constant 0 : index
    %c64 = arith.constant 64 : index
    %71 = vector.load %arg1[%c0_25, %c64] : memref<2x1152xf32, #tpu.memory_space<vmem>>, vector<1x896xf32>
    %72 = vector.broadcast %70 : vector<6x1xf32> to vector<6x896xf32>
    %73 = vector.broadcast %71 : vector<1x896xf32> to vector<6x896xf32>
    %74 = arith.mulf %72, %73 : vector<6x896xf32>
    %75 = arith.addf %69, %74 : vector<6x896xf32>
    %76 = vector.extract_strided_slice %6 {offsets = [0, 11], sizes = [6, 1], strides = [1, 1]} : vector<6x25xf32> to vector<6x1xf32>
    %c0_26 = arith.constant 0 : index
    %c65 = arith.constant 65 : index
    %77 = vector.load %arg1[%c0_26, %c65] : memref<2x1152xf32, #tpu.memory_space<vmem>>, vector<1x896xf32>
    %78 = vector.broadcast %76 : vector<6x1xf32> to vector<6x896xf32>
    %79 = vector.broadcast %77 : vector<1x896xf32> to vector<6x896xf32>
    %80 = arith.mulf %78, %79 : vector<6x896xf32>
    %81 = arith.addf %75, %80 : vector<6x896xf32>
    %82 = vector.extract_strided_slice %6 {offsets = [0, 12], sizes = [6, 1], strides = [1, 1]} : vector<6x25xf32> to vector<6x1xf32>
    %c0_27 = arith.constant 0 : index
    %c66 = arith.constant 66 : index
    %83 = vector.load %arg1[%c0_27, %c66] : memref<2x1152xf32, #tpu.memory_space<vmem>>, vector<1x896xf32>
    %84 = vector.broadcast %82 : vector<6x1xf32> to vector<6x896xf32>
    %85 = vector.broadcast %83 : vector<1x896xf32> to vector<6x896xf32>
    %86 = arith.mulf %84, %85 : vector<6x896xf32>
    %87 = arith.addf %81, %86 : vector<6x896xf32>
    %88 = vector.extract_strided_slice %6 {offsets = [0, 13], sizes = [6, 1], strides = [1, 1]} : vector<6x25xf32> to vector<6x1xf32>
    %c0_28 = arith.constant 0 : index
    %c67 = arith.constant 67 : index
    %89 = vector.load %arg1[%c0_28, %c67] : memref<2x1152xf32, #tpu.memory_space<vmem>>, vector<1x896xf32>
    %90 = vector.broadcast %88 : vector<6x1xf32> to vector<6x896xf32>
    %91 = vector.broadcast %89 : vector<1x896xf32> to vector<6x896xf32>
    %92 = arith.mulf %90, %91 : vector<6x896xf32>
    %93 = arith.addf %87, %92 : vector<6x896xf32>
    %94 = vector.extract_strided_slice %6 {offsets = [0, 14], sizes = [6, 1], strides = [1, 1]} : vector<6x25xf32> to vector<6x1xf32>
    %c0_29 = arith.constant 0 : index
    %c68 = arith.constant 68 : index
    %95 = vector.load %arg1[%c0_29, %c68] : memref<2x1152xf32, #tpu.memory_space<vmem>>, vector<1x896xf32>
    %96 = vector.broadcast %94 : vector<6x1xf32> to vector<6x896xf32>
    %97 = vector.broadcast %95 : vector<1x896xf32> to vector<6x896xf32>
    %98 = arith.mulf %96, %97 : vector<6x896xf32>
    %99 = arith.addf %93, %98 : vector<6x896xf32>
    %100 = vector.extract_strided_slice %6 {offsets = [0, 15], sizes = [6, 1], strides = [1, 1]} : vector<6x25xf32> to vector<6x1xf32>
    %c0_30 = arith.constant 0 : index
    %c96 = arith.constant 96 : index
    %101 = vector.load %arg1[%c0_30, %c96] : memref<2x1152xf32, #tpu.memory_space<vmem>>, vector<1x896xf32>
    %102 = vector.broadcast %100 : vector<6x1xf32> to vector<6x896xf32>
    %103 = vector.broadcast %101 : vector<1x896xf32> to vector<6x896xf32>
    %104 = arith.mulf %102, %103 : vector<6x896xf32>
    %105 = arith.addf %99, %104 : vector<6x896xf32>
    %106 = vector.extract_strided_slice %6 {offsets = [0, 16], sizes = [6, 1], strides = [1, 1]} : vector<6x25xf32> to vector<6x1xf32>
    %c0_31 = arith.constant 0 : index
    %c97 = arith.constant 97 : index
    %107 = vector.load %arg1[%c0_31, %c97] : memref<2x1152xf32, #tpu.memory_space<vmem>>, vector<1x896xf32>
    %108 = vector.broadcast %106 : vector<6x1xf32> to vector<6x896xf32>
    %109 = vector.broadcast %107 : vector<1x896xf32> to vector<6x896xf32>
    %110 = arith.mulf %108, %109 : vector<6x896xf32>
    %111 = arith.addf %105, %110 : vector<6x896xf32>
    %112 = vector.extract_strided_slice %6 {offsets = [0, 17], sizes = [6, 1], strides = [1, 1]} : vector<6x25xf32> to vector<6x1xf32>
    %c0_32 = arith.constant 0 : index
    %c98 = arith.constant 98 : index
    %113 = vector.load %arg1[%c0_32, %c98] : memref<2x1152xf32, #tpu.memory_space<vmem>>, vector<1x896xf32>
    %114 = vector.broadcast %112 : vector<6x1xf32> to vector<6x896xf32>
    %115 = vector.broadcast %113 : vector<1x896xf32> to vector<6x896xf32>
    %116 = arith.mulf %114, %115 : vector<6x896xf32>
    %117 = arith.addf %111, %116 : vector<6x896xf32>
    %118 = vector.extract_strided_slice %6 {offsets = [0, 18], sizes = [6, 1], strides = [1, 1]} : vector<6x25xf32> to vector<6x1xf32>
    %c0_33 = arith.constant 0 : index
    %c99 = arith.constant 99 : index
    %119 = vector.load %arg1[%c0_33, %c99] : memref<2x1152xf32, #tpu.memory_space<vmem>>, vector<1x896xf32>
    %120 = vector.broadcast %118 : vector<6x1xf32> to vector<6x896xf32>
    %121 = vector.broadcast %119 : vector<1x896xf32> to vector<6x896xf32>
    %122 = arith.mulf %120, %121 : vector<6x896xf32>
    %123 = arith.addf %117, %122 : vector<6x896xf32>
    %124 = vector.extract_strided_slice %6 {offsets = [0, 19], sizes = [6, 1], strides = [1, 1]} : vector<6x25xf32> to vector<6x1xf32>
    %c0_34 = arith.constant 0 : index
    %c100 = arith.constant 100 : index
    %125 = vector.load %arg1[%c0_34, %c100] : memref<2x1152xf32, #tpu.memory_space<vmem>>, vector<1x896xf32>
    %126 = vector.broadcast %124 : vector<6x1xf32> to vector<6x896xf32>
    %127 = vector.broadcast %125 : vector<1x896xf32> to vector<6x896xf32>
    %128 = arith.mulf %126, %127 : vector<6x896xf32>
    %129 = arith.addf %123, %128 : vector<6x896xf32>
    %130 = vector.extract_strided_slice %6 {offsets = [0, 20], sizes = [6, 1], strides = [1, 1]} : vector<6x25xf32> to vector<6x1xf32>
    %c0_35 = arith.constant 0 : index
    %c128 = arith.constant 128 : index
    %131 = vector.load %arg1[%c0_35, %c128] : memref<2x1152xf32, #tpu.memory_space<vmem>>, vector<1x896xf32>
    %132 = vector.broadcast %130 : vector<6x1xf32> to vector<6x896xf32>
    %133 = vector.broadcast %131 : vector<1x896xf32> to vector<6x896xf32>
    %134 = arith.mulf %132, %133 : vector<6x896xf32>
    %135 = arith.addf %129, %134 : vector<6x896xf32>
    %136 = vector.extract_strided_slice %6 {offsets = [0, 21], sizes = [6, 1], strides = [1, 1]} : vector<6x25xf32> to vector<6x1xf32>
    %c0_36 = arith.constant 0 : index
    %c129 = arith.constant 129 : index
    %137 = vector.load %arg1[%c0_36, %c129] : memref<2x1152xf32, #tpu.memory_space<vmem>>, vector<1x896xf32>
    %138 = vector.broadcast %136 : vector<6x1xf32> to vector<6x896xf32>
    %139 = vector.broadcast %137 : vector<1x896xf32> to vector<6x896xf32>
    %140 = arith.mulf %138, %139 : vector<6x896xf32>
    %141 = arith.addf %135, %140 : vector<6x896xf32>
    %142 = vector.extract_strided_slice %6 {offsets = [0, 22], sizes = [6, 1], strides = [1, 1]} : vector<6x25xf32> to vector<6x1xf32>
    %c0_37 = arith.constant 0 : index
    %c130 = arith.constant 130 : index
    %143 = vector.load %arg1[%c0_37, %c130] : memref<2x1152xf32, #tpu.memory_space<vmem>>, vector<1x896xf32>
    %144 = vector.broadcast %142 : vector<6x1xf32> to vector<6x896xf32>
    %145 = vector.broadcast %143 : vector<1x896xf32> to vector<6x896xf32>
    %146 = arith.mulf %144, %145 : vector<6x896xf32>
    %147 = arith.addf %141, %146 : vector<6x896xf32>
    %148 = vector.extract_strided_slice %6 {offsets = [0, 23], sizes = [6, 1], strides = [1, 1]} : vector<6x25xf32> to vector<6x1xf32>
    %c0_38 = arith.constant 0 : index
    %c131 = arith.constant 131 : index
    %149 = vector.load %arg1[%c0_38, %c131] : memref<2x1152xf32, #tpu.memory_space<vmem>>, vector<1x896xf32>
    %150 = vector.broadcast %148 : vector<6x1xf32> to vector<6x896xf32>
    %151 = vector.broadcast %149 : vector<1x896xf32> to vector<6x896xf32>
    %152 = arith.mulf %150, %151 : vector<6x896xf32>
    %153 = arith.addf %147, %152 : vector<6x896xf32>
    %154 = vector.extract_strided_slice %6 {offsets = [0, 24], sizes = [6, 1], strides = [1, 1]} : vector<6x25xf32> to vector<6x1xf32>
    %c0_39 = arith.constant 0 : index
    %c132 = arith.constant 132 : index
    %155 = vector.load %arg1[%c0_39, %c132] : memref<2x1152xf32, #tpu.memory_space<vmem>>, vector<1x896xf32>
    %156 = vector.broadcast %154 : vector<6x1xf32> to vector<6x896xf32>
    %157 = vector.broadcast %155 : vector<1x896xf32> to vector<6x896xf32>
    %158 = arith.mulf %156, %157 : vector<6x896xf32>
    %159 = arith.addf %153, %158 : vector<6x896xf32>
    %160 = vector.broadcast %7 : vector<6x1xf32> to vector<6x896xf32>
    %161 = arith.addf %159, %160 : vector<6x896xf32>
    %c0_40 = arith.constant 0 : index
    %c0_41 = arith.constant 0 : index
    %162 = vector.load %arg15[%c0_40, %c0_41] : memref<6x1024xf32, #tpu.memory_space<vmem>>, vector<6x896xf32>
    tpu.vector_store %arg15[%c0_40, %c0_41], %161 {strides = array<i32>} : memref<6x1024xf32, #tpu.memory_space<vmem>>, vector<6x896xf32>,
    %c0_42 = arith.constant 0 : index
    %c1_43 = arith.constant 1 : index
    %163 = vector.load %arg15[%c0_42, %c1_43] : memref<6x1024xf32, #tpu.memory_space<vmem>>, vector<6x896xf32>
    %164 = arith.maximumf %161, %163 : vector<6x896xf32>
    %c0_44 = arith.constant 0 : index
    %c0_45 = arith.constant 0 : index
    %165 = vector.load %arg15[%c0_44, %c0_45] : memref<6x1024xf32, #tpu.memory_space<vmem>>, vector<6x896xf32>
    tpu.vector_store %arg15[%c0_44, %c0_45], %164 {strides = array<i32>} : memref<6x1024xf32, #tpu.memory_space<vmem>>, vector<6x896xf32>,
    %c0_46 = arith.constant 0 : index
    %c32_47 = arith.constant 32 : index
    %166 = vector.load %arg15[%c0_46, %c32_47] : memref<6x1024xf32, #tpu.memory_space<vmem>>, vector<6x896xf32>
    %167 = arith.maximumf %164, %166 : vector<6x896xf32>
    %168 = arith.truncf %167 : vector<6x896xf32> to vector<6x896xbf16>
    %c0_48 = arith.constant 0 : index
    %c0_49 = arith.constant 0 : index
    %169 = vector.load %arg6[%c0_48, %c0_49] : memref<896x256xbf16, #tpu.memory_space<vmem>>, vector<896x256xbf16>
    %cst_50 = arith.constant dense<0.000000e+00> : vector<6x256xf32>
    %170 = tpu.matmul %168, %169, %cst_50 {dimension_numbers = #tpu.dot_dimension_numbers<[1], [0], [0], [1], [0, 0, 1, 1], [], []>} : vector<6x896xbf16>, vector<896x256xbf16>, vector<6x256xf32> -> vector<6x256xf32>
    %171 = vector.extract_strided_slice %170 {offsets = [0, 0], sizes = [6, 160], strides = [1, 1]} : vector<6x256xf32> to vector<6x160xf32>
    %c0_51 = arith.constant 0 : index
    %c0_52 = arith.constant 0 : index
    %172 = vector.load %arg17[%c0_51, %c0_52] : memref<200x160xf32, #tpu.memory_space<vmem>>, vector<6x160xf32>
    tpu.vector_store %arg17[%c0_51, %c0_52], %171 {strides = array<i32>} : memref<200x160xf32, #tpu.memory_space<vmem>>, vector<6x160xf32>,
    %173 = vector.extract_strided_slice %170 {offsets = [0, 1], sizes = [6, 160], strides = [1, 1]} : vector<6x256xf32> to vector<6x160xf32>
    %c8 = arith.constant 8 : index
    %c0_53 = arith.constant 0 : index
    %174 = vector.load %arg17[%c8, %c0_53] : memref<200x160xf32, #tpu.memory_space<vmem>>, vector<6x160xf32>
    tpu.vector_store %arg17[%c8, %c0_53], %173 {strides = array<i32>} : memref<200x160xf32, #tpu.memory_space<vmem>>, vector<6x160xf32>,
    %175 = vector.extract_strided_slice %170 {offsets = [0, 2], sizes = [6, 160], strides = [1, 1]} : vector<6x256xf32> to vector<6x160xf32>
    %c16 = arith.constant 16 : index
    %c0_54 = arith.constant 0 : index
    %176 = vector.load %arg17[%c16, %c0_54] : memref<200x160xf32, #tpu.memory_space<vmem>>, vector<6x160xf32>
    tpu.vector_store %arg17[%c16, %c0_54], %175 {strides = array<i32>} : memref<200x160xf32, #tpu.memory_space<vmem>>, vector<6x160xf32>,
    %177 = vector.extract_strided_slice %170 {offsets = [0, 3], sizes = [6, 160], strides = [1, 1]} : vector<6x256xf32> to vector<6x160xf32>
    %c24 = arith.constant 24 : index
    %c0_55 = arith.constant 0 : index
    %178 = vector.load %arg17[%c24, %c0_55] : memref<200x160xf32, #tpu.memory_space<vmem>>, vector<6x160xf32>
    tpu.vector_store %arg17[%c24, %c0_55], %177 {strides = array<i32>} : memref<200x160xf32, #tpu.memory_space<vmem>>, vector<6x160xf32>,
    %179 = vector.extract_strided_slice %170 {offsets = [0, 4], sizes = [6, 160], strides = [1, 1]} : vector<6x256xf32> to vector<6x160xf32>
    %c32_56 = arith.constant 32 : index
    %c0_57 = arith.constant 0 : index
    %180 = vector.load %arg17[%c32_56, %c0_57] : memref<200x160xf32, #tpu.memory_space<vmem>>, vector<6x160xf32>
    tpu.vector_store %arg17[%c32_56, %c0_57], %179 {strides = array<i32>} : memref<200x160xf32, #tpu.memory_space<vmem>>, vector<6x160xf32>,
    %181 = vector.extract_strided_slice %170 {offsets = [0, 16], sizes = [6, 160], strides = [1, 1]} : vector<6x256xf32> to vector<6x160xf32>
    %c40 = arith.constant 40 : index
    %c0_58 = arith.constant 0 : index
    %182 = vector.load %arg17[%c40, %c0_58] : memref<200x160xf32, #tpu.memory_space<vmem>>, vector<6x160xf32>
    tpu.vector_store %arg17[%c40, %c0_58], %181 {strides = array<i32>} : memref<200x160xf32, #tpu.memory_space<vmem>>, vector<6x160xf32>,
    %183 = vector.extract_strided_slice %170 {offsets = [0, 17], sizes = [6, 160], strides = [1, 1]} : vector<6x256xf32> to vector<6x160xf32>
    %c48 = arith.constant 48 : index
    %c0_59 = arith.constant 0 : index
    %184 = vector.load %arg17[%c48, %c0_59] : memref<200x160xf32, #tpu.memory_space<vmem>>, vector<6x160xf32>
    tpu.vector_store %arg17[%c48, %c0_59], %183 {strides = array<i32>} : memref<200x160xf32, #tpu.memory_space<vmem>>, vector<6x160xf32>,
    %185 = vector.extract_strided_slice %170 {offsets = [0, 18], sizes = [6, 160], strides = [1, 1]} : vector<6x256xf32> to vector<6x160xf32>
    %c56 = arith.constant 56 : index
    %c0_60 = arith.constant 0 : index
    %186 = vector.load %arg17[%c56, %c0_60] : memref<200x160xf32, #tpu.memory_space<vmem>>, vector<6x160xf32>
    tpu.vector_store %arg17[%c56, %c0_60], %185 {strides = array<i32>} : memref<200x160xf32, #tpu.memory_space<vmem>>, vector<6x160xf32>,
    %187 = vector.extract_strided_slice %170 {offsets = [0, 19], sizes = [6, 160], strides = [1, 1]} : vector<6x256xf32> to vector<6x160xf32>
    %c64_61 = arith.constant 64 : index
    %c0_62 = arith.constant 0 : index
    %188 = vector.load %arg17[%c64_61, %c0_62] : memref<200x160xf32, #tpu.memory_space<vmem>>, vector<6x160xf32>
    tpu.vector_store %arg17[%c64_61, %c0_62], %187 {strides = array<i32>} : memref<200x160xf32, #tpu.memory_space<vmem>>, vector<6x160xf32>,
    %189 = vector.extract_strided_slice %170 {offsets = [0, 20], sizes = [6, 160], strides = [1, 1]} : vector<6x256xf32> to vector<6x160xf32>
    %c72 = arith.constant 72 : index
    %c0_63 = arith.constant 0 : index
    %190 = vector.load %arg17[%c72, %c0_63] : memref<200x160xf32, #tpu.memory_space<vmem>>, vector<6x160xf32>
    tpu.vector_store %arg17[%c72, %c0_63], %189 {strides = array<i32>} : memref<200x160xf32, #tpu.memory_space<vmem>>, vector<6x160xf32>,
    %191 = vector.extract_strided_slice %170 {offsets = [0, 32], sizes = [6, 160], strides = [1, 1]} : vector<6x256xf32> to vector<6x160xf32>
    %c80 = arith.constant 80 : index
    %c0_64 = arith.constant 0 : index
    %192 = vector.load %arg17[%c80, %c0_64] : memref<200x160xf32, #tpu.memory_space<vmem>>, vector<6x160xf32>
    tpu.vector_store %arg17[%c80, %c0_64], %191 {strides = array<i32>} : memref<200x160xf32, #tpu.memory_space<vmem>>, vector<6x160xf32>,
    %193 = vector.extract_strided_slice %170 {offsets = [0, 33], sizes = [6, 160], strides = [1, 1]} : vector<6x256xf32> to vector<6x160xf32>
    %c88 = arith.constant 88 : index
    %c0_65 = arith.constant 0 : index
    %194 = vector.load %arg17[%c88, %c0_65] : memref<200x160xf32, #tpu.memory_space<vmem>>, vector<6x160xf32>
    tpu.vector_store %arg17[%c88, %c0_65], %193 {strides = array<i32>} : memref<200x160xf32, #tpu.memory_space<vmem>>, vector<6x160xf32>,
    %195 = vector.extract_strided_slice %170 {offsets = [0, 34], sizes = [6, 160], strides = [1, 1]} : vector<6x256xf32> to vector<6x160xf32>
    %c96_66 = arith.constant 96 : index
    %c0_67 = arith.constant 0 : index
    %196 = vector.load %arg17[%c96_66, %c0_67] : memref<200x160xf32, #tpu.memory_space<vmem>>, vector<6x160xf32>
    tpu.vector_store %arg17[%c96_66, %c0_67], %195 {strides = array<i32>} : memref<200x160xf32, #tpu.memory_space<vmem>>, vector<6x160xf32>,
    %197 = vector.extract_strided_slice %170 {offsets = [0, 35], sizes = [6, 160], strides = [1, 1]} : vector<6x256xf32> to vector<6x160xf32>
    %c104 = arith.constant 104 : index
    %c0_68 = arith.constant 0 : index
    %198 = vector.load %arg17[%c104, %c0_68] : memref<200x160xf32, #tpu.memory_space<vmem>>, vector<6x160xf32>
    tpu.vector_store %arg17[%c104, %c0_68], %197 {strides = array<i32>} : memref<200x160xf32, #tpu.memory_space<vmem>>, vector<6x160xf32>,
    %199 = vector.extract_strided_slice %170 {offsets = [0, 36], sizes = [6, 160], strides = [1, 1]} : vector<6x256xf32> to vector<6x160xf32>
    %c112 = arith.constant 112 : index
    %c0_69 = arith.constant 0 : index
    %200 = vector.load %arg17[%c112, %c0_69] : memref<200x160xf32, #tpu.memory_space<vmem>>, vector<6x160xf32>
    tpu.vector_store %arg17[%c112, %c0_69], %199 {strides = array<i32>} : memref<200x160xf32, #tpu.memory_space<vmem>>, vector<6x160xf32>,
    %201 = vector.extract_strided_slice %170 {offsets = [0, 48], sizes = [6, 160], strides = [1, 1]} : vector<6x256xf32> to vector<6x160xf32>
    %c120 = arith.constant 120 : index
    %c0_70 = arith.constant 0 : index
    %202 = vector.load %arg17[%c120, %c0_70] : memref<200x160xf32, #tpu.memory_space<vmem>>, vector<6x160xf32>
    tpu.vector_store %arg17[%c120, %c0_70], %201 {strides = array<i32>} : memref<200x160xf32, #tpu.memory_space<vmem>>, vector<6x160xf32>,
    %203 = vector.extract_strided_slice %170 {offsets = [0, 49], sizes = [6, 160], strides = [1, 1]} : vector<6x256xf32> to vector<6x160xf32>
    %c128_71 = arith.constant 128 : index
    %c0_72 = arith.constant 0 : index
    %204 = vector.load %arg17[%c128_71, %c0_72] : memref<200x160xf32, #tpu.memory_space<vmem>>, vector<6x160xf32>
    tpu.vector_store %arg17[%c128_71, %c0_72], %203 {strides = array<i32>} : memref<200x160xf32, #tpu.memory_space<vmem>>, vector<6x160xf32>,
    %205 = vector.extract_strided_slice %170 {offsets = [0, 50], sizes = [6, 160], strides = [1, 1]} : vector<6x256xf32> to vector<6x160xf32>
    %c136 = arith.constant 136 : index
    %c0_73 = arith.constant 0 : index
    %206 = vector.load %arg17[%c136, %c0_73] : memref<200x160xf32, #tpu.memory_space<vmem>>, vector<6x160xf32>
    tpu.vector_store %arg17[%c136, %c0_73], %205 {strides = array<i32>} : memref<200x160xf32, #tpu.memory_space<vmem>>, vector<6x160xf32>,
    %207 = vector.extract_strided_slice %170 {offsets = [0, 51], sizes = [6, 160], strides = [1, 1]} : vector<6x256xf32> to vector<6x160xf32>
    %c144 = arith.constant 144 : index
    %c0_74 = arith.constant 0 : index
    %208 = vector.load %arg17[%c144, %c0_74] : memref<200x160xf32, #tpu.memory_space<vmem>>, vector<6x160xf32>
    tpu.vector_store %arg17[%c144, %c0_74], %207 {strides = array<i32>} : memref<200x160xf32, #tpu.memory_space<vmem>>, vector<6x160xf32>,
    %209 = vector.extract_strided_slice %170 {offsets = [0, 52], sizes = [6, 160], strides = [1, 1]} : vector<6x256xf32> to vector<6x160xf32>
    %c152 = arith.constant 152 : index
    %c0_75 = arith.constant 0 : index
    %210 = vector.load %arg17[%c152, %c0_75] : memref<200x160xf32, #tpu.memory_space<vmem>>, vector<6x160xf32>
    tpu.vector_store %arg17[%c152, %c0_75], %209 {strides = array<i32>} : memref<200x160xf32, #tpu.memory_space<vmem>>, vector<6x160xf32>,
    %211 = vector.extract_strided_slice %170 {offsets = [0, 64], sizes = [6, 160], strides = [1, 1]} : vector<6x256xf32> to vector<6x160xf32>
    %c160 = arith.constant 160 : index
    %c0_76 = arith.constant 0 : index
    %212 = vector.load %arg17[%c160, %c0_76] : memref<200x160xf32, #tpu.memory_space<vmem>>, vector<6x160xf32>
    tpu.vector_store %arg17[%c160, %c0_76], %211 {strides = array<i32>} : memref<200x160xf32, #tpu.memory_space<vmem>>, vector<6x160xf32>,
    %213 = vector.extract_strided_slice %170 {offsets = [0, 65], sizes = [6, 160], strides = [1, 1]} : vector<6x256xf32> to vector<6x160xf32>
    %c168 = arith.constant 168 : index
    %c0_77 = arith.constant 0 : index
    %214 = vector.load %arg17[%c168, %c0_77] : memref<200x160xf32, #tpu.memory_space<vmem>>, vector<6x160xf32>
    tpu.vector_store %arg17[%c168, %c0_77], %213 {strides = array<i32>} : memref<200x160xf32, #tpu.memory_space<vmem>>, vector<6x160xf32>,
    %215 = vector.extract_strided_slice %170 {offsets = [0, 66], sizes = [6, 160], strides = [1, 1]} : vector<6x256xf32> to vector<6x160xf32>
    %c176 = arith.constant 176 : index
    %c0_78 = arith.constant 0 : index
    %216 = vector.load %arg17[%c176, %c0_78] : memref<200x160xf32, #tpu.memory_space<vmem>>, vector<6x160xf32>
    tpu.vector_store %arg17[%c176, %c0_78], %215 {strides = array<i32>} : memref<200x160xf32, #tpu.memory_space<vmem>>, vector<6x160xf32>,
    %217 = vector.extract_strided_slice %170 {offsets = [0, 67], sizes = [6, 160], strides = [1, 1]} : vector<6x256xf32> to vector<6x160xf32>
    %c184 = arith.constant 184 : index
    %c0_79 = arith.constant 0 : index
    %218 = vector.load %arg17[%c184, %c0_79] : memref<200x160xf32, #tpu.memory_space<vmem>>, vector<6x160xf32>
    tpu.vector_store %arg17[%c184, %c0_79], %217 {strides = array<i32>} : memref<200x160xf32, #tpu.memory_space<vmem>>, vector<6x160xf32>,
    %219 = vector.extract_strided_slice %170 {offsets = [0, 68], sizes = [6, 160], strides = [1, 1]} : vector<6x256xf32> to vector<6x160xf32>
    %c192 = arith.constant 192 : index
    %c0_80 = arith.constant 0 : index
    %220 = vector.load %arg17[%c192, %c0_80] : memref<200x160xf32, #tpu.memory_space<vmem>>, vector<6x160xf32>
    tpu.vector_store %arg17[%c192, %c0_80], %219 {strides = array<i32>} : memref<200x160xf32, #tpu.memory_space<vmem>>, vector<6x160xf32>,
    %c0_81 = arith.constant 0 : index
    %c0_82 = arith.constant 0 : index
    %221 = vector.load %arg4[%c0_81, %c0_82] : memref<16x200xf32, #tpu.memory_space<vmem>>, vector<16x200xf32>
    %c0_83 = arith.constant 0 : index
    %c0_84 = arith.constant 0 : index
    %222 = vector.load %arg17[%c0_83, %c0_84] : memref<200x160xf32, #tpu.memory_space<vmem>>, vector<200x160xf32>
    %cst_85 = arith.constant dense<0.000000e+00> : vector<16x160xf32>
    %223 = tpu.matmul %221, %222, %cst_85 {dimension_numbers = #tpu.dot_dimension_numbers<[1], [0], [0], [1], [0, 0, 1, 1], [], []>} : vector<16x200xf32>, vector<200x160xf32>, vector<16x160xf32> -> vector<16x160xf32>
    %224 = vector.broadcast %8 : vector<16x1xf32> to vector<16x160xf32>
    %225 = arith.addf %223, %224 : vector<16x160xf32>
    %c0_86 = arith.constant 0 : index
    %c0_87 = arith.constant 0 : index
    %226 = vector.load %arg16[%c0_86, %c0_87] : memref<16x256xf32, #tpu.memory_space<vmem>>, vector<16x160xf32>
    tpu.vector_store %arg16[%c0_86, %c0_87], %225 {strides = array<i32>} : memref<16x256xf32, #tpu.memory_space<vmem>>, vector<16x160xf32>,
    %c0_88 = arith.constant 0 : index
    %c1_89 = arith.constant 1 : index
    %227 = vector.load %arg16[%c0_88, %c1_89] : memref<16x256xf32, #tpu.memory_space<vmem>>, vector<16x160xf32>
    %228 = arith.maximumf %225, %227 : vector<16x160xf32>
    %c0_90 = arith.constant 0 : index
    %c0_91 = arith.constant 0 : index
    %229 = vector.load %arg16[%c0_90, %c0_91] : memref<16x256xf32, #tpu.memory_space<vmem>>, vector<16x160xf32>
    tpu.vector_store %arg16[%c0_90, %c0_91], %228 {strides = array<i32>} : memref<16x256xf32, #tpu.memory_space<vmem>>, vector<16x160xf32>,
    %c0_92 = arith.constant 0 : index
    %c16_93 = arith.constant 16 : index
    %230 = vector.load %arg16[%c0_92, %c16_93] : memref<16x256xf32, #tpu.memory_space<vmem>>, vector<16x160xf32>
    %231 = arith.maximumf %228, %230 : vector<16x160xf32>
    %232 = arith.truncf %231 : vector<16x160xf32> to vector<16x160xbf16>
    %c0_94 = arith.constant 0 : index
    %c0_95 = arith.constant 0 : index
    %233 = vector.load %arg7[%c0_94, %c0_95] : memref<160x32xbf16, #tpu.memory_space<vmem>>, vector<160x32xbf16>
    %cst_96 = arith.constant dense<0.000000e+00> : vector<16x32xf32>
    %234 = tpu.matmul %232, %233, %cst_96 {dimension_numbers = #tpu.dot_dimension_numbers<[1], [0], [0], [1], [0, 0, 1, 1], [], []>} : vector<16x160xbf16>, vector<160x32xbf16>, vector<16x32xf32> -> vector<16x32xf32>
    %235 = vector.extract_strided_slice %234 {offsets = [0, 0], sizes = [1, 32], strides = [1, 1]} : vector<16x32xf32> to vector<1x32xf32>
    %c0_97 = arith.constant 0 : index
    %c0_98 = arith.constant 0 : index
    %236 = vector.load %arg18[%c0_97, %c0_98] : memref<2x512xf32, #tpu.memory_space<vmem>>, vector<1x32xf32>
    tpu.vector_store %arg18[%c0_97, %c0_98], %235 {strides = array<i32>} : memref<2x512xf32, #tpu.memory_space<vmem>>, vector<1x32xf32>,
    %237 = vector.extract_strided_slice %234 {offsets = [1, 0], sizes = [1, 32], strides = [1, 1]} : vector<16x32xf32> to vector<1x32xf32>
    %c0_99 = arith.constant 0 : index
    %c32_100 = arith.constant 32 : index
    %238 = vector.load %arg18[%c0_99, %c32_100] : memref<2x512xf32, #tpu.memory_space<vmem>>, vector<1x32xf32>
    tpu.vector_store %arg18[%c0_99, %c32_100], %237 {strides = array<i32>} : memref<2x512xf32, #tpu.memory_space<vmem>>, vector<1x32xf32>,
    %239 = vector.extract_strided_slice %234 {offsets = [2, 0], sizes = [1, 32], strides = [1, 1]} : vector<16x32xf32> to vector<1x32xf32>
    %c0_101 = arith.constant 0 : index
    %c64_102 = arith.constant 64 : index
    %240 = vector.load %arg18[%c0_101, %c64_102] : memref<2x512xf32, #tpu.memory_space<vmem>>, vector<1x32xf32>
    tpu.vector_store %arg18[%c0_101, %c64_102], %239 {strides = array<i32>} : memref<2x512xf32, #tpu.memory_space<vmem>>, vector<1x32xf32>,
    %241 = vector.extract_strided_slice %234 {offsets = [3, 0], sizes = [1, 32], strides = [1, 1]} : vector<16x32xf32> to vector<1x32xf32>
    %c0_103 = arith.constant 0 : index
    %c96_104 = arith.constant 96 : index
    %242 = vector.load %arg18[%c0_103, %c96_104] : memref<2x512xf32, #tpu.memory_space<vmem>>, vector<1x32xf32>
    tpu.vector_store %arg18[%c0_103, %c96_104], %241 {strides = array<i32>} : memref<2x512xf32, #tpu.memory_space<vmem>>, vector<1x32xf32>,
    %243 = vector.extract_strided_slice %234 {offsets = [4, 0], sizes = [1, 32], strides = [1, 1]} : vector<16x32xf32> to vector<1x32xf32>
    %c0_105 = arith.constant 0 : index
    %c128_106 = arith.constant 128 : index
    %244 = vector.load %arg18[%c0_105, %c128_106] : memref<2x512xf32, #tpu.memory_space<vmem>>, vector<1x32xf32>
    tpu.vector_store %arg18[%c0_105, %c128_106], %243 {strides = array<i32>} : memref<2x512xf32, #tpu.memory_space<vmem>>, vector<1x32xf32>,
    %245 = vector.extract_strided_slice %234 {offsets = [5, 0], sizes = [1, 32], strides = [1, 1]} : vector<16x32xf32> to vector<1x32xf32>
    %c0_107 = arith.constant 0 : index
    %c160_108 = arith.constant 160 : index
    %246 = vector.load %arg18[%c0_107, %c160_108] : memref<2x512xf32, #tpu.memory_space<vmem>>, vector<1x32xf32>
    tpu.vector_store %arg18[%c0_107, %c160_108], %245 {strides = array<i32>} : memref<2x512xf32, #tpu.memory_space<vmem>>, vector<1x32xf32>,
    %247 = vector.extract_strided_slice %234 {offsets = [6, 0], sizes = [1, 32], strides = [1, 1]} : vector<16x32xf32> to vector<1x32xf32>
    %c0_109 = arith.constant 0 : index
    %c192_110 = arith.constant 192 : index
    %248 = vector.load %arg18[%c0_109, %c192_110] : memref<2x512xf32, #tpu.memory_space<vmem>>, vector<1x32xf32>
    tpu.vector_store %arg18[%c0_109, %c192_110], %247 {strides = array<i32>} : memref<2x512xf32, #tpu.memory_space<vmem>>, vector<1x32xf32>,
    %249 = vector.extract_strided_slice %234 {offsets = [7, 0], sizes = [1, 32], strides = [1, 1]} : vector<16x32xf32> to vector<1x32xf32>
    %c0_111 = arith.constant 0 : index
    %c224 = arith.constant 224 : index
    %250 = vector.load %arg18[%c0_111, %c224] : memref<2x512xf32, #tpu.memory_space<vmem>>, vector<1x32xf32>
    tpu.vector_store %arg18[%c0_111, %c224], %249 {strides = array<i32>} : memref<2x512xf32, #tpu.memory_space<vmem>>, vector<1x32xf32>,
    %251 = vector.extract_strided_slice %234 {offsets = [8, 0], sizes = [1, 32], strides = [1, 1]} : vector<16x32xf32> to vector<1x32xf32>
    %c0_112 = arith.constant 0 : index
    %c256 = arith.constant 256 : index
    %252 = vector.load %arg18[%c0_112, %c256] : memref<2x512xf32, #tpu.memory_space<vmem>>, vector<1x32xf32>
    tpu.vector_store %arg18[%c0_112, %c256], %251 {strides = array<i32>} : memref<2x512xf32, #tpu.memory_space<vmem>>, vector<1x32xf32>,
    %253 = vector.extract_strided_slice %234 {offsets = [9, 0], sizes = [1, 32], strides = [1, 1]} : vector<16x32xf32> to vector<1x32xf32>
    %c0_113 = arith.constant 0 : index
    %c288 = arith.constant 288 : index
    %254 = vector.load %arg18[%c0_113, %c288] : memref<2x512xf32, #tpu.memory_space<vmem>>, vector<1x32xf32>
    tpu.vector_store %arg18[%c0_113, %c288], %253 {strides = array<i32>} : memref<2x512xf32, #tpu.memory_space<vmem>>, vector<1x32xf32>,
    %255 = vector.extract_strided_slice %234 {offsets = [10, 0], sizes = [1, 32], strides = [1, 1]} : vector<16x32xf32> to vector<1x32xf32>
    %c0_114 = arith.constant 0 : index
    %c320 = arith.constant 320 : index
    %256 = vector.load %arg18[%c0_114, %c320] : memref<2x512xf32, #tpu.memory_space<vmem>>, vector<1x32xf32>
    tpu.vector_store %arg18[%c0_114, %c320], %255 {strides = array<i32>} : memref<2x512xf32, #tpu.memory_space<vmem>>, vector<1x32xf32>,
    %257 = vector.extract_strided_slice %234 {offsets = [11, 0], sizes = [1, 32], strides = [1, 1]} : vector<16x32xf32> to vector<1x32xf32>
    %c0_115 = arith.constant 0 : index
    %c352 = arith.constant 352 : index
    %258 = vector.load %arg18[%c0_115, %c352] : memref<2x512xf32, #tpu.memory_space<vmem>>, vector<1x32xf32>
    tpu.vector_store %arg18[%c0_115, %c352], %257 {strides = array<i32>} : memref<2x512xf32, #tpu.memory_space<vmem>>, vector<1x32xf32>,
    %259 = vector.extract_strided_slice %234 {offsets = [12, 0], sizes = [1, 32], strides = [1, 1]} : vector<16x32xf32> to vector<1x32xf32>
    %c0_116 = arith.constant 0 : index
    %c384 = arith.constant 384 : index
    %260 = vector.load %arg18[%c0_116, %c384] : memref<2x512xf32, #tpu.memory_space<vmem>>, vector<1x32xf32>
    tpu.vector_store %arg18[%c0_116, %c384], %259 {strides = array<i32>} : memref<2x512xf32, #tpu.memory_space<vmem>>, vector<1x32xf32>,
    %261 = vector.extract_strided_slice %234 {offsets = [13, 0], sizes = [1, 32], strides = [1, 1]} : vector<16x32xf32> to vector<1x32xf32>
    %c0_117 = arith.constant 0 : index
    %c416 = arith.constant 416 : index
    %262 = vector.load %arg18[%c0_117, %c416] : memref<2x512xf32, #tpu.memory_space<vmem>>, vector<1x32xf32>
    tpu.vector_store %arg18[%c0_117, %c416], %261 {strides = array<i32>} : memref<2x512xf32, #tpu.memory_space<vmem>>, vector<1x32xf32>,
    %263 = vector.extract_strided_slice %234 {offsets = [14, 0], sizes = [1, 32], strides = [1, 1]} : vector<16x32xf32> to vector<1x32xf32>
    %c0_118 = arith.constant 0 : index
    %c448 = arith.constant 448 : index
    %264 = vector.load %arg18[%c0_118, %c448] : memref<2x512xf32, #tpu.memory_space<vmem>>, vector<1x32xf32>
    tpu.vector_store %arg18[%c0_118, %c448], %263 {strides = array<i32>} : memref<2x512xf32, #tpu.memory_space<vmem>>, vector<1x32xf32>,
    %265 = vector.extract_strided_slice %234 {offsets = [15, 0], sizes = [1, 32], strides = [1, 1]} : vector<16x32xf32> to vector<1x32xf32>
    %c0_119 = arith.constant 0 : index
    %c480 = arith.constant 480 : index
    %266 = vector.load %arg18[%c0_119, %c480] : memref<2x512xf32, #tpu.memory_space<vmem>>, vector<1x32xf32>
    tpu.vector_store %arg18[%c0_119, %c480], %265 {strides = array<i32>} : memref<2x512xf32, #tpu.memory_space<vmem>>, vector<1x32xf32>,
    %cst_120 = arith.constant 0.000000e+00 : f32
    %267 = vector.broadcast %cst_120 : f32 to vector<6x896xf32>
    %268 = vector.extract_strided_slice %6 {offsets = [0, 0], sizes = [6, 1], strides = [1, 1]} : vector<6x25xf32> to vector<6x1xf32>
    %c1_121 = arith.constant 1 : index
    %c0_122 = arith.constant 0 : index
    %269 = vector.load %arg1[%c1_121, %c0_122] : memref<2x1152xf32, #tpu.memory_space<vmem>>, vector<1x896xf32>
    %270 = vector.broadcast %268 : vector<6x1xf32> to vector<6x896xf32>
    %271 = vector.broadcast %269 : vector<1x896xf32> to vector<6x896xf32>
    %272 = arith.mulf %270, %271 : vector<6x896xf32>
    %273 = arith.addf %267, %272 : vector<6x896xf32>
    %274 = vector.extract_strided_slice %6 {offsets = [0, 1], sizes = [6, 1], strides = [1, 1]} : vector<6x25xf32> to vector<6x1xf32>
    %c1_123 = arith.constant 1 : index
    %c1_124 = arith.constant 1 : index
    %275 = vector.load %arg1[%c1_123, %c1_124] : memref<2x1152xf32, #tpu.memory_space<vmem>>, vector<1x896xf32>
    %276 = vector.broadcast %274 : vector<6x1xf32> to vector<6x896xf32>
    %277 = vector.broadcast %275 : vector<1x896xf32> to vector<6x896xf32>
    %278 = arith.mulf %276, %277 : vector<6x896xf32>
    %279 = arith.addf %273, %278 : vector<6x896xf32>
    %280 = vector.extract_strided_slice %6 {offsets = [0, 2], sizes = [6, 1], strides = [1, 1]} : vector<6x25xf32> to vector<6x1xf32>
    %c1_125 = arith.constant 1 : index
    %c2_126 = arith.constant 2 : index
    %281 = vector.load %arg1[%c1_125, %c2_126] : memref<2x1152xf32, #tpu.memory_space<vmem>>, vector<1x896xf32>
    %282 = vector.broadcast %280 : vector<6x1xf32> to vector<6x896xf32>
    %283 = vector.broadcast %281 : vector<1x896xf32> to vector<6x896xf32>
    %284 = arith.mulf %282, %283 : vector<6x896xf32>
    %285 = arith.addf %279, %284 : vector<6x896xf32>
    %286 = vector.extract_strided_slice %6 {offsets = [0, 3], sizes = [6, 1], strides = [1, 1]} : vector<6x25xf32> to vector<6x1xf32>
    %c1_127 = arith.constant 1 : index
    %c3_128 = arith.constant 3 : index
    %287 = vector.load %arg1[%c1_127, %c3_128] : memref<2x1152xf32, #tpu.memory_space<vmem>>, vector<1x896xf32>
    %288 = vector.broadcast %286 : vector<6x1xf32> to vector<6x896xf32>
    %289 = vector.broadcast %287 : vector<1x896xf32> to vector<6x896xf32>
    %290 = arith.mulf %288, %289 : vector<6x896xf32>
    %291 = arith.addf %285, %290 : vector<6x896xf32>
    %292 = vector.extract_strided_slice %6 {offsets = [0, 4], sizes = [6, 1], strides = [1, 1]} : vector<6x25xf32> to vector<6x1xf32>
    %c1_129 = arith.constant 1 : index
    %c4_130 = arith.constant 4 : index
    %293 = vector.load %arg1[%c1_129, %c4_130] : memref<2x1152xf32, #tpu.memory_space<vmem>>, vector<1x896xf32>
    %294 = vector.broadcast %292 : vector<6x1xf32> to vector<6x896xf32>
    %295 = vector.broadcast %293 : vector<1x896xf32> to vector<6x896xf32>
    %296 = arith.mulf %294, %295 : vector<6x896xf32>
    %297 = arith.addf %291, %296 : vector<6x896xf32>
    %298 = vector.extract_strided_slice %6 {offsets = [0, 5], sizes = [6, 1], strides = [1, 1]} : vector<6x25xf32> to vector<6x1xf32>
    %c1_131 = arith.constant 1 : index
    %c32_132 = arith.constant 32 : index
    %299 = vector.load %arg1[%c1_131, %c32_132] : memref<2x1152xf32, #tpu.memory_space<vmem>>, vector<1x896xf32>
    %300 = vector.broadcast %298 : vector<6x1xf32> to vector<6x896xf32>
    %301 = vector.broadcast %299 : vector<1x896xf32> to vector<6x896xf32>
    %302 = arith.mulf %300, %301 : vector<6x896xf32>
    %303 = arith.addf %297, %302 : vector<6x896xf32>
    %304 = vector.extract_strided_slice %6 {offsets = [0, 6], sizes = [6, 1], strides = [1, 1]} : vector<6x25xf32> to vector<6x1xf32>
    %c1_133 = arith.constant 1 : index
    %c33_134 = arith.constant 33 : index
    %305 = vector.load %arg1[%c1_133, %c33_134] : memref<2x1152xf32, #tpu.memory_space<vmem>>, vector<1x896xf32>
    %306 = vector.broadcast %304 : vector<6x1xf32> to vector<6x896xf32>
    %307 = vector.broadcast %305 : vector<1x896xf32> to vector<6x896xf32>
    %308 = arith.mulf %306, %307 : vector<6x896xf32>
    %309 = arith.addf %303, %308 : vector<6x896xf32>
    %310 = vector.extract_strided_slice %6 {offsets = [0, 7], sizes = [6, 1], strides = [1, 1]} : vector<6x25xf32> to vector<6x1xf32>
    %c1_135 = arith.constant 1 : index
    %c34_136 = arith.constant 34 : index
    %311 = vector.load %arg1[%c1_135, %c34_136] : memref<2x1152xf32, #tpu.memory_space<vmem>>, vector<1x896xf32>
    %312 = vector.broadcast %310 : vector<6x1xf32> to vector<6x896xf32>
    %313 = vector.broadcast %311 : vector<1x896xf32> to vector<6x896xf32>
    %314 = arith.mulf %312, %313 : vector<6x896xf32>
    %315 = arith.addf %309, %314 : vector<6x896xf32>
    %316 = vector.extract_strided_slice %6 {offsets = [0, 8], sizes = [6, 1], strides = [1, 1]} : vector<6x25xf32> to vector<6x1xf32>
    %c1_137 = arith.constant 1 : index
    %c35_138 = arith.constant 35 : index
    %317 = vector.load %arg1[%c1_137, %c35_138] : memref<2x1152xf32, #tpu.memory_space<vmem>>, vector<1x896xf32>
    %318 = vector.broadcast %316 : vector<6x1xf32> to vector<6x896xf32>
    %319 = vector.broadcast %317 : vector<1x896xf32> to vector<6x896xf32>
    %320 = arith.mulf %318, %319 : vector<6x896xf32>
    %321 = arith.addf %315, %320 : vector<6x896xf32>
    %322 = vector.extract_strided_slice %6 {offsets = [0, 9], sizes = [6, 1], strides = [1, 1]} : vector<6x25xf32> to vector<6x1xf32>
    %c1_139 = arith.constant 1 : index
    %c36_140 = arith.constant 36 : index
    %323 = vector.load %arg1[%c1_139, %c36_140] : memref<2x1152xf32, #tpu.memory_space<vmem>>, vector<1x896xf32>
    %324 = vector.broadcast %322 : vector<6x1xf32> to vector<6x896xf32>
    %325 = vector.broadcast %323 : vector<1x896xf32> to vector<6x896xf32>
    %326 = arith.mulf %324, %325 : vector<6x896xf32>
    %327 = arith.addf %321, %326 : vector<6x896xf32>
    %328 = vector.extract_strided_slice %6 {offsets = [0, 10], sizes = [6, 1], strides = [1, 1]} : vector<6x25xf32> to vector<6x1xf32>
    %c1_141 = arith.constant 1 : index
    %c64_142 = arith.constant 64 : index
    %329 = vector.load %arg1[%c1_141, %c64_142] : memref<2x1152xf32, #tpu.memory_space<vmem>>, vector<1x896xf32>
    %330 = vector.broadcast %328 : vector<6x1xf32> to vector<6x896xf32>
    %331 = vector.broadcast %329 : vector<1x896xf32> to vector<6x896xf32>
    %332 = arith.mulf %330, %331 : vector<6x896xf32>
    %333 = arith.addf %327, %332 : vector<6x896xf32>
    %334 = vector.extract_strided_slice %6 {offsets = [0, 11], sizes = [6, 1], strides = [1, 1]} : vector<6x25xf32> to vector<6x1xf32>
    %c1_143 = arith.constant 1 : index
    %c65_144 = arith.constant 65 : index
    %335 = vector.load %arg1[%c1_143, %c65_144] : memref<2x1152xf32, #tpu.memory_space<vmem>>, vector<1x896xf32>
    %336 = vector.broadcast %334 : vector<6x1xf32> to vector<6x896xf32>
    %337 = vector.broadcast %335 : vector<1x896xf32> to vector<6x896xf32>
    %338 = arith.mulf %336, %337 : vector<6x896xf32>
    %339 = arith.addf %333, %338 : vector<6x896xf32>
    %340 = vector.extract_strided_slice %6 {offsets = [0, 12], sizes = [6, 1], strides = [1, 1]} : vector<6x25xf32> to vector<6x1xf32>
    %c1_145 = arith.constant 1 : index
    %c66_146 = arith.constant 66 : index
    %341 = vector.load %arg1[%c1_145, %c66_146] : memref<2x1152xf32, #tpu.memory_space<vmem>>, vector<1x896xf32>
    %342 = vector.broadcast %340 : vector<6x1xf32> to vector<6x896xf32>
    %343 = vector.broadcast %341 : vector<1x896xf32> to vector<6x896xf32>
    %344 = arith.mulf %342, %343 : vector<6x896xf32>
    %345 = arith.addf %339, %344 : vector<6x896xf32>
    %346 = vector.extract_strided_slice %6 {offsets = [0, 13], sizes = [6, 1], strides = [1, 1]} : vector<6x25xf32> to vector<6x1xf32>
    %c1_147 = arith.constant 1 : index
    %c67_148 = arith.constant 67 : index
    %347 = vector.load %arg1[%c1_147, %c67_148] : memref<2x1152xf32, #tpu.memory_space<vmem>>, vector<1x896xf32>
    %348 = vector.broadcast %346 : vector<6x1xf32> to vector<6x896xf32>
    %349 = vector.broadcast %347 : vector<1x896xf32> to vector<6x896xf32>
    %350 = arith.mulf %348, %349 : vector<6x896xf32>
    %351 = arith.addf %345, %350 : vector<6x896xf32>
    %352 = vector.extract_strided_slice %6 {offsets = [0, 14], sizes = [6, 1], strides = [1, 1]} : vector<6x25xf32> to vector<6x1xf32>
    %c1_149 = arith.constant 1 : index
    %c68_150 = arith.constant 68 : index
    %353 = vector.load %arg1[%c1_149, %c68_150] : memref<2x1152xf32, #tpu.memory_space<vmem>>, vector<1x896xf32>
    %354 = vector.broadcast %352 : vector<6x1xf32> to vector<6x896xf32>
    %355 = vector.broadcast %353 : vector<1x896xf32> to vector<6x896xf32>
    %356 = arith.mulf %354, %355 : vector<6x896xf32>
    %357 = arith.addf %351, %356 : vector<6x896xf32>
    %358 = vector.extract_strided_slice %6 {offsets = [0, 15], sizes = [6, 1], strides = [1, 1]} : vector<6x25xf32> to vector<6x1xf32>
    %c1_151 = arith.constant 1 : index
    %c96_152 = arith.constant 96 : index
    %359 = vector.load %arg1[%c1_151, %c96_152] : memref<2x1152xf32, #tpu.memory_space<vmem>>, vector<1x896xf32>
    %360 = vector.broadcast %358 : vector<6x1xf32> to vector<6x896xf32>
    %361 = vector.broadcast %359 : vector<1x896xf32> to vector<6x896xf32>
    %362 = arith.mulf %360, %361 : vector<6x896xf32>
    %363 = arith.addf %357, %362 : vector<6x896xf32>
    %364 = vector.extract_strided_slice %6 {offsets = [0, 16], sizes = [6, 1], strides = [1, 1]} : vector<6x25xf32> to vector<6x1xf32>
    %c1_153 = arith.constant 1 : index
    %c97_154 = arith.constant 97 : index
    %365 = vector.load %arg1[%c1_153, %c97_154] : memref<2x1152xf32, #tpu.memory_space<vmem>>, vector<1x896xf32>
    %366 = vector.broadcast %364 : vector<6x1xf32> to vector<6x896xf32>
    %367 = vector.broadcast %365 : vector<1x896xf32> to vector<6x896xf32>
    %368 = arith.mulf %366, %367 : vector<6x896xf32>
    %369 = arith.addf %363, %368 : vector<6x896xf32>
    %370 = vector.extract_strided_slice %6 {offsets = [0, 17], sizes = [6, 1], strides = [1, 1]} : vector<6x25xf32> to vector<6x1xf32>
    %c1_155 = arith.constant 1 : index
    %c98_156 = arith.constant 98 : index
    %371 = vector.load %arg1[%c1_155, %c98_156] : memref<2x1152xf32, #tpu.memory_space<vmem>>, vector<1x896xf32>
    %372 = vector.broadcast %370 : vector<6x1xf32> to vector<6x896xf32>
    %373 = vector.broadcast %371 : vector<1x896xf32> to vector<6x896xf32>
    %374 = arith.mulf %372, %373 : vector<6x896xf32>
    %375 = arith.addf %369, %374 : vector<6x896xf32>
    %376 = vector.extract_strided_slice %6 {offsets = [0, 18], sizes = [6, 1], strides = [1, 1]} : vector<6x25xf32> to vector<6x1xf32>
    %c1_157 = arith.constant 1 : index
    %c99_158 = arith.constant 99 : index
    %377 = vector.load %arg1[%c1_157, %c99_158] : memref<2x1152xf32, #tpu.memory_space<vmem>>, vector<1x896xf32>
    %378 = vector.broadcast %376 : vector<6x1xf32> to vector<6x896xf32>
    %379 = vector.broadcast %377 : vector<1x896xf32> to vector<6x896xf32>
    %380 = arith.mulf %378, %379 : vector<6x896xf32>
    %381 = arith.addf %375, %380 : vector<6x896xf32>
    %382 = vector.extract_strided_slice %6 {offsets = [0, 19], sizes = [6, 1], strides = [1, 1]} : vector<6x25xf32> to vector<6x1xf32>
    %c1_159 = arith.constant 1 : index
    %c100_160 = arith.constant 100 : index
    %383 = vector.load %arg1[%c1_159, %c100_160] : memref<2x1152xf32, #tpu.memory_space<vmem>>, vector<1x896xf32>
    %384 = vector.broadcast %382 : vector<6x1xf32> to vector<6x896xf32>
    %385 = vector.broadcast %383 : vector<1x896xf32> to vector<6x896xf32>
    %386 = arith.mulf %384, %385 : vector<6x896xf32>
    %387 = arith.addf %381, %386 : vector<6x896xf32>
    %388 = vector.extract_strided_slice %6 {offsets = [0, 20], sizes = [6, 1], strides = [1, 1]} : vector<6x25xf32> to vector<6x1xf32>
    %c1_161 = arith.constant 1 : index
    %c128_162 = arith.constant 128 : index
    %389 = vector.load %arg1[%c1_161, %c128_162] : memref<2x1152xf32, #tpu.memory_space<vmem>>, vector<1x896xf32>
    %390 = vector.broadcast %388 : vector<6x1xf32> to vector<6x896xf32>
    %391 = vector.broadcast %389 : vector<1x896xf32> to vector<6x896xf32>
    %392 = arith.mulf %390, %391 : vector<6x896xf32>
    %393 = arith.addf %387, %392 : vector<6x896xf32>
    %394 = vector.extract_strided_slice %6 {offsets = [0, 21], sizes = [6, 1], strides = [1, 1]} : vector<6x25xf32> to vector<6x1xf32>
    %c1_163 = arith.constant 1 : index
    %c129_164 = arith.constant 129 : index
    %395 = vector.load %arg1[%c1_163, %c129_164] : memref<2x1152xf32, #tpu.memory_space<vmem>>, vector<1x896xf32>
    %396 = vector.broadcast %394 : vector<6x1xf32> to vector<6x896xf32>
    %397 = vector.broadcast %395 : vector<1x896xf32> to vector<6x896xf32>
    %398 = arith.mulf %396, %397 : vector<6x896xf32>
    %399 = arith.addf %393, %398 : vector<6x896xf32>
    %400 = vector.extract_strided_slice %6 {offsets = [0, 22], sizes = [6, 1], strides = [1, 1]} : vector<6x25xf32> to vector<6x1xf32>
    %c1_165 = arith.constant 1 : index
    %c130_166 = arith.constant 130 : index
    %401 = vector.load %arg1[%c1_165, %c130_166] : memref<2x1152xf32, #tpu.memory_space<vmem>>, vector<1x896xf32>
    %402 = vector.broadcast %400 : vector<6x1xf32> to vector<6x896xf32>
    %403 = vector.broadcast %401 : vector<1x896xf32> to vector<6x896xf32>
    %404 = arith.mulf %402, %403 : vector<6x896xf32>
    %405 = arith.addf %399, %404 : vector<6x896xf32>
    %406 = vector.extract_strided_slice %6 {offsets = [0, 23], sizes = [6, 1], strides = [1, 1]} : vector<6x25xf32> to vector<6x1xf32>
    %c1_167 = arith.constant 1 : index
    %c131_168 = arith.constant 131 : index
    %407 = vector.load %arg1[%c1_167, %c131_168] : memref<2x1152xf32, #tpu.memory_space<vmem>>, vector<1x896xf32>
    %408 = vector.broadcast %406 : vector<6x1xf32> to vector<6x896xf32>
    %409 = vector.broadcast %407 : vector<1x896xf32> to vector<6x896xf32>
    %410 = arith.mulf %408, %409 : vector<6x896xf32>
    %411 = arith.addf %405, %410 : vector<6x896xf32>
    %412 = vector.extract_strided_slice %6 {offsets = [0, 24], sizes = [6, 1], strides = [1, 1]} : vector<6x25xf32> to vector<6x1xf32>
    %c1_169 = arith.constant 1 : index
    %c132_170 = arith.constant 132 : index
    %413 = vector.load %arg1[%c1_169, %c132_170] : memref<2x1152xf32, #tpu.memory_space<vmem>>, vector<1x896xf32>
    %414 = vector.broadcast %412 : vector<6x1xf32> to vector<6x896xf32>
    %415 = vector.broadcast %413 : vector<1x896xf32> to vector<6x896xf32>
    %416 = arith.mulf %414, %415 : vector<6x896xf32>
    %417 = arith.addf %411, %416 : vector<6x896xf32>
    %418 = vector.broadcast %7 : vector<6x1xf32> to vector<6x896xf32>
    %419 = arith.addf %417, %418 : vector<6x896xf32>
    %c0_171 = arith.constant 0 : index
    %c0_172 = arith.constant 0 : index
    %420 = vector.load %arg15[%c0_171, %c0_172] : memref<6x1024xf32, #tpu.memory_space<vmem>>, vector<6x896xf32>
    tpu.vector_store %arg15[%c0_171, %c0_172], %419 {strides = array<i32>} : memref<6x1024xf32, #tpu.memory_space<vmem>>, vector<6x896xf32>,
    %c0_173 = arith.constant 0 : index
    %c1_174 = arith.constant 1 : index
    %421 = vector.load %arg15[%c0_173, %c1_174] : memref<6x1024xf32, #tpu.memory_space<vmem>>, vector<6x896xf32>
    %422 = arith.maximumf %419, %421 : vector<6x896xf32>
    %c0_175 = arith.constant 0 : index
    %c0_176 = arith.constant 0 : index
    %423 = vector.load %arg15[%c0_175, %c0_176] : memref<6x1024xf32, #tpu.memory_space<vmem>>, vector<6x896xf32>
    tpu.vector_store %arg15[%c0_175, %c0_176], %422 {strides = array<i32>} : memref<6x1024xf32, #tpu.memory_space<vmem>>, vector<6x896xf32>,
    %c0_177 = arith.constant 0 : index
    %c32_178 = arith.constant 32 : index
    %424 = vector.load %arg15[%c0_177, %c32_178] : memref<6x1024xf32, #tpu.memory_space<vmem>>, vector<6x896xf32>
    %425 = arith.maximumf %422, %424 : vector<6x896xf32>
    %426 = arith.truncf %425 : vector<6x896xf32> to vector<6x896xbf16>
    %c0_179 = arith.constant 0 : index
    %c0_180 = arith.constant 0 : index
    %427 = vector.load %arg6[%c0_179, %c0_180] : memref<896x256xbf16, #tpu.memory_space<vmem>>, vector<896x256xbf16>
    %cst_181 = arith.constant dense<0.000000e+00> : vector<6x256xf32>
    %428 = tpu.matmul %426, %427, %cst_181 {dimension_numbers = #tpu.dot_dimension_numbers<[1], [0], [0], [1], [0, 0, 1, 1], [], []>} : vector<6x896xbf16>, vector<896x256xbf16>, vector<6x256xf32> -> vector<6x256xf32>
    %429 = vector.extract_strided_slice %428 {offsets = [0, 0], sizes = [6, 160], strides = [1, 1]} : vector<6x256xf32> to vector<6x160xf32>
    %c0_182 = arith.constant 0 : index
    %c0_183 = arith.constant 0 : index
    %430 = vector.load %arg17[%c0_182, %c0_183] : memref<200x160xf32, #tpu.memory_space<vmem>>, vector<6x160xf32>
    tpu.vector_store %arg17[%c0_182, %c0_183], %429 {strides = array<i32>} : memref<200x160xf32, #tpu.memory_space<vmem>>, vector<6x160xf32>,
    %431 = vector.extract_strided_slice %428 {offsets = [0, 1], sizes = [6, 160], strides = [1, 1]} : vector<6x256xf32> to vector<6x160xf32>
    %c8_184 = arith.constant 8 : index
    %c0_185 = arith.constant 0 : index
    %432 = vector.load %arg17[%c8_184, %c0_185] : memref<200x160xf32, #tpu.memory_space<vmem>>, vector<6x160xf32>
    tpu.vector_store %arg17[%c8_184, %c0_185], %431 {strides = array<i32>} : memref<200x160xf32, #tpu.memory_space<vmem>>, vector<6x160xf32>,
    %433 = vector.extract_strided_slice %428 {offsets = [0, 2], sizes = [6, 160], strides = [1, 1]} : vector<6x256xf32> to vector<6x160xf32>
    %c16_186 = arith.constant 16 : index
    %c0_187 = arith.constant 0 : index
    %434 = vector.load %arg17[%c16_186, %c0_187] : memref<200x160xf32, #tpu.memory_space<vmem>>, vector<6x160xf32>
    tpu.vector_store %arg17[%c16_186, %c0_187], %433 {strides = array<i32>} : memref<200x160xf32, #tpu.memory_space<vmem>>, vector<6x160xf32>,
    %435 = vector.extract_strided_slice %428 {offsets = [0, 3], sizes = [6, 160], strides = [1, 1]} : vector<6x256xf32> to vector<6x160xf32>
    %c24_188 = arith.constant 24 : index
    %c0_189 = arith.constant 0 : index
    %436 = vector.load %arg17[%c24_188, %c0_189] : memref<200x160xf32, #tpu.memory_space<vmem>>, vector<6x160xf32>
    tpu.vector_store %arg17[%c24_188, %c0_189], %435 {strides = array<i32>} : memref<200x160xf32, #tpu.memory_space<vmem>>, vector<6x160xf32>,
    %437 = vector.extract_strided_slice %428 {offsets = [0, 4], sizes = [6, 160], strides = [1, 1]} : vector<6x256xf32> to vector<6x160xf32>
    %c32_190 = arith.constant 32 : index
    %c0_191 = arith.constant 0 : index
    %438 = vector.load %arg17[%c32_190, %c0_191] : memref<200x160xf32, #tpu.memory_space<vmem>>, vector<6x160xf32>
    tpu.vector_store %arg17[%c32_190, %c0_191], %437 {strides = array<i32>} : memref<200x160xf32, #tpu.memory_space<vmem>>, vector<6x160xf32>,
    %439 = vector.extract_strided_slice %428 {offsets = [0, 16], sizes = [6, 160], strides = [1, 1]} : vector<6x256xf32> to vector<6x160xf32>
    %c40_192 = arith.constant 40 : index
    %c0_193 = arith.constant 0 : index
    %440 = vector.load %arg17[%c40_192, %c0_193] : memref<200x160xf32, #tpu.memory_space<vmem>>, vector<6x160xf32>
    tpu.vector_store %arg17[%c40_192, %c0_193], %439 {strides = array<i32>} : memref<200x160xf32, #tpu.memory_space<vmem>>, vector<6x160xf32>,
    %441 = vector.extract_strided_slice %428 {offsets = [0, 17], sizes = [6, 160], strides = [1, 1]} : vector<6x256xf32> to vector<6x160xf32>
    %c48_194 = arith.constant 48 : index
    %c0_195 = arith.constant 0 : index
    %442 = vector.load %arg17[%c48_194, %c0_195] : memref<200x160xf32, #tpu.memory_space<vmem>>, vector<6x160xf32>
    tpu.vector_store %arg17[%c48_194, %c0_195], %441 {strides = array<i32>} : memref<200x160xf32, #tpu.memory_space<vmem>>, vector<6x160xf32>,
    %443 = vector.extract_strided_slice %428 {offsets = [0, 18], sizes = [6, 160], strides = [1, 1]} : vector<6x256xf32> to vector<6x160xf32>
    %c56_196 = arith.constant 56 : index
    %c0_197 = arith.constant 0 : index
    %444 = vector.load %arg17[%c56_196, %c0_197] : memref<200x160xf32, #tpu.memory_space<vmem>>, vector<6x160xf32>
    tpu.vector_store %arg17[%c56_196, %c0_197], %443 {strides = array<i32>} : memref<200x160xf32, #tpu.memory_space<vmem>>, vector<6x160xf32>,
    %445 = vector.extract_strided_slice %428 {offsets = [0, 19], sizes = [6, 160], strides = [1, 1]} : vector<6x256xf32> to vector<6x160xf32>
    %c64_198 = arith.constant 64 : index
    %c0_199 = arith.constant 0 : index
    %446 = vector.load %arg17[%c64_198, %c0_199] : memref<200x160xf32, #tpu.memory_space<vmem>>, vector<6x160xf32>
    tpu.vector_store %arg17[%c64_198, %c0_199], %445 {strides = array<i32>} : memref<200x160xf32, #tpu.memory_space<vmem>>, vector<6x160xf32>,
    %447 = vector.extract_strided_slice %428 {offsets = [0, 20], sizes = [6, 160], strides = [1, 1]} : vector<6x256xf32> to vector<6x160xf32>
    %c72_200 = arith.constant 72 : index
    %c0_201 = arith.constant 0 : index
    %448 = vector.load %arg17[%c72_200, %c0_201] : memref<200x160xf32, #tpu.memory_space<vmem>>, vector<6x160xf32>
    tpu.vector_store %arg17[%c72_200, %c0_201], %447 {strides = array<i32>} : memref<200x160xf32, #tpu.memory_space<vmem>>, vector<6x160xf32>,
    %449 = vector.extract_strided_slice %428 {offsets = [0, 32], sizes = [6, 160], strides = [1, 1]} : vector<6x256xf32> to vector<6x160xf32>
    %c80_202 = arith.constant 80 : index
    %c0_203 = arith.constant 0 : index
    %450 = vector.load %arg17[%c80_202, %c0_203] : memref<200x160xf32, #tpu.memory_space<vmem>>, vector<6x160xf32>
    tpu.vector_store %arg17[%c80_202, %c0_203], %449 {strides = array<i32>} : memref<200x160xf32, #tpu.memory_space<vmem>>, vector<6x160xf32>,
    %451 = vector.extract_strided_slice %428 {offsets = [0, 33], sizes = [6, 160], strides = [1, 1]} : vector<6x256xf32> to vector<6x160xf32>
    %c88_204 = arith.constant 88 : index
    %c0_205 = arith.constant 0 : index
    %452 = vector.load %arg17[%c88_204, %c0_205] : memref<200x160xf32, #tpu.memory_space<vmem>>, vector<6x160xf32>
    tpu.vector_store %arg17[%c88_204, %c0_205], %451 {strides = array<i32>} : memref<200x160xf32, #tpu.memory_space<vmem>>, vector<6x160xf32>,
    %453 = vector.extract_strided_slice %428 {offsets = [0, 34], sizes = [6, 160], strides = [1, 1]} : vector<6x256xf32> to vector<6x160xf32>
    %c96_206 = arith.constant 96 : index
    %c0_207 = arith.constant 0 : index
    %454 = vector.load %arg17[%c96_206, %c0_207] : memref<200x160xf32, #tpu.memory_space<vmem>>, vector<6x160xf32>
    tpu.vector_store %arg17[%c96_206, %c0_207], %453 {strides = array<i32>} : memref<200x160xf32, #tpu.memory_space<vmem>>, vector<6x160xf32>,
    %455 = vector.extract_strided_slice %428 {offsets = [0, 35], sizes = [6, 160], strides = [1, 1]} : vector<6x256xf32> to vector<6x160xf32>
    %c104_208 = arith.constant 104 : index
    %c0_209 = arith.constant 0 : index
    %456 = vector.load %arg17[%c104_208, %c0_209] : memref<200x160xf32, #tpu.memory_space<vmem>>, vector<6x160xf32>
    tpu.vector_store %arg17[%c104_208, %c0_209], %455 {strides = array<i32>} : memref<200x160xf32, #tpu.memory_space<vmem>>, vector<6x160xf32>,
    %457 = vector.extract_strided_slice %428 {offsets = [0, 36], sizes = [6, 160], strides = [1, 1]} : vector<6x256xf32> to vector<6x160xf32>
    %c112_210 = arith.constant 112 : index
    %c0_211 = arith.constant 0 : index
    %458 = vector.load %arg17[%c112_210, %c0_211] : memref<200x160xf32, #tpu.memory_space<vmem>>, vector<6x160xf32>
    tpu.vector_store %arg17[%c112_210, %c0_211], %457 {strides = array<i32>} : memref<200x160xf32, #tpu.memory_space<vmem>>, vector<6x160xf32>,
    %459 = vector.extract_strided_slice %428 {offsets = [0, 48], sizes = [6, 160], strides = [1, 1]} : vector<6x256xf32> to vector<6x160xf32>
    %c120_212 = arith.constant 120 : index
    %c0_213 = arith.constant 0 : index
    %460 = vector.load %arg17[%c120_212, %c0_213] : memref<200x160xf32, #tpu.memory_space<vmem>>, vector<6x160xf32>
    tpu.vector_store %arg17[%c120_212, %c0_213], %459 {strides = array<i32>} : memref<200x160xf32, #tpu.memory_space<vmem>>, vector<6x160xf32>,
    %461 = vector.extract_strided_slice %428 {offsets = [0, 49], sizes = [6, 160], strides = [1, 1]} : vector<6x256xf32> to vector<6x160xf32>
    %c128_214 = arith.constant 128 : index
    %c0_215 = arith.constant 0 : index
    %462 = vector.load %arg17[%c128_214, %c0_215] : memref<200x160xf32, #tpu.memory_space<vmem>>, vector<6x160xf32>
    tpu.vector_store %arg17[%c128_214, %c0_215], %461 {strides = array<i32>} : memref<200x160xf32, #tpu.memory_space<vmem>>, vector<6x160xf32>,
    %463 = vector.extract_strided_slice %428 {offsets = [0, 50], sizes = [6, 160], strides = [1, 1]} : vector<6x256xf32> to vector<6x160xf32>
    %c136_216 = arith.constant 136 : index
    %c0_217 = arith.constant 0 : index
    %464 = vector.load %arg17[%c136_216, %c0_217] : memref<200x160xf32, #tpu.memory_space<vmem>>, vector<6x160xf32>
    tpu.vector_store %arg17[%c136_216, %c0_217], %463 {strides = array<i32>} : memref<200x160xf32, #tpu.memory_space<vmem>>, vector<6x160xf32>,
    %465 = vector.extract_strided_slice %428 {offsets = [0, 51], sizes = [6, 160], strides = [1, 1]} : vector<6x256xf32> to vector<6x160xf32>
    %c144_218 = arith.constant 144 : index
    %c0_219 = arith.constant 0 : index
    %466 = vector.load %arg17[%c144_218, %c0_219] : memref<200x160xf32, #tpu.memory_space<vmem>>, vector<6x160xf32>
    tpu.vector_store %arg17[%c144_218, %c0_219], %465 {strides = array<i32>} : memref<200x160xf32, #tpu.memory_space<vmem>>, vector<6x160xf32>,
    %467 = vector.extract_strided_slice %428 {offsets = [0, 52], sizes = [6, 160], strides = [1, 1]} : vector<6x256xf32> to vector<6x160xf32>
    %c152_220 = arith.constant 152 : index
    %c0_221 = arith.constant 0 : index
    %468 = vector.load %arg17[%c152_220, %c0_221] : memref<200x160xf32, #tpu.memory_space<vmem>>, vector<6x160xf32>
    tpu.vector_store %arg17[%c152_220, %c0_221], %467 {strides = array<i32>} : memref<200x160xf32, #tpu.memory_space<vmem>>, vector<6x160xf32>,
    %469 = vector.extract_strided_slice %428 {offsets = [0, 64], sizes = [6, 160], strides = [1, 1]} : vector<6x256xf32> to vector<6x160xf32>
    %c160_222 = arith.constant 160 : index
    %c0_223 = arith.constant 0 : index
    %470 = vector.load %arg17[%c160_222, %c0_223] : memref<200x160xf32, #tpu.memory_space<vmem>>, vector<6x160xf32>
    tpu.vector_store %arg17[%c160_222, %c0_223], %469 {strides = array<i32>} : memref<200x160xf32, #tpu.memory_space<vmem>>, vector<6x160xf32>,
    %471 = vector.extract_strided_slice %428 {offsets = [0, 65], sizes = [6, 160], strides = [1, 1]} : vector<6x256xf32> to vector<6x160xf32>
    %c168_224 = arith.constant 168 : index
    %c0_225 = arith.constant 0 : index
    %472 = vector.load %arg17[%c168_224, %c0_225] : memref<200x160xf32, #tpu.memory_space<vmem>>, vector<6x160xf32>
    tpu.vector_store %arg17[%c168_224, %c0_225], %471 {strides = array<i32>} : memref<200x160xf32, #tpu.memory_space<vmem>>, vector<6x160xf32>,
    %473 = vector.extract_strided_slice %428 {offsets = [0, 66], sizes = [6, 160], strides = [1, 1]} : vector<6x256xf32> to vector<6x160xf32>
    %c176_226 = arith.constant 176 : index
    %c0_227 = arith.constant 0 : index
    %474 = vector.load %arg17[%c176_226, %c0_227] : memref<200x160xf32, #tpu.memory_space<vmem>>, vector<6x160xf32>
    tpu.vector_store %arg17[%c176_226, %c0_227], %473 {strides = array<i32>} : memref<200x160xf32, #tpu.memory_space<vmem>>, vector<6x160xf32>,
    %475 = vector.extract_strided_slice %428 {offsets = [0, 67], sizes = [6, 160], strides = [1, 1]} : vector<6x256xf32> to vector<6x160xf32>
    %c184_228 = arith.constant 184 : index
    %c0_229 = arith.constant 0 : index
    %476 = vector.load %arg17[%c184_228, %c0_229] : memref<200x160xf32, #tpu.memory_space<vmem>>, vector<6x160xf32>
    tpu.vector_store %arg17[%c184_228, %c0_229], %475 {strides = array<i32>} : memref<200x160xf32, #tpu.memory_space<vmem>>, vector<6x160xf32>,
    %477 = vector.extract_strided_slice %428 {offsets = [0, 68], sizes = [6, 160], strides = [1, 1]} : vector<6x256xf32> to vector<6x160xf32>
    %c192_230 = arith.constant 192 : index
    %c0_231 = arith.constant 0 : index
    %478 = vector.load %arg17[%c192_230, %c0_231] : memref<200x160xf32, #tpu.memory_space<vmem>>, vector<6x160xf32>
    tpu.vector_store %arg17[%c192_230, %c0_231], %477 {strides = array<i32>} : memref<200x160xf32, #tpu.memory_space<vmem>>, vector<6x160xf32>,
    %c0_232 = arith.constant 0 : index
    %c0_233 = arith.constant 0 : index
    %479 = vector.load %arg4[%c0_232, %c0_233] : memref<16x200xf32, #tpu.memory_space<vmem>>, vector<16x200xf32>
    %c0_234 = arith.constant 0 : index
    %c0_235 = arith.constant 0 : index
    %480 = vector.load %arg17[%c0_234, %c0_235] : memref<200x160xf32, #tpu.memory_space<vmem>>, vector<200x160xf32>
    %cst_236 = arith.constant dense<0.000000e+00> : vector<16x160xf32>
    %481 = tpu.matmul %479, %480, %cst_236 {dimension_numbers = #tpu.dot_dimension_numbers<[1], [0], [0], [1], [0, 0, 1, 1], [], []>} : vector<16x200xf32>, vector<200x160xf32>, vector<16x160xf32> -> vector<16x160xf32>
    %482 = vector.broadcast %8 : vector<16x1xf32> to vector<16x160xf32>
    %483 = arith.addf %481, %482 : vector<16x160xf32>
    %c0_237 = arith.constant 0 : index
    %c0_238 = arith.constant 0 : index
    %484 = vector.load %arg16[%c0_237, %c0_238] : memref<16x256xf32, #tpu.memory_space<vmem>>, vector<16x160xf32>
    tpu.vector_store %arg16[%c0_237, %c0_238], %483 {strides = array<i32>} : memref<16x256xf32, #tpu.memory_space<vmem>>, vector<16x160xf32>,
    %c0_239 = arith.constant 0 : index
    %c1_240 = arith.constant 1 : index
    %485 = vector.load %arg16[%c0_239, %c1_240] : memref<16x256xf32, #tpu.memory_space<vmem>>, vector<16x160xf32>
    %486 = arith.maximumf %483, %485 : vector<16x160xf32>
    %c0_241 = arith.constant 0 : index
    %c0_242 = arith.constant 0 : index
    %487 = vector.load %arg16[%c0_241, %c0_242] : memref<16x256xf32, #tpu.memory_space<vmem>>, vector<16x160xf32>
    tpu.vector_store %arg16[%c0_241, %c0_242], %486 {strides = array<i32>} : memref<16x256xf32, #tpu.memory_space<vmem>>, vector<16x160xf32>,
    %c0_243 = arith.constant 0 : index
    %c16_244 = arith.constant 16 : index
    %488 = vector.load %arg16[%c0_243, %c16_244] : memref<16x256xf32, #tpu.memory_space<vmem>>, vector<16x160xf32>
    %489 = arith.maximumf %486, %488 : vector<16x160xf32>
    %490 = arith.truncf %489 : vector<16x160xf32> to vector<16x160xbf16>
    %c0_245 = arith.constant 0 : index
    %c0_246 = arith.constant 0 : index
    %491 = vector.load %arg7[%c0_245, %c0_246] : memref<160x32xbf16, #tpu.memory_space<vmem>>, vector<160x32xbf16>
    %cst_247 = arith.constant dense<0.000000e+00> : vector<16x32xf32>
    %492 = tpu.matmul %490, %491, %cst_247 {dimension_numbers = #tpu.dot_dimension_numbers<[1], [0], [0], [1], [0, 0, 1, 1], [], []>} : vector<16x160xbf16>, vector<160x32xbf16>, vector<16x32xf32> -> vector<16x32xf32>
    %493 = vector.extract_strided_slice %492 {offsets = [0, 0], sizes = [1, 32], strides = [1, 1]} : vector<16x32xf32> to vector<1x32xf32>
    %c1_248 = arith.constant 1 : index
    %c0_249 = arith.constant 0 : index
    %494 = vector.load %arg18[%c1_248, %c0_249] : memref<2x512xf32, #tpu.memory_space<vmem>>, vector<1x32xf32>
    tpu.vector_store %arg18[%c1_248, %c0_249], %493 {strides = array<i32>} : memref<2x512xf32, #tpu.memory_space<vmem>>, vector<1x32xf32>,
    %495 = vector.extract_strided_slice %492 {offsets = [1, 0], sizes = [1, 32], strides = [1, 1]} : vector<16x32xf32> to vector<1x32xf32>
    %c1_250 = arith.constant 1 : index
    %c32_251 = arith.constant 32 : index
    %496 = vector.load %arg18[%c1_250, %c32_251] : memref<2x512xf32, #tpu.memory_space<vmem>>, vector<1x32xf32>
    tpu.vector_store %arg18[%c1_250, %c32_251], %495 {strides = array<i32>} : memref<2x512xf32, #tpu.memory_space<vmem>>, vector<1x32xf32>,
    %497 = vector.extract_strided_slice %492 {offsets = [2, 0], sizes = [1, 32], strides = [1, 1]} : vector<16x32xf32> to vector<1x32xf32>
    %c1_252 = arith.constant 1 : index
    %c64_253 = arith.constant 64 : index
    %498 = vector.load %arg18[%c1_252, %c64_253] : memref<2x512xf32, #tpu.memory_space<vmem>>, vector<1x32xf32>
    tpu.vector_store %arg18[%c1_252, %c64_253], %497 {strides = array<i32>} : memref<2x512xf32, #tpu.memory_space<vmem>>, vector<1x32xf32>,
    %499 = vector.extract_strided_slice %492 {offsets = [3, 0], sizes = [1, 32], strides = [1, 1]} : vector<16x32xf32> to vector<1x32xf32>
    %c1_254 = arith.constant 1 : index
    %c96_255 = arith.constant 96 : index
    %500 = vector.load %arg18[%c1_254, %c96_255] : memref<2x512xf32, #tpu.memory_space<vmem>>, vector<1x32xf32>
    tpu.vector_store %arg18[%c1_254, %c96_255], %499 {strides = array<i32>} : memref<2x512xf32, #tpu.memory_space<vmem>>, vector<1x32xf32>,
    %501 = vector.extract_strided_slice %492 {offsets = [4, 0], sizes = [1, 32], strides = [1, 1]} : vector<16x32xf32> to vector<1x32xf32>
    %c1_256 = arith.constant 1 : index
    %c128_257 = arith.constant 128 : index
    %502 = vector.load %arg18[%c1_256, %c128_257] : memref<2x512xf32, #tpu.memory_space<vmem>>, vector<1x32xf32>
    tpu.vector_store %arg18[%c1_256, %c128_257], %501 {strides = array<i32>} : memref<2x512xf32, #tpu.memory_space<vmem>>, vector<1x32xf32>,
    %503 = vector.extract_strided_slice %492 {offsets = [5, 0], sizes = [1, 32], strides = [1, 1]} : vector<16x32xf32> to vector<1x32xf32>
    %c1_258 = arith.constant 1 : index
    %c160_259 = arith.constant 160 : index
    %504 = vector.load %arg18[%c1_258, %c160_259] : memref<2x512xf32, #tpu.memory_space<vmem>>, vector<1x32xf32>
    tpu.vector_store %arg18[%c1_258, %c160_259], %503 {strides = array<i32>} : memref<2x512xf32, #tpu.memory_space<vmem>>, vector<1x32xf32>,
    %505 = vector.extract_strided_slice %492 {offsets = [6, 0], sizes = [1, 32], strides = [1, 1]} : vector<16x32xf32> to vector<1x32xf32>
    %c1_260 = arith.constant 1 : index
    %c192_261 = arith.constant 192 : index
    %506 = vector.load %arg18[%c1_260, %c192_261] : memref<2x512xf32, #tpu.memory_space<vmem>>, vector<1x32xf32>
    tpu.vector_store %arg18[%c1_260, %c192_261], %505 {strides = array<i32>} : memref<2x512xf32, #tpu.memory_space<vmem>>, vector<1x32xf32>,
    %507 = vector.extract_strided_slice %492 {offsets = [7, 0], sizes = [1, 32], strides = [1, 1]} : vector<16x32xf32> to vector<1x32xf32>
    %c1_262 = arith.constant 1 : index
    %c224_263 = arith.constant 224 : index
    %508 = vector.load %arg18[%c1_262, %c224_263] : memref<2x512xf32, #tpu.memory_space<vmem>>, vector<1x32xf32>
    tpu.vector_store %arg18[%c1_262, %c224_263], %507 {strides = array<i32>} : memref<2x512xf32, #tpu.memory_space<vmem>>, vector<1x32xf32>,
    %509 = vector.extract_strided_slice %492 {offsets = [8, 0], sizes = [1, 32], strides = [1, 1]} : vector<16x32xf32> to vector<1x32xf32>
    %c1_264 = arith.constant 1 : index
    %c256_265 = arith.constant 256 : index
    %510 = vector.load %arg18[%c1_264, %c256_265] : memref<2x512xf32, #tpu.memory_space<vmem>>, vector<1x32xf32>
    tpu.vector_store %arg18[%c1_264, %c256_265], %509 {strides = array<i32>} : memref<2x512xf32, #tpu.memory_space<vmem>>, vector<1x32xf32>,
    %511 = vector.extract_strided_slice %492 {offsets = [9, 0], sizes = [1, 32], strides = [1, 1]} : vector<16x32xf32> to vector<1x32xf32>
    %c1_266 = arith.constant 1 : index
    %c288_267 = arith.constant 288 : index
    %512 = vector.load %arg18[%c1_266, %c288_267] : memref<2x512xf32, #tpu.memory_space<vmem>>, vector<1x32xf32>
    tpu.vector_store %arg18[%c1_266, %c288_267], %511 {strides = array<i32>} : memref<2x512xf32, #tpu.memory_space<vmem>>, vector<1x32xf32>,
    %513 = vector.extract_strided_slice %492 {offsets = [10, 0], sizes = [1, 32], strides = [1, 1]} : vector<16x32xf32> to vector<1x32xf32>
    %c1_268 = arith.constant 1 : index
    %c320_269 = arith.constant 320 : index
    %514 = vector.load %arg18[%c1_268, %c320_269] : memref<2x512xf32, #tpu.memory_space<vmem>>, vector<1x32xf32>
    tpu.vector_store %arg18[%c1_268, %c320_269], %513 {strides = array<i32>} : memref<2x512xf32, #tpu.memory_space<vmem>>, vector<1x32xf32>,
    %515 = vector.extract_strided_slice %492 {offsets = [11, 0], sizes = [1, 32], strides = [1, 1]} : vector<16x32xf32> to vector<1x32xf32>
    %c1_270 = arith.constant 1 : index
    %c352_271 = arith.constant 352 : index
    %516 = vector.load %arg18[%c1_270, %c352_271] : memref<2x512xf32, #tpu.memory_space<vmem>>, vector<1x32xf32>
    tpu.vector_store %arg18[%c1_270, %c352_271], %515 {strides = array<i32>} : memref<2x512xf32, #tpu.memory_space<vmem>>, vector<1x32xf32>,
    %517 = vector.extract_strided_slice %492 {offsets = [12, 0], sizes = [1, 32], strides = [1, 1]} : vector<16x32xf32> to vector<1x32xf32>
    %c1_272 = arith.constant 1 : index
    %c384_273 = arith.constant 384 : index
    %518 = vector.load %arg18[%c1_272, %c384_273] : memref<2x512xf32, #tpu.memory_space<vmem>>, vector<1x32xf32>
    tpu.vector_store %arg18[%c1_272, %c384_273], %517 {strides = array<i32>} : memref<2x512xf32, #tpu.memory_space<vmem>>, vector<1x32xf32>,
    %519 = vector.extract_strided_slice %492 {offsets = [13, 0], sizes = [1, 32], strides = [1, 1]} : vector<16x32xf32> to vector<1x32xf32>
    %c1_274 = arith.constant 1 : index
    %c416_275 = arith.constant 416 : index
    %520 = vector.load %arg18[%c1_274, %c416_275] : memref<2x512xf32, #tpu.memory_space<vmem>>, vector<1x32xf32>
    tpu.vector_store %arg18[%c1_274, %c416_275], %519 {strides = array<i32>} : memref<2x512xf32, #tpu.memory_space<vmem>>, vector<1x32xf32>,
    %521 = vector.extract_strided_slice %492 {offsets = [14, 0], sizes = [1, 32], strides = [1, 1]} : vector<16x32xf32> to vector<1x32xf32>
    %c1_276 = arith.constant 1 : index
    %c448_277 = arith.constant 448 : index
    %522 = vector.load %arg18[%c1_276, %c448_277] : memref<2x512xf32, #tpu.memory_space<vmem>>, vector<1x32xf32>
    tpu.vector_store %arg18[%c1_276, %c448_277], %521 {strides = array<i32>} : memref<2x512xf32, #tpu.memory_space<vmem>>, vector<1x32xf32>,
    %523 = vector.extract_strided_slice %492 {offsets = [15, 0], sizes = [1, 32], strides = [1, 1]} : vector<16x32xf32> to vector<1x32xf32>
    %c1_278 = arith.constant 1 : index
    %c480_279 = arith.constant 480 : index
    %524 = vector.load %arg18[%c1_278, %c480_279] : memref<2x512xf32, #tpu.memory_space<vmem>>, vector<1x32xf32>
    tpu.vector_store %arg18[%c1_278, %c480_279], %523 {strides = array<i32>} : memref<2x512xf32, #tpu.memory_space<vmem>>, vector<1x32xf32>,
    %c0_280 = arith.constant 0 : index
    %c0_281 = arith.constant 0 : index
    %525 = vector.load %arg18[%c0_280, %c0_281] : memref<2x512xf32, #tpu.memory_space<vmem>>, vector<2x512xf32>
    %526 = arith.truncf %525 : vector<2x512xf32> to vector<2x512xbf16>
    %c0_282 = arith.constant 0 : index
    %c0_283 = arith.constant 0 : index
    %527 = vector.load %arg8[%c0_282, %c0_283] : memref<512x120xbf16, #tpu.memory_space<vmem>>, vector<512x120xbf16>
    %cst_284 = arith.constant dense<0.000000e+00> : vector<2x120xf32>
    %528 = tpu.matmul %526, %527, %cst_284 {dimension_numbers = #tpu.dot_dimension_numbers<[1], [0], [0], [1], [0, 0, 1, 1], [], []>} : vector<2x512xbf16>, vector<512x120xbf16>, vector<2x120xf32> -> vector<2x120xf32>
    %c0_285 = arith.constant 0 : index
    %c0_286 = arith.constant 0 : index
    %529 = vector.load %arg9[%c0_285, %c0_286] : memref<1x120xf32, #tpu.memory_space<vmem>>, vector<1x120xf32>
    %530 = vector.broadcast %529 : vector<1x120xf32> to vector<2x120xf32>
    %531 = arith.addf %528, %530 : vector<2x120xf32>
    %c0_287 = arith.constant 0 : index
    %c0_288 = arith.constant 0 : index
    %532 = vector.load %arg10[%c0_287, %c0_288] : memref<120x84xbf16, #tpu.memory_space<vmem>>, vector<120x84xbf16>
    %533 = arith.extf %532 : vector<120x84xbf16> to vector<120x84xf32>
    %cst_289 = arith.constant dense<0.000000e+00> : vector<2x84xf32>
    %534 = tpu.matmul %531, %533, %cst_289 {dimension_numbers = #tpu.dot_dimension_numbers<[1], [0], [0], [1], [0, 0, 1, 1], [], []>} : vector<2x120xf32>, vector<120x84xf32>, vector<2x84xf32> -> vector<2x84xf32>
    %c0_290 = arith.constant 0 : index
    %c0_291 = arith.constant 0 : index
    %535 = vector.load %arg11[%c0_290, %c0_291] : memref<1x84xf32, #tpu.memory_space<vmem>>, vector<1x84xf32>
    %536 = vector.broadcast %535 : vector<1x84xf32> to vector<2x84xf32>
    %537 = arith.addf %534, %536 : vector<2x84xf32>
    %c0_292 = arith.constant 0 : index
    %c0_293 = arith.constant 0 : index
    %538 = vector.load %arg12[%c0_292, %c0_293] : memref<84x10xbf16, #tpu.memory_space<vmem>>, vector<84x10xbf16>
    %539 = arith.extf %538 : vector<84x10xbf16> to vector<84x10xf32>
    %cst_294 = arith.constant dense<0.000000e+00> : vector<2x10xf32>
    %540 = tpu.matmul %537, %539, %cst_294 {dimension_numbers = #tpu.dot_dimension_numbers<[1], [0], [0], [1], [0, 0, 1, 1], [], []>} : vector<2x84xf32>, vector<84x10xf32>, vector<2x10xf32> -> vector<2x10xf32>
    %c0_295 = arith.constant 0 : index
    %c0_296 = arith.constant 0 : index
    %541 = vector.load %arg13[%c0_295, %c0_296] : memref<1x10xf32, #tpu.memory_space<vmem>>, vector<1x10xf32>
    %542 = vector.broadcast %541 : vector<1x10xf32> to vector<2x10xf32>
    %543 = arith.addf %540, %542 : vector<2x10xf32>
    %c0_297 = arith.constant 0 : index
    %c0_298 = arith.constant 0 : index
    %544 = vector.load %arg14[%c0_297, %c0_298] : memref<2x10xf32, #tpu.memory_space<vmem>>, vector<2x10xf32>
    tpu.vector_store %arg14[%c0_297, %c0_298], %543 {strides = array<i32>} : memref<2x10xf32, #tpu.memory_space<vmem>>, vector<2x10xf32>,
    return
  }
  func.func @transform_0(%arg0: i32) -> (i32, i32) {
    %c0_i32 = arith.constant 0 : i32
    %c0_i32_0 = arith.constant 0 : i32
    return %arg0, %c0_i32 : i32, i32
  }
  func.func @transform_1(%arg0: i32) -> (i32, i32) {
    %c0_i32 = arith.constant 0 : i32
    %c0_i32_0 = arith.constant 0 : i32
    %c0_i32_1 = arith.constant 0 : i32
    return %c0_i32, %c0_i32_0 : i32, i32
  }
  func.func @transform_2(%arg0: i32) -> (i32, i32) {
    %c0_i32 = arith.constant 0 : i32
    %c0_i32_0 = arith.constant 0 : i32
    %c0_i32_1 = arith.constant 0 : i32
    return %c0_i32, %c0_i32_0 : i32, i32
  }
  func.func @transform_3(%arg0: i32) -> (i32, i32) {
    %c0_i32 = arith.constant 0 : i32
    %c0_i32_0 = arith.constant 0 : i32
    %c0_i32_1 = arith.constant 0 : i32
    return %c0_i32, %c0_i32_0 : i32, i32
  }
  func.func @transform_4(%arg0: i32) -> (i32, i32) {
    %c0_i32 = arith.constant 0 : i32
    %c0_i32_0 = arith.constant 0 : i32
    %c0_i32_1 = arith.constant 0 : i32
    return %c0_i32, %c0_i32_0 : i32, i32
  }
  func.func @transform_5(%arg0: i32) -> (i32, i32) {
    %c0_i32 = arith.constant 0 : i32
    %c0_i32_0 = arith.constant 0 : i32
    %c0_i32_1 = arith.constant 0 : i32
    return %c0_i32, %c0_i32_0 : i32, i32
  }
  func.func @transform_6(%arg0: i32) -> (i32, i32) {
    %c0_i32 = arith.constant 0 : i32
    %c0_i32_0 = arith.constant 0 : i32
    %c0_i32_1 = arith.constant 0 : i32
    return %c0_i32, %c0_i32_0 : i32, i32
  }
  func.func @transform_7(%arg0: i32) -> (i32, i32) {
    %c0_i32 = arith.constant 0 : i32
    %c0_i32_0 = arith.constant 0 : i32
    %c0_i32_1 = arith.constant 0 : i32
    return %c0_i32, %c0_i32_0 : i32, i32
  }
  func.func @transform_8(%arg0: i32) -> (i32, i32) {
    %c0_i32 = arith.constant 0 : i32
    %c0_i32_0 = arith.constant 0 : i32
    %c0_i32_1 = arith.constant 0 : i32
    return %c0_i32, %c0_i32_0 : i32, i32
  }
  func.func @transform_9(%arg0: i32) -> (i32, i32) {
    %c0_i32 = arith.constant 0 : i32
    %c0_i32_0 = arith.constant 0 : i32
    %c0_i32_1 = arith.constant 0 : i32
    return %c0_i32, %c0_i32_0 : i32, i32
  }
  func.func @transform_10(%arg0: i32) -> (i32, i32) {
    %c0_i32 = arith.constant 0 : i32
    %c0_i32_0 = arith.constant 0 : i32
    %c0_i32_1 = arith.constant 0 : i32
    return %c0_i32, %c0_i32_0 : i32, i32
  }
  func.func @transform_11(%arg0: i32) -> (i32, i32) {
    %c0_i32 = arith.constant 0 : i32
    %c0_i32_0 = arith.constant 0 : i32
    %c0_i32_1 = arith.constant 0 : i32
    return %c0_i32, %c0_i32_0 : i32, i32
  }
  func.func @transform_12(%arg0: i32) -> (i32, i32) {
    %c0_i32 = arith.constant 0 : i32
    %c0_i32_0 = arith.constant 0 : i32
    %c0_i32_1 = arith.constant 0 : i32
    return %c0_i32, %c0_i32_0 : i32, i32
  }
  func.func @transform_13(%arg0: i32) -> (i32, i32) {
    %c0_i32 = arith.constant 0 : i32
    %c0_i32_0 = arith.constant 0 : i32
    return %arg0, %c0_i32 : i32, i32
  }
}

</mosaic_0001>

<bundles_post_ra>
// kernel: my_model_forward.1
= control target key start
LH: loop header
LB: loop body
LE: loop exit
PB: predicated region body
PF: predicated region fallthrough
CT: control target
= control target key end

     0   :  { %s12766_s0 = inlined_call_operand.vmem [shape: f32[2,1152], index: 0, kind: input, shape index: {}]   ;;  %s12767_s1 = inlined_call_operand.vmem [shape: f32[6,25], index: 1, kind: input, shape index: {}]   ;;  %s12768_s2 = inlined_call_operand.vmem [shape: f32[6,1], index: 2, kind: input, shape index: {}]   ;;  %s12769_s3 = inlined_call_operand.hbm [shape: f32[16,200], index: 3, kind: input, shape index: {}]   ;;  %s12770_s4 = inlined_call_operand.vmem [shape: f32[16,1], index: 4, kind: input, shape index: {}]   ;;  %s12771_s5 = inlined_call_operand.vmem [shape: bf16[896,256], index: 5, kind: input, shape index: {}]   ;;  %s12772_s6 = inlined_call_operand.vmem [shape: bf16[160,32], index: 6, kind: input, shape index: {}]   ;;  %s12773_s7 = inlined_call_operand.vmem [shape: bf16[512,120], index: 7, kind: input, shape index: {}]   ;;  %s12774_s8 = inlined_call_operand.vmem [shape: f32[1,120], index: 8, kind: input, shape index: {}]   ;;  %s12775_s9 = inlined_call_operand.vmem [shape: bf16[120,84], index: 9, kind: input, shape index: {}]   ;;  %s12776_s10 = inlined_call_operand.vmem [shape: f32[1,84], index: 10, kind: input, shape index: {}]   ;;  %s12777_s11 = inlined_call_operand.vmem [shape: bf16[84,10], index: 11, kind: input, shape index: {}]   ;;  %s12778_s12 = inlined_call_operand.vmem [shape: f32[1,10], index: 12, kind: input, shape index: {}]   ;;  %s12779_s13 = inlined_call_operand.hbm [shape: f32[2,10], index: 13, kind: output, shape index: {}]  }
   0x1   :  { %13082 = sst [smem:[#allocation99_spill]] %s12776_s10 }
   0x2   :  { %13083 = sst [smem:[#allocation100_spill]] %s12778_s12 }
   0x3   :  { %13084 = sst [smem:[#allocation101_spill]] %s12779_s13 }
   0x4   :  { %18 = vsyncpa [#allocation7], 0 }
   0x5   :  { %19 = vsyncpa [#allocation8], 0  ;;  %s8133_s25 = smov [#allocation6]   ;;  %s8085_s29 = scalar_lea.hbm %s12769_s3, 512 }
   0x6   :  { %s31_s26 = sshll.u32 %s8133_s25, 4  ;;  %p8086_p0 = scmp.ne.s32.totalorder %s12769_s3, %s8085_s29  ;;  %s32_s26 = int_to_ptr.vmem [resolvable:$true] %s31_s26 }
   0x7   :  { %p8089_p1 = scmp.lt.u32.totalorder %s8085_s29, %s12769_s3 }
   0x9   :  { %p8091_p2 = pnand %p8089_p1, %p8086_p0 }
   0xb   :  { %8094 = shalt.err (!%p8091_p2)
}
   0xc   :  { %s8095_s17 = scalar_lea.vmem %s32_s26, 512  ;;  %p8100_p4 = scmp.lt.s32.totalorder %s32_s26, %s32_s26 }
   0xd   :  { %p8096_p3 = scmp.ne.s32.totalorder %s32_s26, %s8095_s17  ;;  %p8101_p5 = scmp.lt.s32.totalorder %s8095_s17, %s8095_s17 }
   0xf   :  { %p8102_p6 = por %p8101_p5, %p8100_p4 }
  0x11   :  { %p8103_p7 = pnand %p8102_p6, %p8096_p3 }
  0x13   :  { %8106 = shalt.err (!%p8103_p7)
}
  0x14   :  { %s8134_s18 = smov 256   ;;  %s8135_s19 = smov 16  }
  0x15   :  { %37 = dma.hbm_to_vmem [thread:$0]  %s12769_s3, 512, %s32_s26, [#allocation7], %s8134_s18, %s8134_s18, %s8135_s19  }
  0x16   :  { %8129 = dma.done.wait [#allocation7], 512  }
  0x17   :  { %8130 = vsyncadd [#allocation7], 4294966784  ;;  %v8136_v0 = vmov 1   ;;  %v8137_v1 = vmov 3   ;;  %v8280_v2 = vld [vmem:[%s12767_s1] sm:$0x3f]  ;;  %v134_v25 = vlaneseq }
  0x18   :  { %7613 = vset.pattern.permute.xlu0 %v8136_v0  ;;  %7615 = vset.pattern.permute.xlu1 %v8137_v1  ;;  %v8138_v3 = vmov 2   ;;  %v8139_v4 = vmov 4   ;;  %v8140_v5 = vmov 5   ;;  %v8141_v6 = vmov 6   ;;  %v8318_v29 = vld [vmem:[%s12766_s0] ss:$2 sm:$0xff] }
  0x19   :  { %185 = vperm.xlu0 %7613, %v8280_v2   ;;  %342 = vperm.xlu1 %7615, %v8280_v2   ;;  %v8142_v7 = vmov 7   ;;  %v8143_v8 = vmov 9   ;;  %v8144_v9 = vmov 8   ;;  %v8145_v10 = vmov 12   ;;  %s13080_s25 = smov 127   ;;  %s13052_s26 = smov 126  }
  0x1a   :  { %v8146_v11 = vmov 10   ;;  %v8147_v12 = vmov 15   ;;  %v8148_v13 = vmov 11   ;;  %v8149_v14 = vmov 18   ;;  %s13054_s27 = smov 125   ;;  %s13056_s28 = smov 124  }
  0x1b   :  { %v8150_v15 = vmov 13   ;;  %v8151_v16 = vmov 22   ;;  %v8152_v17 = vmov 14   ;;  %v12780_v18 = vmov 0   ;;  %s12962_s29 = smov 96   ;;  %s12960_s30 = smov 95  }
  0x1c   :  { %v8154_v19 = vmov 16   ;;  %v8155_v20 = vmov 17   ;;  %v8156_v21 = vmov 19   ;;  %v8157_v22 = vmov 21   ;;  %s12958_s14 = smov 94   ;;  %s12935_s15 = smov 93  }
  0x1d   :  { %7614 = vset.pattern.permute.xlu0 %v8138_v3  ;;  %7616 = vset.pattern.permute.xlu1 %v8139_v4  ;;  %v8158_v23 = vmov 23   ;;  %v8159_v24 = vmov 24   ;;  %v8307_v26 = vshrl.u32 %v134_v25, 7  ;;  %v8164_v62 = vmov 20   ;;  %s12933_s16 = smov 92   ;;  %s12931_s17 = smov 64  }
  0x1e   :  { %284 = vperm.xlu0 %7614, %v8280_v2   ;;  %400 = vperm.xlu1 %7616, %v8280_v2   ;;  %s12929_s18 = smov 63   ;;  %s12927_s19 = smov 62   ;;  %vm73_vm0 = vcmask 261120   ;;  %vm261_vm1 = vcmask 1039360   ;;  %vm13050_vm2 = vcmask 1031168   ;;  %vm12937_vm3 = vcmask 1022976  }
  0x1f   :  { %13085 = vst [vmem:[#allocation12_spill] sm:$0xff] %v8307_v26  ;;  %v8310_v27 = vsub.s32 3, %v8307_v26  ;;  %v8313_v28 = vsub.s32 1, %v8307_v26  ;;  %v8329_v32 = vsub.s32 2, %v8307_v26  ;;  %v8332_v33 = vsub.s32 0, %v8307_v26  ;;  %s12925_s20 = smov 61  }
  0x20   :  { %v8337_v35 = vsub.s32 4, %v8307_v26  ;;  %s12923_s21 = smov 60   ;;  %s12782_s22 = smov 32   ;;  %vm12917_vm4 = vcmask 1014784   ;;  %vm12918_vm5 = vcmask 785408   ;;  %vm12897_vm6 = vcmask 777216  }
  0x21   :  { %13086 = vst [vmem:[#allocation13_spill] sm:$0xff] %v8310_v27  ;;  %13087 = vst [vmem:[#allocation14_spill] sm:$0xff] %v8313_v28  ;;  %v8322_v30 = vrot.slane %v8318_v29, %v8310_v27  ;;  %v8326_v31 = vrot.slane %v8318_v29, %v8313_v28  ;;  %v8345_v38 = vrot.slane %v8318_v29, %v8329_v32  ;;  %s12921_s23 = smov 31   ;;  %s13172_s3 = smov 30   ;;  %vm609_vm7 = vcmask 769024  }
  0x22   :  { %7617 = vset.pattern.permute.xlu1 %v8140_v5  ;;  %7618 = vset.pattern.permute.xlu0 %v8141_v6  ;;  %13088 = vst [vmem:[#allocation15_spill] sm:$0xff] %v8329_v32  ;;  %13089 = vst [vmem:[#allocation16_spill] sm:$0xff] %v8332_v33  ;;  %v8349_v39 = vrot.slane %v8318_v29, %v8332_v33  ;;  %v8361_v43 = vrot.slane %v8318_v29, %v8337_v35  ;;  %vm12898_vm8 = vcmask 760832   ;;  %vm725_vm9 = vcmask 752640   ;;  %s12948_s24 = smov 109   ;;  %s13503_s13 = smov 112  }
  0x23   :  { %458 = vperm.xlu1 %7617, %v8280_v2   ;;  %516 = vperm.xlu0 %7618, %v8280_v2   ;;  %13091 = vst [vmem:[#allocation18_spill] sm:$0xff] %v8337_v35  ;;  %vm783_vm10 = vcmask 523264   ;;  %vm841_vm11 = vcmask 515072   ;;  %vm899_vm12 = vcmask 506880   ;;  %vm12901_vm13 = vcmask 498688   ;;  %s13626_s10 = sld [smem:[#allocation99_spill]] }
  0x24   :  { %vm1015_vm14 = vcmask 490496   ;;  %vm1130_vm15 = vcmask 252928  }
  0x27   :  { %7619 = vset.pattern.permute.xlu1 %v8142_v7  ;;  %7621 = vset.pattern.permute.xlu0 %v8143_v8 }
  0x28   :  { %574 = vperm.xlu1 %7619, %v8280_v2   ;;  %690 = vperm.xlu0 %7621, %v8280_v2  }
  0x2c   :  { %7620 = vset.pattern.permute.xlu1 %v8144_v9  ;;  %7624 = vset.pattern.permute.xlu0 %v8145_v10 }
  0x2d   :  { %632 = vperm.xlu1 %7620, %v8280_v2   ;;  %864 = vperm.xlu0 %7624, %v8280_v2  }
  0x31   :  { %7622 = vset.pattern.permute.xlu1 %v8146_v11  ;;  %7627 = vset.pattern.permute.xlu0 %v8147_v12 }
  0x32   :  { %748 = vperm.xlu1 %7622, %v8280_v2   ;;  %1038 = vperm.xlu0 %7627, %v8280_v2  }
  0x36   :  { %7623 = vset.pattern.permute.xlu1 %v8148_v13  ;;  %7630 = vset.pattern.permute.xlu0 %v8149_v14 }
  0x37   :  { %806 = vperm.xlu1 %7623, %v8280_v2   ;;  %1211 = vperm.xlu0 %7630, %v8280_v2  }
  0x3b   :  { %7625 = vset.pattern.permute.xlu1 %v8150_v15  ;;  %7633 = vset.pattern.permute.xlu0 %v8151_v16 }
  0x3c   :  { %922 = vperm.xlu1 %7625, %v8280_v2   ;;  %1483 = vperm.xlu0 %7633, %v8280_v2  }
  0x40   :  { %7626 = vset.pattern.permute.xlu1 %v8152_v17  ;;  %7636 = vset.pattern.permute.xlu0 %v12780_v18 }
  0x41   :  { %980 = vperm.xlu1 %7626, %v8280_v2   ;;  %130 = vperm.xlu0 %7636, %v8280_v2  }
  0x45   :  { %7628 = vset.pattern.permute.xlu1 %v8154_v19 }
  0x46   :  { %1095 = vperm.xlu1 %7628, %v8280_v2  }
  0x4a   :  { %7629 = vset.pattern.permute.xlu1 %v8155_v20 }
  0x4b   :  { %1153 = vperm.xlu1 %7629, %v8280_v2  }
  0x4f   :  { %7631 = vset.pattern.permute.xlu1 %v8156_v21 }
  0x50   :  { %1269 = vperm.xlu1 %7631, %v8280_v2  }
  0x54   :  { %7632 = vset.pattern.permute.xlu1 %v8157_v22 }
  0x55   :  { %1385 = vperm.xlu1 %7632, %v8280_v2  }
  0x59   :  { %7634 = vset.pattern.permute.xlu1 %v8158_v23 }
  0x5a   :  { %1540 = vperm.xlu1 %7634, %v8280_v2  }
  0x5e   :  { %7635 = vset.pattern.permute.xlu1 %v8159_v24 }
  0x5f   :  { %1597 = vperm.xlu1 %7635, %v8280_v2  }
  0x63   :  { %7637 = vset.pattern.permute.xlu1 %v8164_v62 }
  0x98   :  { %v8334_v34 = vpop.permute.xlu0 %185  ;;  %v8375_v48 = vpop.permute.xlu1 %342 }
  0x99   :  { %13090 = vst [vmem:[#allocation17_spill] sm:$0xff] %v8334_v34  ;;  %v232_v36 = vmul.f32 %v8322_v30, %v8334_v34  ;;  %v230_v37 = vmul.f32 %v8326_v31, %v8334_v34  ;;  %v231_v40 = vmul.f32 %v8345_v38, %v8334_v34  ;;  %v229_v41 = vmul.f32 %v8349_v39, %v8334_v34 }
  0x9a   :  { %v233_v45 = vmul.f32 %v8361_v43, %v8334_v34  ;;  %13093 = vst [vmem:[#allocation20_spill] sm:$0xff] %v8375_v48  ;;  %v346_v49 = vmul.f32 %v8375_v48, %v8326_v31  ;;  %v348_v51 = vmul.f32 %v8375_v48, %v8322_v30  ;;  %v345_v53 = vmul.f32 %v8375_v48, %v8349_v39 }
  0x9b   :  { %251 = vrot.lane.b32.xlu0 %v232_v36, %s13080_s25  ;;  %247 = vrot.lane.b32.xlu1 %v230_v37, %s13080_s25  ;;  %v347_v54 = vmul.f32 %v8375_v48, %v8345_v38  ;;  %v349_v57 = vmul.f32 %v8375_v48, %v8361_v43 }
  0x9d   :  { %v8357_v42 = vpop.permute.xlu0 %284  ;;  %v8395_v55 = vpop.permute.xlu1 %400 }
  0x9e   :  { %13092 = vst [vmem:[#allocation19_spill] sm:$0xff] %v8357_v42  ;;  %v289_v44 = vmul.f32 %v8357_v42, %v8345_v38  ;;  %v291_v46 = vmul.f32 %v8357_v42, %v8361_v43  ;;  %v288_v47 = vmul.f32 %v8357_v42, %v8326_v31  ;;  %v290_v50 = vmul.f32 %v8357_v42, %v8322_v30 }
  0x9f   :  { %249 = vrot.lane.b32.xlu1 %v231_v40, %s13080_s25  ;;  %245 = vrot.lane.b32.xlu0 %v229_v41, %s13080_s25  ;;  %v287_v52 = vmul.f32 %v8357_v42, %v8349_v39  ;;  %13094 = vst [vmem:[#allocation21_spill] sm:$0xff] %v8395_v55  ;;  %v405_v56 = vmul.f32 %v8395_v55, %v8345_v38 }
  0xa0   :  { %v407_v58 = vmul.f32 %v8395_v55, %v8361_v43  ;;  %v404_v59 = vmul.f32 %v8395_v55, %v8326_v31  ;;  %v406_v63 = vmul.f32 %v8395_v55, %v8322_v30  ;;  %v403_v1 = vmul.f32 %v8395_v55, %v8349_v39 }
  0xa2   :  { %v8409_v60 = vpop.permute.xlu1 %458  ;;  %v8429_v4 = vpop.permute.xlu0 %516 }
  0xa3   :  { %253 = vrot.lane.b32.xlu1 %v233_v45, %s13080_s25  ;;  %307 = vrot.lane.b32.xlu0 %v289_v44, %s13052_s26  ;;  %13095 = vst [vmem:[#allocation22_spill] sm:$0xff] %v8409_v60  ;;  %v462_v61 = vmul.f32 %v8409_v60, %v8326_v31  ;;  %v464_v0 = vmul.f32 %v8409_v60, %v8322_v30  ;;  %13096 = vst [vmem:[#allocation23_spill] sm:$0xff] %v8429_v4 }
  0xa4   :  { %v461_v2 = vmul.f32 %v8409_v60, %v8349_v39  ;;  %v463_v3 = vmul.f32 %v8409_v60, %v8345_v38  ;;  %v521_v5 = vmul.f32 %v8429_v4, %v8345_v38  ;;  %v465_v6 = vmul.f32 %v8409_v60, %v8361_v43 }
  0xa5   :  { %v523_v8 = vmul.f32 %v8429_v4, %v8361_v43  ;;  %v520_v9 = vmul.f32 %v8429_v4, %v8326_v31  ;;  %v522_v12 = vmul.f32 %v8429_v4, %v8322_v30  ;;  %v519_v15 = vmul.f32 %v8429_v4, %v8349_v39 }
  0xa7   :  { %311 = vrot.lane.b32.xlu0 %v291_v46, %s13052_s26  ;;  %305 = vrot.lane.b32.xlu1 %v288_v47, %s13052_s26  ;;  %v8437_v7 = vpop.permute.xlu1 %574  ;;  %v8483_v25 = vpop.permute.xlu0 %690 }
  0xa8   :  { %13097 = vst [vmem:[#allocation24_spill] sm:$0xff] %v8437_v7  ;;  %v578_v11 = vmul.f32 %v8437_v7, %v8326_v31  ;;  %v580_v14 = vmul.f32 %v8437_v7, %v8322_v30  ;;  %v577_v16 = vmul.f32 %v8437_v7, %v8349_v39  ;;  %v579_v17 = vmul.f32 %v8437_v7, %v8345_v38 }
  0xa9   :  { %v581_v21 = vmul.f32 %v8437_v7, %v8361_v43  ;;  %13102 = vst [vmem:[#allocation29_spill] sm:$0xff] %v8483_v25  ;;  %v694_v36 = vmul.f32 %v8483_v25, %v8326_v31  ;;  %v696_v41 = vmul.f32 %v8483_v25, %v8322_v30  ;;  %v695_v46 = vmul.f32 %v8483_v25, %v8345_v38 }
  0xaa   :  { %v693_v47 = vmul.f32 %v8483_v25, %v8349_v39 }
  0xab   :  { %363 = vrot.lane.b32.xlu0 %v346_v49, %s13054_s27  ;;  %309 = vrot.lane.b32.xlu1 %v290_v50, %s13052_s26 }
  0xac   :  { %v8445_v10 = vpop.permute.xlu1 %632  ;;  %v8511_v50 = vpop.permute.xlu0 %864 }
  0xad   :  { %13098 = vst [vmem:[#allocation25_spill] sm:$0xff] %v8445_v10  ;;  %v637_v20 = vmul.f32 %v8445_v10, %v8345_v38  ;;  %v639_v23 = vmul.f32 %v8445_v10, %v8361_v43  ;;  %v636_v24 = vmul.f32 %v8445_v10, %v8326_v31  ;;  %v638_v40 = vmul.f32 %v8445_v10, %v8322_v30 }
  0xae   :  { %v635_v44 = vmul.f32 %v8445_v10, %v8349_v39  ;;  %13106 = vst [vmem:[#allocation33_spill] sm:$0xff] %v8511_v50 }
  0xaf   :  { %367 = vrot.lane.b32.xlu0 %v348_v51, %s13054_s27  ;;  %303 = vrot.lane.b32.xlu1 %v287_v52, %s13052_s26  ;;  %v697_v51 = vmul.f32 %v8483_v25, %v8361_v43 }
  0xb1   :  { %v8453_v13 = vpop.permute.xlu1 %748 }
  0xb2   :  { %13099 = vst [vmem:[#allocation26_spill] sm:$0xff] %v8453_v13  ;;  %v753_v52 = vmul.f32 %v8453_v13, %v8345_v38 }
  0xb3   :  { %361 = vrot.lane.b32.xlu0 %v345_v53, %s13054_s27  ;;  %365 = vrot.lane.b32.xlu1 %v347_v54, %s13054_s27  ;;  %v752_v53 = vmul.f32 %v8453_v13, %v8326_v31  ;;  %v755_v54 = vmul.f32 %v8453_v13, %v8361_v43 }
  0xb6   :  { %v8467_v19 = vpop.permute.xlu1 %806 }
  0xb7   :  { %423 = vrot.lane.b32.xlu0 %v405_v56, %s13056_s28  ;;  %369 = vrot.lane.b32.xlu1 %v349_v57, %s13054_s27  ;;  %13100 = vst [vmem:[#allocation27_spill] sm:$0xff] %v8467_v19  ;;  %v8525_v57 = vpop.permute.xlu0 %1038 }
  0xb8   :  { %13108 = vst [vmem:[#allocation35_spill] sm:$0xff] %v8525_v57 }
  0xbb   :  { %427 = vrot.lane.b32.xlu0 %v407_v58, %s13056_s28  ;;  %421 = vrot.lane.b32.xlu1 %v404_v59, %s13056_s28  ;;  %v8475_v22 = vpop.permute.xlu1 %922  ;;  %v754_v58 = vmul.f32 %v8453_v13, %v8322_v30  ;;  %v810_v59 = vmul.f32 %v8467_v19, %v8326_v31  ;;  %v8537_v62 = vpop.permute.xlu0 %1211 }
  0xbc   :  { %13101 = vst [vmem:[#allocation28_spill] sm:$0xff] %v8475_v22  ;;  %13110 = vst [vmem:[#allocation37_spill] sm:$0xff] %v8537_v62 }
  0xbf   :  { %479 = vrot.lane.b32.xlu0 %v462_v61, %s12962_s29  ;;  %425 = vrot.lane.b32.xlu1 %v406_v63, %s13056_s28  ;;  %v751_v63 = vmul.f32 %v8453_v13, %v8349_v39 }
  0xc0   :  { %v8489_v37 = vpop.permute.xlu1 %980 }
  0xc1   :  { %13103 = vst [vmem:[#allocation30_spill] sm:$0xff] %v8489_v37 }
  0xc3   :  { %483 = vrot.lane.b32.xlu0 %v464_v0, %s12962_s29  ;;  %419 = vrot.lane.b32.xlu1 %v403_v1, %s13056_s28  ;;  %v812_v0 = vmul.f32 %v8467_v19, %v8322_v30  ;;  %v811_v1 = vmul.f32 %v8467_v19, %v8345_v38 }
  0xc5   :  { %v8499_v45 = vpop.permute.xlu1 %1095 }
  0xc6   :  { %13104 = vst [vmem:[#allocation31_spill] sm:$0xff] %v8499_v45 }
  0xc7   :  { %477 = vrot.lane.b32.xlu0 %v461_v2, %s12962_s29  ;;  %481 = vrot.lane.b32.xlu1 %v463_v3, %s12962_s29  ;;  %v809_v2 = vmul.f32 %v8467_v19, %v8349_v39 }
  0xca   :  { %v8509_v49 = vpop.permute.xlu1 %1153 }
  0xcb   :  { %485 = vrot.lane.b32.xlu1 %v465_v6, %s12962_s29  ;;  %539 = vrot.lane.b32.xlu0 %v521_v5, %s12960_s30  ;;  %13105 = vst [vmem:[#allocation32_spill] sm:$0xff] %v8509_v49  ;;  %v8551_v5 = vpop.permute.xlu0 %1483  ;;  %v869_v6 = vmul.f32 %v8511_v50, %v8345_v38 }
  0xcc   :  { %13112 = vst [vmem:[#allocation39_spill] sm:$0xff] %v8551_v5 }
  0xcf   :  { %543 = vrot.lane.b32.xlu0 %v523_v8, %s12960_s30  ;;  %537 = vrot.lane.b32.xlu1 %v520_v9, %s12960_s30  ;;  %v8523_v56 = vpop.permute.xlu1 %1269  ;;  %v813_v8 = vmul.f32 %v8467_v19, %v8361_v43 }
  0xd0   :  { %13107 = vst [vmem:[#allocation34_spill] sm:$0xff] %v8523_v56 }
  0xd3   :  { %595 = vrot.lane.b32.xlu0 %v578_v11, %s12958_s14  ;;  %541 = vrot.lane.b32.xlu1 %v522_v12, %s12960_s30  ;;  %v8563_v11 = vpop.permute.xlu0 %130  ;;  %v871_v12 = vmul.f32 %v8511_v50, %v8361_v43 }
  0xd4   :  { %v8535_v61 = vpop.permute.xlu1 %1385  ;;  %13114 = vst [vmem:[#allocation41_spill] sm:$0xff] %v8563_v11 }
  0xd5   :  { %13109 = vst [vmem:[#allocation36_spill] sm:$0xff] %v8535_v61 }
  0xd7   :  { %599 = vrot.lane.b32.xlu0 %v580_v14, %s12958_s14  ;;  %535 = vrot.lane.b32.xlu1 %v519_v15, %s12960_s30  ;;  %v868_v14 = vmul.f32 %v8511_v50, %v8326_v31 }
  0xd9   :  { %v8549_v3 = vpop.permute.xlu1 %1540 }
  0xda   :  { %13111 = vst [vmem:[#allocation38_spill] sm:$0xff] %v8549_v3 }
  0xdb   :  { %593 = vrot.lane.b32.xlu0 %v577_v16, %s12958_s14  ;;  %597 = vrot.lane.b32.xlu1 %v579_v17, %s12958_s14  ;;  %v926_v17 = vmul.f32 %v8475_v22, %v8326_v31 }
  0xde   :  { %v8561_v9 = vpop.permute.xlu1 %1597 }
  0xdf   :  { %655 = vrot.lane.b32.xlu0 %v637_v20, %s12935_s15  ;;  %601 = vrot.lane.b32.xlu1 %v581_v21, %s12958_s14  ;;  %13113 = vst [vmem:[#allocation40_spill] sm:$0xff] %v8561_v9  ;;  %v870_v20 = vmul.f32 %v8511_v50, %v8322_v30 }
  0xe3   :  { %659 = vrot.lane.b32.xlu0 %v639_v23, %s12935_s15  ;;  %653 = vrot.lane.b32.xlu1 %v636_v24, %s12935_s15  ;;  %v928_v24 = vmul.f32 %v8475_v22, %v8322_v30 }
  0xe7   :  { %657 = vrot.lane.b32.xlu1 %v638_v40, %s12935_s15  ;;  %711 = vrot.lane.b32.xlu0 %v694_v36, %s12933_s16  ;;  %v867_v36 = vmul.f32 %v8511_v50, %v8349_v39 }
  0xeb   :  { %651 = vrot.lane.b32.xlu1 %v635_v44, %s12935_s15  ;;  %715 = vrot.lane.b32.xlu0 %v696_v41, %s12933_s16  ;;  %v925_v44 = vmul.f32 %v8475_v22, %v8349_v39 }
  0xef   :  { %713 = vrot.lane.b32.xlu1 %v695_v46, %s12933_s16  ;;  %709 = vrot.lane.b32.xlu0 %v693_v47, %s12933_s16  ;;  %v927_v46 = vmul.f32 %v8475_v22, %v8345_v38 }
  0xf3   :  { %717 = vrot.lane.b32.xlu1 %v697_v51, %s12933_s16  ;;  %771 = vrot.lane.b32.xlu0 %v753_v52, %s12931_s17  ;;  %v985_v52 = vmul.f32 %v8489_v37, %v8345_v38 }
  0xf7   :  { %769 = vrot.lane.b32.xlu1 %v752_v53, %s12931_s17  ;;  %775 = vrot.lane.b32.xlu0 %v755_v54, %s12931_s17  ;;  %v929_v53 = vmul.f32 %v8475_v22, %v8361_v43 }
  0xfb   :  { %773 = vrot.lane.b32.xlu1 %v754_v58, %s12931_s17  ;;  %827 = vrot.lane.b32.xlu0 %v810_v59, %s12929_s18  ;;  %v987_v59 = vmul.f32 %v8489_v37, %v8361_v43 }
  0xff   :  { %767 = vrot.lane.b32.xlu1 %v751_v63, %s12931_s17  ;;  %831 = vrot.lane.b32.xlu0 %v812_v0, %s12929_s18  ;;  %v984_v63 = vmul.f32 %v8489_v37, %v8326_v31 }
 0x103   :  { %829 = vrot.lane.b32.xlu1 %v811_v1, %s12929_s18  ;;  %825 = vrot.lane.b32.xlu0 %v809_v2, %s12929_s18  ;;  %v986_v2 = vmul.f32 %v8489_v37, %v8322_v30 }
 0x107   :  { %833 = vrot.lane.b32.xlu1 %v813_v8, %s12929_s18  ;;  %887 = vrot.lane.b32.xlu0 %v869_v6, %s12927_s19  ;;  %v1042_v6 = vmul.f32 %v8525_v57, %v8326_v31 }
 0x10b   :  { %891 = vrot.lane.b32.xlu0 %v871_v12, %s12927_s19  ;;  %885 = vrot.lane.b32.xlu1 %v868_v14, %s12927_s19  ;;  %v983_v14 = vmul.f32 %v8489_v37, %v8349_v39 }
 0x10d   :  { %v8571_v15 = vpop.permute.xlu1 %247  ;;  %v8573_v16 = vpop.permute.xlu0 %251 }
 0x10f   :  { %943 = vrot.lane.b32.xlu0 %v926_v17, %s12925_s20  ;;  %889 = vrot.lane.b32.xlu1 %v870_v20, %s12927_s19  ;;  %v1044_v17 = vmul.f32 %v8525_v57, %v8322_v30 }
 0x111   :  { %v8581_v21 = vpop.permute.xlu1 %249  ;;  %v8583_v23 = vpop.permute.xlu0 %245 }
 0x113   :  { %947 = vrot.lane.b32.xlu0 %v928_v24, %s12925_s20  ;;  %883 = vrot.lane.b32.xlu1 %v867_v36, %s12927_s19  ;;  %v1043_v36 = vmul.f32 %v8525_v57, %v8345_v38 }
 0x115   :  { %v8591_v40 = vpop.permute.xlu1 %253  ;;  %v8593_v41 = vpop.permute.xlu0 %307 }
 0x117   :  { %941 = vrot.lane.b32.xlu0 %v925_v44, %s12925_s20  ;;  %945 = vrot.lane.b32.xlu1 %v927_v46, %s12925_s20  ;;  %v1041_v44 = vmul.f32 %v8525_v57, %v8349_v39 }
 0x119   :  { %v8601_v47 = vpop.permute.xlu1 %305  ;;  %v8603_v51 = vpop.permute.xlu0 %311 }
 0x11b   :  { %1003 = vrot.lane.b32.xlu0 %v985_v52, %s12923_s21  ;;  %949 = vrot.lane.b32.xlu1 %v929_v53, %s12925_s20  ;;  %v1045_v53 = vmul.f32 %v8525_v57, %v8361_v43 }
 0x11d   :  { %v8611_v54 = vpop.permute.xlu1 %309  ;;  %v8613_v58 = vpop.permute.xlu0 %363 }
 0x11f   :  { %1007 = vrot.lane.b32.xlu0 %v987_v59, %s12923_s21  ;;  %1001 = vrot.lane.b32.xlu1 %v984_v63, %s12923_s21  ;;  %v1100_v59 = vmul.f32 %v8499_v45, %v8345_v38 }
 0x121   :  { %v8621_v0 = vpop.permute.xlu1 %303  ;;  %v8623_v1 = vpop.permute.xlu0 %367 }
 0x123   :  { %1005 = vrot.lane.b32.xlu1 %v986_v2, %s12923_s21  ;;  %1059 = vrot.lane.b32.xlu0 %v1042_v6, %s12782_s22  ;;  %v1099_v6 = vmul.f32 %v8499_v45, %v8326_v31 }
 0x125   :  { %v8631_v8 = vpop.permute.xlu1 %365  ;;  %v8633_v12 = vpop.permute.xlu0 %361 }
 0x127   :  { %999 = vrot.lane.b32.xlu1 %v983_v14, %s12923_s21  ;;  %1063 = vrot.lane.b32.xlu0 %v1044_v17, %s12782_s22  ;;  %v1102_v14 = vmul.f32 %v8499_v45, %v8361_v43 }
 0x129   :  { %v8641_v20 = vpop.permute.xlu1 %369  ;;  %v8643_v24 = vpop.permute.xlu0 %423 }
 0x12a   :  { %13115 = vst [vmem:[#allocation42_spill] sm:$0xff] %v8641_v20  ;;  %13116 = vst [vmem:[#allocation43_spill] sm:$0xff] %v8643_v24 }
 0x12b   :  { %1061 = vrot.lane.b32.xlu1 %v1043_v36, %s12782_s22  ;;  %1057 = vrot.lane.b32.xlu0 %v1041_v44, %s12782_s22  ;;  %v1101_v44 = vmul.f32 %v8499_v45, %v8322_v30 }
 0x12d   :  { %v8651_v46 = vpop.permute.xlu1 %421  ;;  %v8653_v52 = vpop.permute.xlu0 %427 }
 0x12e   :  { %13117 = vst [vmem:[#allocation44_spill] sm:$0xff] %v8653_v52  ;;  %v13123_v52 = vmov 0  }
 0x12f   :  { %1065 = vrot.lane.b32.xlu1 %v1045_v53, %s12782_s22  ;;  %1118 = vrot.lane.b32.xlu0 %v1100_v59, %s12921_s23  ;;  %v1098_v53 = vmul.f32 %v8499_v45, %v8349_v39  ;;  %s12795_s22 = smov 30  }
 0x131   :  { %v8661_v63 = vpop.permute.xlu1 %425  ;;  %v8663_v2 = vpop.permute.xlu0 %479 }
 0x132   :  { %13118 = vst [vmem:[#allocation45_spill] sm:$0xff] %v8661_v63 }
 0x133   :  { %1116 = vrot.lane.b32.xlu1 %v1099_v6, %s12921_s23  ;;  %1122 = vrot.lane.b32.xlu0 %v1102_v14, %s12921_s23  ;;  %v1158_v6 = vmul.f32 %v8509_v49, %v8345_v38  ;;  %v8078_v14 = vld [vmem:[%s12767_s1] sm:$0x3f]  ;;  %s12919_s1 = smov 29  }
 0x135   :  { %v8671_v17 = vpop.permute.xlu1 %419  ;;  %v8673_v36 = vpop.permute.xlu0 %483 }
 0x136   :  { %13119 = vst [vmem:[#allocation46_spill] sm:$0xff] %v8673_v36 }
 0x137   :  { %1120 = vrot.lane.b32.xlu1 %v1101_v44, %s12921_s23  ;;  %1114 = vrot.lane.b32.xlu0 %v1098_v53, %s12921_s23  ;;  %v1157_v53 = vmul.f32 %v8509_v49, %v8326_v31 }
 0x139   :  { %v8681_v59 = vpop.permute.xlu1 %481  ;;  %v8683_v18 = vpop.permute.xlu0 %477 }
 0x13a   :  { %13120 = vst [vmem:[#allocation47_spill] sm:$0xff] %v8681_v59  ;;  %v1160_v59 = vmul.f32 %v8509_v49, %v8361_v43 }
 0x13b   :  { %1329 = vperm.xlu1 %7637, %v8078_v14   ;;  %1176 = vrot.lane.b32.xlu0 %v1158_v6, %s12795_s22  ;;  %v1159_v6 = vmul.f32 %v8509_v49, %v8322_v30 }
 0x13d   :  { %v8691_v36 = vpop.permute.xlu1 %485  ;;  %v8693_v44 = vpop.permute.xlu0 %539 }
 0x13e   :  { %13121 = vst [vmem:[#allocation48_spill] sm:$0xff] %v8691_v36  ;;  %13122 = vst [vmem:[#allocation49_spill] sm:$0xff] %v8693_v44  ;;  %v1215_v36 = vmul.f32 %v8537_v62, %v8326_v31 }
 0x13f   :  { %1174 = vrot.lane.b32.xlu1 %v1157_v53, %s12795_s22  ;;  %1180 = vrot.lane.b32.xlu0 %v1160_v59, %s12795_s22 }
 0x140   :  { %7638 = vset.pattern.permute.xlu1 %v13123_v52  ;;  %v1156_v52 = vmul.f32 %v8509_v49, %v8349_v39 }
 0x141   :  { %v8702_v14 = vpop.permute.xlu1 %537  ;;  %v8704_v63 = vpop.permute.xlu0 %543 }
 0x142   :  { %13124 = vst [vmem:[#allocation50_spill] sm:$0xff] %v8704_v63  ;;  %v1217_v63 = vmul.f32 %v8537_v62, %v8322_v30 }
 0x143   :  { %1178 = vrot.lane.b32.xlu1 %v1159_v6, %s12795_s22  ;;  %1232 = vrot.lane.b32.xlu0 %v1215_v36, %s12919_s1  ;;  %v1216_v36 = vmul.f32 %v8537_v62, %v8345_v38 }
 0x145   :  { %v8712_v53 = vpop.permute.xlu1 %541  ;;  %v8714_v59 = vpop.permute.xlu0 %595 }
 0x146   :  { %13125 = vst [vmem:[#allocation51_spill] sm:$0xff] %v8712_v53  ;;  %13126 = vst [vmem:[#allocation52_spill] sm:$0xff] %v8714_v59  ;;  %v1214_v53 = vmul.f32 %v8537_v62, %v8349_v39 }
 0x147   :  { %1172 = vrot.lane.b32.xlu1 %v1156_v52, %s12795_s22  ;;  %1236 = vrot.lane.b32.xlu0 %v1217_v63, %s12919_s1  ;;  %v1218_v52 = vmul.f32 %v8537_v62, %v8361_v43  ;;  %v1274_v63 = vmul.f32 %v8523_v56, %v8345_v38  ;;  %s12899_s22 = smov 28   ;;  %v1276_v38 = vmul.f32 %v8523_v56, %v8361_v43 }
 0x149   :  { %v8722_v44 = vpop.permute.xlu1 %535  ;;  %v8724_v6 = vpop.permute.xlu0 %599 }
 0x14a   :  { %13127 = vst [vmem:[#allocation53_spill] sm:$0xff] %v8724_v6  ;;  %v8743_v6 = vld [vmem:[%s12766_s0 + $0x2] ss:$2 sm:$0xff] }
 0x14b   :  { %1234 = vrot.lane.b32.xlu1 %v1216_v36, %s12919_s1  ;;  %1230 = vrot.lane.b32.xlu0 %v1214_v53, %s12919_s1 }
 0x14d   :  { %v8732_v59 = vpop.permute.xlu1 %597  ;;  %v8734_v24 = vpop.permute.xlu0 %593 }
 0x14e   :  { %13128 = vst [vmem:[#allocation54_spill] sm:$0xff] %v8732_v59  ;;  %13129 = vst [vmem:[#allocation55_spill] sm:$0xff] %v8734_v24  ;;  %v1273_v59 = vmul.f32 %v8523_v56, %v8326_v31  ;;  %v1396_v24 = vrot.slane %v8743_v6, %v8313_v28  ;;  %v1404_v31 = vrot.slane %v8743_v6, %v8310_v27 }
 0x14f   :  { %1238 = vrot.lane.b32.xlu1 %v1218_v52, %s12919_s1  ;;  %1292 = vrot.lane.b32.xlu0 %v1274_v63, %s12899_s22 }
 0x151   :  { %v8747_v53 = vpop.permute.xlu1 %601  ;;  %v8749_v36 = vpop.permute.xlu0 %655 }
 0x152   :  { %13130 = vst [vmem:[#allocation56_spill] sm:$0xff] %v8747_v53  ;;  %13131 = vst [vmem:[#allocation57_spill] sm:$0xff] %v8749_v36  ;;  %v1275_v53 = vmul.f32 %v8523_v56, %v8322_v30  ;;  %v1430_v36 = vmul.f32 %v1396_v24, %v8535_v61  ;;  %v8779_v30 = vrot.slane %v8743_v6, %v8329_v32 }
 0x153   :  { %1290 = vrot.lane.b32.xlu1 %v1273_v59, %s12899_s22  ;;  %1296 = vrot.lane.b32.xlu0 %v1276_v38, %s12899_s22  ;;  %v1272_v38 = vmul.f32 %v8523_v56, %v8349_v39 }
 0x154   :  { %v1431_v39 = vmul.f32 %v8779_v30, %v8535_v61 }
 0x155   :  { %v8759_v52 = vpop.permute.xlu1 %653  ;;  %v8761_v63 = vpop.permute.xlu0 %659 }
 0x156   :  { %13132 = vst [vmem:[#allocation58_spill] sm:$0xff] %v8759_v52  ;;  %13133 = vst [vmem:[#allocation59_spill] sm:$0xff] %v8761_v63  ;;  %v1432_v63 = vmul.f32 %v1404_v31, %v8535_v61  ;;  %v8783_v52 = vrot.slane %v8743_v6, %v8332_v33 }
 0x157   :  { %1294 = vrot.lane.b32.xlu1 %v1275_v53, %s12899_s22  ;;  %1447 = vrot.lane.b32.xlu0 %v1430_v36, %s13080_s25 }
 0x159   :  { %v8770_v43 = vpop.permute.xlu1 %657  ;;  %v8772_v59 = vpop.permute.xlu0 %711 }
 0x15a   :  { %13134 = vst [vmem:[#allocation60_spill] sm:$0xff] %v8770_v43  ;;  %13135 = vst [vmem:[#allocation61_spill] sm:$0xff] %v8772_v59  ;;  %v1429_v43 = vmul.f32 %v8783_v52, %v8535_v61  ;;  %v8797_v59 = vrot.slane %v8743_v6, %v8337_v35 }
 0x15b   :  { %1288 = vrot.lane.b32.xlu1 %v1272_v38, %s12899_s22  ;;  %1451 = vrot.lane.b32.xlu0 %v1432_v63, %s13080_s25 }
 0x15d   :  { %v8787_v53 = vpop.permute.xlu1 %651  ;;  %v8789_v36 = vpop.permute.xlu0 %715 }
 0x15e   :  { %13136 = vst [vmem:[#allocation62_spill] sm:$0xff] %v8787_v53  ;;  %13137 = vst [vmem:[#allocation63_spill] sm:$0xff] %v8789_v36  ;;  %v1433_v36 = vmul.f32 %v8797_v59, %v8535_v61  ;;  %v1488_v53 = vmul.f32 %v8551_v5, %v8779_v30 }
 0x15f   :  { %1449 = vrot.lane.b32.xlu1 %v1431_v39, %s13080_s25  ;;  %1445 = vrot.lane.b32.xlu0 %v1429_v43, %s13080_s25  ;;  %v1487_v43 = vmul.f32 %v8551_v5, %v1396_v24  ;;  %v1490_v39 = vmul.f32 %v8551_v5, %v8797_v59 }
 0x161   :  { %v8801_v38 = vpop.permute.xlu1 %713  ;;  %v8803_v63 = vpop.permute.xlu0 %709 }
 0x162   :  { %13138 = vst [vmem:[#allocation64_spill] sm:$0xff] %v8801_v38  ;;  %13139 = vst [vmem:[#allocation65_spill] sm:$0xff] %v8803_v63 }
 0x163   :  { %1453 = vrot.lane.b32.xlu1 %v1433_v36, %s13080_s25  ;;  %1506 = vrot.lane.b32.xlu0 %v1488_v53, %s13052_s26  ;;  %v1489_v36 = vmul.f32 %v8551_v5, %v1404_v31  ;;  %v1486_v53 = vmul.f32 %v8551_v5, %v8783_v52 }
 0x165   :  { %v8811_v35 = vpop.permute.xlu1 %717  ;;  %v8813_v20 = vpop.permute.xlu0 %771 }
 0x166   :  { %13140 = vst [vmem:[#allocation66_spill] sm:$0xff] %v8811_v35  ;;  %13141 = vst [vmem:[#allocation67_spill] sm:$0xff] %v8813_v20  ;;  %v124_v35 = vld [vmem:[%s12768_s2] sm:$0x3f]  ;;  %s13167_s2 = smov 32  }
 0x167   :  { %1504 = vrot.lane.b32.xlu1 %v1487_v43, %s13052_s26  ;;  %1510 = vrot.lane.b32.xlu0 %v1490_v39, %s13052_s26 }
 0x169   :  { %v8820_v38 = vpop.permute.xlu1 %769  ;;  %v8822_v63 = vpop.permute.xlu0 %775 }
 0x16a   :  { %13142 = vst [vmem:[#allocation68_spill] sm:$0xff] %v8820_v38  ;;  %13143 = vst [vmem:[#allocation69_spill] sm:$0xff] %v8822_v63  ;;  %v1545_v63 = vmul.f32 %v8549_v3, %v8779_v30 }
 0x16b   :  { %1508 = vrot.lane.b32.xlu1 %v1489_v36, %s13052_s26  ;;  %1502 = vrot.lane.b32.xlu0 %v1486_v53, %s13052_s26  ;;  %v1544_v36 = vmul.f32 %v8549_v3, %v1396_v24  ;;  %v1547_v53 = vmul.f32 %v8549_v3, %v8797_v59 }
 0x16d   :  { %v8832_v43 = vpop.permute.xlu1 %773  ;;  %v8834_v39 = vpop.permute.xlu0 %827 }
 0x16e   :  { %13144 = vst [vmem:[#allocation70_spill] sm:$0xff] %v8832_v43  ;;  %13145 = vst [vmem:[#allocation71_spill] sm:$0xff] %v8834_v39 }
 0x16f   :  { %1655 = vperm.xlu1 %7638, %v124_v35   ;;  %1563 = vrot.lane.b32.xlu0 %v1545_v63, %s13054_s27  ;;  %v1546_v35 = vmul.f32 %v8549_v3, %v1404_v31  ;;  %v1601_v63 = vmul.f32 %v8561_v9, %v1396_v24  ;;  %v12819_v24 = vmov 0.0  }
 0x170   :  { %60 = vst [vmem:[#allocation2] sm:$0x3f] %v12819_v24  ;;  %61 = vst [vmem:[#allocation2 + $0x8] sm:$0x3f] %v12819_v24 }
 0x171   :  { %v8839_v20 = vpop.permute.xlu1 %767  ;;  %v8841_v38 = vpop.permute.xlu0 %831  ;;  %62 = vst [vmem:[#allocation2 + $0x10] sm:$0x3f] %v12819_v24  ;;  %63 = vst [vmem:[#allocation2 + $0x18] sm:$0x3f] %v12819_v24 }
 0x172   :  { %13146 = vst [vmem:[#allocation72_spill] sm:$0xff] %v8839_v20  ;;  %13147 = vst [vmem:[#allocation73_spill] sm:$0xff] %v8841_v38  ;;  %v8857_v38 = vsub.s32 6, %v8307_v26 }
 0x173   :  { %1561 = vrot.lane.b32.xlu1 %v1544_v36, %s13054_s27  ;;  %1567 = vrot.lane.b32.xlu0 %v1547_v53, %s13054_s27  ;;  %v8865_v53 = vmul.f32 %v8549_v3, %v8783_v52  ;;  %64 = vst [vmem:[#allocation2 + $0x20] sm:$0x3f] %v12819_v24  ;;  %65 = vst [vmem:[#allocation2 + $0x28] sm:$0x3f] %v12819_v24 }
 0x174   :  { %13149 = vst [vmem:[#allocation75_spill] sm:$0xff] %v8857_v38  ;;  %66 = vst [vmem:[#allocation2 + $0x30] sm:$0x3f] %v12819_v24 }
 0x175   :  { %v8848_v43 = vpop.permute.xlu1 %829  ;;  %v8850_v39 = vpop.permute.xlu0 %825  ;;  %67 = vst [vmem:[#allocation2 + $0x38] sm:$0x3f] %v12819_v24  ;;  %69 = vst [vmem:[#allocation3 + $0x8] sm:$0xff] %v12819_v24 }
 0x176   :  { %13148 = vst [vmem:[#allocation74_spill] sm:$0xff] %v8848_v43  ;;  %v8868_v43 = vmul.f32 %v8561_v9, %v1404_v31  ;;  %71 = vst [vmem:[#allocation3 + $0x18] sm:$0xff] %v12819_v24 }
 0x177   :  { %1565 = vrot.lane.b32.xlu1 %v1546_v35, %s13054_s27  ;;  %1618 = vrot.lane.b32.xlu0 %v1601_v63, %s13056_s28  ;;  %72 = vst [vmem:[#allocation4] sm:$0xff] %v12819_v24  ;;  %74 = vst.msk [vmem:[#allocation4 + $0x8] sm:$0xff] %vm73_vm0, %v12819_v24  ;;  %v1602_v63 = vmul.f32 %v8561_v9, %v8779_v30  ;;  %v1604_v30 = vmul.f32 %v8561_v9, %v8797_v59 }
 0x178   :  { %75 = vst [vmem:[#allocation4 + $0x10] sm:$0xff] %v12819_v24  ;;  %76 = vst.msk [vmem:[#allocation4 + $0x18] sm:$0xff] %vm73_vm0, %v12819_v24 }
 0x179   :  { %v8859_v20 = vpop.permute.xlu1 %833  ;;  %v8861_v36 = vpop.permute.xlu0 %887  ;;  %77 = vst [vmem:[#allocation4 + $0x20] sm:$0xff] %v12819_v24  ;;  %78 = vst.msk [vmem:[#allocation4 + $0x28] sm:$0xff] %vm73_vm0, %v12819_v24 }
 0x17a   :  { %13150 = vst [vmem:[#allocation76_spill] sm:$0xff] %v8859_v20  ;;  %13151 = vst [vmem:[#allocation77_spill] sm:$0xff] %v8861_v36  ;;  %v1600_v20 = vmul.f32 %v8561_v9, %v8783_v52  ;;  %v8969_v36 = vrot.slane %v8318_v29, %v8857_v38 }
 0x17b   :  { %79 = vst [vmem:[#allocation4 + $0x30] sm:$0xff] %v12819_v24  ;;  %80 = vst.msk [vmem:[#allocation4 + $0x38] sm:$0xff] %vm73_vm0, %v12819_v24  ;;  %1559 = vrot.lane.b32.xlu1 %v8865_v53, %s13054_s27  ;;  %1622 = vrot.lane.b32.xlu0 %v8868_v43, %s13056_s28 }
 0x17c   :  { %81 = vst [vmem:[#allocation4 + $0x40] sm:$0xff] %v12819_v24  ;;  %82 = vst.msk [vmem:[#allocation4 + $0x48] sm:$0xff] %vm73_vm0, %v12819_v24  ;;  %v235_v52 = vmul.f32 %v8969_v36, %v8334_v34  ;;  %v293_v59 = vmul.f32 %v8357_v42, %v8969_v36 }
 0x17d   :  { %83 = vst [vmem:[#allocation4 + $0x50] sm:$0xff] %v12819_v24  ;;  %84 = vst.msk [vmem:[#allocation4 + $0x58] sm:$0xff] %vm73_vm0, %v12819_v24  ;;  %v8959_v31 = vpop.permute.xlu1 %885  ;;  %v8961_v35 = vpop.permute.xlu0 %891 }
 0x17e   :  { %85 = vst [vmem:[#allocation4 + $0x60] sm:$0xff] %v12819_v24  ;;  %86 = vst.msk [vmem:[#allocation4 + $0x68] sm:$0xff] %vm73_vm0, %v12819_v24 }
 0x17f   :  { %87 = vst [vmem:[#allocation4 + $0x70] sm:$0xff] %v12819_v24  ;;  %88 = vst.msk [vmem:[#allocation4 + $0x78] sm:$0xff] %vm73_vm0, %v12819_v24  ;;  %1620 = vrot.lane.b32.xlu1 %v1602_v63, %s13056_s28  ;;  %1616 = vrot.lane.b32.xlu0 %v1600_v20, %s13056_s28 }
 0x180   :  { %89 = vst [vmem:[#allocation4 + $0x80] sm:$0xff] %v12819_v24  ;;  %90 = vst.msk [vmem:[#allocation4 + $0x88] sm:$0xff] %vm73_vm0, %v12819_v24 }
 0x181   :  { %91 = vst [vmem:[#allocation4 + $0x90] sm:$0xff] %v12819_v24  ;;  %92 = vst.msk [vmem:[#allocation4 + $0x98] sm:$0xff] %vm73_vm0, %v12819_v24  ;;  %v8976_v43 = vpop.permute.xlu1 %889  ;;  %v8978_v53 = vpop.permute.xlu0 %943 }
 0x182   :  { %93 = vst [vmem:[#allocation4 + $0xa0] sm:$0xff] %v12819_v24  ;;  %94 = vst.msk [vmem:[#allocation4 + $0xa8] sm:$0xff] %vm73_vm0, %v12819_v24 }
 0x183   :  { %95 = vst [vmem:[#allocation4 + $0xb0] sm:$0xff] %v12819_v24  ;;  %96 = vst.msk [vmem:[#allocation4 + $0xb8] sm:$0xff] %vm73_vm0, %v12819_v24  ;;  %1624 = vrot.lane.b32.xlu1 %v1604_v30, %s13056_s28  ;;  %257 = vrot.lane.b32.xlu0 %v235_v52, %s13080_s25  ;;  %v351_v52 = vmul.f32 %v8375_v48, %v8969_v36 }
 0x184   :  { %97 = vst [vmem:[#allocation4 + $0xc0] sm:$0xff] %v12819_v24  ;;  %98 = vst.msk [vmem:[#allocation4 + $0xc8] sm:$0xff] %vm73_vm0, %v12819_v24 }
 0x185   :  { %99 = vst [vmem:[#allocation4 + $0xd0] sm:$0xff] %v12819_v24  ;;  %100 = vst.msk [vmem:[#allocation4 + $0xd8] sm:$0xff] %vm73_vm0, %v12819_v24  ;;  %v8990_v63 = vpop.permute.xlu1 %883  ;;  %v8992_v20 = vpop.permute.xlu0 %947 }
 0x186   :  { %101 = vst [vmem:[#allocation4 + $0xe0] sm:$0xff] %v12819_v24  ;;  %102 = vst.msk [vmem:[#allocation4 + $0xe8] sm:$0xff] %vm73_vm0, %v12819_v24 }
 0x187   :  { %103 = vst [vmem:[#allocation4 + $0xf0] sm:$0xff] %v12819_v24  ;;  %104 = vst.msk [vmem:[#allocation4 + $0xf8] sm:$0xff] %vm73_vm0, %v12819_v24  ;;  %315 = vrot.lane.b32.xlu0 %v293_v59, %s13052_s26  ;;  %v409_v59 = vmul.f32 %v8395_v55, %v8969_v36 }
 0x188   :  { %105 = vst [vmem:[#allocation4 + $0x100] sm:$0xff] %v12819_v24  ;;  %106 = vst.msk [vmem:[#allocation4 + $0x108] sm:$0xff] %vm73_vm0, %v12819_v24 }
 0x189   :  { %107 = vst [vmem:[#allocation4 + $0x110] sm:$0xff] %v12819_v24  ;;  %108 = vst.msk [vmem:[#allocation4 + $0x118] sm:$0xff] %vm73_vm0, %v12819_v24 }
 0x18a   :  { %109 = vst [vmem:[#allocation4 + $0x120] sm:$0xff] %v12819_v24  ;;  %110 = vst.msk [vmem:[#allocation4 + $0x128] sm:$0xff] %vm73_vm0, %v12819_v24 }
 0x18b   :  { %111 = vst [vmem:[#allocation4 + $0x130] sm:$0xff] %v12819_v24  ;;  %112 = vst.msk [vmem:[#allocation4 + $0x138] sm:$0xff] %vm73_vm0, %v12819_v24  ;;  %373 = vrot.lane.b32.xlu0 %v351_v52, %s13054_s27  ;;  %v467_v52 = vmul.f32 %v8409_v60, %v8969_v36 }
 0x18c   :  { %113 = vst [vmem:[#allocation4 + $0x140] sm:$0xff] %v12819_v24  ;;  %114 = vst.msk [vmem:[#allocation4 + $0x148] sm:$0xff] %vm73_vm0, %v12819_v24 }
 0x18d   :  { %115 = vst [vmem:[#allocation4 + $0x150] sm:$0xff] %v12819_v24  ;;  %116 = vst.msk [vmem:[#allocation4 + $0x158] sm:$0xff] %vm73_vm0, %v12819_v24 }
 0x18e   :  { %117 = vst [vmem:[#allocation4 + $0x160] sm:$0xff] %v12819_v24  ;;  %118 = vst.msk [vmem:[#allocation4 + $0x168] sm:$0xff] %vm73_vm0, %v12819_v24 }
 0x18f   :  { %119 = vst [vmem:[#allocation4 + $0x170] sm:$0xff] %v12819_v24  ;;  %120 = vst.msk [vmem:[#allocation4 + $0x178] sm:$0xff] %vm73_vm0, %v12819_v24  ;;  %431 = vrot.lane.b32.xlu0 %v409_v59, %s13056_s28  ;;  %v525_v59 = vmul.f32 %v8429_v4, %v8969_v36 }
 0x190   :  { %121 = vst [vmem:[#allocation4 + $0x180] sm:$0xff] %v12819_v24  ;;  %122 = vst.msk [vmem:[#allocation4 + $0x188] sm:$0xff] %vm73_vm0, %v12819_v24  ;;  %v8972_v24 = vsub.s32 5, %v8307_v26 }
 0x191   :  { %13152 = vst [vmem:[#allocation78_spill] sm:$0xff] %v8961_v35  ;;  %13154 = vst [vmem:[#allocation80_spill] sm:$0xff] %v8976_v43  ;;  %v9002_v43 = vpop.permute.xlu0 %941 }
 0x192   :  { %13153 = vst [vmem:[#allocation79_spill] sm:$0xff] %v8972_v24  ;;  %v8986_v35 = vrot.slane %v8318_v29, %v8972_v24  ;;  %13155 = vst [vmem:[#allocation81_spill] sm:$0xff] %v8992_v20  ;;  %v9000_v29 = vpop.permute.xlu1 %945 }
 0x193   :  { %489 = vrot.lane.b32.xlu0 %v467_v52, %s12962_s29  ;;  %v583_v52 = vmul.f32 %v8437_v7, %v8969_v36 }
 0x194   :  { %v234_v26 = vmul.f32 %v8986_v35, %v8334_v34  ;;  %v292_v30 = vmul.f32 %v8357_v42, %v8986_v35 }
 0x195   :  { %v9012_v20 = vpop.permute.xlu0 %1003 }
 0x196   :  { %255 = vrot.lane.b32.xlu1 %v234_v26, %s13080_s25  ;;  %v9010_v34 = vpop.permute.xlu1 %949  ;;  %v350_v26 = vmul.f32 %v8375_v48, %v8986_v35 }
 0x197   :  { %13156 = vst [vmem:[#allocation82_spill] sm:$0xff] %v9010_v34  ;;  %547 = vrot.lane.b32.xlu0 %v525_v59, %s12960_s30  ;;  %v641_v59 = vmul.f32 %v8445_v10, %v8969_v36 }
 0x199   :  { %v9020_v42 = vpop.permute.xlu0 %1007 }
 0x19a   :  { %313 = vrot.lane.b32.xlu1 %v292_v30, %s13052_s26  ;;  %13157 = vst [vmem:[#allocation83_spill] sm:$0xff] %v9020_v42  ;;  %v408_v30 = vmul.f32 %v8395_v55, %v8986_v35  ;;  %v9026_v34 = vpop.permute.xlu1 %1001 }
 0x19b   :  { %605 = vrot.lane.b32.xlu0 %v583_v52, %s12958_s14  ;;  %v699_v52 = vmul.f32 %v8483_v25, %v8969_v36 }
 0x19d   :  { %v9030_v48 = vpop.permute.xlu0 %1059 }
 0x19e   :  { %371 = vrot.lane.b32.xlu1 %v350_v26, %s13054_s27  ;;  %v466_v26 = vmul.f32 %v8409_v60, %v8986_v35  ;;  %v9038_v55 = vpop.permute.xlu1 %1005 }
 0x19f   :  { %13158 = vst [vmem:[#allocation84_spill] sm:$0xff] %v9038_v55  ;;  %663 = vrot.lane.b32.xlu0 %v641_v59, %s12935_s15  ;;  %v757_v59 = vmul.f32 %v8453_v13, %v8969_v36 }
 0x1a1   :  { %v9040_v42 = vpop.permute.xlu0 %1063 }
 0x1a2   :  { %429 = vrot.lane.b32.xlu1 %v408_v30, %s13056_s28  ;;  %13159 = vst [vmem:[#allocation85_spill] sm:$0xff] %v9040_v42  ;;  %v524_v30 = vmul.f32 %v8429_v4, %v8986_v35  ;;  %v9054_v55 = vpop.permute.xlu1 %999 }
 0x1a3   :  { %721 = vrot.lane.b32.xlu0 %v699_v52, %s12933_s16  ;;  %v815_v52 = vmul.f32 %v8467_v19, %v8969_v36 }
 0x1a5   :  { %v9048_v60 = vpop.permute.xlu0 %1057 }
 0x1a6   :  { %487 = vrot.lane.b32.xlu1 %v466_v26, %s12962_s29  ;;  %v582_v26 = vmul.f32 %v8437_v7, %v8986_v35  ;;  %v9066_v7 = vpop.permute.xlu1 %1061 }
 0x1a7   :  { %779 = vrot.lane.b32.xlu0 %v757_v59, %s12931_s17  ;;  %v873_v59 = vmul.f32 %v8511_v50, %v8969_v36 }
 0x1a9   :  { %v9058_v4 = vpop.permute.xlu0 %1118 }
 0x1aa   :  { %545 = vrot.lane.b32.xlu1 %v524_v30, %s12960_s30  ;;  %13160 = vst [vmem:[#allocation86_spill] sm:$0xff] %v9058_v4  ;;  %v640_v30 = vmul.f32 %v8445_v10, %v8986_v35  ;;  %v9082_v4 = vpop.permute.xlu1 %1065 }
 0x1ab   :  { %837 = vrot.lane.b32.xlu0 %v815_v52, %s12929_s18  ;;  %v931_v52 = vmul.f32 %v8475_v22, %v8969_v36 }
 0x1ad   :  { %v9068_v42 = vpop.permute.xlu0 %1122 }
 0x1ae   :  { %603 = vrot.lane.b32.xlu1 %v582_v26, %s12958_s14  ;;  %13161 = vst [vmem:[#allocation87_spill] sm:$0xff] %v9068_v42  ;;  %v698_v26 = vmul.f32 %v8483_v25, %v8986_v35 }
 0x1af   :  { %895 = vrot.lane.b32.xlu0 %v873_v59, %s12927_s19  ;;  %v989_v59 = vmul.f32 %v8489_v37, %v8969_v36 }
 0x1b1   :  { %v9076_v10 = vpop.permute.xlu0 %1114 }
 0x1b2   :  { %661 = vrot.lane.b32.xlu1 %v640_v30, %s12935_s15  ;;  %v756_v30 = vmul.f32 %v8453_v13, %v8986_v35  ;;  %v9094_v13 = vpop.permute.xlu1 %1116 }
 0x1b3   :  { %953 = vrot.lane.b32.xlu0 %v931_v52, %s12925_s20  ;;  %v1047_v52 = vmul.f32 %v8525_v57, %v8969_v36 }
 0x1b5   :  { %v9086_v25 = vpop.permute.xlu0 %1176 }
 0x1b6   :  { %719 = vrot.lane.b32.xlu1 %v698_v26, %s12933_s16  ;;  %13162 = vst [vmem:[#allocation88_spill] sm:$0xff] %v9086_v25  ;;  %v814_v26 = vmul.f32 %v8467_v19, %v8986_v35  ;;  %v9110_v25 = vpop.permute.xlu1 %1120 }
 0x1b7   :  { %1011 = vrot.lane.b32.xlu0 %v989_v59, %s12923_s21  ;;  %v1104_v59 = vmul.f32 %v8499_v45, %v8969_v36 }
 0x1b9   :  { %v9096_v42 = vpop.permute.xlu0 %1180 }
 0x1ba   :  { %777 = vrot.lane.b32.xlu1 %v756_v30, %s12931_s17  ;;  %13163 = vst [vmem:[#allocation89_spill] sm:$0xff] %v9096_v42  ;;  %v872_v30 = vmul.f32 %v8511_v50, %v8986_v35  ;;  %v9120_v42 = vpop.permute.xlu1 %1329 }
 0x1bb   :  { %13166 = vst [vmem:[#allocation92_spill] sm:$0xff] %v9120_v42  ;;  %1069 = vrot.lane.b32.xlu0 %v1047_v52, %s13167_s2  ;;  %v1103_v52 = vmul.f32 %v8499_v45, %v8986_v35  ;;  %v1220_v45 = vmul.f32 %v8537_v62, %v8969_v36 }
 0x1bd   :  { %v9104_v19 = vpop.permute.xlu0 %1232 }
 0x1be   :  { %835 = vrot.lane.b32.xlu1 %v814_v26, %s12929_s18  ;;  %13164 = vst [vmem:[#allocation90_spill] sm:$0xff] %v9104_v19  ;;  %v930_v26 = vmul.f32 %v8475_v22, %v8986_v35 }
 0x1bf   :  { %1126 = vrot.lane.b32.xlu0 %v1104_v59, %s12921_s23  ;;  %v1161_v59 = vmul.f32 %v8509_v49, %v8986_v35 }
 0x1c1   :  { %v9114_v50 = vpop.permute.xlu0 %1236 }
 0x1c2   :  { %893 = vrot.lane.b32.xlu1 %v872_v30, %s12927_s19  ;;  %13165 = vst [vmem:[#allocation91_spill] sm:$0xff] %v9114_v50  ;;  %v988_v30 = vmul.f32 %v8489_v37, %v8986_v35  ;;  %v9130_v50 = vpop.permute.xlu1 %1174  ;;  %v9135_v37 = vld [vmem:[%s12766_s0] ss:$2 sm:$0xff] }
 0x1c3   :  { %13169 = vst [vmem:[#allocation94_spill] sm:$0xff] %v9135_v37  ;;  %v137_v42 = vrot.slane %v9135_v37, %v8332_v33  ;;  %v145_v19 = vrot.slane %v9135_v37, %v8329_v32 }
 0x1c5   :  { %v9124_v22 = vpop.permute.xlu0 %1230 }
 0x1c6   :  { %951 = vrot.lane.b32.xlu1 %v930_v26, %s12925_s20  ;;  %13168 = vst [vmem:[#allocation93_spill] sm:$0xff] %v9124_v22  ;;  %v1046_v26 = vmul.f32 %v8525_v57, %v8986_v35  ;;  %v1162_v57 = vmul.f32 %v8509_v49, %v8969_v36  ;;  %v9147_v22 = vpop.permute.xlu1 %1178  ;;  %v262_v49 = vsel %vm261_vm1, %v8583_v23, %v8571_v15 }
 0x1c7   :  { %13171 = vst [vmem:[#allocation96_spill] sm:$0xff] %v9147_v22  ;;  %v169_v22 = vmul.f32 %v137_v42, %v8563_v11  ;;  %v1412_v42 = vrot.slane %v8743_v6, %v8972_v24  ;;  %v320_v23 = vsel %vm13050_vm2, %v8621_v0, %v8601_v47  ;;  %v171_v24 = vmul.f32 %v145_v19, %v8563_v11 }
 0x1c8   :  { %1184 = vrot.lane.b32.xlu0 %v1162_v57, %s13172_s3  ;;  %v1416_v57 = vrot.slane %v8743_v6, %v8857_v38  ;;  %v1219_v38 = vmul.f32 %v8537_v62, %v8986_v35  ;;  %v1277_v19 = vmul.f32 %v8523_v56, %v8986_v35  ;;  %v265_v35 = vsel %vm261_vm1, %v8573_v16, %v8591_v40 }
 0x1c9   :  { %v9190_v62 = vmul.f32 %v8551_v5, %v1412_v42 }
 0x1ca   :  { %1009 = vrot.lane.b32.xlu1 %v988_v30, %s12923_s21  ;;  %v9139_v30 = vpop.permute.xlu0 %1292 }
 0x1cb   :  { %13170 = vst [vmem:[#allocation95_spill] sm:$0xff] %v9139_v30  ;;  %v141_v30 = vrot.slane %v9135_v37, %v8313_v28 }
 0x1cc   :  { %1242 = vrot.lane.b32.xlu0 %v1220_v45, %s12919_s1  ;;  %v1492_v45 = vmul.f32 %v8551_v5, %v1416_v57  ;;  %v9220_v5 = vmul.f32 %v8549_v3, %v1412_v42 }
 0x1cd   :  { %v170_v6 = vmul.f32 %v141_v30, %v8563_v11  ;;  %v1549_v30 = vmul.f32 %v8549_v3, %v1416_v57  ;;  %v13182_v3 = vld [vmem:[#allocation46_spill] sm:$0xff] }
 0x1ce   :  { %1067 = vrot.lane.b32.xlu1 %v1046_v26, %s13167_s2  ;;  %v9151_v26 = vpop.permute.xlu0 %1296 }
 0x1cf   :  { %13173 = vst [vmem:[#allocation97_spill] sm:$0xff] %v9151_v26  ;;  %v149_v26 = vrot.slane %v9135_v37, %v8310_v27  ;;  %v276_v27 = vadd.f32 %v262_v49, %v169_v22  ;;  %v1435_v49 = vmul.f32 %v1416_v57, %v8535_v61 }
 0x1d1   :  { %v172_v0 = vmul.f32 %v149_v26, %v8563_v11  ;;  %v334_v22 = vadd.f32 %v320_v23, %v276_v27  ;;  %v436_v27 = vsel %vm12917_vm4, %v8671_v17, %v8651_v46  ;;  %v322_v17 = vsel %vm13050_vm2, %v8593_v41, %v8611_v54 }
 0x1d2   :  { %1124 = vrot.lane.b32.xlu1 %v1103_v52, %s12921_s23  ;;  %v9162_v52 = vpop.permute.xlu1 %1172  ;;  %v9180_v37 = vpop.permute.xlu0 %1447 }
 0x1d3   :  { %13174 = vst [vmem:[#allocation98_spill] sm:$0xff] %v9180_v37  ;;  %v378_v37 = vsel %vm12937_vm3, %v8633_v12, %v8613_v58  ;;  %v263_v12 = vsel %vm261_vm1, %v8571_v15, %v8581_v21  ;;  %v9223_v15 = vmul.f32 %v8561_v9, %v1416_v57 }
 0x1d4   :  { %v392_v23 = vadd.f32 %v378_v37, %v334_v22  ;;  %v494_v37 = vsel %vm12918_vm5, %v8683_v18, %v8663_v2  ;;  %v277_v57 = vadd.f32 %v263_v12, %v170_v6  ;;  %v279_v22 = vadd.f32 %v265_v35, %v172_v0 }
 0x1d5   :  { %v380_v18 = vsel %vm12937_vm3, %v8631_v8, %v8623_v1  ;;  %v552_v6 = vsel %vm12897_vm6, %v8722_v44, %v8702_v14  ;;  %v13178_v44 = vld [vmem:[#allocation52_spill] sm:$0xff] }
 0x1d6   :  { %1182 = vrot.lane.b32.xlu1 %v1161_v59, %s13172_s3  ;;  %v1278_v59 = vmul.f32 %v8523_v56, %v8969_v36  ;;  %v9187_v32 = vpop.permute.xlu1 %1234  ;;  %v1434_v36 = vmul.f32 %v1412_v42, %v8535_v61  ;;  %v9215_v26 = vpop.permute.xlu0 %1451  ;;  %v13184_v61 = vld [vmem:[#allocation62_spill] sm:$0xff]  ;;  %v13188_v56 = vld [vmem:[#allocation65_spill] sm:$0xff] }
 0x1d8   :  { %1300 = vrot.lane.b32.xlu0 %v1278_v59, %s12899_s22 }
 0x1da   :  { %1240 = vrot.lane.b32.xlu1 %v1219_v38, %s12919_s1  ;;  %v264_v38 = vsel %vm261_vm1, %v8581_v21, %v8573_v16  ;;  %v9217_v59 = vpop.permute.xlu1 %1238  ;;  %v9226_v21 = vmul.f32 %v8561_v9, %v1412_v42  ;;  %v321_v16 = vsel %vm13050_vm2, %v8601_v47, %v8593_v41  ;;  %v450_v9 = vadd.f32 %v436_v27, %v392_v23  ;;  %v13179_v23 = vld [vmem:[#allocation55_spill] sm:$0xff] }
 0x1db   :  { %v278_v42 = vadd.f32 %v264_v38, %v171_v24  ;;  %v323_v47 = vsel %vm13050_vm2, %v8611_v54, %v8603_v51  ;;  %v379_v41 = vsel %vm12937_vm3, %v8613_v58, %v8631_v8  ;;  %v9251_v24 = vpop.permute.xlu0 %1445  ;;  %v335_v0 = vadd.f32 %v321_v16, %v277_v57  ;;  %v13176_v58 = vld [vmem:[#allocation43_spill] sm:$0xff]  ;;  %v13177_v8 = vld [vmem:[#allocation45_spill] sm:$0xff]  ;;  %v13180_v57 = vld [vmem:[#allocation44_spill] sm:$0xff] }
 0x1dc   :  { %1457 = vrot.lane.b32.xlu0 %v1435_v49, %s13080_s25  ;;  %v13175_v49 = vld [vmem:[#allocation42_spill] sm:$0xff]  ;;  %v508_v12 = vadd.f32 %v494_v37, %v450_v9  ;;  %v437_v35 = vsel %vm12917_vm4, %v8651_v46, %v13176_v58  ;;  %v438_v27 = vsel %vm12917_vm4, %v13176_v58, %v13177_v8  ;;  %v610_v16 = vsel %vm609_vm7, %v13179_v23, %v13178_v44 }
 0x1dd   :  { %v381_v54 = vsel %vm12937_vm3, %v8623_v1, %v13175_v49  ;;  %v337_v9 = vadd.f32 %v323_v47, %v279_v22  ;;  %v393_v1 = vadd.f32 %v379_v41, %v335_v0  ;;  %v439_v46 = vsel %vm12917_vm4, %v13177_v8, %v13180_v57 }
 0x1de   :  { %1298 = vrot.lane.b32.xlu1 %v1277_v19, %s12899_s22  ;;  %v336_v19 = vadd.f32 %v322_v17, %v278_v42  ;;  %v9256_v38 = vpop.permute.xlu1 %1290  ;;  %v566_v37 = vadd.f32 %v552_v6, %v508_v12  ;;  %v13181_v42 = vld [vmem:[#allocation47_spill] sm:$0xff]  ;;  %s13268_s22 = smov 28  }
 0x1df   :  { %v495_v58 = vsel %vm12918_vm5, %v8663_v2, %v13181_v42  ;;  %v496_v23 = vsel %vm12918_vm5, %v13181_v42, %v13182_v3  ;;  %v9281_v22 = vpop.permute.xlu0 %1506  ;;  %v395_v47 = vadd.f32 %v381_v54, %v337_v9  ;;  %v451_v41 = vadd.f32 %v437_v35, %v393_v1  ;;  %v13186_v12 = vld [vmem:[#allocation51_spill] sm:$0xff]  ;;  %v13187_v42 = vld [vmem:[#allocation61_spill] sm:$0xff]  ;;  %v13189_v9 = vld [vmem:[#allocation48_spill] sm:$0xff] }
 0x1e0   :  { %1514 = vrot.lane.b32.xlu0 %v1492_v45, %s13052_s26  ;;  %v394_v17 = vadd.f32 %v380_v18, %v336_v19  ;;  %v624_v6 = vadd.f32 %v610_v16, %v566_v37  ;;  %v13185_v19 = vld [vmem:[#allocation49_spill] sm:$0xff]  ;;  %v13190_v1 = vld [vmem:[#allocation54_spill] sm:$0xff] }
 0x1e1   :  { %v553_v2 = vsel %vm12897_vm6, %v8702_v14, %v13185_v19  ;;  %v554_v8 = vsel %vm12897_vm6, %v13185_v19, %v13186_v12  ;;  %v453_v54 = vadd.f32 %v439_v46, %v395_v47  ;;  %v509_v35 = vadd.f32 %v495_v58, %v451_v41  ;;  %v13191_v37 = vld [vmem:[#allocation53_spill] sm:$0xff]  ;;  %v13192_v19 = vld [vmem:[#allocation68_spill] sm:$0xff] }
 0x1e2   :  { %1455 = vrot.lane.b32.xlu1 %v1434_v36, %s13080_s25  ;;  %v13183_v36 = vld [vmem:[#allocation58_spill] sm:$0xff]  ;;  %v452_v18 = vadd.f32 %v438_v27, %v394_v17  ;;  %v9283_v0 = vpop.permute.xlu1 %1294  ;;  %v497_v14 = vsel %vm12918_vm5, %v13182_v3, %v13189_v9  ;;  %v611_v17 = vsel %vm609_vm7, %v13178_v44, %v13190_v1  ;;  %v13195_v44 = vld [vmem:[#allocation57_spill] sm:$0xff] }
 0x1e3   :  { %v668_v45 = vsel %vm12898_vm8, %v13184_v61, %v13183_v36  ;;  %v726_v61 = vsel %vm725_vm9, %v13188_v56, %v13187_v42  ;;  %v612_v56 = vsel %vm609_vm7, %v13190_v1, %v13191_v37  ;;  %v9309_v46 = vpop.permute.xlu0 %1510  ;;  %v567_v58 = vadd.f32 %v553_v2, %v509_v35 }
 0x1e4   :  { %1571 = vrot.lane.b32.xlu0 %v1549_v30, %s13054_s27  ;;  %v510_v27 = vadd.f32 %v496_v23, %v452_v18  ;;  %v682_v16 = vadd.f32 %v668_v45, %v624_v6  ;;  %v13194_v23 = vld [vmem:[#allocation50_spill] sm:$0xff]  ;;  %v669_v18 = vsel %vm12898_vm8, %v13183_v36, %v13195_v44  ;;  %v13196_v6 = vld [vmem:[#allocation60_spill] sm:$0xff] }
 0x1e5   :  { %v555_v45 = vsel %vm12897_vm6, %v13186_v12, %v13194_v23  ;;  %v670_v1 = vsel %vm12898_vm8, %v13195_v44, %v13196_v6  ;;  %v511_v12 = vadd.f32 %v497_v14, %v453_v54  ;;  %v13198_v36 = vld [vmem:[#allocation56_spill] sm:$0xff]  ;;  %v13200_v44 = vld [vmem:[#allocation63_spill] sm:$0xff]  ;;  %vm1188_vm6 = vcmask 244736  }
 0x1e6   :  { %1512 = vrot.lane.b32.xlu1 %v9190_v62, %s13052_s26  ;;  %v13193_v62 = vld [vmem:[#allocation72_spill] sm:$0xff]  ;;  %v568_v3 = vadd.f32 %v554_v8, %v510_v27  ;;  %v740_v47 = vadd.f32 %v726_v61, %v682_v16  ;;  %v9314_v41 = vpop.permute.xlu1 %1288  ;;  %v625_v8 = vadd.f32 %v611_v17, %v567_v58  ;;  %v613_v27 = vsel %vm609_vm7, %v13191_v37, %v13198_v36  ;;  %v13201_v58 = vld [vmem:[#allocation59_spill] sm:$0xff] }
 0x1e7   :  { %v784_v30 = vsel %vm783_vm10, %v13193_v62, %v13192_v19  ;;  %v13197_v62 = vld [vmem:[#allocation71_spill] sm:$0xff]  ;;  %v13199_v16 = vld [vmem:[#allocation64_spill] sm:$0xff]  ;;  %v9341_v54 = vpop.permute.xlu0 %1502  ;;  %v569_v14 = vadd.f32 %v555_v45, %v511_v12  ;;  %v958_v45 = vsel %vm12901_vm13, %v9002_v43, %v8978_v53  ;;  %v1016_v43 = vsel %vm1015_vm14, %v9054_v55, %v9026_v34 }
 0x1e8   :  { %v842_v2 = vsel %vm841_vm11, %v8850_v39, %v13197_v62  ;;  %1628 = vrot.lane.b32.xlu0 %v9223_v15, %s13056_s28  ;;  %v626_v61 = vadd.f32 %v612_v56, %v568_v3  ;;  %v798_v35 = vadd.f32 %v784_v30, %v740_v47  ;;  %v727_v39 = vsel %vm725_vm9, %v13187_v42, %v13199_v16  ;;  %v13202_v3 = vld [vmem:[#allocation67_spill] sm:$0xff] }
 0x1e9   :  { %v900_v15 = vsel %vm899_vm12, %v8990_v63, %v8959_v31  ;;  %v683_v17 = vadd.f32 %v669_v18, %v625_v8  ;;  %v671_v42 = vsel %vm12898_vm8, %v13196_v6, %v13201_v58  ;;  %v785_v47 = vsel %vm783_vm10, %v13192_v19, %v13202_v3  ;;  %v13204_v6 = vld [vmem:[#allocation66_spill] sm:$0xff] }
 0x1ea   :  { %1569 = vrot.lane.b32.xlu1 %v9220_v5, %s13054_s27  ;;  %v728_v5 = vsel %vm725_vm9, %v13199_v16, %v13200_v44  ;;  %v684_v56 = vadd.f32 %v670_v1, %v626_v61  ;;  %v856_v30 = vadd.f32 %v842_v2, %v798_v35  ;;  %v9343_v37 = vpop.permute.xlu1 %1449  ;;  %v13203_v16 = vld [vmem:[#allocation70_spill] sm:$0xff]  ;;  %v627_v18 = vadd.f32 %v613_v27, %v569_v14  ;;  %v13206_v35 = vld [vmem:[#allocation73_spill] sm:$0xff] }
 0x1eb   :  { %v786_v63 = vsel %vm783_vm10, %v13202_v3, %v13203_v16  ;;  %v741_v1 = vadd.f32 %v727_v39, %v683_v17  ;;  %v729_v8 = vsel %vm725_vm9, %v13200_v44, %v13204_v6  ;;  %v13205_v19 = vld [vmem:[#allocation74_spill] sm:$0xff]  ;;  %vm1246_vm8 = vcmask 236544   ;;  %v13207_v14 = vld [vmem:[#allocation69_spill] sm:$0xff] }
 0x1ec   :  { %v742_v2 = vadd.f32 %v728_v5, %v684_v56  ;;  %v914_v12 = vadd.f32 %v900_v15, %v856_v30  ;;  %v843_v61 = vsel %vm841_vm11, %v13197_v62, %v13205_v19  ;;  %v844_v3 = vsel %vm841_vm11, %v13205_v19, %v13206_v35  ;;  %v13208_v17 = vld [vmem:[#allocation77_spill] sm:$0xff]  ;;  %v13209_v30 = vld [vmem:[#allocation80_spill] sm:$0xff] }
 0x1ed   :  { %v685_v27 = vadd.f32 %v671_v42, %v627_v18  ;;  %v799_v39 = vadd.f32 %v785_v47, %v741_v1  ;;  %v787_v62 = vsel %vm783_vm10, %v13203_v16, %v13207_v14  ;;  %v901_v56 = vsel %vm899_vm12, %v8959_v31, %v13208_v17  ;;  %v13210_v1 = vld [vmem:[#allocation76_spill] sm:$0xff] }
 0x1ee   :  { %1626 = vrot.lane.b32.xlu1 %v9226_v21, %s13056_s28  ;;  %v9371_v21 = vpop.permute.xlu0 %1563  ;;  %v800_v5 = vadd.f32 %v786_v63, %v742_v2  ;;  %v972_v15 = vadd.f32 %v958_v45, %v914_v12  ;;  %v9373_v44 = vpop.permute.xlu1 %1453  ;;  %v902_v55 = vsel %vm899_vm12, %v13208_v17, %v13209_v30  ;;  %v1073_v42 = vsel %vm73_vm0, %v9048_v60, %v9030_v48  ;;  %v13211_v2 = vld [vmem:[#allocation81_spill] sm:$0xff] }
 0x1ef   :  { %v743_v47 = vadd.f32 %v729_v8, %v685_v27  ;;  %v857_v63 = vadd.f32 %v843_v61, %v799_v39  ;;  %v845_v16 = vsel %vm841_vm11, %v13206_v35, %v13210_v1  ;;  %v959_v31 = vsel %vm12901_vm13, %v8978_v53, %v9000_v29  ;;  %v9404_v35 = vld [vmem:[%s12766_s0 + $0x2] ss:$2 sm:$0xff]  ;;  %v13214_v39 = vld [vmem:[#allocation84_spill] sm:$0xff] }
 0x1f0   :  { %v858_v45 = vadd.f32 %v844_v3, %v800_v5  ;;  %v1030_v18 = vadd.f32 %v1016_v43, %v972_v15  ;;  %v960_v12 = vsel %vm12901_vm13, %v9000_v29, %v13211_v2  ;;  %v1131_v60 = vsel %vm1130_vm15, %v9076_v10, %v9094_v13  ;;  %v13213_v27 = vld [vmem:[#allocation78_spill] sm:$0xff] }
 0x1f1   :  { %v801_v19 = vadd.f32 %v787_v62, %v743_v47  ;;  %v915_v61 = vadd.f32 %v901_v56, %v857_v63  ;;  %v903_v29 = vsel %vm899_vm12, %v13209_v30, %v13213_v27  ;;  %v1017_v10 = vsel %vm1015_vm14, %v9026_v34, %v9012_v20  ;;  %v13216_v47 = vld [vmem:[#allocation85_spill] sm:$0xff] }
 0x1f2   :  { %v9399_v8 = vpop.permute.xlu0 %1567  ;;  %v916_v3 = vadd.f32 %v902_v55, %v858_v45  ;;  %v1087_v43 = vadd.f32 %v1073_v42, %v1030_v18  ;;  %v9406_v53 = vpop.permute.xlu1 %1504  ;;  %v1018_v5 = vsel %vm1015_vm14, %v9012_v20, %v13214_v39  ;;  %v1189_v15 = vsel %vm1188_vm6, %v9162_v52, %v9130_v50  ;;  %v13215_v42 = vld [vmem:[#allocation82_spill] sm:$0xff] }
 0x1f3   :  { %13212 = vst [vmem:[#allocation42_spill] sm:$0xff] %v9399_v8  ;;  %v859_v62 = vadd.f32 %v845_v16, %v801_v19  ;;  %v973_v17 = vadd.f32 %v959_v31, %v915_v61  ;;  %v961_v30 = vsel %vm12901_vm13, %v13211_v2, %v13215_v42  ;;  %v1074_v34 = vsel %vm73_vm0, %v9030_v48, %v9066_v7  ;;  %v13217_v2 = vld [vmem:[#allocation83_spill] sm:$0xff]  ;;  %v13218_v48 = vld [vmem:[#allocation86_spill] sm:$0xff] }
 0x1f4   :  { %v974_v56 = vadd.f32 %v960_v12, %v916_v3  ;;  %v1145_v55 = vadd.f32 %v1131_v60, %v1087_v43  ;;  %v1075_v20 = vsel %vm73_vm0, %v9066_v7, %v13216_v47  ;;  %v1336_v63 = vrot.slane %v9404_v35, %v8332_v33 }
 0x1f5   :  { %v917_v45 = vadd.f32 %v903_v29, %v859_v62  ;;  %v1031_v18 = vadd.f32 %v1017_v10, %v973_v17  ;;  %v1019_v60 = vsel %vm1015_vm14, %v13214_v39, %v13217_v2  ;;  %v1132_v19 = vsel %vm1130_vm15, %v9094_v13, %v13218_v48  ;;  %v13219_v10 = vld [vmem:[#allocation90_spill] sm:$0xff]  ;;  %v13222_v62 = vld [vmem:[#allocation96_spill] sm:$0xff] }
 0x1f6   :  { %v9431_v52 = vpop.permute.xlu0 %1618  ;;  %v1032_v16 = vadd.f32 %v1018_v5, %v974_v56  ;;  %v1203_v31 = vadd.f32 %v1189_v15, %v1145_v55  ;;  %v9433_v12 = vpop.permute.xlu1 %1508  ;;  %v1133_v7 = vsel %vm1130_vm15, %v13218_v48, %v9110_v25  ;;  %vm12964_vm13 = vcmask 228352   ;;  %v13220_v5 = vld [vmem:[#allocation93_spill] sm:$0xff]  ;;  %v13221_v15 = vld [vmem:[#allocation88_spill] sm:$0xff]  ;;  %v13225_v48 = vld [vmem:[#allocation91_spill] sm:$0xff] }
 0x1f7   :  { %v975_v61 = vadd.f32 %v961_v30, %v917_v45  ;;  %v1088_v3 = vadd.f32 %v1074_v34, %v1031_v18  ;;  %v1076_v29 = vsel %vm73_vm0, %v13216_v47, %v9082_v4  ;;  %v1247_v39 = vsel %vm1246_vm8, %v13220_v5, %v13219_v10  ;;  %v13224_v18 = vld [vmem:[#allocation87_spill] sm:$0xff] }
 0x1f8   :  { %v1089_v43 = vadd.f32 %v1075_v20, %v1032_v16  ;;  %v1190_v13 = vsel %vm1188_vm6, %v9130_v50, %v13221_v15  ;;  %v1191_v17 = vsel %vm1188_vm6, %v13221_v15, %v13222_v62  ;;  %v1305_v56 = vsel %vm12964_vm13, %v9314_v41, %v9256_v38 }
 0x1f9   :  { %v1033_v30 = vadd.f32 %v1019_v60, %v975_v61  ;;  %v1146_v34 = vadd.f32 %v1132_v19, %v1088_v3  ;;  %v1261_v20 = vadd.f32 %v1247_v39, %v1203_v31  ;;  %v1134_v50 = vsel %vm1130_vm15, %v9110_v25, %v13224_v18  ;;  %v13226_v3 = vld [vmem:[#allocation89_spill] sm:$0xff]  ;;  %v13227_v25 = vld [vmem:[#allocation95_spill] sm:$0xff] }
 0x1fa   :  { %v9459_v55 = vpop.permute.xlu0 %1622  ;;  %v1147_v47 = vadd.f32 %v1133_v7, %v1089_v43  ;;  %v9461_v45 = vpop.permute.xlu1 %1655  ;;  %v1248_v16 = vsel %vm1246_vm8, %v13219_v10, %v9187_v32  ;;  %v1249_v41 = vsel %vm1246_vm8, %v9187_v32, %v13225_v48  ;;  %v1340_v60 = vrot.slane %v9404_v35, %v8313_v28  ;;  %v13228_v32 = vld [vmem:[#allocation15_spill] sm:$0xff]  ;;  %v13230_v28 = vld [vmem:[#allocation97_spill] sm:$0xff] }
 0x1fb   :  { %13223 = vst [vmem:[#allocation43_spill] sm:$0xff] %v9461_v45  ;;  %v1090_v19 = vadd.f32 %v1076_v29, %v1033_v30  ;;  %v1204_v7 = vadd.f32 %v1190_v13, %v1146_v34  ;;  %v1319_v61 = vadd.f32 %v1305_v56, %v1261_v20  ;;  %v1192_v43 = vsel %vm1188_vm6, %v13222_v62, %v13226_v3  ;;  %v13229_v56 = vld [vmem:[#allocation92_spill] sm:$0xff] }
 0x1fc   :  { %v1205_v31 = vadd.f32 %v1191_v17, %v1147_v47  ;;  %v1306_v5 = vsel %vm12964_vm13, %v9256_v38, %v13227_v25  ;;  %v1307_v10 = vsel %vm12964_vm13, %v13227_v25, %v9283_v0  ;;  %v1344_v39 = vrot.slane %v9404_v35, %v13228_v32 }
 0x1fd   :  { %v1148_v29 = vadd.f32 %v1134_v50, %v1090_v19  ;;  %v1262_v13 = vadd.f32 %v1248_v16, %v1204_v7  ;;  %v1368_v30 = vmul.f32 %v1336_v63, %v13229_v56  ;;  %v1250_v62 = vsel %vm1246_vm8, %v13225_v48, %v9217_v59  ;;  %v13233_v48 = vld [vmem:[#allocation98_spill] sm:$0xff] }
 0x1fe   :  { %v1617_v15 = vpop.permute.xlu0 %1616  ;;  %v1263_v17 = vadd.f32 %v1249_v41, %v1205_v31  ;;  %v1562_v34 = vpop.permute.xlu1 %1561  ;;  %v1308_v25 = vsel %vm12964_vm13, %v9283_v0, %v13230_v28  ;;  %v1369_v16 = vmul.f32 %v1340_v60, %v13229_v56  ;;  %v1370_v63 = vmul.f32 %v1344_v39, %v13229_v56  ;;  %v13232_v41 = vld [vmem:[#allocation13_spill] sm:$0xff] }
 0x1ff   :  { %v1206_v47 = vadd.f32 %v1192_v43, %v1148_v29  ;;  %v1320_v38 = vadd.f32 %v1306_v5, %v1262_v13  ;;  %v1375_v33 = vadd.f32 %v1368_v30, %v1319_v61  ;;  %v1348_v19 = vrot.slane %v9404_v35, %v13232_v41 }
 0x200   :  { %v1321_v20 = vadd.f32 %v1307_v10, %v1263_v17  ;;  %v1461_v31 = vsel %vm261_vm1, %v9251_v24, %v13233_v48  ;;  %v1462_v61 = vsel %vm261_vm1, %v13233_v48, %v9343_v37  ;;  %v1463_v0 = vsel %vm261_vm1, %v9343_v37, %v9215_v26 }
 0x201   :  { %v1264_v50 = vadd.f32 %v1250_v62, %v1206_v47  ;;  %v1518_v60 = vsel %vm13050_vm2, %v9341_v54, %v9406_v53  ;;  %v1376_v5 = vadd.f32 %v1369_v16, %v1320_v38  ;;  %v1475_v39 = vadd.f32 %v1461_v31, %v1375_v33 }
 0x202   :  { %v9492_v32 = vpop.permute.xlu0 %257  ;;  %v1566_v7 = vpop.permute.xlu1 %1565  ;;  %v1377_v10 = vadd.f32 %v1370_v63, %v1321_v20  ;;  %v1519_v24 = vsel %vm13050_vm2, %v9406_v53, %v9281_v22  ;;  %v1520_v29 = vsel %vm13050_vm2, %v9281_v22, %v9433_v12  ;;  %v1371_v30 = vmul.f32 %v1348_v19, %v13229_v56 }
 0x203   :  { %13231 = vst [vmem:[#allocation45_spill] sm:$0xff] %v9492_v32  ;;  %v1322_v43 = vadd.f32 %v1308_v25, %v1264_v50  ;;  %v1476_v17 = vadd.f32 %v1462_v61, %v1376_v5  ;;  %v1532_v62 = vadd.f32 %v1518_v60, %v1475_v39  ;;  %v1464_v33 = vsel %vm261_vm1, %v9215_v26, %v9373_v44 }
 0x204   :  { %v1477_v37 = vadd.f32 %v1463_v0, %v1377_v10  ;;  %v1576_v47 = vsel %vm12937_vm3, %v1562_v34, %v9371_v21  ;;  %v1577_v53 = vsel %vm12937_vm3, %v9371_v21, %v1566_v7  ;;  %v1521_v16 = vsel %vm13050_vm2, %v9433_v12, %v9309_v46 }
 0x205   :  { %v1378_v38 = vadd.f32 %v1371_v30, %v1322_v43  ;;  %v1533_v20 = vadd.f32 %v1519_v24, %v1476_v17  ;;  %v1632_v63 = vsel %vm12917_vm4, %v1617_v15, %v9431_v52 }
 0x206   :  { %v9516_v13 = vpop.permute.xlu0 %315  ;;  %v1560_v54 = vpop.permute.xlu1 %1559  ;;  %v1534_v25 = vadd.f32 %v1520_v29, %v1477_v37 }
 0x207   :  { %v1575_v22 = vsel %vm12937_vm3, %v1560_v54, %v1562_v34  ;;  %v1478_v19 = vadd.f32 %v1464_v33, %v1378_v38  ;;  %v1590_v48 = vadd.f32 %v1576_v47, %v1533_v20  ;;  %v1578_v34 = vsel %vm12937_vm3, %v1566_v7, %v9399_v8  ;;  %v13239_v47 = vld [vmem:[#allocation12_spill] sm:$0xff]  ;;  %v13258_v8 = vld [vmem:[#allocation35_spill] sm:$0xff] }
 0x208   :  { %v1589_v50 = vadd.f32 %v1575_v22, %v1532_v62  ;;  %v1591_v31 = vadd.f32 %v1577_v53, %v1534_v25  ;;  %v9568_v53 = vsub.s32 7, %v13239_v47  ;;  %v8079_v25 = vld [vmem:[%s12766_s0] ss:$2 sm:$0xff] }
 0x209   :  { %v1535_v12 = vadd.f32 %v1521_v16, %v1478_v19 }
 0x20a   :  { %v9532_v26 = vpop.permute.xlu0 %373  ;;  %v1646_v61 = vadd.f32 %v1632_v63, %v1589_v50  ;;  %v1621_v21 = vpop.permute.xlu1 %1620  ;;  %13240 = vst [vmem:[#allocation58_spill] sm:$0xff] %v9568_v53  ;;  %v9578_v50 = vrot.slane %v8079_v25, %v9568_v53  ;;  %v13246_v25 = vld [vmem:[#allocation23_spill] sm:$0xff] }
 0x20b   :  { %v1633_v0 = vsel %vm12917_vm4, %v9431_v52, %v1621_v21  ;;  %v1634_v60 = vsel %vm12917_vm4, %v1621_v21, %v9459_v55  ;;  %v1592_v39 = vadd.f32 %v1578_v34, %v1535_v12  ;;  %v13242_v21 = vld [vmem:[#allocation19_spill] sm:$0xff]  ;;  %v13243_v12 = vld [vmem:[#allocation20_spill] sm:$0xff] }
 0x20c   :  { %v9541_v43 = vadd.f32 %v9461_v45, %v1646_v61  ;;  %v1647_v15 = vadd.f32 %v1633_v0, %v1590_v48  ;;  %v1648_v5 = vadd.f32 %v1634_v60, %v1591_v31  ;;  %v13241_v31 = vld [vmem:[#allocation17_spill] sm:$0xff]  ;;  %v294_v34 = vmul.f32 %v13242_v21, %v9578_v50 }
 0x20d   :  { %v236_v61 = vmul.f32 %v9578_v50, %v13241_v31 }
 0x20e   :  { %13234 = vst [vmem:[#allocation52_spill] sm:$0xff] %v9541_v43  ;;  %v9543_v10 = vpop.permute.xlu0 %431  ;;  %1665 = vst [vmem:[#allocation2] sm:$0x3f] %v9541_v43  ;;  %v9547_v24 = vadd.f32 %v9461_v45, %v1647_v15  ;;  %v9550_v7 = vadd.f32 %v9461_v45, %v1648_v5  ;;  %v9552_v52 = vpop.permute.xlu1 %1624  ;;  %v352_v15 = vmul.f32 %v13243_v12, %v9578_v50  ;;  %v13244_v5 = vld [vmem:[#allocation21_spill] sm:$0xff] }
 0x20f   :  { %13237 = vst [vmem:[#allocation47_spill] sm:$0xff] %v9552_v52  ;;  %v1635_v29 = vsel %vm12917_vm4, %v9459_v55, %v9552_v52  ;;  %v13255_v43 = vld [vmem:[#allocation33_spill] sm:$0xff] }
 0x210   :  { %13235 = vst [vmem:[#allocation55_spill] sm:$0xff] %v9547_v24  ;;  %13236 = vst [vmem:[#allocation44_spill] sm:$0xff] %v9550_v7  ;;  %v1649_v17 = vadd.f32 %v1635_v29, %v1592_v39  ;;  %v410_v39 = vmul.f32 %v13244_v5, %v9578_v50  ;;  %v13250_v5 = vld [vmem:[#allocation26_spill] sm:$0xff] }
 0x211   :  { %1666 = vst [vmem:[#allocation2 + $0x8] sm:$0x3f] %v9547_v24  ;;  %1667 = vst [vmem:[#allocation2 + $0x10] sm:$0x3f] %v9550_v7  ;;  %v758_v12 = vmul.f32 %v13250_v5, %v9578_v50  ;;  %v874_v5 = vmul.f32 %v13255_v43, %v9578_v50 }
 0x212   :  { %v9559_v37 = vpop.permute.xlu0 %489  ;;  %v9562_v30 = vadd.f32 %v9461_v45, %v1649_v17  ;;  %v256_v62 = vpop.permute.xlu1 %255  ;;  %v13256_v45 = vld [vmem:[#allocation28_spill] sm:$0xff] }
 0x213   :  { %v932_v43 = vmul.f32 %v13256_v45, %v9578_v50 }
 0x214   :  { %13238 = vst [vmem:[#allocation46_spill] sm:$0xff] %v9562_v30  ;;  %1668 = vst [vmem:[#allocation2 + $0x18] sm:$0x3f] %v9562_v30  ;;  %v13254_v30 = vld [vmem:[#allocation27_spill] sm:$0xff] }
 0x215   :  { %v1672_v63 = vld [vmem:[#allocation2] sm:$0x3f] }
 0x216   :  { %v9565_v54 = vpop.permute.xlu0 %547  ;;  %v314_v33 = vpop.permute.xlu1 %313 }
 0x218   :  { %v1674_v55 = vld [vmem:[#allocation2 + $0x10] sm:$0x3f]  ;;  %v1673_v22 = vld [vmem:[#allocation2 + $0x8] sm:$0x3f] }
 0x219   :  { %1692 = vrot.lane.b32.xlu0 %v1674_v55, %s13080_s25  ;;  %1690 = vrot.lane.b32.xlu1 %v1673_v22, %s13080_s25  ;;  %v13245_v55 = vld [vmem:[#allocation22_spill] sm:$0xff] }
 0x21a   :  { %v9572_v38 = vpop.permute.xlu0 %605  ;;  %v372_v20 = vpop.permute.xlu1 %371  ;;  %v468_v22 = vmul.f32 %v13245_v55, %v9578_v50 }
 0x21b   :  { %v1675_v16 = vld [vmem:[#allocation2 + $0x18] sm:$0x3f] }
 0x21d   :  { %1694 = vrot.lane.b32.xlu1 %v1675_v16, %s13080_s25  ;;  %1688 = vrot.lane.b32.xlu0 %v1672_v63, %s13080_s25  ;;  %v526_v16 = vmul.f32 %v13246_v25, %v9578_v50 }
 0x21e   :  { %v9582_v19 = vpop.permute.xlu0 %663  ;;  %v430_v48 = vpop.permute.xlu1 %429 }
 0x221   :  { %259 = vrot.lane.b32.xlu1 %v236_v61, %s13080_s25  ;;  %317 = vrot.lane.b32.xlu0 %v294_v34, %s13052_s26  ;;  %v13247_v34 = vld [vmem:[#allocation24_spill] sm:$0xff] }
 0x222   :  { %v9590_v0 = vpop.permute.xlu0 %721  ;;  %v488_v60 = vpop.permute.xlu1 %487 }
 0x225   :  { %375 = vrot.lane.b32.xlu1 %v352_v15, %s13054_s27  ;;  %433 = vrot.lane.b32.xlu0 %v410_v39, %s13056_s28  ;;  %v584_v15 = vmul.f32 %v13247_v34, %v9578_v50  ;;  %v13248_v39 = vld [vmem:[#allocation25_spill] sm:$0xff] }
 0x226   :  { %v9598_v29 = vpop.permute.xlu0 %779  ;;  %v9600_v17 = vpop.permute.xlu1 %545  ;;  %v642_v47 = vmul.f32 %v13248_v39, %v9578_v50  ;;  %v13251_v39 = vld [vmem:[#allocation18_spill] sm:$0xff] }
 0x229   :  { %491 = vrot.lane.b32.xlu1 %v468_v22, %s12962_s29  ;;  %549 = vrot.lane.b32.xlu0 %v526_v16, %s12960_s30  ;;  %v13249_v22 = vld [vmem:[#allocation29_spill] sm:$0xff] }
 0x22a   :  { %v9608_v63 = vpop.permute.xlu0 %837  ;;  %v9610_v61 = vpop.permute.xlu1 %603  ;;  %v700_v16 = vmul.f32 %v13249_v22, %v9578_v50  ;;  %v816_v22 = vmul.f32 %v13254_v30, %v9578_v50 }
 0x22d   :  { %607 = vrot.lane.b32.xlu1 %v584_v15, %s12958_s14  ;;  %665 = vrot.lane.b32.xlu0 %v642_v47, %s12935_s15  ;;  %v13252_v15 = vld [vmem:[#allocation94_spill] sm:$0xff]  ;;  %v13253_v47 = vld [vmem:[#allocation79_spill] sm:$0xff]  ;;  %s12942_s15 = smov 79  }
 0x22e   :  { %v9618_v55 = vpop.permute.xlu0 %895  ;;  %v9620_v25 = vpop.permute.xlu1 %661  ;;  %v153_v21 = vrot.slane %v13252_v15, %v13251_v39  ;;  %v157_v41 = vrot.slane %v13252_v15, %v13253_v47 }
 0x230   :  { %v173_v15 = vmul.f32 %v153_v21, %v8563_v11  ;;  %v174_v24 = vmul.f32 %v157_v41, %v8563_v11  ;;  %v382_v41 = vsel %vm12937_vm3, %v13175_v49, %v372_v20  ;;  %v383_v21 = vsel %vm12937_vm3, %v372_v20, %v9532_v26 }
 0x231   :  { %723 = vrot.lane.b32.xlu1 %v700_v16, %s12933_s16  ;;  %781 = vrot.lane.b32.xlu0 %v758_v12, %s12931_s17  ;;  %v266_v12 = vsel %vm261_vm1, %v8591_v40, %v256_v62  ;;  %v267_v16 = vsel %vm261_vm1, %v256_v62, %v9492_v32  ;;  %v325_v40 = vsel %vm13050_vm2, %v314_v33, %v9516_v13  ;;  %s13299_s17 = smov 92   ;;  %s12944_s16 = smov 78  }
 0x232   :  { %v9628_v34 = vpop.permute.xlu0 %953  ;;  %v9634_v31 = vpop.permute.xlu1 %719  ;;  %v280_v62 = vadd.f32 %v266_v12, %v173_v15  ;;  %v281_v32 = vadd.f32 %v267_v16, %v174_v24  ;;  %v13259_v24 = vld [vmem:[#allocation31_spill] sm:$0xff]  ;;  %v441_v49 = vsel %vm12917_vm4, %v430_v48, %v9543_v10  ;;  %v499_v20 = vsel %vm12918_vm5, %v488_v60, %v9559_v37 }
 0x233   :  { %v1105_v12 = vmul.f32 %v13259_v24, %v9578_v50  ;;  %v8080_v15 = vld [vmem:[%s12766_s0 + $0x2] ss:$2 sm:$0xff] }
 0x235   :  { %839 = vrot.lane.b32.xlu1 %v816_v22, %s12929_s18  ;;  %897 = vrot.lane.b32.xlu0 %v874_v5, %s12927_s19  ;;  %v13257_v22 = vld [vmem:[#allocation30_spill] sm:$0xff]  ;;  %v324_v5 = vsel %vm13050_vm2, %v8603_v51, %v314_v33  ;;  %v1048_v33 = vmul.f32 %v13258_v8, %v9578_v50  ;;  %s12956_s19 = smov 112   ;;  %s12940_s18 = smov 80  }
 0x236   :  { %v9646_v7 = vpop.permute.xlu0 %1011  ;;  %v778_v30 = vpop.permute.xlu1 %777  ;;  %v990_v52 = vmul.f32 %v13257_v22, %v9578_v50  ;;  %v338_v45 = vadd.f32 %v324_v5, %v280_v62  ;;  %v339_v22 = vadd.f32 %v325_v40, %v281_v32  ;;  %v498_v32 = vsel %vm12918_vm5, %v13189_v9, %v488_v60  ;;  %v13261_v62 = vld [vmem:[#allocation37_spill] sm:$0xff] }
 0x238   :  { %v397_v16 = vadd.f32 %v383_v21, %v339_v22  ;;  %v13260_v22 = vld [vmem:[#allocation32_spill] sm:$0xff] }
 0x239   :  { %955 = vrot.lane.b32.xlu1 %v932_v43, %s12925_s20  ;;  %1013 = vrot.lane.b32.xlu0 %v990_v52, %s12923_s21  ;;  %v440_v43 = vsel %vm12917_vm4, %v13180_v57, %v430_v48  ;;  %v396_v52 = vadd.f32 %v382_v41, %v338_v45  ;;  %v1420_v57 = vrot.slane %v8080_v15, %v9568_v53  ;;  %vm13262_vm4 = vcmask 777216   ;;  %s12954_s20 = smov 111   ;;  %s12938_s21 = smov 108  }
 0x23a   :  { %v9664_v11 = vpop.permute.xlu0 %1069  ;;  %v836_v51 = vpop.permute.xlu1 %835  ;;  %v455_v48 = vadd.f32 %v441_v49, %v397_v16  ;;  %v1163_v40 = vmul.f32 %v13260_v22, %v9578_v50  ;;  %v1221_v41 = vmul.f32 %v13261_v62, %v9578_v50  ;;  %v556_v9 = vsel %vm13262_vm4, %v13194_v23, %v9600_v17  ;;  %vm13263_vm5 = vmmov %vm13262_vm4 }
 0x23b   :  { %v454_v5 = vadd.f32 %v440_v43, %v396_v52  ;;  %v557_v60 = vsel %vm13263_vm5, %v9600_v17, %v9565_v54  ;;  %v614_v43 = vsel %vm609_vm7, %v13198_v36, %v9610_v61  ;;  %v615_v23 = vsel %vm609_vm7, %v9610_v61, %v9572_v38  ;;  %v13264_v17 = vld [vmem:[#allocation34_spill] sm:$0xff] }
 0x23c   :  { %vm13266_vm4 = vcmask 760832   ;;  %v731_v61 = vsel %vm725_vm9, %v9634_v31, %v9590_v0 }
 0x23d   :  { %1071 = vrot.lane.b32.xlu1 %v1048_v33, %s13167_s2  ;;  %1128 = vrot.lane.b32.xlu0 %v1105_v12, %s12921_s23  ;;  %v512_v21 = vadd.f32 %v498_v32, %v454_v5  ;;  %v513_v33 = vadd.f32 %v499_v20, %v455_v48  ;;  %v1279_v32 = vmul.f32 %v13264_v17, %v9578_v50  ;;  %v13265_v20 = vld [vmem:[#allocation36_spill] sm:$0xff]  ;;  %vm13267_vm5 = vmmov %vm13266_vm4  ;;  %s13298_s23 = smov 93  }
 0x23e   :  { %v894_v45 = vpop.permute.xlu1 %893  ;;  %v9694_v12 = vpop.permute.xlu0 %1126  ;;  %v1436_v15 = vmul.f32 %v1420_v57, %v13265_v20  ;;  %v672_v5 = vsel %vm13266_vm4, %v13201_v58, %v9620_v25  ;;  %v673_v36 = vsel %vm13267_vm5, %v9620_v25, %v9582_v19  ;;  %v730_v50 = vsel %vm725_vm9, %v13204_v6, %v9634_v31  ;;  %v13269_v25 = vld [vmem:[#allocation39_spill] sm:$0xff] }
 0x23f   :  { %v570_v49 = vadd.f32 %v556_v9, %v512_v21  ;;  %v571_v52 = vadd.f32 %v557_v60, %v513_v33  ;;  %v1493_v21 = vmul.f32 %v13269_v25, %v1420_v57  ;;  %v13270_v33 = vld [vmem:[#allocation38_spill] sm:$0xff]  ;;  %v846_v31 = vsel %vm841_vm11, %v13210_v1, %v836_v51 }
 0x240   :  { %vm13272_vm4 = vcmask 498688  }
 0x241   :  { %1186 = vrot.lane.b32.xlu1 %v1163_v40, %s13172_s3  ;;  %1244 = vrot.lane.b32.xlu0 %v1221_v41, %s12919_s1  ;;  %v628_v48 = vadd.f32 %v614_v43, %v570_v49  ;;  %v629_v40 = vadd.f32 %v615_v23, %v571_v52  ;;  %v1550_v43 = vmul.f32 %v13270_v33, %v1420_v57  ;;  %vm13273_vm5 = vmmov %vm13272_vm4  ;;  %s12952_s1 = smov 110  }
 0x242   :  { %v952_v16 = vpop.permute.xlu1 %951  ;;  %v9721_v9 = vpop.permute.xlu0 %1184  ;;  %v788_v23 = vsel %vm783_vm10, %v13207_v14, %v778_v30  ;;  %v789_v49 = vsel %vm783_vm10, %v778_v30, %v9598_v29  ;;  %v904_v30 = vsel %vm899_vm12, %v13213_v27, %v894_v45  ;;  %v7689_v27 = vld [vmem:[%s12771_s5 + $0x4] ss:$8 sps:$4 sm:$0xff]  }
 0x243   :  { %v686_v41 = vadd.f32 %v672_v5, %v628_v48  ;;  %v687_v58 = vadd.f32 %v673_v36, %v629_v40  ;;  %v13271_v48 = vld [vmem:[#allocation40_spill] sm:$0xff]  ;;  %v905_v40 = vsel %vm899_vm12, %v894_v45, %v9618_v55  ;;  %v962_v1 = vsel %vm13272_vm4, %v13215_v42, %v952_v16  ;;  %v7691_v45 = vld [vmem:[%s12771_s5] ss:$8 sps:$4 sm:$0xff]   ;;  %2464 = vmatprep.subr.bf16.mxu0 %v7689_v27 }
 0x244   :  { %v1607_v14 = vmul.f32 %v13271_v48, %v1420_v57  ;;  %2465 = vmatpush1.bf16.msra.mxu0 %v7691_v45  ;;  %vm13276_vm4 = vcmask 1014784  }
 0x245   :  { %1302 = vrot.lane.b32.xlu1 %v1279_v32, %s13268_s22  ;;  %1459 = vrot.lane.b32.xlu0 %v1436_v15, %s13080_s25  ;;  %v744_v6 = vadd.f32 %v730_v50, %v686_v41  ;;  %v745_v52 = vadd.f32 %v731_v61, %v687_v58  ;;  %v847_v32 = vsel %vm841_vm11, %v836_v51, %v9608_v63 }
 0x246   :  { %v1010_v60 = vpop.permute.xlu1 %1009  ;;  %v9740_v41 = vpop.permute.xlu0 %1242  ;;  %v963_v51 = vsel %vm13273_vm5, %v952_v16, %v9628_v34  ;;  %vm13277_vm5 = vmmov %vm13276_vm4 }
 0x247   :  { %v802_v15 = vadd.f32 %v788_v23, %v744_v6  ;;  %v803_v5 = vadd.f32 %v789_v49, %v745_v52  ;;  %v1020_v42 = vsel %vm1015_vm14, %v13217_v2, %v1010_v60  ;;  %v1021_v16 = vsel %vm1015_vm14, %v1010_v60, %v9646_v7  ;;  %v7695_v60 = vld [vmem:[%s12771_s5 + $0x24] ss:$8 sps:$4 sm:$0xff]  }
 0x249   :  { %1516 = vrot.lane.b32.xlu1 %v1493_v21, %s13052_s26  ;;  %1573 = vrot.lane.b32.xlu0 %v1550_v43, %s13054_s27  ;;  %v860_v50 = vadd.f32 %v846_v31, %v802_v15  ;;  %v861_v61 = vadd.f32 %v847_v32, %v803_v5  ;;  %v7692_v43 = vld [vmem:[%s12771_s5 + $0x14] ss:$8 sps:$4 sm:$0xff]   ;;  %v7694_v31 = vld [vmem:[%s12771_s5 + $0x10] ss:$8 sps:$4 sm:$0xff]  }
 0x24a   :  { %v1068_v36 = vpop.permute.xlu1 %1067  ;;  %v9767_v2 = vpop.permute.xlu0 %1300  ;;  %2466 = vmatprep.subr.bf16.mxu0 %v7692_v43  ;;  %v1352_v43 = vrot.slane %v9404_v35, %v13251_v39 }
 0x24b   :  { %v918_v58 = vadd.f32 %v904_v30, %v860_v50  ;;  %v919_v57 = vadd.f32 %v905_v40, %v861_v61  ;;  %v1077_v6 = vsel %vm73_vm0, %v9082_v4, %v1068_v36  ;;  %v1078_v52 = vsel %vm73_vm0, %v1068_v36, %v9664_v11  ;;  %2467 = vmatpush1.bf16.msra.mxu0 %v7694_v31  ;;  %v7697_v61 = vld [vmem:[%s12771_s5 + $0x20] ss:$8 sps:$4 sm:$0xff]  }
 0x24c   :  { %2468 = vmatprep.subr.bf16.mxu0 %v7695_v60 }
 0x24d   :  { %1630 = vrot.lane.b32.xlu1 %v1607_v14, %s13056_s28  ;;  %v976_v23 = vadd.f32 %v962_v1, %v918_v58  ;;  %v977_v49 = vadd.f32 %v963_v51, %v919_v57 }
 0x24e   :  { %v1125_v21 = vpop.permute.xlu1 %1124 }
 0x24f   :  { %v1034_v32 = vadd.f32 %v1020_v42, %v976_v23  ;;  %v1035_v15 = vadd.f32 %v1021_v16, %v977_v49  ;;  %v1135_v4 = vsel %vm1130_vm15, %v13224_v18, %v1125_v21  ;;  %v1136_v36 = vsel %vm1130_vm15, %v1125_v21, %v9694_v12  ;;  %v7698_v18 = vld [vmem:[%s12771_s5 + $0x34] ss:$8 sps:$4 sm:$0xff]   ;;  %v9790_v21 = vpop.permute.xlu0 %1457  ;;  %2469 = vmatpush1.bf16.msra.mxu0 %v7697_v61  ;;  %v7700_v16 = vld [vmem:[%s12771_s5 + $0x30] ss:$8 sps:$4 sm:$0xff]  }
 0x250   :  { %v1356_v42 = vrot.slane %v9404_v35, %v13253_v47  ;;  %2470 = vmatprep.subr.bf16.mxu0 %v7698_v18 }
 0x251   :  { %v1091_v14 = vadd.f32 %v1077_v6, %v1034_v32  ;;  %v1092_v30 = vadd.f32 %v1078_v52, %v1035_v15  ;;  %v7701_v6 = vld [vmem:[%s12771_s5 + $0x44] ss:$8 sps:$4 sm:$0xff]  }
 0x252   :  { %v1183_v5 = vpop.permute.xlu1 %1182  ;;  %v1373_v60 = vmul.f32 %v1356_v42, %v13229_v56 }
 0x253   :  { %v1193_v40 = vsel %vm1188_vm6, %v13226_v3, %v1183_v5  ;;  %v1194_v50 = vsel %vm1188_vm6, %v1183_v5, %v9721_v9  ;;  %v1149_v1 = vadd.f32 %v1135_v4, %v1091_v14  ;;  %v1150_v51 = vadd.f32 %v1136_v36, %v1092_v30  ;;  %2471 = vmatpush1.bf16.msra.mxu0 %v7700_v16  ;;  %v7703_v4 = vld [vmem:[%s12771_s5 + $0x40] ss:$8 sps:$4 sm:$0xff]   ;;  %v9811_v36 = vpop.permute.xlu0 %1514 }
 0x254   :  { %v1372_v5 = vmul.f32 %v1352_v43, %v13229_v56  ;;  %2472 = vmatprep.subr.bf16.mxu0 %v7701_v6 }
 0x255   :  { %v1207_v27 = vadd.f32 %v1193_v40, %v1149_v1  ;;  %v1208_v45 = vadd.f32 %v1194_v50, %v1150_v51 }
 0x256   :  { %v1241_v58 = vpop.permute.xlu1 %1240 }
 0x257   :  { %v1251_v57 = vsel %vm1246_vm8, %v9217_v59, %v1241_v58  ;;  %v1252_v3 = vsel %vm1246_vm8, %v1241_v58, %v9740_v41  ;;  %2473 = vmatpush1.bf16.msra.mxu0 %v7703_v4  ;;  %v9817_v1 = vpop.permute.xlu0 %1571 }
 0x258   :  { %v1265_v23 = vadd.f32 %v1251_v57, %v1207_v27  ;;  %v1266_v59 = vadd.f32 %v1252_v3, %v1208_v45  ;;  %v13274_v27 = vld [vmem:[#allocation42_spill] sm:$0xff] }
 0x25a   :  { %v1299_v49 = vpop.permute.xlu1 %1298 }
 0x25b   :  { %v1309_v52 = vsel %vm12964_vm13, %v13230_v28, %v1299_v49  ;;  %v1310_v31 = vsel %vm12964_vm13, %v1299_v49, %v9767_v2  ;;  %v9827_v16 = vpop.permute.xlu0 %1628 }
 0x25c   :  { %v1323_v32 = vadd.f32 %v1309_v52, %v1265_v23  ;;  %v1324_v15 = vadd.f32 %v1310_v31, %v1266_v59 }
 0x25e   :  { %v1456_v14 = vpop.permute.xlu1 %1455  ;;  %v1379_v30 = vadd.f32 %v1372_v5, %v1323_v32  ;;  %v1380_v40 = vadd.f32 %v1373_v60, %v1324_v15  ;;  %v7704_v15 = vld [vmem:[%s12771_s5 + $0x54] ss:$8 sps:$4 sm:$0xff]   ;;  %v7706_v5 = vld [vmem:[%s12771_s5 + $0x50] ss:$8 sps:$4 sm:$0xff]  }
 0x25f   :  { %v1465_v50 = vsel %vm261_vm1, %v9373_v44, %v1456_v14  ;;  %v1466_v61 = vsel %vm261_vm1, %v1456_v14, %v9790_v21  ;;  %v13278_v60 = vld [vmem:[#allocation43_spill] sm:$0xff]  ;;  %2474 = vmatprep.subr.bf16.mxu0 %v7704_v15 }
 0x260   :  { %v1479_v18 = vadd.f32 %v1465_v50, %v1379_v30  ;;  %v1480_v57 = vadd.f32 %v1466_v61, %v1380_v40  ;;  %v7707_v30 = vld [vmem:[%s12771_s5 + $0x64] ss:$8 sps:$4 sm:$0xff]   ;;  %2475 = vmatpush1.bf16.msra.mxu0 %v7706_v5  ;;  %v7709_v40 = vld [vmem:[%s12771_s5 + $0x60] ss:$8 sps:$4 sm:$0xff]   ;;  %v7712_v50 = vld [vmem:[%s12771_s5 + $0x70] ss:$8 sps:$4 sm:$0xff]  }
 0x261   :  { %2476 = vmatprep.subr.bf16.mxu0 %v7707_v30  ;;  %v7713_v61 = vld [vmem:[%s12771_s5 + $0x84] ss:$8 sps:$4 sm:$0xff]  }
 0x262   :  { %v1513_v28 = vpop.permute.xlu1 %1512  ;;  %v8081_v30 = vld [vmem:[%s12766_s0] ss:$2 sm:$0xff] }
 0x263   :  { %v1522_v51 = vsel %vm13050_vm2, %v9309_v46, %v1513_v28  ;;  %v1523_v58 = vsel %vm13050_vm2, %v1513_v28, %v9811_v36  ;;  %v13275_v46 = vld [vmem:[#allocation47_spill] sm:$0xff]  ;;  %v7710_v28 = vld [vmem:[%s12771_s5 + $0x74] ss:$8 sps:$4 sm:$0xff]  }
 0x264   :  { %v1536_v43 = vadd.f32 %v1522_v51, %v1479_v18  ;;  %v1537_v42 = vadd.f32 %v1523_v58, %v1480_v57  ;;  %2477 = vmatpush1.bf16.msra.mxu0 %v7709_v40  ;;  %v7715_v18 = vld [vmem:[%s12771_s5 + $0x80] ss:$8 sps:$4 sm:$0xff]   ;;  %v7716_v57 = vld [vmem:[%s12771_s5 + $0x94] ss:$8 sps:$4 sm:$0xff]  }
 0x265   :  { %2478 = vmatprep.subr.bf16.mxu0 %v7710_v28  ;;  %v13280_v40 = vld [vmem:[#allocation75_spill] sm:$0xff] }
 0x266   :  { %v1570_v3 = vpop.permute.xlu1 %1569  ;;  %v161_v28 = vrot.slane %v8081_v30, %v13280_v40 }
 0x267   :  { %v1579_v45 = vsel %vm12937_vm3, %v13274_v27, %v1570_v3  ;;  %v1580_v44 = vsel %vm12937_vm3, %v1570_v3, %v9817_v1  ;;  %v7718_v3 = vld [vmem:[%s12771_s5 + $0x90] ss:$8 sps:$4 sm:$0xff]   ;;  %v7719_v27 = vld [vmem:[%s12771_s5 + $0xa4] ss:$8 sps:$4 sm:$0xff]  }
 0x268   :  { %v1593_v23 = vadd.f32 %v1579_v45, %v1536_v43  ;;  %v1594_v59 = vadd.f32 %v1580_v44, %v1537_v42  ;;  %2479 = vmatpush1.bf16.msra.mxu0 %v7712_v50  ;;  %v7721_v45 = vld [vmem:[%s12771_s5 + $0xa0] ss:$8 sps:$4 sm:$0xff]   ;;  %v7722_v44 = vld [vmem:[%s12771_s5 + $0xb4] ss:$8 sps:$4 sm:$0xff]   ;;  %v7724_v43 = vld [vmem:[%s12771_s5 + $0xb0] ss:$8 sps:$4 sm:$0xff]  }
 0x269   :  { %2480 = vmatprep.subr.bf16.mxu0 %v7713_v61  ;;  %v7725_v42 = vld [vmem:[%s12771_s5 + $0xc4] ss:$8 sps:$4 sm:$0xff]  }
 0x26a   :  { %v1627_v49 = vpop.permute.xlu1 %1626 }
 0x26b   :  { %v1636_v6 = vsel %vm13276_vm4, %v13275_v46, %v1627_v49  ;;  %v1637_v52 = vsel %vm13277_vm5, %v1627_v49, %v9827_v16  ;;  %vm13285_vm5 = vcmask 785408  }
 0x26c   :  { %v1650_v31 = vadd.f32 %v1636_v6, %v1593_v23  ;;  %v1651_v32 = vadd.f32 %v1637_v52, %v1594_v59  ;;  %2481 = vmatpush1.bf16.msra.mxu0 %v7715_v18  ;;  %v7727_v23 = vld [vmem:[%s12771_s5 + $0xc0] ss:$8 sps:$4 sm:$0xff]   ;;  %v7728_v59 = vld [vmem:[%s12771_s5 + $0xd4] ss:$8 sps:$4 sm:$0xff]   ;;  %v7730_v52 = vld [vmem:[%s12771_s5 + $0xd0] ss:$8 sps:$4 sm:$0xff]  }
 0x26d   :  { %2482 = vmatprep.subr.bf16.mxu0 %v7716_v57  ;;  %v13281_v18 = vld [vmem:[#allocation44_spill] sm:$0xff] }
 0x26e   :  { %v9840_v4 = vadd.f32 %v13278_v60, %v1650_v31  ;;  %v9843_v14 = vadd.f32 %v13278_v60, %v1651_v32  ;;  %v13279_v31 = vld [vmem:[#allocation55_spill] sm:$0xff] }
 0x270   :  { %1669 = vst [vmem:[#allocation2 + $0x20] sm:$0x3f] %v9840_v4  ;;  %1670 = vst [vmem:[#allocation2 + $0x28] sm:$0x3f] %v9843_v14  ;;  %2483 = vmatpush1.bf16.msra.mxu0 %v7718_v3  ;;  %v13282_v3 = vld [vmem:[#allocation52_spill] sm:$0xff] }
 0x271   :  { %2484 = vmatprep.subr.bf16.mxu0 %v7719_v27 }
 0x274   :  { %2485 = vmatpush1.bf16.msra.mxu0 %v7721_v45  ;;  %v7734_v45 = vld [vmem:[%s12771_s5 + $0xf4] ss:$8 sps:$4 sm:$0xff]  }
 0x275   :  { %2486 = vmatprep.subr.bf16.mxu0 %v7722_v44  ;;  %v13283_v44 = vld [vmem:[#allocation41_spill] sm:$0xff] }
 0x277   :  { %v1677_v51 = vld [vmem:[#allocation2 + $0x28] sm:$0x3f]  ;;  %v1676_v58 = vld [vmem:[#allocation2 + $0x20] sm:$0x3f] }
 0x278   :  { %1698 = vrot.lane.b32.xlu1 %v1677_v51, %s13080_s25  ;;  %1696 = vrot.lane.b32.xlu0 %v1676_v58, %s13080_s25  ;;  %v7731_v51 = vld [vmem:[%s12771_s5 + $0xe4] ss:$8 sps:$4 sm:$0xff]   ;;  %v7733_v58 = vld [vmem:[%s12771_s5 + $0xe0] ss:$8 sps:$4 sm:$0xff]  }
 0x279   :  { %2487 = vmatpush1.bf16.msra.mxu0 %v7724_v43  ;;  %v175_v43 = vmul.f32 %v161_v28, %v13283_v44 }
 0x27a   :  { %2488 = vmatprep.subr.bf16.mxu0 %v7725_v42 }
 0x27d   :  { %2489 = vmatpush1.bf16.msra.mxu0 %v7727_v23 }
 0x27e   :  { %2490 = vmatprep.subr.bf16.mxu0 %v7728_v59  ;;  %v13284_v59 = vld [vmem:[#allocation45_spill] sm:$0xff] }
 0x281   :  { %2491 = vmatpush1.bf16.msra.mxu0 %v7730_v52 }
 0x282   :  { %2492 = vmatprep.subr.bf16.mxu0 %v7731_v51 }
 0x285   :  { %2493 = vmatpush1.bf16.msra.mxu0 %v7733_v58 }
 0x286   :  { %2494 = vmatprep.subr.bf16.mxu0 %v7734_v45 }
 0x28b   :  { %v1693_v49 = vpop.permute.xlu0 %1692  ;;  %v1691_v46 = vpop.permute.xlu1 %1690 }
 0x28c   :  { %v1705_v6 = vsel %vm261_vm1, %v1691_v46, %v1693_v49 }
 0x28d   :  { %v9899_v32 = vmax.f32 %v13279_v31, %v1705_v6 }
 0x28f   :  { %1726 = vst [vmem:[#allocation2 + $0x8] sm:$0x3f] %v9899_v32  ;;  %v9902_v15 = vpop.permute.xlu1 %1694  ;;  %v1689_v5 = vpop.permute.xlu0 %1688 }
 0x290   :  { %v1706_v50 = vsel %vm261_vm1, %v1693_v49, %v9902_v15  ;;  %v1704_v61 = vsel %vm261_vm1, %v1689_v5, %v1691_v46  ;;  %v7736_v46 = vld [vmem:[%s12771_s5 + $0xf0] ss:$8 sps:$4 sm:$0xff]  }
 0x291   :  { %v9918_v57 = vmax.f32 %v13281_v18, %v1706_v50  ;;  %v9921_v27 = vmax.f32 %v13282_v3, %v1704_v61  ;;  %2495 = vmatpush1.bf16.msra.mxu0 %v7736_v46  ;;  %v7739_v50 = vld [vmem:[%s12771_s5 + $0x104] ss:$8 sps:$4 sm:$0xff]  }
 0x292   :  { %2505 = vmatprep.subr.bf16.mxu0 %v7739_v50 }
 0x293   :  { %1727 = vst [vmem:[#allocation2 + $0x10] sm:$0x3f] %v9918_v57  ;;  %1725 = vst [vmem:[#allocation2] sm:$0x3f] %v9921_v27  ;;  %v260_v42 = vpop.permute.xlu1 %259  ;;  %v318_v23 = vpop.permute.xlu0 %317 }
 0x294   :  { %v268_v49 = vsel %vm261_vm1, %v13284_v59, %v260_v42  ;;  %v326_v52 = vsel %vm13050_vm2, %v9516_v13, %v318_v23  ;;  %v1679_v23 = vld [vmem:[#allocation2 + $0x38] sm:$0x3f] }
 0x295   :  { %v282_v6 = vadd.f32 %v268_v49, %v175_v43 }
 0x296   :  { %v1733_v18 = vld [vmem:[#allocation2 + $0x8] sm:$0x3f] }
 0x297   :  { %v340_v31 = vadd.f32 %v326_v52, %v282_v6  ;;  %v376_v5 = vpop.permute.xlu1 %375  ;;  %v434_v30 = vpop.permute.xlu0 %433 }
 0x298   :  { %v384_v28 = vsel %vm12937_vm3, %v9532_v26, %v376_v5  ;;  %v442_v51 = vsel %vm13276_vm4, %v9543_v10, %v434_v30  ;;  %vm13286_vm3 = vcmask 777216   ;;  %vm13287_vm4 = vcmask 760832  }
 0x299   :  { %v398_v61 = vadd.f32 %v384_v28, %v340_v31 }
 0x29a   :  { %v1732_v58 = vld [vmem:[#allocation2] sm:$0x3f]  ;;  %v1734_v3 = vld [vmem:[#allocation2 + $0x10] sm:$0x3f] }
 0x29b   :  { %v456_v13 = vadd.f32 %v442_v51, %v398_v61  ;;  %v492_v45 = vpop.permute.xlu1 %491  ;;  %1748 = vrot.lane.b32.xlu1 %v1732_v58, %s12962_s29  ;;  %v550_v43 = vpop.permute.xlu0 %549  ;;  %v7639_v42 = vpack.i.bf16 %v1734_v3, %v1733_v18 }
 0x29c   :  { %v500_v26 = vsel %vm13285_vm5, %v9559_v37, %v492_v45  ;;  %v558_v10 = vsel %vm13286_vm3, %v9565_v54, %v550_v43  ;;  %vm13288_vm3 = vcmask 498688   ;;  %vm13289_vm5 = vcmask 1022976  }
 0x29d   :  { %v514_v59 = vadd.f32 %v500_v26, %v456_v13  ;;  %7640 = vrot.lane.b32.xlu0 %v7639_v42, %s12962_s29 }
 0x29f   :  { %v572_v49 = vadd.f32 %v558_v10, %v514_v59  ;;  %v608_v46 = vpop.permute.xlu1 %607  ;;  %v666_v6 = vpop.permute.xlu0 %665  ;;  %1702 = vrot.lane.b32.xlu1 %v1679_v23, %s13080_s25 }
 0x2a0   :  { %v616_v52 = vsel %vm609_vm7, %v9572_v38, %v608_v46  ;;  %v674_v5 = vsel %vm13287_vm4, %v9582_v19, %v666_v6  ;;  %vm13290_vm4 = vcmask 1014784  }
 0x2a1   :  { %v630_v31 = vadd.f32 %v616_v52, %v572_v49 }
 0x2a3   :  { %v688_v37 = vadd.f32 %v674_v5, %v630_v31  ;;  %v724_v30 = vpop.permute.xlu1 %723  ;;  %v782_v28 = vpop.permute.xlu0 %781 }
 0x2a4   :  { %v732_v50 = vsel %vm725_vm9, %v9590_v0, %v724_v30  ;;  %v790_v54 = vsel %vm783_vm10, %v9598_v29, %v782_v28 }
 0x2a5   :  { %v746_v61 = vadd.f32 %v732_v50, %v688_v37 }
 0x2a7   :  { %v804_v51 = vadd.f32 %v790_v54, %v746_v61  ;;  %v840_v58 = vpop.permute.xlu1 %839  ;;  %v898_v18 = vpop.permute.xlu0 %897 }
 0x2a8   :  { %v848_v38 = vsel %vm841_vm11, %v9608_v63, %v840_v58  ;;  %v906_v19 = vsel %vm899_vm12, %v9618_v55, %v898_v18 }
 0x2a9   :  { %v862_v3 = vadd.f32 %v848_v38, %v804_v51 }
 0x2ab   :  { %v920_v13 = vadd.f32 %v906_v19, %v862_v3  ;;  %v956_v45 = vpop.permute.xlu1 %955  ;;  %v1014_v43 = vpop.permute.xlu0 %1013 }
 0x2ac   :  { %v964_v0 = vsel %vm13288_vm3, %v9628_v34, %v956_v45  ;;  %v1022_v29 = vsel %vm1015_vm14, %v9646_v7, %v1014_v43  ;;  %v1360_v7 = vrot.slane %v9404_v35, %v13280_v40  ;;  %v13291_v43 = vld [vmem:[#allocation46_spill] sm:$0xff]  ;;  %vm13292_vm3 = vcmask 785408  }
 0x2ad   :  { %v978_v42 = vadd.f32 %v964_v0, %v920_v13 }
 0x2ae   :  { %v1374_v28 = vmul.f32 %v1360_v7, %v13229_v56  ;;  %v7742_v7 = vld [vmem:[%s12771_s5 + $0x114] ss:$8 sps:$4 sm:$0xff]  }
 0x2af   :  { %v1036_v26 = vadd.f32 %v1022_v29, %v978_v42  ;;  %v1072_v23 = vpop.permute.xlu1 %1071  ;;  %v1129_v59 = vpop.permute.xlu0 %1128 }
 0x2b0   :  { %v1079_v63 = vsel %vm73_vm0, %v9664_v11, %v1072_v23  ;;  %v1137_v55 = vsel %vm1130_vm15, %v9694_v12, %v1129_v59  ;;  %v1739_v23 = vld [vmem:[#allocation2 + $0x38] sm:$0x3f] }
 0x2b1   :  { %v1093_v10 = vadd.f32 %v1079_v63, %v1036_v26 }
 0x2b3   :  { %v1151_v49 = vadd.f32 %v1137_v55, %v1093_v10  ;;  %v1187_v46 = vpop.permute.xlu1 %1186  ;;  %v1245_v6 = vpop.permute.xlu0 %1244 }
 0x2b4   :  { %v1195_v34 = vsel %vm1188_vm6, %v9721_v9, %v1187_v46  ;;  %v1253_v31 = vsel %vm1246_vm8, %v9740_v41, %v1245_v6 }
 0x2b5   :  { %v1209_v52 = vadd.f32 %v1195_v34, %v1151_v49 }
 0x2b7   :  { %v1267_v5 = vadd.f32 %v1253_v31, %v1209_v52  ;;  %v1303_v37 = vpop.permute.xlu1 %1302  ;;  %v1460_v11 = vpop.permute.xlu0 %1459  ;;  %v7737_v52 = vld [vmem:[%s12771_s5 + $0x100] ss:$8 sps:$4 sm:$0xff]   ;;  %v7740_v31 = vld [vmem:[%s12771_s5 + $0x110] ss:$8 sps:$4 sm:$0xff]  }
 0x2b8   :  { %v1311_v30 = vsel %vm12964_vm13, %v9767_v2, %v1303_v37  ;;  %v1467_v9 = vsel %vm261_vm1, %v9790_v21, %v1460_v11  ;;  %v7746_v37 = vld [vmem:[%s12771_s5 + $0x130] ss:$8 sps:$4 sm:$0xff]   ;;  %v7751_v11 = vld [vmem:[%s12771_s5 + $0x144] ss:$8 sps:$4 sm:$0xff]   ;;  %vm12965_vm13 = vcmask 916480  }
 0x2b9   :  { %v1325_v12 = vadd.f32 %v1311_v30, %v1267_v5  ;;  %v7748_v5 = vld [vmem:[%s12771_s5 + $0x134] ss:$8 sps:$4 sm:$0xff]   ;;  %v7749_v30 = vld [vmem:[%s12771_s5 + $0x140] ss:$8 sps:$4 sm:$0xff]  }
 0x2bb   :  { %v1381_v50 = vadd.f32 %v1374_v28, %v1325_v12  ;;  %v1517_v61 = vpop.permute.xlu1 %1516  ;;  %v1574_v51 = vpop.permute.xlu0 %1573  ;;  %v7754_v12 = vld [vmem:[%s12771_s5 + $0x154] ss:$8 sps:$4 sm:$0xff]   ;;  %v7752_v28 = vld [vmem:[%s12771_s5 + $0x150] ss:$8 sps:$4 sm:$0xff]  }
 0x2bc   :  { %v1524_v35 = vsel %vm13050_vm2, %v9811_v36, %v1517_v61  ;;  %v1581_v18 = vsel %vm13289_vm5, %v9817_v1, %v1574_v51  ;;  %vm13293_vm5 = vmmov %vm13292_vm3  ;;  %v7755_v61 = vld [vmem:[%s12771_s5 + $0x160] ss:$8 sps:$4 sm:$0xff]   ;;  %v7763_v51 = vld [vmem:[%s12771_s5 + $0x184] ss:$8 sps:$4 sm:$0xff]  }
 0x2bd   :  { %v1481_v54 = vadd.f32 %v1467_v9, %v1381_v50  ;;  %v7757_v50 = vld [vmem:[%s12771_s5 + $0x164] ss:$8 sps:$4 sm:$0xff]   ;;  %v7760_v9 = vld [vmem:[%s12771_s5 + $0x174] ss:$8 sps:$4 sm:$0xff]  }
 0x2bf   :  { %v1538_v41 = vadd.f32 %v1524_v35, %v1481_v54  ;;  %v1631_v58 = vpop.permute.xlu1 %1630  ;;  %v7758_v54 = vld [vmem:[%s12771_s5 + $0x170] ss:$8 sps:$4 sm:$0xff]   ;;  %v7761_v35 = vld [vmem:[%s12771_s5 + $0x180] ss:$8 sps:$4 sm:$0xff]  }
 0x2c0   :  { %v1638_v2 = vsel %vm13290_vm4, %v9827_v16, %v1631_v58  ;;  %v7764_v58 = vld [vmem:[%s12771_s5 + $0x190] ss:$8 sps:$4 sm:$0xff]   ;;  %vm13294_vm4 = vmmov %vm13292_vm3 }
 0x2c1   :  { %v1595_v38 = vadd.f32 %v1581_v18, %v1538_v41  ;;  %v7766_v41 = vld [vmem:[%s12771_s5 + $0x194] ss:$8 sps:$4 sm:$0xff]   ;;  %v7769_v18 = vld [vmem:[%s12771_s5 + $0x1a4] ss:$8 sps:$4 sm:$0xff]  }
 0x2c3   :  { %v1652_v3 = vadd.f32 %v1638_v2, %v1595_v38  ;;  %v7767_v38 = vld [vmem:[%s12771_s5 + $0x1a0] ss:$8 sps:$4 sm:$0xff]   ;;  %v7772_v2 = vld [vmem:[%s12771_s5 + $0x1b4] ss:$8 sps:$4 sm:$0xff]  }
 0x2c5   :  { %v9988_v19 = vadd.f32 %v13278_v60, %v1652_v3 }
 0x2c7   :  { %1671 = vst [vmem:[#allocation2 + $0x30] sm:$0x3f] %v9988_v19 }
 0x2ce   :  { %v1678_v21 = vld [vmem:[#allocation2 + $0x30] sm:$0x3f] }
 0x2cf   :  { %1700 = vrot.lane.b32.xlu0 %v1678_v21, %s13080_s25 }
 0x2ea   :  { %v9992_v13 = vpop.permute.xlu1 %1698  ;;  %v1697_v36 = vpop.permute.xlu0 %1696 }
 0x2eb   :  { %v1707_v45 = vsel %vm261_vm1, %v9902_v15, %v1697_v36  ;;  %v1708_v1 = vsel %vm261_vm1, %v1697_v36, %v9992_v13  ;;  %v7770_v36 = vld [vmem:[%s12771_s5 + $0x1b0] ss:$8 sps:$4 sm:$0xff]  }
 0x2ec   :  { %v9999_v16 = vmax.f32 %v13291_v43, %v1707_v45  ;;  %v10002_v0 = vmax.f32 %v9840_v4, %v1708_v1  ;;  %v7775_v43 = vld [vmem:[%s12771_s5 + $0x1c4] ss:$8 sps:$4 sm:$0xff]  }
 0x2ee   :  { %1728 = vst [vmem:[#allocation2 + $0x18] sm:$0x3f] %v9999_v16  ;;  %1729 = vst [vmem:[#allocation2 + $0x20] sm:$0x3f] %v10002_v0 }
 0x2f5   :  { %v1735_v42 = vld [vmem:[#allocation2 + $0x18] sm:$0x3f]  ;;  %v1736_v29 = vld [vmem:[#allocation2 + $0x20] sm:$0x3f] }
 0x2f6   :  { %v7644_v26 = vpack.i.bf16 %v1736_v29, %v1735_v42 }
 0x2f8   :  { %7645 = vrot.lane.b32.xlu0 %v7644_v26, %s12962_s29  ;;  %v7778_v26 = vld [vmem:[%s12771_s5 + $0x1d4] ss:$8 sps:$4 sm:$0xff]  }
 0x2fc   :  { %1762 = vrot.lane.b32.xlu0 %v1739_v23, %s12962_s29 }
 0x30d   :  { %v1749_v4 = vpop.permute.xlu1 %1748 }
 0x30f   :  { %v10008_v15 = vpop.permute.xlu0 %7640 }
 0x310   :  { %v7643_v59 = vunpack.i.h.bf16 %v10008_v15  ;;  %v7642_v63 = vunpack.i.l.bf16 %v10008_v15  ;;  %v7790_v15 = vld [vmem:[%s12771_s5 + $0x214] ss:$8 sps:$4 sm:$0xff]  }
 0x311   :  { %v1703_v3 = vpop.permute.xlu1 %1702 }
 0x312   :  { %v1765_v10 = vsel %vm13292_vm3, %v7642_v63, %v7643_v59  ;;  %v1764_v55 = vsel %vm13293_vm5, %v1749_v4, %v7642_v63  ;;  %vm13295_vm5 = vmmov %vm13292_vm3 }
 0x313   :  { %v1779_v49 = vmax.f32 %v9899_v32, %v1765_v10  ;;  %v1778_v46 = vmax.f32 %v9921_v27, %v1764_v55  ;;  %v7745_v32 = vld [vmem:[%s12771_s5 + $0x124] ss:$8 sps:$4 sm:$0xff]   ;;  %v7743_v27 = vld [vmem:[%s12771_s5 + $0x120] ss:$8 sps:$4 sm:$0xff]   ;;  %v7784_v55 = vld [vmem:[%s12771_s5 + $0x1f4] ss:$8 sps:$4 sm:$0xff]  }
 0x314   :  { %v7779_v10 = vld [vmem:[%s12771_s5 + $0x1e0] ss:$8 sps:$4 sm:$0xff]  }
 0x315   :  { %v1786_v6 = vpack.c.bf16 %v1779_v49, %v1779_v49  ;;  %v1785_v34 = vpack.c.bf16 %v1778_v46, %v1778_v46  ;;  %v7782_v49 = vld [vmem:[%s12771_s5 + $0x1f0] ss:$8 sps:$4 sm:$0xff]   ;;  %v7787_v46 = vld [vmem:[%s12771_s5 + $0x204] ss:$8 sps:$4 sm:$0xff]  }
 0x317   :  { %2496 = vmatprep.mubr.bf16.mxu0 %v1786_v6 }
 0x318   :  { %2497 = vmatmul.mubr.bf16.vlgmr.msra.gmra.mrb[0].mxu0 %v1785_v34 }
 0x319   :  { %2506 = vmatpush1.bf16.msra.mxu0 %v7737_v52 }
 0x31a   :  { %2507 = vmatprep.subr.bf16.mxu0 %v7742_v7 }
 0x31d   :  { %2508 = vmatpush1.bf16.msra.mxu0 %v7740_v31 }
 0x31e   :  { %2509 = vmatprep.subr.bf16.mxu0 %v7745_v32 }
 0x321   :  { %2510 = vmatpush1.bf16.msra.mxu0 %v7743_v27 }
 0x322   :  { %2511 = vmatprep.subr.bf16.mxu0 %v7748_v5 }
 0x325   :  { %2512 = vmatpush1.bf16.msra.mxu0 %v7746_v37 }
 0x326   :  { %2513 = vmatprep.subr.bf16.mxu0 %v7751_v11  ;;  %v7785_v11 = vld [vmem:[%s12771_s5 + $0x200] ss:$8 sps:$4 sm:$0xff]  }
 0x329   :  { %2514 = vmatpush1.bf16.msra.mxu0 %v7749_v30  ;;  %v7796_v30 = vld [vmem:[%s12771_s5 + $0x234] ss:$8 sps:$4 sm:$0xff]  }
 0x32a   :  { %2515 = vmatprep.subr.bf16.mxu0 %v7754_v12  ;;  %v7794_v12 = vld [vmem:[%s12771_s5 + $0x230] ss:$8 sps:$4 sm:$0xff]  }
 0x32d   :  { %2516 = vmatpush1.bf16.msra.mxu0 %v7752_v28  ;;  %v7799_v28 = vld [vmem:[%s12771_s5 + $0x244] ss:$8 sps:$4 sm:$0xff]  }
 0x32e   :  { %2517 = vmatprep.subr.bf16.mxu0 %v7757_v50  ;;  %v7797_v50 = vld [vmem:[%s12771_s5 + $0x240] ss:$8 sps:$4 sm:$0xff]  }
 0x331   :  { %2518 = vmatpush1.bf16.msra.mxu0 %v7755_v61  ;;  %v7802_v61 = vld [vmem:[%s12771_s5 + $0x254] ss:$8 sps:$4 sm:$0xff]  }
 0x332   :  { %2519 = vmatprep.subr.bf16.mxu0 %v7760_v9  ;;  %v7800_v9 = vld [vmem:[%s12771_s5 + $0x250] ss:$8 sps:$4 sm:$0xff]  }
 0x335   :  { %2520 = vmatpush1.bf16.msra.mxu0 %v7758_v54  ;;  %v7805_v54 = vld [vmem:[%s12771_s5 + $0x264] ss:$8 sps:$4 sm:$0xff]  }
 0x336   :  { %2521 = vmatprep.subr.bf16.mxu0 %v7763_v51  ;;  %v7803_v51 = vld [vmem:[%s12771_s5 + $0x260] ss:$8 sps:$4 sm:$0xff]  }
 0x339   :  { %2522 = vmatpush1.bf16.msra.mxu0 %v7761_v35  ;;  %v7808_v35 = vld [vmem:[%s12771_s5 + $0x274] ss:$8 sps:$4 sm:$0xff]  }
 0x33a   :  { %2523 = vmatprep.subr.bf16.mxu0 %v7766_v41  ;;  %v7806_v41 = vld [vmem:[%s12771_s5 + $0x270] ss:$8 sps:$4 sm:$0xff]  }
 0x33d   :  { %2524 = vmatpush1.bf16.msra.mxu0 %v7764_v58  ;;  %v7811_v58 = vld [vmem:[%s12771_s5 + $0x284] ss:$8 sps:$4 sm:$0xff]  }
 0x33e   :  { %2525 = vmatprep.subr.bf16.mxu0 %v7769_v18  ;;  %v7809_v18 = vld [vmem:[%s12771_s5 + $0x280] ss:$8 sps:$4 sm:$0xff]  }
 0x341   :  { %v1701_v21 = vpop.permute.xlu0 %1700  ;;  %2526 = vmatpush1.bf16.msra.mxu0 %v7767_v38  ;;  %v7814_v38 = vld [vmem:[%s12771_s5 + $0x294] ss:$8 sps:$4 sm:$0xff]  }
 0x342   :  { %v1709_v45 = vsel %vm261_vm1, %v9992_v13, %v1701_v21  ;;  %v1710_v1 = vsel %vm261_vm1, %v1701_v21, %v1703_v3  ;;  %2527 = vmatprep.subr.bf16.mxu0 %v7772_v2  ;;  %v7773_v13 = vld [vmem:[%s12771_s5 + $0x1c0] ss:$8 sps:$4 sm:$0xff]   ;;  %v7812_v2 = vld [vmem:[%s12771_s5 + $0x290] ss:$8 sps:$4 sm:$0xff]   ;;  %v7817_v3 = vld [vmem:[%s12771_s5 + $0x2a4] ss:$8 sps:$4 sm:$0xff]  }
 0x343   :  { %v10094_v42 = vmax.f32 %v9843_v14, %v1709_v45  ;;  %v10097_v29 = vmax.f32 %v9988_v19, %v1710_v1  ;;  %v7776_v14 = vld [vmem:[%s12771_s5 + $0x1d0] ss:$8 sps:$4 sm:$0xff]   ;;  %v7781_v19 = vld [vmem:[%s12771_s5 + $0x1e4] ss:$8 sps:$4 sm:$0xff]   ;;  %v7815_v21 = vld [vmem:[%s12771_s5 + $0x2a0] ss:$8 sps:$4 sm:$0xff]  }
 0x344   :  { %v7818_v45 = vld [vmem:[%s12771_s5 + $0x2b0] ss:$8 sps:$4 sm:$0xff]   ;;  %v7823_v1 = vld [vmem:[%s12771_s5 + $0x2c4] ss:$8 sps:$4 sm:$0xff]  }
 0x345   :  { %1730 = vst [vmem:[#allocation2 + $0x28] sm:$0x3f] %v10094_v42  ;;  %1731 = vst [vmem:[#allocation2 + $0x30] sm:$0x3f] %v10097_v29  ;;  %2528 = vmatpush1.bf16.msra.mxu0 %v7770_v36  ;;  %v7820_v36 = vld [vmem:[%s12771_s5 + $0x2b4] ss:$8 sps:$4 sm:$0xff]  }
 0x346   :  { %2529 = vmatprep.subr.bf16.mxu0 %v7775_v43  ;;  %v7821_v43 = vld [vmem:[%s12771_s5 + $0x2c0] ss:$8 sps:$4 sm:$0xff]  }
 0x349   :  { %2530 = vmatpush1.bf16.msra.mxu0 %v7773_v13  ;;  %v7826_v13 = vld [vmem:[%s12771_s5 + $0x2d4] ss:$8 sps:$4 sm:$0xff]  }
 0x34a   :  { %2531 = vmatprep.subr.bf16.mxu0 %v7778_v26  ;;  %v7824_v26 = vld [vmem:[%s12771_s5 + $0x2d0] ss:$8 sps:$4 sm:$0xff]  }
 0x34c   :  { %v1737_v23 = vld [vmem:[#allocation2 + $0x28] sm:$0x3f]  ;;  %v1738_v63 = vld [vmem:[#allocation2 + $0x30] sm:$0x3f] }
 0x34d   :  { %v7649_v4 = vpack.i.bf16 %v1738_v63, %v1737_v23  ;;  %2532 = vmatpush1.bf16.msra.mxu0 %v7776_v14  ;;  %v7829_v14 = vld [vmem:[%s12771_s5 + $0x2e4] ss:$8 sps:$4 sm:$0xff]   ;;  %v7832_v23 = vld [vmem:[%s12771_s5 + $0x2f4] ss:$8 sps:$4 sm:$0xff]   ;;  %v7830_v63 = vld [vmem:[%s12771_s5 + $0x2f0] ss:$8 sps:$4 sm:$0xff]  }
 0x34e   :  { %2533 = vmatprep.subr.bf16.mxu0 %v7781_v19  ;;  %v7827_v19 = vld [vmem:[%s12771_s5 + $0x2e0] ss:$8 sps:$4 sm:$0xff]  }
 0x34f   :  { %7650 = vrot.lane.b32.xlu1 %v7649_v4, %s12962_s29  ;;  %v7835_v4 = vld [vmem:[%s12771_s5 + $0x304] ss:$8 sps:$4 sm:$0xff]  }
 0x351   :  { %2534 = vmatpush1.bf16.msra.mxu0 %v7779_v10 }
 0x352   :  { %2535 = vmatprep.subr.bf16.mxu0 %v7784_v55 }
 0x355   :  { %2536 = vmatpush1.bf16.msra.mxu0 %v7782_v49 }
 0x356   :  { %2546 = vmatprep.subr.bf16.mxu0 %v7787_v46 }
 0x36a   :  { %v10126_v6 = vpop.permute.xlu0 %7645 }
 0x36b   :  { %v7648_v34 = vunpack.i.h.bf16 %v10126_v6  ;;  %v7647_v52 = vunpack.i.l.bf16 %v10126_v6  ;;  %v7836_v6 = vld [vmem:[%s12771_s5 + $0x310] ss:$8 sps:$4 sm:$0xff]  }
 0x36d   :  { %v1766_v7 = vsel %vm13294_vm4, %v7643_v59, %v7647_v52  ;;  %v1767_v31 = vsel %vm13292_vm3, %v7647_v52, %v7648_v34  ;;  %v7788_v59 = vld [vmem:[%s12771_s5 + $0x210] ss:$8 sps:$4 sm:$0xff]   ;;  %vm13296_vm4 = vmmov %vm13292_vm3 }
 0x36e   :  { %v1781_v32 = vmax.f32 %v9999_v16, %v1767_v31  ;;  %v1780_v27 = vmax.f32 %v9918_v57, %v1766_v7  ;;  %v7793_v57 = vld [vmem:[%s12771_s5 + $0x224] ss:$8 sps:$4 sm:$0xff]   ;;  %v7791_v16 = vld [vmem:[%s12771_s5 + $0x220] ss:$8 sps:$4 sm:$0xff]  }
 0x370   :  { %v1788_v5 = vpack.c.bf16 %v1781_v32, %v1781_v32  ;;  %v1787_v37 = vpack.c.bf16 %v1780_v27, %v1780_v27  ;;  %v7833_v27 = vld [vmem:[%s12771_s5 + $0x300] ss:$8 sps:$4 sm:$0xff]  }
 0x372   :  { %2537 = vmatprep.mubr.bf16.mxu0 %v1788_v5 }
 0x373   :  { %2538 = vmatmul.mubr.bf16.vlgmr.msra.gmra.mrb[0].mxu0 %v1787_v37  ;;  %v7838_v37 = vld [vmem:[%s12771_s5 + $0x314] ss:$8 sps:$4 sm:$0xff]  }
 0x374   :  { %2547 = vmatpush1.bf16.msra.mxu0 %v7785_v11  ;;  %v7844_v11 = vld [vmem:[%s12771_s5 + $0x334] ss:$8 sps:$4 sm:$0xff]  }
 0x375   :  { %2548 = vmatprep.subr.bf16.mxu0 %v7790_v15  ;;  %v7842_v15 = vld [vmem:[%s12771_s5 + $0x330] ss:$8 sps:$4 sm:$0xff]  }
 0x378   :  { %2549 = vmatpush1.bf16.msra.mxu0 %v7788_v59  ;;  %v7847_v59 = vld [vmem:[%s12771_s5 + $0x344] ss:$8 sps:$4 sm:$0xff]  }
 0x379   :  { %2550 = vmatprep.subr.bf16.mxu0 %v7793_v57  ;;  %v7845_v57 = vld [vmem:[%s12771_s5 + $0x340] ss:$8 sps:$4 sm:$0xff]  }
 0x37c   :  { %2551 = vmatpush1.bf16.msra.mxu0 %v7791_v16  ;;  %v7850_v16 = vld [vmem:[%s12771_s5 + $0x354] ss:$8 sps:$4 sm:$0xff]  }
 0x37d   :  { %2552 = vmatprep.subr.bf16.mxu0 %v7796_v30  ;;  %v7848_v30 = vld [vmem:[%s12771_s5 + $0x350] ss:$8 sps:$4 sm:$0xff]  }
 0x380   :  { %2553 = vmatpush1.bf16.msra.mxu0 %v7794_v12  ;;  %v7853_v12 = vld [vmem:[%s12771_s5 + $0x364] ss:$8 sps:$4 sm:$0xff]  }
 0x381   :  { %2554 = vmatprep.subr.bf16.mxu0 %v7799_v28  ;;  %v1763_v28 = vpop.permute.xlu0 %1762 }
 0x384   :  { %2555 = vmatpush1.bf16.msra.mxu0 %v7797_v50  ;;  %v7851_v50 = vld [vmem:[%s12771_s5 + $0x360] ss:$8 sps:$4 sm:$0xff]  }
 0x385   :  { %2556 = vmatprep.subr.bf16.mxu0 %v7802_v61  ;;  %v7856_v61 = vld [vmem:[%s12771_s5 + $0x374] ss:$8 sps:$4 sm:$0xff]  }
 0x388   :  { %2557 = vmatpush1.bf16.msra.mxu0 %v7800_v9 }
 0x389   :  { %2558 = vmatprep.subr.bf16.mxu0 %v7805_v54  ;;  %v7854_v54 = vld [vmem:[%s12771_s5 + $0x370] ss:$8 sps:$4 sm:$0xff]  }
 0x38c   :  { %2559 = vmatpush1.bf16.msra.mxu0 %v7803_v51 }
 0x38d   :  { %2560 = vmatprep.subr.bf16.mxu0 %v7808_v35 }
 0x390   :  { %2561 = vmatpush1.bf16.msra.mxu0 %v7806_v41 }
 0x391   :  { %2562 = vmatprep.subr.bf16.mxu0 %v7811_v58 }
 0x394   :  { %2563 = vmatpush1.bf16.msra.mxu0 %v7809_v18 }
 0x395   :  { %2564 = vmatprep.subr.bf16.mxu0 %v7814_v38  ;;  %v7033_v38 = vld [vmem:[%s12766_s0 + $0x1] ss:$2 sm:$0xff] }
 0x398   :  { %2565 = vmatpush1.bf16.msra.mxu0 %v7812_v2  ;;  %v2860_v2 = vld [vmem:[#allocation6 + $0x8] sm:$0xff] }
 0x399   :  { %2566 = vmatprep.subr.bf16.mxu0 %v7817_v3  ;;  %v125_v3 = vld [vmem:[%s12770_s4] sm:$0xff] }
 0x39c   :  { %2567 = vmatpush1.bf16.msra.mxu0 %v7815_v21  ;;  %v126_v21 = vld [vmem:[%s12770_s4 + $0x8] sm:$0xff]  ;;  %s13317_s4 = smov 96  }
 0x39d   :  { %2568 = vmatprep.subr.bf16.mxu0 %v7820_v36  ;;  %v13305_v36 = vld [vmem:[#allocation14_spill] sm:$0xff] }
 0x3a0   :  { %2569 = vmatpush1.bf16.msra.mxu0 %v7818_v45  ;;  %v10402_v45 = vrot.slane %v7033_v38, %v13305_v36 }
 0x3a1   :  { %2570 = vmatprep.subr.bf16.mxu0 %v7823_v1  ;;  %v13306_v1 = vld [vmem:[#allocation15_spill] sm:$0xff] }
 0x3a4   :  { %2571 = vmatpush1.bf16.msra.mxu0 %v7821_v43  ;;  %v10405_v43 = vrot.slane %v7033_v38, %v13306_v1 }
 0x3a5   :  { %2572 = vmatprep.subr.bf16.mxu0 %v7826_v13  ;;  %v13307_v13 = vld [vmem:[#allocation17_spill] sm:$0xff] }
 0x3a8   :  { %2573 = vmatpush1.bf16.msra.mxu0 %v7824_v26  ;;  %v3361_v26 = vmul.f32 %v10402_v45, %v13307_v13 }
 0x3a9   :  { %2574 = vmatprep.subr.bf16.mxu0 %v7829_v14  ;;  %v13308_v14 = vld [vmem:[#allocation13_spill] sm:$0xff] }
 0x3ac   :  { %2575 = vmatpush1.bf16.msra.mxu0 %v7827_v19  ;;  %v10410_v19 = vrot.slane %v7033_v38, %v13308_v14 }
 0x3ad   :  { %2576 = vmatprep.subr.bf16.mxu0 %v7832_v23  ;;  %v3362_v23 = vmul.f32 %v10405_v43, %v13307_v13 }
 0x3b0   :  { %2577 = vmatpush1.bf16.msra.mxu0 %v7830_v63  ;;  %v10415_v63 = vrot.slane %v7033_v38, %v13251_v39 }
 0x3b1   :  { %2587 = vmatprep.subr.bf16.mxu0 %v7835_v4  ;;  %v3363_v4 = vmul.f32 %v10410_v19, %v13307_v13 }
 0x3b2   :  { %13309 = vst [vmem:[#allocation62_spill] sm:$0xff] %v10415_v63  ;;  %v4318_v56 = vmul.f32 %v10415_v63, %v13264_v17 }
 0x3c1   :  { %v7651_v10 = vpop.permute.xlu1 %7650 }
 0x3c2   :  { %v7653_v55 = vunpack.i.h.bf16 %v7651_v10  ;;  %v7652_v49 = vunpack.i.l.bf16 %v7651_v10  ;;  %v13310_v10 = vld [vmem:[#allocation16_spill] sm:$0xff] }
 0x3c4   :  { %v1768_v46 = vsel %vm13295_vm5, %v7648_v34, %v7652_v49  ;;  %v1769_v52 = vsel %vm13296_vm4, %v7652_v49, %v7653_v55  ;;  %v7839_v34 = vld [vmem:[%s12771_s5 + $0x320] ss:$8 sps:$4 sm:$0xff]   ;;  %v1770_v9 = vsel %vm13292_vm3, %v7653_v55, %v1763_v28  ;;  %vm13049_vm5 = vcmask 259072  }
 0x3c5   :  { %v1783_v7 = vmax.f32 %v10094_v42, %v1769_v52  ;;  %v1782_v31 = vmax.f32 %v10002_v0, %v1768_v46  ;;  %v13297_v42 = vmov 0   ;;  %v7841_v0 = vld [vmem:[%s12771_s5 + $0x324] ss:$8 sps:$4 sm:$0xff]   ;;  %v1784_v51 = vmax.f32 %v10097_v29, %v1770_v9 }
 0x3c6   :  { %vm13047_vm4 = vcmask 588800   ;;  %v10422_v55 = vrot.slane %v7033_v38, %v13310_v10  ;;  %v3364_v49 = vmul.f32 %v10415_v63, %v13307_v13  ;;  %v13311_v52 = vld [vmem:[#allocation19_spill] sm:$0xff]  ;;  %vm13313_vm3 = vcmask 1022976  }
 0x3c7   :  { %v1790_v32 = vpack.c.bf16 %v1783_v7, %v1783_v7  ;;  %v1789_v5 = vpack.c.bf16 %v1782_v31, %v1782_v31  ;;  %v1791_v35 = vpack.c.bf16 %v1784_v51, %v1784_v51  ;;  %7012 = vmatprep.mubr.msk.f32.mxu1 %vm13047_vm4, %v2860_v2  ;;  %v3414_v7 = vmul.f32 %v10402_v45, %v13311_v52  ;;  %v13314_v2 = vld [vmem:[#allocation21_spill] sm:$0xff] }
 0x3c8   :  { %v3360_v46 = vmul.f32 %v10422_v55, %v13307_v13  ;;  %v3415_v31 = vmul.f32 %v10405_v43, %v13311_v52 }
 0x3c9   :  { %2578 = vmatprep.mubr.bf16.mxu0 %v1790_v32  ;;  %v3416_v32 = vmul.f32 %v10410_v19, %v13311_v52 }
 0x3ca   :  { %2579 = vmatmul.mubr.bf16.vlgmr.msra.gmra.mrb[0].mxu0 %v1789_v5  ;;  %v3417_v5 = vmul.f32 %v10415_v63, %v13311_v52 }
 0x3cb   :  { %2588 = vmatpush1.bf16.msra.mxu0 %v7833_v27  ;;  %2619 = vmatprep.mubr.bf16.mxu0 %v13297_v42 }
 0x3cc   :  { %2589 = vmatprep.subr.bf16.mxu0 %v7838_v37 }
 0x3cf   :  { %2590 = vmatpush1.bf16.msra.mxu0 %v7836_v6  ;;  %v3413_v6 = vmul.f32 %v10422_v55, %v13311_v52 }
 0x3d0   :  { %2591 = vmatprep.subr.bf16.mxu0 %v7841_v0 }
 0x3d3   :  { %2592 = vmatpush1.bf16.msra.mxu0 %v7839_v34 }
 0x3d4   :  { %2593 = vmatprep.subr.bf16.mxu0 %v7844_v11  ;;  %v13312_v11 = vld [vmem:[#allocation20_spill] sm:$0xff] }
 0x3d7   :  { %2594 = vmatpush1.bf16.msra.mxu0 %v7842_v15  ;;  %v3467_v15 = vmul.f32 %v10402_v45, %v13312_v11 }
 0x3d8   :  { %2595 = vmatprep.subr.bf16.mxu0 %v7847_v59 }
 0x3db   :  { %2596 = vmatpush1.bf16.msra.mxu0 %v7845_v57  ;;  %v3468_v57 = vmul.f32 %v10405_v43, %v13312_v11 }
 0x3dc   :  { %2597 = vmatprep.subr.bf16.mxu0 %v7850_v16 }
 0x3df   :  { %2598 = vmatpush1.bf16.msra.mxu0 %v7848_v30 }
 0x3e0   :  { %2599 = vmatprep.subr.bf16.mxu0 %v7853_v12  ;;  %v3469_v12 = vmul.f32 %v10410_v19, %v13312_v11 }
 0x3e3   :  { %2600 = vmatpush1.bf16.msra.mxu0 %v7851_v50  ;;  %v3470_v50 = vmul.f32 %v10415_v63, %v13312_v11 }
 0x3e4   :  { %2601 = vmatprep.subr.bf16.mxu0 %v7856_v61 }
 0x3e7   :  { %2602 = vmatpush1.bf16.msra.mxu0 %v7854_v54 }
 0x3ea   :  { %2620 = vmatmul.mubr.bf16.vlgmr.msra.gmra.mrb[0].mxu0 %v1791_v35 }
 0x4bd   :  { %v10288_v41 = vpop.f32.mrb[0].mxu0 }
 0x4be   :  { %2628 = vst [vmem:[#allocation4] sm:$0x3f] %v10288_v41  ;;  %2633 = vrot.lane.b32.xlu1 %v10288_v41, %s13080_s25  ;;  %v10293_v58 = vpop.f32.mrb[1].mxu0 }
 0x4bf   :  { %2635 = vrot.lane.b32.xlu0 %v10293_v58, %s13080_s25  ;;  %v2625_v18 = vpop.f32.mrb[2].mxu0  ;;  %2630 = vst.msk [vmem:[#allocation4 + $0x8] sm:$0x3f] %vm13049_vm5, %v10293_v58 }
 0x4c0   :  { %v2626_v29 = vpop.f32.mrb[3].mxu0 }
 0x4c1   :  { %v3466_v29 = vmul.f32 %v10422_v55, %v13312_v11 }
 0x4c2   :  { %2642 = vrot.lane.b32.xlu1 %v10288_v41, %s13052_s26 }
 0x4c3   :  { %2644 = vrot.lane.b32.xlu0 %v10293_v58, %s13052_s26 }
 0x4c5   :  { %v2863_v35 = vld [vmem:[#allocation4] sm:$0xff] }
 0x4c6   :  { %2651 = vrot.lane.b32.xlu1 %v10288_v41, %s13054_s27  ;;  %v2864_v61 = vld [vmem:[#allocation4 + $0x8] sm:$0xff] }
 0x4c7   :  { %2653 = vrot.lane.b32.xlu0 %v10293_v58, %s13054_s27 }
 0x4ca   :  { %2660 = vrot.lane.b32.xlu1 %v10288_v41, %s13056_s28 }
 0x4cb   :  { %2662 = vrot.lane.b32.xlu0 %v10293_v58, %s13056_s28 }
 0x4ce   :  { %2669 = vrot.lane.b32.xlu1 %v10288_v41, %s12956_s19 }
 0x4cf   :  { %2671 = vrot.lane.b32.xlu0 %v10293_v58, %s12956_s19  ;;  %s13338_s19 = smov 29  }
 0x4d2   :  { %2679 = vrot.lane.b32.xlu1 %v10288_v41, %s12954_s20 }
 0x4d3   :  { %2681 = vrot.lane.b32.xlu0 %v10293_v58, %s12954_s20  ;;  %s13304_s20 = smov 60  }
 0x4d6   :  { %2689 = vrot.lane.b32.xlu1 %v10288_v41, %s12952_s1 }
 0x4d7   :  { %2691 = vrot.lane.b32.xlu0 %v10293_v58, %s12952_s1  ;;  %s13511_s1 = smov 126  }
 0x4da   :  { %2699 = vrot.lane.b32.xlu1 %v10288_v41, %s12948_s24 }
 0x4db   :  { %2701 = vrot.lane.b32.xlu0 %v10293_v58, %s12948_s24  ;;  %s13303_s24 = smov 61  }
 0x4de   :  { %2709 = vrot.lane.b32.xlu1 %v10288_v41, %s12938_s21 }
 0x4df   :  { %2711 = vrot.lane.b32.xlu0 %v10293_v58, %s12938_s21  ;;  %s12946_s21 = smov 77  }
 0x4e2   :  { %2719 = vrot.lane.b32.xlu1 %v10288_v41, %s12962_s29 }
 0x4e3   :  { %2721 = vrot.lane.b32.xlu0 %v10293_v58, %s12962_s29  ;;  %s13319_s29 = smov 95  }
 0x4e6   :  { %2728 = vrot.lane.b32.xlu1 %v10288_v41, %s12960_s30 }
 0x4e7   :  { %2730 = vrot.lane.b32.xlu0 %v10293_v58, %s12960_s30  ;;  %s13323_s30 = smov 94  }
 0x4ea   :  { %2737 = vrot.lane.b32.xlu1 %v10288_v41, %s12958_s14 }
 0x4eb   :  { %2739 = vrot.lane.b32.xlu0 %v10293_v58, %s12958_s14  ;;  %s13337_s14 = smov 31  }
 0x4ee   :  { %2746 = vrot.lane.b32.xlu1 %v10288_v41, %s13298_s23 }
 0x4ef   :  { %2748 = vrot.lane.b32.xlu0 %v10293_v58, %s13298_s23 }
 0x4f2   :  { %2755 = vrot.lane.b32.xlu1 %v10288_v41, %s13299_s17 }
 0x4f3   :  { %2757 = vrot.lane.b32.xlu0 %v10293_v58, %s13299_s17 }
 0x4f6   :  { %2764 = vrot.lane.b32.xlu1 %v10288_v41, %s12940_s18 }
 0x4f7   :  { %2766 = vrot.lane.b32.xlu0 %v10293_v58, %s12940_s18  ;;  %s12950_s18 = smov 76  }
 0x4fa   :  { %2774 = vrot.lane.b32.xlu1 %v10288_v41, %s12942_s15 }
 0x4fb   :  { %2776 = vrot.lane.b32.xlu0 %v10293_v58, %s12942_s15  ;;  %s13300_s15 = smov 64  }
 0x4fe   :  { %2784 = vrot.lane.b32.xlu1 %v10288_v41, %s12944_s16 }
 0x4ff   :  { %2786 = vrot.lane.b32.xlu0 %v10293_v58, %s12944_s16  ;;  %s13301_s16 = smov 63  }
 0x502   :  { %2794 = vrot.lane.b32.xlu1 %v10288_v41, %s12946_s21 }
 0x503   :  { %2796 = vrot.lane.b32.xlu0 %v10293_v58, %s12946_s21  ;;  %s13302_s21 = smov 62  }
 0x506   :  { %2804 = vrot.lane.b32.xlu1 %v10288_v41, %s12950_s18 }
 0x507   :  { %2806 = vrot.lane.b32.xlu0 %v10293_v58, %s12950_s18  ;;  %s13515_s18 = smov 124  }
 0x50a   :  { %2814 = vrot.lane.b32.xlu1 %v10288_v41, %s13300_s15 }
 0x50b   :  { %2816 = vrot.lane.b32.xlu0 %v10293_v58, %s13300_s15 }
 0x50e   :  { %2823 = vrot.lane.b32.xlu1 %v10288_v41, %s13301_s16 }
 0x50f   :  { %2825 = vrot.lane.b32.xlu0 %v10293_v58, %s13301_s16 }
 0x512   :  { %2832 = vrot.lane.b32.xlu1 %v10288_v41, %s13302_s21 }
 0x513   :  { %2834 = vrot.lane.b32.xlu0 %v10293_v58, %s13302_s21 }
 0x516   :  { %2841 = vrot.lane.b32.xlu1 %v10288_v41, %s13303_s24 }
 0x517   :  { %2843 = vrot.lane.b32.xlu0 %v10293_v58, %s13303_s24 }
 0x51a   :  { %2850 = vrot.lane.b32.xlu1 %v10288_v41, %s13304_s20 }
 0x51b   :  { %2852 = vrot.lane.b32.xlu0 %v10293_v58, %s13304_s20 }
 0x51e   :  { %2915 = vperm.xlu1 %7638, %v125_v3   ;;  %v3520_v3 = vmul.f32 %v10402_v45, %v13314_v2 }
 0x51f   :  { %2920 = vperm.xlu0 %7636, %v126_v21  }
 0x522   :  { %3378 = vrot.lane.b32.xlu1 %v3361_v26, %s13080_s25 }
 0x523   :  { %3380 = vrot.lane.b32.xlu0 %v3362_v23, %s13080_s25  ;;  %v3521_v23 = vmul.f32 %v10405_v43, %v13314_v2 }
 0x526   :  { %3382 = vrot.lane.b32.xlu1 %v3363_v4, %s13080_s25 }
 0x527   :  { %3384 = vrot.lane.b32.xlu0 %v3364_v49, %s13080_s25  ;;  %v3522_v49 = vmul.f32 %v10410_v19, %v13314_v2 }
 0x52a   :  { %3376 = vrot.lane.b32.xlu1 %v3360_v46, %s13080_s25 }
 0x52b   :  { %3431 = vrot.lane.b32.xlu0 %v3414_v7, %s13052_s26 }
 0x52e   :  { %3433 = vrot.lane.b32.xlu1 %v3415_v31, %s13052_s26 }
 0x52f   :  { %3435 = vrot.lane.b32.xlu0 %v3416_v32, %s13052_s26 }
 0x530   :  { %v2634_v27 = vpop.permute.xlu1 %2633 }
 0x531   :  { %v2636_v37 = vpop.permute.xlu0 %2635 }
 0x532   :  { %v2637_v0 = vsel %vm261_vm1, %v2634_v27, %v2636_v37  ;;  %2641 = vst.msk [vmem:[#allocation4 + $0x18] sm:$0x3f] %vm13049_vm5, %v2636_v37  ;;  %3437 = vrot.lane.b32.xlu1 %v3417_v5, %s13052_s26 }
 0x533   :  { %2640 = vst [vmem:[#allocation4 + $0x10] sm:$0x3f] %v2637_v0  ;;  %3429 = vrot.lane.b32.xlu0 %v3413_v6, %s13052_s26  ;;  %v3523_v0 = vmul.f32 %v10415_v63, %v13314_v2 }
 0x534   :  { %v2643_v34 = vpop.permute.xlu1 %2642 }
 0x535   :  { %v2645_v59 = vpop.permute.xlu0 %2644 }
 0x536   :  { %v2646_v16 = vsel %vm13050_vm2, %v2643_v34, %v2645_v59  ;;  %2650 = vst.msk [vmem:[#allocation4 + $0x28] sm:$0x3f] %vm13049_vm5, %v2645_v59  ;;  %3484 = vrot.lane.b32.xlu1 %v3467_v15, %s13054_s27  ;;  %v3519_v15 = vmul.f32 %v10422_v55, %v13314_v2 }
 0x537   :  { %2649 = vst [vmem:[#allocation4 + $0x20] sm:$0x3f] %v2646_v16  ;;  %3486 = vrot.lane.b32.xlu0 %v3468_v57, %s13054_s27  ;;  %v13316_v16 = vld [vmem:[#allocation22_spill] sm:$0xff] }
 0x538   :  { %v2652_v30 = vpop.permute.xlu1 %2651 }
 0x539   :  { %v2654_v28 = vpop.permute.xlu0 %2653  ;;  %v2866_v9 = vld [vmem:[#allocation4 + $0x18] sm:$0xff] }
 0x53a   :  { %v2655_v54 = vsel %vm13313_vm3, %v2652_v30, %v2654_v28  ;;  %2659 = vst.msk [vmem:[#allocation4 + $0x38] sm:$0x3f] %vm13049_vm5, %v2654_v28  ;;  %3488 = vrot.lane.b32.xlu1 %v3469_v12, %s13054_s27  ;;  %v7395_v51 = vpack.c.bf16 %v2866_v9, %v2864_v61  ;;  %v2865_v41 = vld [vmem:[#allocation4 + $0x10] sm:$0xff]  ;;  %vm13315_vm3 = vcmask 1014784   ;;  %v3573_v30 = vmul.f32 %v10402_v45, %v13316_v16 }
 0x53b   :  { %2658 = vst [vmem:[#allocation4 + $0x30] sm:$0x3f] %v2655_v54  ;;  %3490 = vrot.lane.b32.xlu0 %v3470_v50, %s13054_s27  ;;  %v7397_v58 = vpack.c.bf16 %v2865_v41, %v2863_v35  ;;  %v3574_v28 = vmul.f32 %v10405_v43, %v13316_v16 }
 0x53c   :  { %v2661_v18 = vpop.permute.xlu1 %2660  ;;  %7396 = vmatprep.subr.bf16.mxu1 %v7395_v51 }
 0x53d   :  { %v2663_v38 = vpop.permute.xlu0 %2662  ;;  %7398 = vmatpush1.bf16.msra.mxu1 %v7397_v58  ;;  %v2868_v46 = vld [vmem:[#allocation4 + $0x28] sm:$0xff] }
 0x53e   :  { %v2664_v21 = vsel %vm13315_vm3, %v2661_v18, %v2663_v38  ;;  %2668 = vst.msk [vmem:[#allocation4 + $0x48] sm:$0x3f] %vm13049_vm5, %v2663_v38  ;;  %3482 = vrot.lane.b32.xlu1 %v3466_v29, %s13054_s27  ;;  %v2867_v27 = vld [vmem:[#allocation4 + $0x20] sm:$0xff]  ;;  %vm12966_vm3 = vcmask 908288   ;;  %v3575_v18 = vmul.f32 %v10410_v19, %v13316_v16  ;;  %v3576_v38 = vmul.f32 %v10415_v63, %v13316_v16 }
 0x53f   :  { %2667 = vst [vmem:[#allocation4 + $0x40] sm:$0x3f] %v2664_v21  ;;  %3537 = vrot.lane.b32.xlu0 %v3520_v3, %s13056_s28 }
 0x540   :  { %v2670_v26 = vpop.permute.xlu1 %2669 }
 0x541   :  { %v2672_v4 = vpop.permute.xlu0 %2671  ;;  %v2870_v7 = vld [vmem:[#allocation4 + $0x38] sm:$0xff] }
 0x542   :  { %v2674_v31 = vsel %vm12965_vm13, %v2670_v26, %v2672_v4  ;;  %2678 = vst.msk [vmem:[#allocation4 + $0x58] sm:$0x3f] %vm13049_vm5, %v2672_v4  ;;  %3539 = vrot.lane.b32.xlu1 %v3521_v23, %s13056_s28  ;;  %v7399_v32 = vpack.c.bf16 %v2870_v7, %v2868_v46  ;;  %v2869_v5 = vld [vmem:[#allocation4 + $0x30] sm:$0xff]  ;;  %vm12967_vm13 = vcmask 900096   ;;  %v3572_v26 = vmul.f32 %v10422_v55, %v13316_v16 }
 0x543   :  { %2677 = vst [vmem:[#allocation4 + $0x50] sm:$0x3f] %v2674_v31  ;;  %3541 = vrot.lane.b32.xlu0 %v3522_v49, %s13056_s28  ;;  %v7401_v37 = vpack.c.bf16 %v2869_v5, %v2867_v27  ;;  %v13318_v4 = vld [vmem:[#allocation23_spill] sm:$0xff] }
 0x544   :  { %v2680_v6 = vpop.permute.xlu1 %2679  ;;  %7400 = vmatprep.subr.bf16.mxu1 %v7399_v32  ;;  %v3626_v49 = vmul.f32 %v10402_v45, %v13318_v4 }
 0x545   :  { %v2682_v34 = vpop.permute.xlu0 %2681  ;;  %7402 = vmatpush1.bf16.msra.mxu1 %v7401_v37  ;;  %v2872_v50 = vld [vmem:[#allocation4 + $0x48] sm:$0xff] }
 0x546   :  { %v2684_v59 = vsel %vm12966_vm3, %v2680_v6, %v2682_v34  ;;  %2688 = vst.msk [vmem:[#allocation4 + $0x68] sm:$0x3f] %vm13049_vm5, %v2682_v34  ;;  %3543 = vrot.lane.b32.xlu1 %v3523_v0, %s13056_s28  ;;  %v2871_v51 = vld [vmem:[#allocation4 + $0x40] sm:$0xff]  ;;  %vm12969_vm3 = vcmask 891904   ;;  %v3627_v0 = vmul.f32 %v10405_v43, %v13318_v4 }
 0x547   :  { %2687 = vst [vmem:[#allocation4 + $0x60] sm:$0x3f] %v2684_v59  ;;  %3535 = vrot.lane.b32.xlu0 %v3519_v15, %s13056_s28  ;;  %v3628_v15 = vmul.f32 %v10410_v19, %v13318_v4 }
 0x548   :  { %v2690_v57 = vpop.permute.xlu1 %2689 }
 0x549   :  { %v2692_v12 = vpop.permute.xlu0 %2691  ;;  %v2874_v61 = vld [vmem:[#allocation4 + $0x58] sm:$0xff] }
 0x54a   :  { %v2694_v9 = vsel %vm12967_vm13, %v2690_v57, %v2692_v12  ;;  %2698 = vst.msk [vmem:[#allocation4 + $0x78] sm:$0x3f] %vm13049_vm5, %v2692_v12  ;;  %3590 = vrot.lane.b32.xlu1 %v3573_v30, %s13317_s4  ;;  %v7403_v54 = vpack.c.bf16 %v2874_v61, %v2872_v50  ;;  %v2873_v35 = vld [vmem:[#allocation4 + $0x50] sm:$0xff]  ;;  %vm12968_vm13 = vcmask 883712   ;;  %v3629_v30 = vmul.f32 %v10415_v63, %v13318_v4 }
 0x54b   :  { %2697 = vst [vmem:[#allocation4 + $0x70] sm:$0x3f] %v2694_v9  ;;  %3592 = vrot.lane.b32.xlu0 %v3574_v28, %s13317_s4  ;;  %v7405_v41 = vpack.c.bf16 %v2873_v35, %v2871_v51  ;;  %v3625_v28 = vmul.f32 %v10422_v55, %v13318_v4 }
 0x54c   :  { %v2700_v58 = vpop.permute.xlu1 %2699  ;;  %7404 = vmatprep.subr.bf16.mxu1 %v7403_v54 }
 0x54d   :  { %v2702_v29 = vpop.permute.xlu0 %2701  ;;  %7406 = vmatpush1.bf16.msra.mxu1 %v7405_v41  ;;  %v2876_v46 = vld [vmem:[#allocation4 + $0x68] sm:$0xff] }
 0x54e   :  { %v2704_v3 = vsel %vm12969_vm3, %v2700_v58, %v2702_v29  ;;  %2708 = vst.msk [vmem:[#allocation4 + $0x88] sm:$0x3f] %vm13049_vm5, %v2702_v29  ;;  %3594 = vrot.lane.b32.xlu1 %v3575_v18, %s13317_s4  ;;  %v2875_v27 = vld [vmem:[#allocation4 + $0x60] sm:$0xff]  ;;  %vm13321_vm3 = vcmask 777216  }
 0x54f   :  { %2707 = vst [vmem:[#allocation4 + $0x80] sm:$0x3f] %v2704_v3  ;;  %3596 = vrot.lane.b32.xlu0 %v3576_v38, %s13317_s4  ;;  %v13322_v18 = vld [vmem:[#allocation24_spill] sm:$0xff] }
 0x550   :  { %v2710_v21 = vpop.permute.xlu1 %2709  ;;  %v3679_v29 = vmul.f32 %v10402_v45, %v13322_v18  ;;  %v3680_v3 = vmul.f32 %v10405_v43, %v13322_v18 }
 0x551   :  { %v2712_v23 = vpop.permute.xlu0 %2711  ;;  %v2878_v7 = vld [vmem:[#allocation4 + $0x78] sm:$0xff] }
 0x552   :  { %v2714_v31 = vsel %vm12968_vm13, %v2710_v21, %v2712_v23  ;;  %2718 = vst.msk [vmem:[#allocation4 + $0x98] sm:$0x3f] %vm13049_vm5, %v2712_v23  ;;  %3588 = vrot.lane.b32.xlu1 %v3572_v26, %s13317_s4  ;;  %v7407_v32 = vpack.c.bf16 %v2878_v7, %v2876_v46  ;;  %v2877_v5 = vld [vmem:[#allocation4 + $0x70] sm:$0xff]  ;;  %vm13320_vm13 = vcmask 785408   ;;  %v3681_v23 = vmul.f32 %v10410_v19, %v13322_v18 }
 0x553   :  { %2717 = vst [vmem:[#allocation4 + $0x90] sm:$0x3f] %v2714_v31  ;;  %3643 = vrot.lane.b32.xlu0 %v3626_v49, %s13319_s29  ;;  %v7409_v37 = vpack.c.bf16 %v2877_v5, %v2875_v27  ;;  %v3682_v46 = vmul.f32 %v10415_v63, %v13322_v18 }
 0x554   :  { %v2720_v6 = vpop.permute.xlu1 %2719  ;;  %7408 = vmatprep.subr.bf16.mxu1 %v7407_v32 }
 0x555   :  { %v2722_v34 = vpop.permute.xlu0 %2721  ;;  %7410 = vmatpush1.bf16.msra.mxu1 %v7409_v37  ;;  %v2880_v50 = vld [vmem:[#allocation4 + $0x88] sm:$0xff] }
 0x556   :  { %v2723_v59 = vsel %vm13320_vm13, %v2720_v6, %v2722_v34  ;;  %2727 = vst.msk [vmem:[#allocation4 + $0xa8] sm:$0x3f] %vm13049_vm5, %v2722_v34  ;;  %3645 = vrot.lane.b32.xlu1 %v3627_v0, %s13319_s29  ;;  %v2879_v51 = vld [vmem:[#allocation4 + $0x80] sm:$0xff]  ;;  %vm13324_vm13 = vcmask 760832   ;;  %v3678_v34 = vmul.f32 %v10422_v55, %v13322_v18 }
 0x557   :  { %2726 = vst [vmem:[#allocation4 + $0xa0] sm:$0x3f] %v2723_v59  ;;  %3647 = vrot.lane.b32.xlu0 %v3628_v15, %s13319_s29  ;;  %v13325_v59 = vld [vmem:[#allocation25_spill] sm:$0xff] }
 0x558   :  { %v2729_v57 = vpop.permute.xlu1 %2728 }
 0x559   :  { %v2731_v12 = vpop.permute.xlu0 %2730  ;;  %v2882_v61 = vld [vmem:[#allocation4 + $0x98] sm:$0xff] }
 0x55a   :  { %v2732_v9 = vsel %vm13321_vm3, %v2729_v57, %v2731_v12  ;;  %2736 = vst.msk [vmem:[#allocation4 + $0xb8] sm:$0x3f] %vm13049_vm5, %v2731_v12  ;;  %3649 = vrot.lane.b32.xlu1 %v3629_v30, %s13319_s29  ;;  %v7411_v54 = vpack.c.bf16 %v2882_v61, %v2880_v50  ;;  %v2881_v35 = vld [vmem:[#allocation4 + $0x90] sm:$0xff]  ;;  %v3732_v57 = vmul.f32 %v10402_v45, %v13325_v59  ;;  %vm12970_vm3 = vcmask 654336  }
 0x55b   :  { %2735 = vst [vmem:[#allocation4 + $0xb0] sm:$0x3f] %v2732_v9  ;;  %3641 = vrot.lane.b32.xlu0 %v3625_v28, %s13319_s29  ;;  %v7413_v41 = vpack.c.bf16 %v2881_v35, %v2879_v51  ;;  %v3733_v28 = vmul.f32 %v10405_v43, %v13325_v59  ;;  %v3734_v61 = vmul.f32 %v10410_v19, %v13325_v59 }
 0x55c   :  { %v2738_v58 = vpop.permute.xlu1 %2737  ;;  %7412 = vmatprep.subr.bf16.mxu1 %v7411_v54 }
 0x55d   :  { %v2740_v38 = vpop.permute.xlu0 %2739  ;;  %7414 = vmatpush1.bf16.msra.mxu1 %v7413_v41  ;;  %v2884_v7 = vld [vmem:[#allocation4 + $0xa8] sm:$0xff] }
 0x55e   :  { %v2741_v21 = vsel %vm609_vm7, %v2738_v58, %v2740_v38  ;;  %2745 = vst.msk [vmem:[#allocation4 + $0xc8] sm:$0x3f] %vm13049_vm5, %v2740_v38  ;;  %3696 = vrot.lane.b32.xlu1 %v3679_v29, %s13323_s30  ;;  %v2883_v5 = vld [vmem:[#allocation4 + $0xa0] sm:$0xff] }
 0x55f   :  { %2744 = vst [vmem:[#allocation4 + $0xc0] sm:$0x3f] %v2741_v21  ;;  %3698 = vrot.lane.b32.xlu0 %v3680_v3, %s13323_s30  ;;  %v3735_v3 = vmul.f32 %v10415_v63, %v13325_v59 }
 0x560   :  { %v2747_v26 = vpop.permute.xlu1 %2746 }
 0x561   :  { %v2749_v49 = vpop.permute.xlu0 %2748  ;;  %v2886_v31 = vld [vmem:[#allocation4 + $0xb8] sm:$0xff] }
 0x562   :  { %v2750_v32 = vsel %vm13324_vm13, %v2747_v26, %v2749_v49  ;;  %2754 = vst.msk [vmem:[#allocation4 + $0xd8] sm:$0x3f] %vm13049_vm5, %v2749_v49  ;;  %3700 = vrot.lane.b32.xlu1 %v3681_v23, %s13323_s30  ;;  %v7415_v27 = vpack.c.bf16 %v2886_v31, %v2884_v7  ;;  %v2885_v37 = vld [vmem:[#allocation4 + $0xb0] sm:$0xff]  ;;  %vm12971_vm13 = vcmask 646144   ;;  %v3731_v26 = vmul.f32 %v10422_v55, %v13325_v59 }
 0x563   :  { %2753 = vst [vmem:[#allocation4 + $0xd0] sm:$0x3f] %v2750_v32  ;;  %3702 = vrot.lane.b32.xlu0 %v3682_v46, %s13323_s30  ;;  %v7417_v6 = vpack.c.bf16 %v2885_v37, %v2883_v5  ;;  %v13326_v46 = vld [vmem:[#allocation29_spill] sm:$0xff] }
 0x564   :  { %v2756_v0 = vpop.permute.xlu1 %2755  ;;  %7416 = vmatprep.subr.bf16.mxu1 %v7415_v27  ;;  %v3785_v7 = vmul.f32 %v10402_v45, %v13326_v46  ;;  %v3786_v32 = vmul.f32 %v10405_v43, %v13326_v46 }
 0x565   :  { %v2758_v15 = vpop.permute.xlu0 %2757  ;;  %7418 = vmatpush1.bf16.msra.mxu1 %v7417_v6  ;;  %v2888_v9 = vld [vmem:[#allocation4 + $0xc8] sm:$0xff] }
 0x566   :  { %v2759_v30 = vsel %vm725_vm9, %v2756_v0, %v2758_v15  ;;  %2763 = vst.msk [vmem:[#allocation4 + $0xe8] sm:$0x3f] %vm13049_vm5, %v2758_v15  ;;  %3694 = vrot.lane.b32.xlu1 %v3678_v34, %s13323_s30  ;;  %v2887_v41 = vld [vmem:[#allocation4 + $0xc0] sm:$0xff] }
 0x567   :  { %2762 = vst [vmem:[#allocation4 + $0xe0] sm:$0x3f] %v2759_v30  ;;  %3749 = vrot.lane.b32.xlu0 %v3732_v57, %s13298_s23  ;;  %v3787_v30 = vmul.f32 %v10410_v19, %v13326_v46 }
 0x568   :  { %v2765_v12 = vpop.permute.xlu1 %2764 }
 0x569   :  { %v2767_v50 = vpop.permute.xlu0 %2766  ;;  %v2890_v54 = vld [vmem:[#allocation4 + $0xd8] sm:$0xff] }
 0x56a   :  { %v2769_v51 = vsel %vm12970_vm3, %v2765_v12, %v2767_v50  ;;  %2773 = vst.msk [vmem:[#allocation4 + $0xf8] sm:$0x3f] %vm13049_vm5, %v2767_v50  ;;  %3751 = vrot.lane.b32.xlu1 %v3733_v28, %s13298_s23  ;;  %v7419_v35 = vpack.c.bf16 %v2890_v54, %v2888_v9  ;;  %v2889_v58 = vld [vmem:[#allocation4 + $0xd0] sm:$0xff]  ;;  %vm12972_vm3 = vcmask 637952   ;;  %v3788_v28 = vmul.f32 %v10415_v63, %v13326_v46 }
 0x56b   :  { %2772 = vst [vmem:[#allocation4 + $0xf0] sm:$0x3f] %v2769_v51  ;;  %3753 = vrot.lane.b32.xlu0 %v3734_v61, %s13298_s23  ;;  %v7421_v29 = vpack.c.bf16 %v2889_v58, %v2887_v41  ;;  %v3784_v9 = vmul.f32 %v10422_v55, %v13326_v46  ;;  %v13327_v51 = vld [vmem:[#allocation26_spill] sm:$0xff] }
 0x56c   :  { %v2775_v38 = vpop.permute.xlu1 %2774  ;;  %7420 = vmatprep.subr.bf16.mxu1 %v7419_v35  ;;  %v3838_v35 = vmul.f32 %v10402_v45, %v13327_v51 }
 0x56d   :  { %v2777_v21 = vpop.permute.xlu0 %2776  ;;  %7422 = vmatpush1.bf16.msra.mxu1 %v7421_v29  ;;  %v2892_v27 = vld [vmem:[#allocation4 + $0xe8] sm:$0xff] }
 0x56e   :  { %v2779_v23 = vsel %vm12971_vm13, %v2775_v38, %v2777_v21  ;;  %2783 = vst.msk [vmem:[#allocation4 + $0x108] sm:$0x3f] %vm13049_vm5, %v2777_v21  ;;  %3755 = vrot.lane.b32.xlu1 %v3735_v3, %s13298_s23  ;;  %v2891_v0 = vld [vmem:[#allocation4 + $0xe0] sm:$0xff]  ;;  %vm13046_vm13 = vcmask 629760  }
 0x56f   :  { %2782 = vst [vmem:[#allocation4 + $0x100] sm:$0x3f] %v2779_v23  ;;  %3747 = vrot.lane.b32.xlu0 %v3731_v26, %s13298_s23 }
 0x570   :  { %v2785_v49 = vpop.permute.xlu1 %2784 }
 0x571   :  { %v2787_v31 = vpop.permute.xlu0 %2786  ;;  %v2894_v5 = vld [vmem:[#allocation4 + $0xf8] sm:$0xff] }
 0x572   :  { %v2789_v37 = vsel %vm12972_vm3, %v2785_v49, %v2787_v31  ;;  %2793 = vst.msk [vmem:[#allocation4 + $0x118] sm:$0x3f] %vm13049_vm5, %v2787_v31  ;;  %3802 = vrot.lane.b32.xlu1 %v3785_v7, %s13299_s17  ;;  %v7423_v6 = vpack.c.bf16 %v2894_v5, %v2892_v27  ;;  %v2893_v34 = vld [vmem:[#allocation4 + $0xf0] sm:$0xff]  ;;  %vm12973_vm3 = vcmask 621568   ;;  %v3839_v49 = vmul.f32 %v10405_v43, %v13327_v51 }
 0x573   :  { %2792 = vst [vmem:[#allocation4 + $0x110] sm:$0x3f] %v2789_v37  ;;  %3804 = vrot.lane.b32.xlu0 %v3786_v32, %s13299_s17  ;;  %v7425_v15 = vpack.c.bf16 %v2893_v34, %v2891_v0  ;;  %v3840_v31 = vmul.f32 %v10410_v19, %v13327_v51  ;;  %v3841_v5 = vmul.f32 %v10415_v63, %v13327_v51 }
 0x574   :  { %v2795_v57 = vpop.permute.xlu1 %2794  ;;  %7424 = vmatprep.subr.bf16.mxu1 %v7423_v6  ;;  %v3837_v6 = vmul.f32 %v10422_v55, %v13327_v51 }
 0x575   :  { %v2797_v12 = vpop.permute.xlu0 %2796  ;;  %7426 = vmatpush1.bf16.msra.mxu1 %v7425_v15  ;;  %v2896_v41 = vld [vmem:[#allocation4 + $0x108] sm:$0xff] }
 0x576   :  { %v2799_v50 = vsel %vm13046_vm13, %v2795_v57, %v2797_v12  ;;  %2803 = vst.msk [vmem:[#allocation4 + $0x128] sm:$0x3f] %vm13049_vm5, %v2797_v12  ;;  %3806 = vrot.lane.b32.xlu1 %v3787_v30, %s13299_s17  ;;  %v2895_v3 = vld [vmem:[#allocation4 + $0x100] sm:$0xff]  ;;  %vm13383_vm13 = vcmask 1022976  }
 0x577   :  { %2802 = vst [vmem:[#allocation4 + $0x120] sm:$0x3f] %v2799_v50  ;;  %3808 = vrot.lane.b32.xlu0 %v3788_v28, %s13299_s17 }
 0x578   :  { %v2805_v61 = vpop.permute.xlu1 %2804 }
 0x579   :  { %v2807_v54 = vpop.permute.xlu0 %2806  ;;  %v2898_v58 = vld [vmem:[#allocation4 + $0x118] sm:$0xff] }
 0x57a   :  { %v2809_v29 = vsel %vm12973_vm3, %v2805_v61, %v2807_v54  ;;  %2813 = vst.msk [vmem:[#allocation4 + $0x138] sm:$0x3f] %vm13049_vm5, %v2807_v54  ;;  %3800 = vrot.lane.b32.xlu1 %v3784_v9, %s13299_s17  ;;  %v7427_v38 = vpack.c.bf16 %v2898_v58, %v2896_v41  ;;  %v2897_v21 = vld [vmem:[#allocation4 + $0x110] sm:$0xff]  ;;  %vm13329_vm3 = vcmask 498688  }
 0x57b   :  { %2812 = vst [vmem:[#allocation4 + $0x130] sm:$0x3f] %v2809_v29  ;;  %3855 = vrot.lane.b32.xlu0 %v3838_v35, %s13300_s15  ;;  %v7429_v26 = vpack.c.bf16 %v2897_v21, %v2895_v3  ;;  %v13328_v61 = vld [vmem:[#allocation27_spill] sm:$0xff] }
 0x57c   :  { %v2815_v23 = vpop.permute.xlu1 %2814  ;;  %7428 = vmatprep.subr.bf16.mxu1 %v7427_v38  ;;  %v3891_v9 = vmul.f32 %v10402_v45, %v13328_v61  ;;  %v3892_v35 = vmul.f32 %v10405_v43, %v13328_v61  ;;  %v3893_v29 = vmul.f32 %v10410_v19, %v13328_v61  ;;  %v3894_v3 = vmul.f32 %v10415_v63, %v13328_v61 }
 0x57d   :  { %v2817_v7 = vpop.permute.xlu0 %2816  ;;  %7430 = vmatpush1.bf16.msra.mxu1 %v7429_v26  ;;  %v2900_v0 = vld [vmem:[#allocation4 + $0x128] sm:$0xff] }
 0x57e   :  { %v2818_v32 = vsel %vm783_vm10, %v2815_v23, %v2817_v7  ;;  %2822 = vst.msk [vmem:[#allocation4 + $0x148] sm:$0x3f] %vm13049_vm5, %v2817_v7  ;;  %3857 = vrot.lane.b32.xlu1 %v3839_v49, %s13300_s15  ;;  %v2899_v30 = vld [vmem:[#allocation4 + $0x120] sm:$0xff] }
 0x57f   :  { %2821 = vst [vmem:[#allocation4 + $0x140] sm:$0x3f] %v2818_v32  ;;  %3859 = vrot.lane.b32.xlu0 %v3840_v31, %s13300_s15 }
 0x580   :  { %v2824_v27 = vpop.permute.xlu1 %2823 }
 0x581   :  { %v2826_v37 = vpop.permute.xlu0 %2825  ;;  %v2902_v34 = vld [vmem:[#allocation4 + $0x138] sm:$0xff] }
 0x582   :  { %v2827_v15 = vsel %vm841_vm11, %v2824_v27, %v2826_v37  ;;  %2831 = vst.msk [vmem:[#allocation4 + $0x158] sm:$0x3f] %vm13049_vm5, %v2826_v37  ;;  %3861 = vrot.lane.b32.xlu1 %v3841_v5, %s13300_s15  ;;  %v7431_v57 = vpack.c.bf16 %v2902_v34, %v2900_v0  ;;  %v2901_v12 = vld [vmem:[#allocation4 + $0x130] sm:$0xff]  ;;  %v3890_v5 = vmul.f32 %v10422_v55, %v13328_v61 }
 0x583   :  { %2830 = vst [vmem:[#allocation4 + $0x150] sm:$0x3f] %v2827_v15  ;;  %3853 = vrot.lane.b32.xlu0 %v3837_v6, %s13300_s15  ;;  %v7433_v28 = vpack.c.bf16 %v2901_v12, %v2899_v30  ;;  %v13330_v6 = vld [vmem:[#allocation33_spill] sm:$0xff] }
 0x584   :  { %v2833_v50 = vpop.permute.xlu1 %2832  ;;  %7432 = vmatprep.subr.bf16.mxu1 %v7431_v57  ;;  %v3944_v0 = vmul.f32 %v10402_v45, %v13330_v6  ;;  %v3945_v15 = vmul.f32 %v10405_v43, %v13330_v6  ;;  %v3946_v57 = vmul.f32 %v10410_v19, %v13330_v6 }
 0x585   :  { %v2835_v54 = vpop.permute.xlu0 %2834  ;;  %7434 = vmatpush1.bf16.msra.mxu1 %v7433_v28  ;;  %v2904_v21 = vld [vmem:[#allocation4 + $0x148] sm:$0xff] }
 0x586   :  { %v2836_v41 = vsel %vm899_vm12, %v2833_v50, %v2835_v54  ;;  %2840 = vst.msk [vmem:[#allocation4 + $0x168] sm:$0x3f] %vm13049_vm5, %v2835_v54  ;;  %3908 = vrot.lane.b32.xlu1 %v3891_v9, %s13301_s16  ;;  %v2903_v7 = vld [vmem:[#allocation4 + $0x140] sm:$0xff] }
 0x587   :  { %2839 = vst [vmem:[#allocation4 + $0x160] sm:$0x3f] %v2836_v41  ;;  %3910 = vrot.lane.b32.xlu0 %v3892_v35, %s13301_s16  ;;  %v3947_v35 = vmul.f32 %v10415_v63, %v13330_v6 }
 0x588   :  { %v2842_v58 = vpop.permute.xlu1 %2841 }
 0x589   :  { %v2844_v38 = vpop.permute.xlu0 %2843  ;;  %v2906_v26 = vld [vmem:[#allocation4 + $0x158] sm:$0xff] }
 0x58a   :  { %v2845_v23 = vsel %vm13329_vm3, %v2842_v58, %v2844_v38  ;;  %2849 = vst.msk [vmem:[#allocation4 + $0x178] sm:$0x3f] %vm13049_vm5, %v2844_v38  ;;  %3912 = vrot.lane.b32.xlu1 %v3893_v29, %s13301_s16  ;;  %v7435_v49 = vpack.c.bf16 %v2906_v26, %v2904_v21  ;;  %v2905_v31 = vld [vmem:[#allocation4 + $0x150] sm:$0xff]  ;;  %v3943_v58 = vmul.f32 %v10422_v55, %v13330_v6  ;;  %v2859_v29 = vld [vmem:[#allocation6] sm:$0xff]  ;;  %vm13381_vm3 = vcmask 1022976  }
 0x58b   :  { %2848 = vst [vmem:[#allocation4 + $0x170] sm:$0x3f] %v2845_v23  ;;  %3914 = vrot.lane.b32.xlu0 %v3894_v3, %s13301_s16  ;;  %v7437_v32 = vpack.c.bf16 %v2905_v31, %v2903_v7  ;;  %v13331_v3 = vld [vmem:[#allocation28_spill] sm:$0xff]  ;;  %v2862_v26 = vld [vmem:[#allocation6 + $0x18] sm:$0xff] }
 0x58c   :  { %v2851_v27 = vpop.permute.xlu1 %2850  ;;  %7436 = vmatprep.subr.bf16.mxu1 %v7435_v49  ;;  %v3997_v21 = vmul.f32 %v10402_v45, %v13331_v3  ;;  %v3998_v23 = vmul.f32 %v10405_v43, %v13331_v3  ;;  %v2861_v49 = vld [vmem:[#allocation6 + $0x10] sm:$0xff]  ;;  %v3999_v7 = vmul.f32 %v10410_v19, %v13331_v3 }
 0x58d   :  { %v2853_v37 = vpop.permute.xlu0 %2852  ;;  %7438 = vmatpush1.bf16.msra.mxu1 %v7437_v32  ;;  %v2908_v30 = vld [vmem:[#allocation4 + $0x168] sm:$0xff]  ;;  %v4000_v32 = vmul.f32 %v10415_v63, %v13331_v3 }
 0x58e   :  { %v2854_v34 = vsel %vm1015_vm14, %v2851_v27, %v2853_v37  ;;  %2858 = vst.msk [vmem:[#allocation4 + $0x188] sm:$0x3f] %vm13049_vm5, %v2853_v37  ;;  %3906 = vrot.lane.b32.xlu1 %v3890_v5, %s13301_s16  ;;  %v2907_v50 = vld [vmem:[#allocation4 + $0x160] sm:$0xff]  ;;  %v3996_v5 = vmul.f32 %v10422_v55, %v13331_v3 }
 0x58f   :  { %2857 = vst [vmem:[#allocation4 + $0x180] sm:$0x3f] %v2854_v34  ;;  %3961 = vrot.lane.b32.xlu0 %v3944_v0, %s13302_s21  ;;  %v13334_v0 = vld [vmem:[#allocation30_spill] sm:$0xff] }
 0x590   :  { %v4050_v34 = vmul.f32 %v10402_v45, %v13334_v0 }
 0x591   :  { %v2910_v12 = vld [vmem:[#allocation4 + $0x178] sm:$0xff] }
 0x592   :  { %3963 = vrot.lane.b32.xlu1 %v3945_v15, %s13302_s21  ;;  %v7439_v28 = vpack.c.bf16 %v2910_v12, %v2908_v30  ;;  %v2909_v9 = vld [vmem:[#allocation4 + $0x170] sm:$0xff]  ;;  %v4052_v12 = vmul.f32 %v10410_v19, %v13334_v0 }
 0x593   :  { %3965 = vrot.lane.b32.xlu0 %v3946_v57, %s13302_s21  ;;  %v7441_v54 = vpack.c.bf16 %v2909_v9, %v2907_v50  ;;  %v4051_v57 = vmul.f32 %v10405_v43, %v13334_v0  ;;  %v4053_v50 = vmul.f32 %v10415_v63, %v13334_v0 }
 0x594   :  { %7440 = vmatprep.subr.bf16.mxu1 %v7439_v28 }
 0x595   :  { %7442 = vmatpush1.bf16.msra.mxu1 %v7441_v54  ;;  %v2912_v41 = vld [vmem:[#allocation4 + $0x188] sm:$0xff]  ;;  %v4049_v54 = vmul.f32 %v10422_v55, %v13334_v0 }
 0x596   :  { %3967 = vrot.lane.b32.xlu1 %v3947_v35, %s13302_s21  ;;  %2978 = vmatprep.subr.mxu1 %v2912_v41  ;;  %v2911_v38 = vld [vmem:[#allocation4 + $0x180] sm:$0xff]  ;;  %v4103_v41 = vmul.f32 %v10402_v45, %v13258_v8 }
 0x597   :  { %3959 = vrot.lane.b32.xlu0 %v3943_v58, %s13302_s21 }
 0x599   :  { %2979 = vmatpush1.msra.mxu1 %v2911_v38 }
 0x59a   :  { %4014 = vrot.lane.b32.xlu1 %v3997_v21, %s13303_s24  ;;  %2995 = vmatmul.mubr.f32.vlgmr.msra.gmra.mrb[0].mxu1 %v2859_v29  ;;  %v4104_v29 = vmul.f32 %v10405_v43, %v13258_v8  ;;  %v4105_v21 = vmul.f32 %v10410_v19, %v13258_v8 }
 0x59b   :  { %4016 = vrot.lane.b32.xlu0 %v3998_v23, %s13303_s24  ;;  %7013 = vmatprep.mubr.msk.f32.mxu1 %vm13047_vm4, %v2862_v26  ;;  %v4106_v23 = vmul.f32 %v10415_v63, %v13258_v8  ;;  %vm13384_vm4 = vmmov %vm13383_vm13 }
 0x59c   :  { %3152 = vmatprep.subr.bf16.mxu1 %v13297_v42  ;;  %vm13385_vm5 = vmmov %vm13384_vm4 }
 0x59d   :  { %v10654_v31 = vpop.permute.xlu1 %2915 }
 0x59e   :  { %13332 = vst [vmem:[#allocation49_spill] sm:$0xff] %v10654_v31  ;;  %4018 = vrot.lane.b32.xlu1 %v3999_v7, %s13303_s24  ;;  %v10659_v27 = vpop.permute.xlu0 %2920  ;;  %3001 = vmatmul.mubr.f32.gmra.mrb[2].mxu1 %v2861_v49  ;;  %v4102_v7 = vmul.f32 %v10422_v55, %v13258_v8 }
 0x59f   :  { %13333 = vst [vmem:[#allocation51_spill] sm:$0xff] %v10659_v27  ;;  %4020 = vrot.lane.b32.xlu0 %v4000_v32, %s13303_s24 }
 0x5a1   :  { %v10664_v37 = vpop.permute.xlu1 %3378 }
 0x5a2   :  { %4012 = vrot.lane.b32.xlu1 %v3996_v5, %s13303_s24  ;;  %v10669_v15 = vpop.permute.xlu0 %3380  ;;  %v4156_v5 = vmul.f32 %v10402_v45, %v13259_v24 }
 0x5a3   :  { %4067 = vrot.lane.b32.xlu0 %v4050_v34, %s13304_s20 }
 0x5a5   :  { %v10674_v30 = vpop.permute.xlu1 %3382 }
 0x5a6   :  { %4069 = vrot.lane.b32.xlu1 %v4051_v57, %s13304_s20  ;;  %v10679_v28 = vpop.permute.xlu0 %3384  ;;  %v4157_v57 = vmul.f32 %v10405_v43, %v13259_v24 }
 0x5a7   :  { %13335 = vst [vmem:[#allocation61_spill] sm:$0xff] %v10679_v28  ;;  %4071 = vrot.lane.b32.xlu0 %v4052_v12, %s13304_s20 }
 0x5a9   :  { %v10684_v9 = vpop.permute.xlu1 %3376 }
 0x5aa   :  { %4073 = vrot.lane.b32.xlu1 %v4053_v50, %s13304_s20  ;;  %v10689_v35 = vpop.permute.xlu0 %3431  ;;  %v4158_v50 = vmul.f32 %v10410_v19, %v13259_v24 }
 0x5ab   :  { %4065 = vrot.lane.b32.xlu0 %v4049_v54, %s13304_s20 }
 0x5ad   :  { %v10694_v58 = vpop.permute.xlu1 %3433 }
 0x5ae   :  { %4120 = vrot.lane.b32.xlu1 %v4103_v41, %s13167_s2  ;;  %v10699_v38 = vpop.permute.xlu0 %3435  ;;  %v4159_v41 = vmul.f32 %v10415_v63, %v13259_v24 }
 0x5af   :  { %4122 = vrot.lane.b32.xlu0 %v4104_v29, %s13167_s2 }
 0x5b1   :  { %v10704_v26 = vpop.permute.xlu1 %3437 }
 0x5b2   :  { %13336 = vst [vmem:[#allocation65_spill] sm:$0xff] %v10704_v26  ;;  %4124 = vrot.lane.b32.xlu1 %v4105_v21, %s13167_s2  ;;  %v10709_v49 = vpop.permute.xlu0 %3429  ;;  %v4155_v21 = vmul.f32 %v10422_v55, %v13259_v24 }
 0x5b3   :  { %4126 = vrot.lane.b32.xlu0 %v4106_v23, %s13167_s2 }
 0x5b5   :  { %v10714_v32 = vpop.permute.xlu1 %3484 }
 0x5b6   :  { %4118 = vrot.lane.b32.xlu1 %v4102_v7, %s13167_s2  ;;  %v10719_v34 = vpop.permute.xlu0 %3486  ;;  %v4209_v7 = vmul.f32 %v10402_v45, %v13260_v22 }
 0x5b7   :  { %4173 = vrot.lane.b32.xlu0 %v4156_v5, %s13337_s14 }
 0x5b9   :  { %v10724_v12 = vpop.permute.xlu1 %3488 }
 0x5ba   :  { %4175 = vrot.lane.b32.xlu1 %v4157_v57, %s13337_s14  ;;  %v10729_v54 = vpop.permute.xlu0 %3490  ;;  %v4210_v57 = vmul.f32 %v10405_v43, %v13260_v22 }
 0x5bb   :  { %4177 = vrot.lane.b32.xlu0 %v4158_v50, %s13337_s14 }
 0x5bd   :  { %v10734_v29 = vpop.permute.xlu1 %3482 }
 0x5be   :  { %4179 = vrot.lane.b32.xlu1 %v4159_v41, %s13337_s14  ;;  %v10739_v23 = vpop.permute.xlu0 %3537  ;;  %v4211_v41 = vmul.f32 %v10410_v19, %v13260_v22 }
 0x5bf   :  { %4171 = vrot.lane.b32.xlu0 %v4155_v21, %s13337_s14  ;;  %v4212_v21 = vmul.f32 %v10415_v63, %v13260_v22 }
 0x5c1   :  { %v10744_v5 = vpop.permute.xlu1 %3539 }
 0x5c2   :  { %4226 = vrot.lane.b32.xlu1 %v4209_v7, %s13172_s3  ;;  %v10749_v50 = vpop.permute.xlu0 %3541  ;;  %v4208_v7 = vmul.f32 %v10422_v55, %v13260_v22 }
 0x5c3   :  { %4228 = vrot.lane.b32.xlu0 %v4210_v57, %s13172_s3  ;;  %v4262_v57 = vmul.f32 %v10402_v45, %v13261_v62 }
 0x5c5   :  { %v10754_v53 = vpop.permute.xlu1 %3543 }
 0x5c6   :  { %4230 = vrot.lane.b32.xlu1 %v4211_v41, %s13172_s3  ;;  %v10759_v42 = vpop.permute.xlu0 %3535  ;;  %v4263_v41 = vmul.f32 %v10405_v43, %v13261_v62 }
 0x5c7   :  { %4232 = vrot.lane.b32.xlu0 %v4212_v21, %s13172_s3  ;;  %v4264_v21 = vmul.f32 %v10410_v19, %v13261_v62 }
 0x5c9   :  { %v10764_v24 = vpop.permute.xlu1 %3590 }
 0x5ca   :  { %4224 = vrot.lane.b32.xlu1 %v4208_v7, %s13172_s3  ;;  %v10769_v8 = vpop.permute.xlu0 %3592  ;;  %v4265_v7 = vmul.f32 %v10415_v63, %v13261_v62 }
 0x5cb   :  { %4279 = vrot.lane.b32.xlu0 %v4262_v57, %s13338_s19  ;;  %v4261_v57 = vmul.f32 %v10422_v55, %v13261_v62 }
 0x5cd   :  { %v10774_v0 = vpop.permute.xlu1 %3594 }
 0x5ce   :  { %4281 = vrot.lane.b32.xlu1 %v4263_v41, %s13338_s19  ;;  %v10779_v22 = vpop.permute.xlu0 %3596  ;;  %v4315_v41 = vmul.f32 %v10402_v45, %v13264_v17 }
 0x5cf   :  { %4283 = vrot.lane.b32.xlu0 %v4264_v21, %s13338_s19  ;;  %v4316_v21 = vmul.f32 %v10405_v43, %v13264_v17 }
 0x5d1   :  { %v10784_v60 = vpop.permute.xlu1 %3588 }
 0x5d2   :  { %4285 = vrot.lane.b32.xlu1 %v4265_v7, %s13338_s19  ;;  %v10789_v3 = vpop.permute.xlu0 %3643  ;;  %v10804_v7 = vld [vmem:[%s12766_s0 + $0x3] ss:$2 sm:$0xff] }
 0x5d3   :  { %4277 = vrot.lane.b32.xlu0 %v4261_v57, %s13338_s19  ;;  %13340 = vst [vmem:[#allocation54_spill] sm:$0xff] %v10804_v7  ;;  %v4317_v57 = vmul.f32 %v10410_v19, %v13264_v17  ;;  %v4433_v31 = vrot.slane %v10804_v7, %v13306_v1  ;;  %v4437_v63 = vrot.slane %v10804_v7, %v13308_v14 }
 0x5d5   :  { %v10794_v6 = vpop.permute.xlu1 %3645  ;;  %v4465_v1 = vmul.f32 %v4437_v63, %v13265_v20 }
 0x5d6   :  { %4332 = vrot.lane.b32.xlu1 %v4315_v41, %s13268_s22  ;;  %v10799_v61 = vpop.permute.xlu0 %3647  ;;  %v4429_v41 = vrot.slane %v10804_v7, %v13305_v36 }
 0x5d7   :  { %13339 = vst [vmem:[#allocation48_spill] sm:$0xff] %v10799_v61  ;;  %4334 = vrot.lane.b32.xlu0 %v4316_v21, %s13268_s22  ;;  %v4314_v21 = vmul.f32 %v10422_v55, %v13264_v17  ;;  %v4441_v17 = vrot.slane %v10804_v7, %v13251_v39 }
 0x5d9   :  { %v10809_v62 = vpop.permute.xlu1 %3649 }
 0x5da   :  { %13341 = vst [vmem:[#allocation53_spill] sm:$0xff] %v10809_v62  ;;  %4336 = vrot.lane.b32.xlu1 %v4317_v57, %s13268_s22  ;;  %v10816_v27 = vpop.permute.xlu0 %3641  ;;  %v4463_v62 = vmul.f32 %v4429_v41, %v13265_v20 }
 0x5db   :  { %13342 = vst [vmem:[#allocation68_spill] sm:$0xff] %v10816_v27  ;;  %4338 = vrot.lane.b32.xlu0 %v4318_v56, %s13268_s22  ;;  %v4464_v56 = vmul.f32 %v4433_v31, %v13265_v20  ;;  %v4425_v27 = vrot.slane %v10804_v7, %v13310_v10  ;;  %v4516_v7 = vmul.f32 %v4429_v41, %v13269_v25 }
 0x5dd   :  { %v10823_v61 = vpop.permute.xlu1 %3696 }
 0x5de   :  { %13343 = vst [vmem:[#allocation72_spill] sm:$0xff] %v10823_v61  ;;  %4330 = vrot.lane.b32.xlu1 %v4314_v21, %s13268_s22  ;;  %v10829_v57 = vpop.permute.xlu0 %3698  ;;  %v4462_v61 = vmul.f32 %v4425_v27, %v13265_v20 }
 0x5df   :  { %4480 = vrot.lane.b32.xlu0 %v4463_v62, %s13080_s25  ;;  %v4466_v62 = vmul.f32 %v4441_v17, %v13265_v20  ;;  %v4518_v20 = vmul.f32 %v4437_v63, %v13269_v25 }
 0x5e1   :  { %v10835_v36 = vpop.permute.xlu1 %3700 }
 0x5e2   :  { %13344 = vst [vmem:[#allocation50_spill] sm:$0xff] %v10835_v36  ;;  %4482 = vrot.lane.b32.xlu1 %v4464_v56, %s13080_s25  ;;  %v10841_v14 = vpop.permute.xlu0 %3702  ;;  %v4517_v56 = vmul.f32 %v4433_v31, %v13269_v25 }
 0x5e3   :  { %13345 = vst [vmem:[#allocation57_spill] sm:$0xff] %v10841_v14  ;;  %4484 = vrot.lane.b32.xlu0 %v4465_v1, %s13080_s25  ;;  %v4515_v14 = vmul.f32 %v4425_v27, %v13269_v25 }
 0x5e5   :  { %v10845_v21 = vpop.permute.xlu1 %3694 }
 0x5e6   :  { %13346 = vst [vmem:[#allocation60_spill] sm:$0xff] %v10845_v21  ;;  %4486 = vrot.lane.b32.xlu1 %v4466_v62, %s13080_s25  ;;  %v10849_v39 = vpop.permute.xlu0 %3749  ;;  %v4519_v62 = vmul.f32 %v4441_v17, %v13269_v25  ;;  %v4572_v25 = vmul.f32 %v4441_v17, %v13270_v33 }
 0x5e7   :  { %4478 = vrot.lane.b32.xlu0 %v4462_v61, %s13080_s25 }
 0x5e9   :  { %v10853_v10 = vpop.permute.xlu1 %3751 }
 0x5ea   :  { %4533 = vrot.lane.b32.xlu1 %v4516_v7, %s13052_s26  ;;  %v10857_v1 = vpop.permute.xlu0 %3753  ;;  %v4569_v7 = vmul.f32 %v4429_v41, %v13270_v33 }
 0x5eb   :  { %13347 = vst [vmem:[#allocation71_spill] sm:$0xff] %v10857_v1  ;;  %4535 = vrot.lane.b32.xlu0 %v4517_v56, %s13052_s26 }
 0x5ed   :  { %v10861_v21 = vpop.permute.xlu1 %3755 }
 0x5ee   :  { %13348 = vst [vmem:[#allocation56_spill] sm:$0xff] %v10861_v21  ;;  %4537 = vrot.lane.b32.xlu1 %v4518_v20, %s13052_s26  ;;  %v10865_v61 = vpop.permute.xlu0 %3747  ;;  %v4570_v21 = vmul.f32 %v4433_v31, %v13270_v33  ;;  %v4571_v20 = vmul.f32 %v4437_v63, %v13270_v33 }
 0x5ef   :  { %13349 = vst [vmem:[#allocation64_spill] sm:$0xff] %v10865_v61  ;;  %4539 = vrot.lane.b32.xlu0 %v4519_v62, %s13052_s26 }
 0x5f1   :  { %v10869_v36 = vpop.permute.xlu1 %3802 }
 0x5f2   :  { %13350 = vst [vmem:[#allocation63_spill] sm:$0xff] %v10869_v36  ;;  %4531 = vrot.lane.b32.xlu1 %v4515_v14, %s13052_s26  ;;  %v10873_v56 = vpop.permute.xlu0 %3804  ;;  %v4568_v14 = vmul.f32 %v4425_v27, %v13270_v33  ;;  %v4624_v33 = vmul.f32 %v4437_v63, %v13271_v48  ;;  %v4621_v63 = vmul.f32 %v4425_v27, %v13271_v48 }
 0x5f3   :  { %4586 = vrot.lane.b32.xlu0 %v4569_v7, %s13054_s27 }
 0x5f5   :  { %v10877_v1 = vpop.permute.xlu1 %3806 }
 0x5f6   :  { %13351 = vst [vmem:[#allocation59_spill] sm:$0xff] %v10877_v1  ;;  %4588 = vrot.lane.b32.xlu1 %v4570_v21, %s13054_s27  ;;  %v10881_v62 = vpop.permute.xlu0 %3808  ;;  %v4622_v1 = vmul.f32 %v4429_v41, %v13271_v48  ;;  %v4623_v21 = vmul.f32 %v4433_v31, %v13271_v48  ;;  %v10907_v41 = vld [vmem:[%s12766_s0 + $0x1] ss:$2 sm:$0xff] }
 0x5f7   :  { %4590 = vrot.lane.b32.xlu0 %v4571_v20, %s13054_s27  ;;  %13353 = vst [vmem:[#allocation70_spill] sm:$0xff] %v10907_v41  ;;  %v10911_v31 = vrot.slane %v10907_v41, %v13253_v47 }
 0x5f9   :  { %v10885_v61 = vpop.permute.xlu1 %3800  ;;  %v3418_v27 = vmul.f32 %v10911_v31, %v13311_v52 }
 0x5fa   :  { %13352 = vst [vmem:[#allocation67_spill] sm:$0xff] %v10885_v61  ;;  %4592 = vrot.lane.b32.xlu1 %v4572_v25, %s13054_s27  ;;  %v10889_v7 = vpop.permute.xlu0 %3855  ;;  %v4625_v25 = vmul.f32 %v4441_v17, %v13271_v48  ;;  %v10920_v17 = vrot.slane %v10907_v41, %v13280_v40 }
 0x5fb   :  { %4584 = vrot.lane.b32.xlu0 %v4568_v14, %s13054_s27 }
 0x5fc   :  { %13354 = vst [vmem:[#allocation66_spill] sm:$0xff] %v10920_v17 }
 0x5fd   :  { %v10893_v36 = vpop.permute.xlu1 %3857 }
 0x5fe   :  { %4639 = vrot.lane.b32.xlu1 %v4622_v1, %s13056_s28  ;;  %v10897_v20 = vpop.permute.xlu0 %3859 }
 0x5ff   :  { %4641 = vrot.lane.b32.xlu0 %v4623_v21, %s13056_s28  ;;  %v3365_v21 = vmul.f32 %v10911_v31, %v13307_v13 }
 0x601   :  { %v10901_v61 = vpop.permute.xlu1 %3861 }
 0x602   :  { %4643 = vrot.lane.b32.xlu1 %v4624_v33, %s13056_s28  ;;  %v10914_v1 = vpop.permute.xlu0 %3853  ;;  %v3366_v33 = vmul.f32 %v10920_v17, %v13307_v13 }
 0x603   :  { %4645 = vrot.lane.b32.xlu0 %v4625_v25, %s13056_s28 }
 0x605   :  { %v10922_v14 = vpop.permute.xlu1 %3908 }
 0x606   :  { %4637 = vrot.lane.b32.xlu1 %v4621_v63, %s13056_s28  ;;  %v10927_v47 = vpop.permute.xlu0 %3910  ;;  %v3419_v63 = vmul.f32 %v10920_v17, %v13311_v52 }
 0x607   :  { %3386 = vrot.lane.b32.xlu0 %v3365_v21, %s13080_s25  ;;  %v3471_v21 = vmul.f32 %v10911_v31, %v13312_v11 }
 0x609   :  { %v10932_v25 = vpop.permute.xlu1 %3912 }
 0x60a   :  { %3388 = vrot.lane.b32.xlu1 %v3366_v33, %s13080_s25  ;;  %v10937_v41 = vpop.permute.xlu0 %3914  ;;  %v3472_v33 = vmul.f32 %v10920_v17, %v13312_v11 }
 0x60b   :  { %3439 = vrot.lane.b32.xlu0 %v3418_v27, %s13052_s26  ;;  %v3524_v27 = vmul.f32 %v10911_v31, %v13314_v2 }
 0x60d   :  { %v10942_v48 = vpop.permute.xlu1 %3906 }
 0x60e   :  { %13355 = vst [vmem:[#allocation74_spill] sm:$0xff] %v10942_v48  ;;  %3441 = vrot.lane.b32.xlu1 %v3419_v63, %s13052_s26  ;;  %v10947_v13 = vpop.permute.xlu0 %3961  ;;  %v3525_v63 = vmul.f32 %v10920_v17, %v13314_v2 }
 0x60f   :  { %3492 = vrot.lane.b32.xlu0 %v3471_v21, %s13054_s27  ;;  %v3577_v21 = vmul.f32 %v10911_v31, %v13316_v16 }
 0x611   :  { %v10952_v40 = vpop.permute.xlu1 %3963 }
 0x612   :  { %3494 = vrot.lane.b32.xlu1 %v3472_v33, %s13054_s27  ;;  %v10957_v52 = vpop.permute.xlu0 %3965  ;;  %v3578_v33 = vmul.f32 %v10920_v17, %v13316_v16 }
 0x613   :  { %13356 = vst [vmem:[#allocation73_spill] sm:$0xff] %v10957_v52  ;;  %3545 = vrot.lane.b32.xlu0 %v3524_v27, %s13056_s28  ;;  %v3630_v27 = vmul.f32 %v10911_v31, %v13318_v4 }
 0x615   :  { %v10962_v48 = vpop.permute.xlu1 %3967 }
 0x616   :  { %13357 = vst [vmem:[#allocation69_spill] sm:$0xff] %v10962_v48  ;;  %3547 = vrot.lane.b32.xlu1 %v3525_v63, %s13056_s28  ;;  %v10967_v11 = vpop.permute.xlu0 %3959  ;;  %v3631_v63 = vmul.f32 %v10920_v17, %v13318_v4 }
 0x617   :  { %13358 = vst [vmem:[#allocation77_spill] sm:$0xff] %v10967_v11  ;;  %3598 = vrot.lane.b32.xlu0 %v3577_v21, %s13317_s4  ;;  %v3683_v21 = vmul.f32 %v10911_v31, %v13322_v18 }
 0x619   :  { %v10972_v52 = vpop.permute.xlu1 %4014 }
 0x61a   :  { %3600 = vrot.lane.b32.xlu1 %v3578_v33, %s13317_s4  ;;  %v10977_v2 = vpop.permute.xlu0 %4016  ;;  %v3684_v33 = vmul.f32 %v10920_v17, %v13322_v18 }
 0x61b   :  { %3651 = vrot.lane.b32.xlu0 %v3630_v27, %s13319_s29  ;;  %v3736_v27 = vmul.f32 %v10911_v31, %v13325_v59 }
 0x61d   :  { %v10982_v11 = vpop.permute.xlu1 %4018 }
 0x61e   :  { %13359 = vst [vmem:[#allocation80_spill] sm:$0xff] %v10982_v11  ;;  %3653 = vrot.lane.b32.xlu1 %v3631_v63, %s13319_s29  ;;  %v10987_v16 = vpop.permute.xlu0 %4020  ;;  %v3737_v63 = vmul.f32 %v10920_v17, %v13325_v59 }
 0x61f   :  { %13360 = vst [vmem:[#allocation76_spill] sm:$0xff] %v10987_v16  ;;  %3704 = vrot.lane.b32.xlu0 %v3683_v21, %s13323_s30  ;;  %v3789_v21 = vmul.f32 %v10911_v31, %v13326_v46 }
 0x621   :  { %v10992_v48 = vpop.permute.xlu1 %4012 }
 0x622   :  { %13361 = vst [vmem:[#allocation81_spill] sm:$0xff] %v10992_v48  ;;  %3706 = vrot.lane.b32.xlu1 %v3684_v33, %s13323_s30  ;;  %v10997_v4 = vpop.permute.xlu0 %4067  ;;  %v3790_v33 = vmul.f32 %v10920_v17, %v13326_v46 }
 0x623   :  { %13362 = vst [vmem:[#allocation78_spill] sm:$0xff] %v10997_v4  ;;  %3757 = vrot.lane.b32.xlu0 %v3736_v27, %s13298_s23 }
 0x625   :  { %v11002_v16 = vpop.permute.xlu1 %4069 }
 0x626   :  { %13363 = vst [vmem:[#allocation84_spill] sm:$0xff] %v11002_v16  ;;  %3759 = vrot.lane.b32.xlu1 %v3737_v63, %s13298_s23  ;;  %v11007_v18 = vpop.permute.xlu0 %4071 }
 0x627   :  { %13364 = vst [vmem:[#allocation82_spill] sm:$0xff] %v11007_v18  ;;  %3810 = vrot.lane.b32.xlu0 %v3789_v21, %s13299_s17 }
 0x629   :  { %v11012_v48 = vpop.permute.xlu1 %4073 }
 0x62a   :  { %13365 = vst [vmem:[#allocation85_spill] sm:$0xff] %v11012_v48  ;;  %3812 = vrot.lane.b32.xlu1 %v3790_v33, %s13299_s17  ;;  %v11015_v27 = vpop.permute.xlu0 %4065 }
 0x62b   :  { %13366 = vst [vmem:[#allocation83_spill] sm:$0xff] %v11015_v27 }
 0x62d   :  { %v11017_v59 = vpop.permute.xlu1 %4120 }
 0x62e   :  { %13367 = vst [vmem:[#allocation86_spill] sm:$0xff] %v11017_v59  ;;  %v11019_v11 = vpop.permute.xlu0 %4122 }
 0x631   :  { %v11021_v4 = vpop.permute.xlu1 %4124 }
 0x632   :  { %13368 = vst [vmem:[#allocation90_spill] sm:$0xff] %v11021_v4  ;;  %v11023_v63 = vpop.permute.xlu0 %4126 }
 0x633   :  { %13369 = vst [vmem:[#allocation93_spill] sm:$0xff] %v11023_v63 }
 0x635   :  { %v11025_v18 = vpop.permute.xlu1 %4118 }
 0x636   :  { %13370 = vst [vmem:[#allocation88_spill] sm:$0xff] %v11025_v18  ;;  %v11027_v21 = vpop.permute.xlu0 %4173 }
 0x637   :  { %13371 = vst [vmem:[#allocation96_spill] sm:$0xff] %v11027_v21 }
 0x639   :  { %v11029_v16 = vpop.permute.xlu1 %4175 }
 0x63a   :  { %v11031_v46 = vpop.permute.xlu0 %4177 }
 0x63b   :  { %13372 = vst [vmem:[#allocation87_spill] sm:$0xff] %v11031_v46  ;;  %v3393_v46 = vsel %vm261_vm1, %v10664_v37, %v10669_v15 }
 0x63d   :  { %v11033_v17 = vpop.permute.xlu1 %4179 }
 0x63e   :  { %13373 = vst [vmem:[#allocation91_spill] sm:$0xff] %v11033_v17  ;;  %v11035_v33 = vpop.permute.xlu0 %4171 }
 0x63f   :  { %13374 = vst [vmem:[#allocation89_spill] sm:$0xff] %v11035_v33  ;;  %v3342_v33 = vmul.f32 %v10402_v45, %v13283_v44  ;;  %v3344_v45 = vmul.f32 %v10410_v19, %v13283_v44  ;;  %v3448_v19 = vsel %vm13050_vm2, %v10699_v38, %v10704_v26  ;;  %v3501_v26 = vsel %vm13384_vm4, %v10724_v12, %v10729_v54 }
 0x641   :  { %v11037_v27 = vpop.permute.xlu1 %4226 }
 0x642   :  { %v11039_v48 = vpop.permute.xlu0 %4228 }
 0x645   :  { %v11041_v59 = vpop.permute.xlu1 %4230 }
 0x646   :  { %13375 = vst [vmem:[#allocation95_spill] sm:$0xff] %v11041_v59  ;;  %v11043_v4 = vpop.permute.xlu0 %4232  ;;  %v3446_v59 = vsel %vm13050_vm2, %v10689_v35, %v10694_v58 }
 0x647   :  { %13376 = vst [vmem:[#allocation97_spill] sm:$0xff] %v11043_v4  ;;  %v3407_v4 = vadd.f32 %v3393_v46, %v3342_v33  ;;  %v3392_v46 = vsel %vm261_vm1, %v10684_v9, %v10664_v37  ;;  %v11091_v37 = vmul.f32 %v10911_v31, %v13327_v51 }
 0x649   :  { %v11045_v63 = vpop.permute.xlu1 %4224 }
 0x64a   :  { %13377 = vst [vmem:[#allocation98_spill] sm:$0xff] %v11045_v63  ;;  %v11047_v18 = vpop.permute.xlu0 %4279  ;;  %v3343_v63 = vmul.f32 %v10405_v43, %v13283_v44  ;;  %v3499_v43 = vsel %vm13381_vm3, %v10714_v32, %v10719_v34  ;;  %vm13382_vm3 = vcmask 1014784  }
 0x64b   :  { %13378 = vst [vmem:[#allocation94_spill] sm:$0xff] %v11047_v18  ;;  %v3394_v18 = vsel %vm261_vm1, %v10669_v15, %v10674_v30  ;;  %v3460_v15 = vadd.f32 %v3446_v59, %v3407_v4  ;;  %v3445_v4 = vsel %vm13050_vm2, %v10709_v49, %v10689_v35  ;;  %v3552_v59 = vsel %vm13382_vm3, %v10739_v23, %v10744_v5  ;;  %vm13388_vm4 = vmmov %vm13382_vm3 }
 0x64c   :  { %v3408_v9 = vadd.f32 %v3394_v18, %v3343_v63  ;;  %v3498_v35 = vsel %vm13385_vm5, %v10734_v29, %v10714_v32  ;;  %vm13389_vm5 = vmmov %vm13382_vm3 }
 0x64d   :  { %v11052_v21 = vpop.permute.xlu1 %4281  ;;  %v3551_v29 = vsel %vm13389_vm5, %v10759_v42, %v10739_v23  ;;  %v13394_v23 = vld [vmem:[#allocation72_spill] sm:$0xff] }
 0x64e   :  { %13379 = vst [vmem:[#allocation42_spill] sm:$0xff] %v11052_v21  ;;  %v11056_v17 = vpop.permute.xlu0 %4283  ;;  %v3395_v21 = vsel %vm261_vm1, %v10674_v30, %v10679_v28  ;;  %v3447_v30 = vsel %vm13050_vm2, %v10694_v58, %v10699_v38  ;;  %v3513_v28 = vadd.f32 %v3499_v43, %v3460_v15  ;;  %v3500_v38 = vsel %vm13383_vm13, %v10719_v34, %v10724_v12  ;;  %vm13387_vm13 = vmmov %vm13382_vm3 }
 0x64f   :  { %13380 = vst [vmem:[#allocation47_spill] sm:$0xff] %v11056_v17  ;;  %v3341_v17 = vmul.f32 %v10422_v55, %v13283_v44  ;;  %v3409_v44 = vadd.f32 %v3395_v21, %v3344_v45  ;;  %v3461_v18 = vadd.f32 %v3447_v30, %v3408_v9  ;;  %vm13386_vm2 = vcmask 785408  }
 0x650   :  { %v3605_v49 = vsel %vm13386_vm2, %v10764_v24, %v10769_v8  ;;  %v3566_v45 = vadd.f32 %v3552_v59, %v3513_v28  ;;  %v3553_v34 = vsel %vm13387_vm13, %v10744_v5, %v10749_v50  ;;  %vm13390_vm2 = vcmask 777216  }
 0x651   :  { %v11079_v33 = vpop.permute.xlu1 %4285  ;;  %v3406_v58 = vadd.f32 %v3392_v46, %v3341_v17  ;;  %v3462_v63 = vadd.f32 %v3448_v19, %v3409_v44  ;;  %v3554_v44 = vsel %vm13388_vm4, %v10749_v50, %v10754_v53  ;;  %v3514_v46 = vadd.f32 %v3500_v38, %v3461_v18  ;;  %vm13396_vm5 = vmmov %vm13390_vm2  ;;  %v13397_v38 = vld [vmem:[#allocation53_spill] sm:$0xff] }
 0x652   :  { %v11087_v55 = vpop.permute.xlu0 %4277  ;;  %v3658_v28 = vsel %vm13390_vm2, %v10789_v3, %v10794_v6  ;;  %v3619_v15 = vadd.f32 %v3605_v49, %v3566_v45  ;;  %vm13391_vm3 = vcmask 785408   ;;  %v3711_v19 = vsel %vm609_vm7, %v13394_v23, %v10829_v57 }
 0x653   :  { %v3459_v21 = vadd.f32 %v3445_v4, %v3406_v58  ;;  %v3515_v32 = vadd.f32 %v3501_v26, %v3462_v63  ;;  %v3606_v5 = vsel %vm13391_vm3, %v10769_v8, %v10774_v0  ;;  %vm13392_vm13 = vmmov %vm13391_vm3  ;;  %v3567_v30 = vadd.f32 %v3553_v34, %v3514_v46  ;;  %v13395_v58 = vld [vmem:[#allocation48_spill] sm:$0xff]  ;;  %v13401_v34 = vld [vmem:[#allocation50_spill] sm:$0xff] }
 0x654   :  { %v3607_v50 = vsel %vm13392_vm13, %v10774_v0, %v10779_v22  ;;  %vm13393_vm4 = vmmov %vm13391_vm3  ;;  %v3672_v59 = vadd.f32 %v3658_v28, %v3619_v15  ;;  %v3659_v8 = vsel %vm13396_vm5, %v10794_v6, %v13395_v58  ;;  %v3660_v0 = vsel %vm13390_vm2, %v13395_v58, %v13397_v38  ;;  %v13403_v28 = vld [vmem:[#allocation60_spill] sm:$0xff] }
 0x655   :  { %v11111_v17 = vpop.permute.xlu1 %4332  ;;  %v3512_v43 = vadd.f32 %v3498_v35, %v3459_v21  ;;  %v3568_v26 = vadd.f32 %v3554_v44, %v3515_v32  ;;  %v3604_v42 = vsel %vm13393_vm4, %v10784_v60, %v10764_v24  ;;  %v3620_v63 = vadd.f32 %v3606_v5, %v3567_v30  ;;  %v13398_v60 = vld [vmem:[#allocation68_spill] sm:$0xff]  ;;  %vm13399_vm3 = vmmov %vm13390_vm2  ;;  %v13402_v44 = vld [vmem:[#allocation57_spill] sm:$0xff] }
 0x656   :  { %v11119_v12 = vpop.permute.xlu0 %4334  ;;  %v3657_v35 = vsel %vm13399_vm3, %v13398_v60, %v10789_v3  ;;  %vm13400_vm13 = vcmask 760832   ;;  %v3725_v45 = vadd.f32 %v3711_v19, %v3672_v59  ;;  %v3712_v6 = vsel %vm609_vm7, %v10829_v57, %v13401_v34  ;;  %v13409_v58 = vld [vmem:[#allocation64_spill] sm:$0xff]  ;;  %v13411_v60 = vld [vmem:[#allocation59_spill] sm:$0xff] }
 0x657   :  { %v3565_v4 = vadd.f32 %v3551_v29, %v3512_v43  ;;  %v3621_v24 = vadd.f32 %v3607_v50, %v3568_v26  ;;  %v3764_v49 = vsel %vm13400_vm13, %v10849_v39, %v10853_v10  ;;  %v3713_v46 = vsel %vm609_vm7, %v13401_v34, %v13402_v44  ;;  %v13404_v43 = vld [vmem:[#allocation63_spill] sm:$0xff]  ;;  %vm13406_vm4 = vmmov %vm13400_vm13 }
 0x658   :  { %v3673_v32 = vadd.f32 %v3659_v8, %v3620_v63  ;;  %v3710_v3 = vsel %vm609_vm7, %v13403_v28, %v13394_v23  ;;  %v3817_v15 = vsel %vm725_vm9, %v13404_v43, %v10873_v56  ;;  %v3778_v30 = vadd.f32 %v3764_v49, %v3725_v45  ;;  %v13405_v26 = vld [vmem:[#allocation71_spill] sm:$0xff]  ;;  %vm13408_vm5 = vmmov %vm13406_vm4 }
 0x659   :  { %v11139_v9 = vpop.permute.xlu1 %4336  ;;  %v3618_v21 = vadd.f32 %v3604_v42, %v3565_v4  ;;  %v3674_v29 = vadd.f32 %v3660_v0, %v3621_v24  ;;  %v3765_v57 = vsel %vm13406_vm4, %v10853_v10, %v13405_v26  ;;  %v13407_v42 = vld [vmem:[#allocation56_spill] sm:$0xff]  ;;  %vm13410_vm2 = vmmov %vm13406_vm4  ;;  %v3870_v0 = vsel %vm783_vm10, %v10889_v7, %v10893_v36  ;;  %v13412_v45 = vld [vmem:[#allocation67_spill] sm:$0xff] }
 0x65a   :  { %v11147_v18 = vpop.permute.xlu0 %4338  ;;  %v3766_v19 = vsel %vm13408_vm5, %v13405_v26, %v13407_v42  ;;  %v3726_v59 = vadd.f32 %v3712_v6, %v3673_v32  ;;  %v3763_v8 = vsel %vm13410_vm2, %v13409_v58, %v10849_v39  ;;  %v3831_v24 = vadd.f32 %v3817_v15, %v3778_v30 }
 0x65b   :  { %v3671_v50 = vadd.f32 %v3657_v35, %v3618_v21  ;;  %v3727_v23 = vadd.f32 %v3713_v46, %v3674_v29  ;;  %v3818_v10 = vsel %vm725_vm9, %v10873_v56, %v13411_v60  ;;  %v3819_v35 = vsel %vm725_vm9, %v13411_v60, %v10881_v62 }
 0x65c   :  { %v3779_v49 = vadd.f32 %v3765_v57, %v3726_v59  ;;  %v3816_v39 = vsel %vm725_vm9, %v13412_v45, %v13404_v43  ;;  %v3923_v34 = vsel %vm841_vm11, %v10922_v14, %v10927_v47  ;;  %v3884_v32 = vadd.f32 %v3870_v0, %v3831_v24  ;;  %v13413_v59 = vld [vmem:[#allocation74_spill] sm:$0xff]  ;;  %v13416_v0 = vld [vmem:[#allocation73_spill] sm:$0xff] }
 0x65d   :  { %v11167_v5 = vpop.permute.xlu1 %4330  ;;  %v3724_v63 = vadd.f32 %v3710_v3, %v3671_v50  ;;  %v3780_v21 = vadd.f32 %v3766_v19, %v3727_v23  ;;  %v3871_v56 = vsel %vm783_vm10, %v10893_v36, %v10897_v20  ;;  %v3872_v29 = vsel %vm783_vm10, %v10897_v20, %v10901_v61 }
 0x65e   :  { %v11175_v4 = vpop.permute.xlu0 %4480  ;;  %v3832_v3 = vadd.f32 %v3818_v10, %v3779_v49  ;;  %v3869_v15 = vsel %vm783_vm10, %v10914_v1, %v10889_v7  ;;  %v3976_v50 = vsel %vm899_vm12, %v10947_v13, %v10952_v40  ;;  %v3937_v26 = vadd.f32 %v3923_v34, %v3884_v32  ;;  %v13418_v10 = vld [vmem:[#allocation77_spill] sm:$0xff]  ;;  %v13419_v49 = vld [vmem:[#allocation84_spill] sm:$0xff] }
 0x65f   :  { %v3777_v46 = vadd.f32 %v3763_v8, %v3724_v63  ;;  %v3833_v43 = vadd.f32 %v3819_v35, %v3780_v21  ;;  %v3924_v36 = vsel %vm841_vm11, %v10927_v47, %v10932_v25  ;;  %v3925_v20 = vsel %vm841_vm11, %v10932_v25, %v10937_v41  ;;  %v13417_v63 = vld [vmem:[#allocation69_spill] sm:$0xff]  ;;  %v13420_v21 = vld [vmem:[#allocation78_spill] sm:$0xff]  ;;  %v13423_v32 = vld [vmem:[#allocation76_spill] sm:$0xff] }
 0x660   :  { %v3885_v57 = vadd.f32 %v3871_v56, %v3832_v3  ;;  %v3922_v7 = vsel %vm841_vm11, %v13413_v59, %v10922_v14  ;;  %vm13414_vm3 = vcmask 498688   ;;  %v3990_v8 = vadd.f32 %v3976_v50, %v3937_v26  ;;  %v13427_v50 = vld [vmem:[#allocation86_spill] sm:$0xff] }
 0x661   :  { %v11195_v6 = vpop.permute.xlu1 %4482  ;;  %v3830_v30 = vadd.f32 %v3816_v39, %v3777_v46  ;;  %v3886_v19 = vadd.f32 %v3872_v29, %v3833_v43  ;;  %v4029_v1 = vsel %vm13414_vm3, %v10972_v52, %v10977_v2  ;;  %v3977_v47 = vsel %vm899_vm12, %v10952_v40, %v13416_v0  ;;  %v13421_v46 = vld [vmem:[#allocation80_spill] sm:$0xff]  ;;  %vm13422_vm13 = vmmov %vm13414_vm3  ;;  %v11248_v29 = vld [vmem:[%s12766_s0 + $0x3] ss:$2 sm:$0xff] }
 0x662   :  { %v11203_v28 = vpop.permute.xlu0 %4484  ;;  %v3978_v25 = vsel %vm899_vm12, %v13416_v0, %v13417_v63  ;;  %v3938_v60 = vadd.f32 %v3924_v36, %v3885_v57  ;;  %v3975_v35 = vsel %vm899_vm12, %v13418_v10, %v10947_v13  ;;  %v4082_v45 = vsel %vm1015_vm14, %v13420_v21, %v13419_v49  ;;  %vm13424_vm4 = vmmov %vm13414_vm3  ;;  %v13425_v43 = vld [vmem:[#allocation81_spill] sm:$0xff]  ;;  %v13431_v0 = vld [vmem:[#allocation14_spill] sm:$0xff] }
 0x663   :  { %v3883_v58 = vadd.f32 %v3869_v15, %v3830_v30  ;;  %v3939_v14 = vadd.f32 %v3925_v20, %v3886_v19  ;;  %v4043_v34 = vadd.f32 %v4029_v1, %v3990_v8  ;;  %v4030_v40 = vsel %vm13422_vm13, %v10977_v2, %v13421_v46  ;;  %vm13426_vm5 = vmmov %vm13414_vm3  ;;  %v13428_v20 = vld [vmem:[#allocation82_spill] sm:$0xff]  ;;  %v13429_v19 = vld [vmem:[#allocation85_spill] sm:$0xff] }
 0x664   :  { %v4031_v56 = vsel %vm13424_vm4, %v13421_v46, %v13423_v32  ;;  %v3991_v13 = vadd.f32 %v3977_v47, %v3938_v60  ;;  %v4028_v15 = vsel %vm13426_vm5, %v13425_v43, %v10972_v52  ;;  %v4135_v30 = vsel %vm73_vm0, %v13427_v50, %v11019_v11  ;;  %v13435_v43 = vld [vmem:[#allocation87_spill] sm:$0xff] }
 0x665   :  { %v11223_v23 = vpop.permute.xlu1 %4486  ;;  %v3936_v39 = vadd.f32 %v3922_v7, %v3883_v58  ;;  %v3992_v3 = vadd.f32 %v3978_v25, %v3939_v14  ;;  %v4096_v36 = vadd.f32 %v4082_v45, %v4043_v34  ;;  %v4083_v57 = vsel %vm1015_vm14, %v13419_v49, %v13428_v20  ;;  %v13430_v58 = vld [vmem:[#allocation96_spill] sm:$0xff]  ;;  %v13432_v14 = vld [vmem:[#allocation90_spill] sm:$0xff]  ;;  %v13434_v34 = vld [vmem:[#allocation83_spill] sm:$0xff] }
 0x666   :  { %13415 = vst [vmem:[#allocation55_spill] sm:$0xff] %v11223_v23  ;;  %v11231_v24 = vpop.permute.xlu0 %4478  ;;  %v4084_v59 = vsel %vm1015_vm14, %v13428_v20, %v13429_v19  ;;  %v4044_v1 = vadd.f32 %v4030_v40, %v3991_v13  ;;  %v4188_v8 = vsel %vm1130_vm15, %v13430_v58, %v11029_v16  ;;  %v4377_v47 = vrot.slane %v11248_v29, %v13431_v0 }
 0x667   :  { %v3989_v26 = vadd.f32 %v3975_v35, %v3936_v39  ;;  %v4045_v52 = vadd.f32 %v4031_v56, %v3992_v3  ;;  %v4149_v60 = vadd.f32 %v4135_v30, %v4096_v36  ;;  %v4136_v10 = vsel %vm73_vm0, %v11019_v11, %v13432_v14  ;;  %v13433_v35 = vld [vmem:[#allocation93_spill] sm:$0xff] }
 0x668   :  { %v4137_v49 = vsel %vm73_vm0, %v13432_v14, %v13433_v35  ;;  %v4097_v45 = vadd.f32 %v4083_v57, %v4044_v1  ;;  %v4081_v46 = vsel %vm1015_vm14, %v13434_v34, %v13420_v21  ;;  %v4241_v40 = vsel %vm1188_vm6, %v11037_v27, %v11039_v48  ;;  %v13439_v1 = vld [vmem:[#allocation42_spill] sm:$0xff] }
 0x669   :  { %v11256_v2 = vpop.permute.xlu1 %4533  ;;  %v4042_v25 = vadd.f32 %v4028_v15, %v3989_v26  ;;  %v4098_v39 = vadd.f32 %v4084_v59, %v4045_v52  ;;  %v4202_v3 = vadd.f32 %v4188_v8, %v4149_v60  ;;  %v4189_v11 = vsel %vm1130_vm15, %v11029_v16, %v13435_v43  ;;  %v13436_v15 = vld [vmem:[#allocation91_spill] sm:$0xff]  ;;  %v13437_v26 = vld [vmem:[#allocation49_spill] sm:$0xff]  ;;  %v13440_v52 = vld [vmem:[#allocation94_spill] sm:$0xff] }
 0x66a   :  { %v11264_v7 = vpop.permute.xlu0 %4535  ;;  %v4190_v30 = vsel %vm1130_vm15, %v13435_v43, %v13436_v15  ;;  %v4150_v57 = vadd.f32 %v4136_v10, %v4097_v45  ;;  %v4294_v8 = vsel %vm1246_vm8, %v13440_v52, %v13439_v1  ;;  %v13441_v60 = vld [vmem:[#allocation88_spill] sm:$0xff]  ;;  %v13443_v45 = vld [vmem:[#allocation97_spill] sm:$0xff]  ;;  %vm13444_vm2 = vcmask 228352  }
 0x66b   :  { %v4151_v59 = vadd.f32 %v4137_v49, %v4098_v39  ;;  %v4095_v16 = vadd.f32 %v4081_v46, %v4042_v25  ;;  %v4134_v14 = vsel %vm73_vm0, %v13441_v60, %v13427_v50  ;;  %v4255_v34 = vadd.f32 %v4241_v40, %v4202_v3  ;;  %vm13449_vm3 = vmmov %vm13444_vm2 }
 0x66c   :  { %v4203_v10 = vadd.f32 %v4189_v11, %v4150_v57  ;;  %v4347_v25 = vsel %vm13444_vm2, %v11111_v17, %v11119_v12  ;;  %v13446_v11 = vld [vmem:[#allocation47_spill] sm:$0xff]  ;;  %vm13450_vm13 = vmmov %vm13444_vm2  ;;  %vm13456_vm5 = vcmask 1031168  }
 0x66d   :  { %v11283_v56 = vpop.permute.xlu1 %4537  ;;  %v2996_v13 = vpop.f32.mrb[0].mxu1  ;;  %v4204_v49 = vadd.f32 %v4190_v30, %v4151_v59  ;;  %v4308_v3 = vadd.f32 %v4294_v8, %v4255_v34  ;;  %v4295_v30 = vsel %vm1246_vm8, %v13439_v1, %v13446_v11  ;;  %v13448_v8 = vld [vmem:[#allocation98_spill] sm:$0xff]  ;;  %vm13454_vm4 = vmmov %vm13444_vm2  ;;  %vm13459_vm2 = vcmask 1022976  }
 0x66e   :  { %v11292_v36 = vadd.f32 %v2996_v13, %v13437_v26  ;;  %v11294_v21 = vpop.permute.xlu0 %4539  ;;  %v2998_v20 = vpop.f32.mrb[1].mxu1  ;;  %v13442_v13 = vld [vmem:[#allocation95_spill] sm:$0xff]  ;;  %v4240_v1 = vsel %vm1188_vm6, %v13448_v8, %v11037_v27 }
 0x66f   :  { %13438 = vst [vmem:[#allocation44_spill] sm:$0xff] %v11294_v21  ;;  %v11300_v0 = vadd.f32 %v2998_v20, %v13437_v26  ;;  %v4242_v43 = vsel %vm1188_vm6, %v11039_v48, %v13442_v13  ;;  %v4243_v39 = vsel %vm1188_vm6, %v13442_v13, %v13443_v45  ;;  %v13445_v48 = vld [vmem:[#allocation89_spill] sm:$0xff]  ;;  %v13447_v20 = vld [vmem:[#allocation51_spill] sm:$0xff]  ;;  %v4148_v13 = vadd.f32 %v4134_v14, %v4095_v16 }
 0x670   :  { %3019 = vrot.lane.b32.xlu0 %v11292_v36, %s13080_s25  ;;  %v4187_v40 = vsel %vm1130_vm15, %v13445_v48, %v13430_v58  ;;  %v4256_v26 = vadd.f32 %v4242_v43, %v4203_v10  ;;  %v4296_v45 = vsel %vm1246_vm8, %v13446_v11, %v11079_v33  ;;  %v4257_v58 = vadd.f32 %v4243_v39, %v4204_v49  ;;  %v13451_v10 = vld [vmem:[#allocation15_spill] sm:$0xff] }
 0x671   :  { %3008 = vst.msk [vmem:[#allocation3 + $0x8] sm:$0xff] %vm73_vm0, %v11300_v0  ;;  %v11318_v50 = vpop.permute.xlu1 %4531  ;;  %v3002_v46 = vpop.f32.mrb[2].mxu1  ;;  %v4361_v34 = vadd.f32 %v4347_v25, %v4308_v3  ;;  %v4201_v16 = vadd.f32 %v4187_v40, %v4148_v13  ;;  %v4349_v43 = vsel %vm13450_vm13, %v11139_v9, %v11147_v18  ;;  %v4381_v49 = vrot.slane %v11248_v29, %v13451_v10  ;;  %v13452_v25 = vld [vmem:[#allocation92_spill] sm:$0xff]  ;;  %v13453_v40 = vld [vmem:[#allocation13_spill] sm:$0xff] }
 0x672   :  { %v11327_v57 = vadd.f32 %v3002_v46, %v13447_v20  ;;  %v11329_v59 = vpop.permute.xlu0 %4586  ;;  %v3004_v60 = vpop.f32.mrb[3].mxu1  ;;  %v4348_v46 = vsel %vm13449_vm3, %v11119_v12, %v11139_v9  ;;  %v4309_v14 = vadd.f32 %v4295_v30, %v4256_v26  ;;  %v4310_v39 = vadd.f32 %v4296_v45, %v4257_v58  ;;  %vm13460_vm3 = vmmov %vm13456_vm5 }
 0x673   :  { %v11335_v15 = vadd.f32 %v3004_v60, %v13447_v20  ;;  %v4293_v12 = vsel %vm1246_vm8, %v11087_v55, %v13440_v52  ;;  %v4406_v48 = vmul.f32 %v4377_v47, %v13452_v25  ;;  %v4385_v26 = vrot.slane %v11248_v29, %v13453_v40  ;;  %v13455_v52 = vld [vmem:[#allocation16_spill] sm:$0xff]  ;;  %vm13462_vm13 = vmmov %vm13460_vm3 }
 0x674   :  { %3023 = vrot.lane.b32.xlu0 %v11327_v57, %s13080_s25  ;;  %v4254_v11 = vadd.f32 %v4240_v1, %v4201_v16  ;;  %v4362_v9 = vadd.f32 %v4348_v46, %v4309_v14  ;;  %v4495_v30 = vsel %vm261_vm1, %v11175_v4, %v11195_v6  ;;  %v4363_v60 = vadd.f32 %v4349_v43, %v4310_v39  ;;  %v13458_v16 = vld [vmem:[#allocation27_spill] sm:$0xff] }
 0x675   :  { %3010 = vst.msk [vmem:[#allocation3 + $0x18] sm:$0xff] %vm73_vm0, %v11335_v15  ;;  %v4589_v27 = vpop.permute.xlu1 %4588  ;;  %v4346_v45 = vsel %vm13454_vm4, %v11167_v5, %v11111_v17  ;;  %v4413_v13 = vadd.f32 %v4406_v48, %v4361_v34  ;;  %v4407_v47 = vmul.f32 %v4381_v49, %v13452_v25  ;;  %v4373_v8 = vrot.slane %v11248_v29, %v13455_v52  ;;  %vm13464_vm4 = vmmov %vm13459_vm2 }
 0x676   :  { %v4591_v3 = vpop.permute.xlu0 %4590  ;;  %v4307_v55 = vadd.f32 %v4293_v12, %v4254_v11  ;;  %v4548_v1 = vsel %vm13456_vm5, %v11256_v2, %v11264_v7  ;;  %v4496_v5 = vsel %vm261_vm1, %v11195_v6, %v11203_v28  ;;  %v3895_v14 = vmul.f32 %v10911_v31, %v13458_v16  ;;  %vm13465_vm5 = vmmov %vm13459_vm2 }
 0x677   :  { %v4509_v17 = vadd.f32 %v4495_v30, %v4413_v13  ;;  %v4414_v10 = vadd.f32 %v4407_v47, %v4362_v9  ;;  %v4497_v49 = vsel %vm261_vm1, %v11203_v28, %v11223_v23  ;;  %v4601_v39 = vsel %vm13459_vm2, %v11329_v59, %v4589_v27 }
 0x678   :  { %v3012_v58 = vld [vmem:[#allocation3 + $0x8] sm:$0xff]  ;;  %3863 = vrot.lane.b32.xlu0 %v11091_v37, %s13300_s15  ;;  %v4408_v37 = vmul.f32 %v4385_v26, %v13452_v25  ;;  %v4360_v43 = vadd.f32 %v4346_v45, %v4307_v55  ;;  %v4549_v6 = vsel %vm13460_vm3, %v11264_v7, %v11283_v56  ;;  %v4405_v30 = vmul.f32 %v4373_v8, %v13452_v25 }
 0x679   :  { %v11372_v46 = vpop.permute.xlu1 %4592  ;;  %3021 = vrot.lane.b32.xlu1 %v3012_v58, %s13080_s25  ;;  %v4562_v48 = vadd.f32 %v4548_v1, %v4509_v17  ;;  %v13461_v26 = vld [vmem:[#allocation66_spill] sm:$0xff]  ;;  %v4510_v9 = vadd.f32 %v4496_v5, %v4414_v10  ;;  %v4550_v28 = vsel %vm13462_vm13, %v11283_v56, %v11294_v21  ;;  %v4494_v58 = vsel %vm261_vm1, %v11231_v24, %v11175_v4  ;;  %vm13468_vm13 = vmmov %vm13464_vm4 }
 0x67a   :  { %13457 = vst [vmem:[#allocation52_spill] sm:$0xff] %v11372_v46  ;;  %v4585_v34 = vpop.permute.xlu0 %4584  ;;  %v4415_v12 = vadd.f32 %v4408_v37, %v4363_v60  ;;  %v3843_v11 = vmul.f32 %v13461_v26, %v13327_v51  ;;  %v13463_v60 = vld [vmem:[#allocation33_spill] sm:$0xff]  ;;  %v4602_v47 = vsel %vm13464_vm4, %v4589_v27, %v4591_v3  ;;  %v4412_v8 = vadd.f32 %v4405_v30, %v4360_v43  ;;  %v13467_v27 = vld [vmem:[#allocation28_spill] sm:$0xff] }
 0x67b   :  { %v3948_v13 = vmul.f32 %v10911_v31, %v13463_v60  ;;  %v4615_v55 = vadd.f32 %v4601_v39, %v4562_v48  ;;  %v4563_v1 = vadd.f32 %v4549_v6, %v4510_v9  ;;  %v4603_v56 = vsel %vm13465_vm5, %v4591_v3, %v11372_v46  ;;  %v13469_v39 = vld [vmem:[#allocation43_spill] sm:$0xff] }
 0x67c   :  { %v3014_v40 = vld [vmem:[#allocation3 + $0x18] sm:$0xff]  ;;  %3916 = vrot.lane.b32.xlu0 %v3895_v14, %s13301_s16  ;;  %v4511_v7 = vadd.f32 %v4497_v49, %v4415_v12  ;;  %vm13466_vm2 = vcmask 1014784   ;;  %v4547_v37 = vsel %vm13460_vm3, %v11318_v50, %v11256_v2  ;;  %v4508_v4 = vadd.f32 %v4494_v58, %v4412_v8 }
 0x67d   :  { %v4640_v45 = vpop.permute.xlu1 %4639  ;;  %3025 = vrot.lane.b32.xlu1 %v3014_v40, %s13080_s25  ;;  %v4616_v24 = vadd.f32 %v4602_v47, %v4563_v1  ;;  %v4001_v43 = vmul.f32 %v10911_v31, %v13467_v27  ;;  %v4600_v3 = vsel %vm13468_vm13, %v4585_v34, %v11329_v59  ;;  %vm13471_vm4 = vmmov %vm13466_vm2  ;;  %v3949_v47 = vmul.f32 %v13461_v26, %v13463_v60  ;;  %v13478_v8 = vld [vmem:[#allocation35_spill] sm:$0xff] }
 0x67e   :  { %v4642_v52 = vpop.permute.xlu0 %4641  ;;  %v4564_v5 = vadd.f32 %v4550_v28, %v4511_v7  ;;  %v4561_v48 = vadd.f32 %v4547_v37, %v4508_v4  ;;  %vm13473_vm5 = vmmov %vm13466_vm2  ;;  %v13476_v7 = vld [vmem:[#allocation30_spill] sm:$0xff]  ;;  %v4002_v1 = vmul.f32 %v13461_v26, %v13467_v27  ;;  %v13480_v37 = vld [vmem:[#allocation32_spill] sm:$0xff]  ;;  %v4108_v4 = vmul.f32 %v13461_v26, %v13478_v8 }
 0x67f   :  { %v4654_v17 = vsel %vm13466_vm2, %v4640_v45, %v4642_v52  ;;  %v4054_v58 = vmul.f32 %v10911_v31, %v13476_v7 }
 0x680   :  { %v4668_v14 = vadd.f32 %v4654_v17, %v4615_v55  ;;  %3969 = vrot.lane.b32.xlu0 %v3948_v13, %s13302_s21  ;;  %v4617_v49 = vadd.f32 %v4603_v56, %v4564_v5  ;;  %v4614_v59 = vadd.f32 %v4600_v3, %v4561_v48  ;;  %v13479_v56 = vld [vmem:[#allocation31_spill] sm:$0xff]  ;;  %v4055_v5 = vmul.f32 %v13461_v26, %v13476_v7  ;;  %v13484_v48 = vld [vmem:[#allocation54_spill] sm:$0xff] }
 0x681   :  { %v4644_v10 = vpop.permute.xlu1 %4643  ;;  %3865 = vrot.lane.b32.xlu1 %v3843_v11, %s13300_s15  ;;  %v3896_v11 = vmul.f32 %v13461_v26, %v13458_v16  ;;  %v4160_v17 = vmul.f32 %v10911_v31, %v13479_v56 }
 0x682   :  { %v11416_v12 = vadd.f32 %v4668_v14, %v13469_v39  ;;  %v4655_v2 = vsel %vm13471_vm4, %v4642_v52, %v4644_v10  ;;  %v11419_v50 = vpop.permute.xlu0 %4645  ;;  %v4213_v14 = vmul.f32 %v10911_v31, %v13480_v37  ;;  %vm13497_vm4 = vmmov %vm13466_vm2 }
 0x683   :  { %13472 = vst [vmem:[#allocation46_spill] sm:$0xff] %v11419_v50  ;;  %v4669_v6 = vadd.f32 %v4655_v2, %v4616_v24  ;;  %v4656_v40 = vsel %vm13473_vm5, %v4644_v10, %v11419_v50  ;;  %v13481_v24 = vld [vmem:[#allocation37_spill] sm:$0xff]  ;;  %v13483_v2 = vld [vmem:[#allocation79_spill] sm:$0xff]  ;;  %vm13498_vm5 = vcmask 785408  }
 0x684   :  { %13470 = vst [vmem:[#allocation45_spill] sm:$0xff] %v11416_v12  ;;  %4682 = vst [vmem:[#allocation2 + $0x8] sm:$0x3f] %v11416_v12  ;;  %v4670_v9 = vadd.f32 %v4656_v40, %v4617_v49  ;;  %4022 = vrot.lane.b32.xlu0 %v4001_v43, %s13303_s24  ;;  %v4266_v10 = vmul.f32 %v10911_v31, %v13481_v24  ;;  %v4161_v43 = vmul.f32 %v13461_v26, %v13479_v56  ;;  %v13482_v49 = vld [vmem:[#allocation34_spill] sm:$0xff] }
 0x685   :  { %v11428_v34 = vadd.f32 %v4669_v6, %v13469_v39  ;;  %v4638_v30 = vpop.permute.xlu1 %4637  ;;  %3918 = vrot.lane.b32.xlu1 %v3896_v11, %s13301_s16  ;;  %v4319_v3 = vmul.f32 %v10911_v31, %v13482_v49  ;;  %v4445_v6 = vrot.slane %v13484_v48, %v13483_v2  ;;  %v4214_v40 = vmul.f32 %v13461_v26, %v13480_v37  ;;  %v13485_v11 = vld [vmem:[#allocation36_spill] sm:$0xff] }
 0x686   :  { %v11432_v28 = vadd.f32 %v4670_v9, %v13469_v39  ;;  %v4653_v13 = vsel %vm13466_vm2, %v4638_v30, %v4640_v45  ;;  %v4107_v45 = vmul.f32 %v10911_v31, %v13478_v8  ;;  %v13486_v30 = vld [vmem:[#allocation39_spill] sm:$0xff]  ;;  %vm13499_vm2 = vmmov %vm13460_vm3 }
 0x687   :  { %13474 = vst [vmem:[#allocation26_spill] sm:$0xff] %v11428_v34  ;;  %4683 = vst [vmem:[#allocation2 + $0x10] sm:$0x3f] %v11428_v34  ;;  %v4667_v55 = vadd.f32 %v4653_v13, %v4614_v59  ;;  %v4467_v9 = vmul.f32 %v4445_v6, %v13485_v11  ;;  %v4267_v59 = vmul.f32 %v13461_v26, %v13481_v24 }
 0x688   :  { %13475 = vst [vmem:[#allocation72_spill] sm:$0xff] %v11432_v28  ;;  %4684 = vst [vmem:[#allocation2 + $0x18] sm:$0x3f] %v11432_v28  ;;  %4075 = vrot.lane.b32.xlu0 %v4054_v58, %s13304_s20  ;;  %v4520_v13 = vmul.f32 %v4445_v6, %v13486_v30  ;;  %v4320_v58 = vmul.f32 %v13461_v26, %v13482_v49  ;;  %v13496_v49 = vld [vmem:[#allocation65_spill] sm:$0xff] }
 0x689   :  { %v11443_v52 = vadd.f32 %v4667_v55, %v13469_v39  ;;  %3971 = vrot.lane.b32.xlu1 %v3949_v47, %s13302_s21  ;;  %v13487_v55 = vld [vmem:[#allocation75_spill] sm:$0xff] }
 0x68a   :  { %v4449_v47 = vrot.slane %v13484_v48, %v13487_v55 }
 0x68b   :  { %13477 = vst [vmem:[#allocation48_spill] sm:$0xff] %v11443_v52  ;;  %4681 = vst [vmem:[#allocation2] sm:$0x3f] %v11443_v52 }
 0x68c   :  { %4128 = vrot.lane.b32.xlu0 %v4107_v45, %s13167_s2  ;;  %v13488_v45 = vld [vmem:[#allocation38_spill] sm:$0xff] }
 0x68d   :  { %4024 = vrot.lane.b32.xlu1 %v4002_v1, %s13303_s24  ;;  %v4573_v1 = vmul.f32 %v4445_v6, %v13488_v45 }
 0x690   :  { %4181 = vrot.lane.b32.xlu0 %v4160_v17, %s13337_s14  ;;  %v4468_v17 = vmul.f32 %v4449_v47, %v13485_v11  ;;  %v13493_v11 = vld [vmem:[#allocation41_spill] sm:$0xff] }
 0x691   :  { %4077 = vrot.lane.b32.xlu1 %v4055_v5, %s13304_s20  ;;  %v13489_v5 = vld [vmem:[#allocation40_spill] sm:$0xff] }
 0x692   :  { %v4627_v48 = vmul.f32 %v4449_v47, %v13489_v5 }
 0x694   :  { %4234 = vrot.lane.b32.xlu0 %v4213_v14, %s13172_s3  ;;  %v4626_v14 = vmul.f32 %v4445_v6, %v13489_v5  ;;  %v11509_v6 = vpop.permute.xlu1 %3388  ;;  %v13492_v5 = vld [vmem:[#allocation61_spill] sm:$0xff] }
 0x695   :  { %4130 = vrot.lane.b32.xlu1 %v4108_v4, %s13167_s2  ;;  %v4521_v4 = vmul.f32 %v4449_v47, %v13486_v30  ;;  %v13494_v30 = vld [vmem:[#allocation62_spill] sm:$0xff] }
 0x696   :  { %v3345_v50 = vmul.f32 %v13494_v30, %v13493_v11 }
 0x698   :  { %4287 = vrot.lane.b32.xlu0 %v4266_v10, %s13338_s19  ;;  %v11499_v10 = vpop.permute.xlu0 %3386 }
 0x699   :  { %4183 = vrot.lane.b32.xlu1 %v4161_v43, %s13337_s14  ;;  %v4574_v43 = vmul.f32 %v4449_v47, %v13488_v45  ;;  %v11517_v47 = vpop.permute.xlu1 %3441 }
 0x69a   :  { %13490 = vst [vmem:[#allocation53_spill] sm:$0xff] %v11517_v47 }
 0x69c   :  { %4340 = vrot.lane.b32.xlu0 %v4319_v3, %s13268_s22  ;;  %v4689_v3 = vld [vmem:[#allocation2 + $0x8] sm:$0x3f] }
 0x69d   :  { %4236 = vrot.lane.b32.xlu1 %v4214_v40, %s13172_s3  ;;  %v4691_v40 = vld [vmem:[#allocation2 + $0x18] sm:$0x3f] }
 0x6a0   :  { %4488 = vrot.lane.b32.xlu0 %v4467_v9, %s13080_s25  ;;  %v11505_v9 = vpop.permute.xlu0 %3439 }
 0x6a1   :  { %4289 = vrot.lane.b32.xlu1 %v4267_v59, %s13338_s19  ;;  %v4690_v59 = vld [vmem:[#allocation2 + $0x10] sm:$0x3f]  ;;  %v3449_v46 = vsel %vm13460_vm3, %v13496_v49, %v11505_v9  ;;  %vm13500_vm3 = vcmask 777216  }
 0x6a4   :  { %4541 = vrot.lane.b32.xlu0 %v4520_v13, %s13052_s26  ;;  %v11512_v13 = vpop.permute.xlu0 %3492 }
 0x6a5   :  { %4342 = vrot.lane.b32.xlu1 %v4320_v58, %s13268_s22  ;;  %v7857_v58 = vld [vmem:[%s12772_s6] sm:$0xff]   ;;  %v3502_v30 = vsel %vm13468_vm13, %v10729_v54, %v11512_v13 }
 0x6a6   :  { %3153 = vmatpush1.bf16.msra.mxu1 %v7857_v58  ;;  %v7861_v58 = vld [vmem:[%s12772_s6 + $0x20] sm:$0xff]  }
 0x6a8   :  { %4594 = vrot.lane.b32.xlu0 %v4573_v1, %s13054_s27  ;;  %v4688_v1 = vld [vmem:[#allocation2] sm:$0x3f] }
 0x6a9   :  { %4490 = vrot.lane.b32.xlu1 %v4468_v17, %s13080_s25  ;;  %v7858_v17 = vld [vmem:[%s12772_s6 + $0x8] sm:$0xff]  }
 0x6ac   :  { %4647 = vrot.lane.b32.xlu0 %v4626_v14, %s13056_s28  ;;  %v13491_v14 = vmov 0  }
 0x6ad   :  { %4543 = vrot.lane.b32.xlu1 %v4521_v4, %s13052_s26  ;;  %3154 = vmatprep.subr.bf16.mxu1 %v13491_v14  ;;  %v11524_v4 = vpop.permute.xlu0 %3545 }
 0x6ae   :  { %3155 = vmatpush1.bf16.msra.mxu1 %v7858_v17  ;;  %v7862_v17 = vld [vmem:[%s12772_s6 + $0x28] sm:$0xff]  }
 0x6af   :  { %3156 = vmatprep.subr.bf16.mxu1 %v13491_v14 }
 0x6b0   :  { %4706 = vrot.lane.b32.xlu0 %v4689_v3, %s13080_s25  ;;  %v11530_v3 = vpop.permute.xlu1 %3494 }
 0x6b1   :  { %4596 = vrot.lane.b32.xlu1 %v4574_v43, %s13054_s27  ;;  %v7859_v43 = vld [vmem:[%s12772_s6 + $0x10] sm:$0xff]  }
 0x6b2   :  { %3157 = vmatpush1.bf16.msra.mxu1 %v7859_v43 }
 0x6b3   :  { %3158 = vmatprep.subr.bf16.mxu1 %v13491_v14 }
 0x6b4   :  { %4710 = vrot.lane.b32.xlu0 %v4691_v40, %s13080_s25  ;;  %v11535_v40 = vpop.permute.xlu0 %3598 }
 0x6b5   :  { %4649 = vrot.lane.b32.xlu1 %v4627_v48, %s13056_s28  ;;  %v7860_v48 = vld [vmem:[%s12772_s6 + $0x18] sm:$0xff]   ;;  %s13510_s28 = smov 125  }
 0x6b6   :  { %3159 = vmatpush1.bf16.msra.mxu1 %v7860_v48  ;;  %v7863_v48 = vld [vmem:[%s12772_s6 + $0x30] sm:$0xff]  }
 0x6b7   :  { %3160 = vmatprep.subr.bf16.mxu1 %v13491_v14 }
 0x6b9   :  { %4708 = vrot.lane.b32.xlu1 %v4690_v59, %s13080_s25  ;;  %v11538_v59 = vpop.permute.xlu1 %3547 }
 0x6ba   :  { %3161 = vmatpush1.bf16.msra.mxu1 %v7861_v58 }
 0x6bb   :  { %3162 = vmatprep.subr.bf16.mxu1 %v13491_v14 }
 0x6bd   :  { %4704 = vrot.lane.b32.xlu1 %v4688_v1, %s13080_s25  ;;  %v11544_v1 = vpop.permute.xlu0 %3651  ;;  %v11550_v43 = vpop.permute.xlu1 %3600 }
 0x6be   :  { %3163 = vmatpush1.bf16.msra.mxu1 %v7862_v17 }
 0x6bf   :  { %3164 = vmatprep.subr.bf16.mxu1 %v13491_v14 }
 0x6c1   :  { %v11555_v20 = vpop.permute.xlu0 %3704  ;;  %v11558_v28 = vpop.permute.xlu1 %3653 }
 0x6c2   :  { %3165 = vmatpush1.bf16.msra.mxu1 %v7863_v48  ;;  %v3396_v48 = vsel %vm261_vm1, %v13492_v5, %v11499_v10  ;;  %v7864_v5 = vld [vmem:[%s12772_s6 + $0x38] sm:$0xff]  }
 0x6c3   :  { %3166 = vmatprep.subr.bf16.mxu1 %v13491_v14  ;;  %v3410_v56 = vadd.f32 %v3396_v48, %v3345_v50  ;;  %v3555_v50 = vsel %vm13497_vm4, %v10754_v53, %v11524_v4  ;;  %v3397_v48 = vsel %vm261_vm1, %v11499_v10, %v11509_v6  ;;  %v3608_v53 = vsel %vm13498_vm5, %v10779_v22, %v11535_v40 }
 0x6c4   :  { %vm13504_vm5 = vcmask 760832  }
 0x6c5   :  { %v11561_v58 = vpop.permute.xlu0 %3757  ;;  %v11563_v55 = vpop.permute.xlu1 %3706  ;;  %v3463_v21 = vadd.f32 %v3449_v46, %v3410_v56  ;;  %v7865_v56 = vld [vmem:[%s12772_s6 + $0x40] sm:$0xff]  }
 0x6c6   :  { %3167 = vmatpush1.bf16.msra.mxu1 %v7864_v5 }
 0x6c7   :  { %3168 = vmatprep.subr.bf16.mxu1 %v13491_v14 }
 0x6c9   :  { %v11565_v26 = vpop.permute.xlu0 %3810  ;;  %v11567_v17 = vpop.permute.xlu1 %3759 }
 0x6ca   :  { %3169 = vmatpush1.bf16.msra.mxu1 %v7865_v56 }
 0x6cb   :  { %3170 = vmatprep.subr.bf16.mxu1 %v13491_v14 }
 0x6cd   :  { %v11569_v12 = vpop.permute.xlu1 %3812 }
 0x6e2   :  { %v3020_v52 = vpop.permute.xlu0 %3019 }
 0x6e6   :  { %v3024_v34 = vpop.permute.xlu0 %3023 }
 0x6ea   :  { %v11571_v45 = vpop.permute.xlu0 %3863 }
 0x6eb   :  { %v3022_v39 = vpop.permute.xlu1 %3021 }
 0x6ec   :  { %v11579_v24 = vmax.f32 %v11300_v0, %v3022_v39  ;;  %v3027_v49 = vsel %vm261_vm1, %v3020_v52, %v3022_v39  ;;  %v3450_v39 = vsel %vm13499_vm2, %v11505_v9, %v11517_v47  ;;  %v3503_v9 = vsel %vm13468_vm13, %v11512_v13, %v11530_v3  ;;  %vm13509_vm13 = vmmov %vm13504_vm5 }
 0x6ed   :  { %vm13505_vm2 = vcmask 785408  }
 0x6ee   :  { %13495 = vst [vmem:[#allocation68_spill] sm:$0xff] %v11579_v24  ;;  %3038 = vst.msk [vmem:[#allocation3 + $0x8] sm:$0xff] %vm73_vm0, %v11579_v24  ;;  %v11586_v37 = vpop.permute.xlu0 %3916  ;;  %v3516_v24 = vadd.f32 %v3502_v30, %v3463_v21  ;;  %v11620_v21 = vmax.f32 %v11292_v36, %v3027_v49  ;;  %v13501_v30 = vld [vmem:[#allocation58_spill] sm:$0xff] }
 0x6ef   :  { %v3026_v0 = vpop.permute.xlu1 %3025 }
 0x6f0   :  { %v11595_v23 = vmax.f32 %v11335_v15, %v3026_v0  ;;  %v3346_v15 = vmul.f32 %v10911_v31, %v13493_v11  ;;  %v3569_v52 = vadd.f32 %v3555_v50, %v3516_v24  ;;  %v3661_v31 = vsel %vm13500_vm3, %v13397_v38, %v11544_v1  ;;  %v13502_v50 = vld [vmem:[#allocation70_spill] sm:$0xff] }
 0x6f1   :  { %v3028_v22 = vsel %vm261_vm1, %v3024_v34, %v3026_v0  ;;  %v11635_v49 = vrot.slane %v13502_v50, %v13501_v30  ;;  %v7866_v38 = vld [vmem:[%s12772_s6 + $0x48] sm:$0xff]   ;;  %v3714_v0 = vsel %vm609_vm7, %v13402_v44, %v11555_v20  ;;  %v3767_v44 = vsel %vm13504_vm5, %v13407_v42, %v11561_v58  ;;  %v13506_v50 = vld [vmem:[#allocation17_spill] sm:$0xff] }
 0x6f2   :  { %3040 = vst.msk [vmem:[#allocation3 + $0x18] sm:$0xff] %vm73_vm0, %v11595_v23  ;;  %v11607_v54 = vpop.permute.xlu0 %3969  ;;  %v3411_v10 = vadd.f32 %v3397_v48, %v3346_v15  ;;  %v3622_v24 = vadd.f32 %v3608_v53, %v3569_v52  ;;  %v7869_v48 = vld [vmem:[%s12771_s5 + $0x4] ss:$8 sps:$4 sm:$0xff]   ;;  %v3556_v15 = vsel %vm13497_vm4, %v11524_v4, %v11538_v59  ;;  %v11655_v52 = vmax.f32 %v11327_v57, %v3028_v22 }
 0x6f3   :  { %v11614_v46 = vpop.permute.xlu1 %3865  ;;  %v3367_v4 = vmul.f32 %v11635_v49, %v13506_v50  ;;  %3171 = vmatpush1.bf16.msra.mxu1 %v7866_v38  ;;  %v3873_v38 = vsel %vm783_vm10, %v10901_v61, %v11571_v45  ;;  %v3768_v61 = vsel %vm13509_vm13, %v11561_v58, %v11567_v17  ;;  %vm13514_vm4 = vcmask 498688  }
 0x6f4   :  { %v3464_v34 = vadd.f32 %v3450_v39, %v3411_v10  ;;  %v3675_v53 = vadd.f32 %v3661_v31, %v3622_v24  ;;  %v3609_v10 = vsel %vm13505_vm2, %v11535_v40, %v11550_v43  ;;  %5480 = vmatprep.subr.bf16.mxu1 %v7869_v48  ;;  %v3662_v40 = vsel %vm13500_vm3, %v11544_v1, %v11558_v28  ;;  %vm13519_vm5 = vmmov %vm13514_vm4 }
 0x6f5   :  { %v3042_v5 = vld [vmem:[#allocation3 + $0x8] sm:$0xff]  ;;  %vm13523_vm2 = vcmask 228352   ;;  %vm13528_vm13 = vcmask 1031168  }
 0x6f6   :  { %v7654_v36 = vpack.i.bf16 %v3042_v5, %v11620_v21  ;;  %v11637_v47 = vpop.permute.xlu0 %4022  ;;  %v3517_v39 = vadd.f32 %v3503_v9, %v3464_v34  ;;  %v3728_v5 = vadd.f32 %v3714_v0, %v3675_v53  ;;  %v3820_v9 = vsel %vm725_vm9, %v10881_v62, %v11565_v26  ;;  %v13507_v0 = vld [vmem:[#allocation20_spill] sm:$0xff]  ;;  %vm13526_vm3 = vmmov %vm13523_vm2 }
 0x6f7   :  { %v11645_v13 = vpop.permute.xlu1 %3918  ;;  %v3715_v62 = vsel %vm609_vm7, %v11555_v20, %v11563_v55  ;;  %v3473_v48 = vmul.f32 %v11635_v49, %v13507_v0  ;;  %v13516_v0 = vld [vmem:[#allocation24_spill] sm:$0xff] }
 0x6f8   :  { %7655 = vrot.lane.b32.xlu0 %v7654_v36, %s13503_s13  ;;  %v3570_v22 = vadd.f32 %v3556_v15, %v3517_v39  ;;  %v3781_v24 = vadd.f32 %v3767_v44, %v3728_v5  ;;  %v13508_v15 = vld [vmem:[#allocation19_spill] sm:$0xff]  ;;  %v3926_v44 = vsel %vm841_vm11, %v10937_v41, %v11586_v37  ;;  %v3979_v5 = vsel %vm899_vm12, %v13417_v63, %v11607_v54 }
 0x6f9   :  { %v3044_v56 = vld [vmem:[#allocation3 + $0x18] sm:$0xff]  ;;  %v3420_v1 = vmul.f32 %v11635_v49, %v13508_v15  ;;  %v3821_v41 = vsel %vm725_vm9, %v11565_v26, %v11569_v12  ;;  %v3874_v63 = vsel %vm783_vm10, %v11571_v45, %v11614_v46 }
 0x6fa   :  { %v7659_v31 = vpack.i.bf16 %v3044_v56, %v11655_v52  ;;  %v11667_v57 = vpop.permute.xlu0 %4075  ;;  %v3623_v36 = vadd.f32 %v3609_v10, %v3570_v22  ;;  %v3834_v34 = vadd.f32 %v3820_v9, %v3781_v24  ;;  %v13513_v22 = vld [vmem:[#allocation21_spill] sm:$0xff]  ;;  %v4032_v24 = vsel %vm13514_vm4, %v13423_v32, %v11637_v47  ;;  %v13517_v15 = vld [vmem:[#allocation23_spill] sm:$0xff] }
 0x6fb   :  { %v11672_v42 = vpop.permute.xlu1 %3971  ;;  %v3526_v58 = vmul.f32 %v11635_v49, %v13513_v22  ;;  %v3927_v32 = vsel %vm841_vm11, %v11586_v37, %v11645_v13  ;;  %v3632_v45 = vmul.f32 %v11635_v49, %v13517_v15  ;;  %vm13532_vm4 = vcmask 1022976  }
 0x6fc   :  { %3390 = vrot.lane.b32.xlu0 %v3367_v4, %s13080_s25  ;;  %7660 = vrot.lane.b32.xlu1 %v7659_v31, %s13503_s13  ;;  %v3676_v39 = vadd.f32 %v3662_v40, %v3623_v36  ;;  %v3887_v20 = vadd.f32 %v3873_v38, %v3834_v34  ;;  %v13512_v4 = vld [vmem:[#allocation22_spill] sm:$0xff] }
 0x6fd   :  { %v3579_v31 = vmul.f32 %v11635_v49, %v13512_v4 }
 0x6fe   :  { %v4129_v53 = vpop.permute.xlu0 %4128  ;;  %v3729_v10 = vadd.f32 %v3715_v62, %v3676_v39  ;;  %v3940_v50 = vadd.f32 %v3926_v44, %v3887_v20  ;;  %v4085_v62 = vsel %vm1015_vm14, %v13429_v19, %v11667_v57  ;;  %v3980_v19 = vsel %vm899_vm12, %v11607_v54, %v11672_v42 }
 0x6ff   :  { %v11692_v56 = vpop.permute.xlu1 %4024  ;;  %v4138_v44 = vsel %vm73_vm0, %v13433_v35, %v4129_v53 }
 0x700   :  { %3496 = vrot.lane.b32.xlu0 %v3473_v48, %s13510_s28  ;;  %3443 = vrot.lane.b32.xlu1 %v3420_v1, %s13511_s1  ;;  %v3782_v40 = vadd.f32 %v3768_v61, %v3729_v10  ;;  %v3993_v26 = vadd.f32 %v3979_v5, %v3940_v50  ;;  %v3685_v48 = vmul.f32 %v11635_v49, %v13516_v0  ;;  %v13518_v10 = vld [vmem:[#allocation91_spill] sm:$0xff]  ;;  %v13520_v50 = vld [vmem:[#allocation29_spill] sm:$0xff] }
 0x701   :  { %v3791_v4 = vmul.f32 %v11635_v49, %v13520_v50  ;;  %v3897_v0 = vmul.f32 %v11635_v49, %v13458_v16  ;;  %v4056_v50 = vmul.f32 %v11635_v49, %v13476_v7 }
 0x702   :  { %v4182_v9 = vpop.permute.xlu0 %4181  ;;  %v3835_v38 = vadd.f32 %v3821_v41, %v3782_v40  ;;  %v4046_v34 = vadd.f32 %v4032_v24, %v3993_v26  ;;  %v4033_v41 = vsel %vm13519_vm5, %v11637_v47, %v11692_v56  ;;  %v13522_v24 = vld [vmem:[#allocation97_spill] sm:$0xff]  ;;  %vm13536_vm5 = vcmask 1014784  }
 0x703   :  { %v11712_v36 = vpop.permute.xlu1 %4077  ;;  %v4191_v5 = vsel %vm1130_vm15, %v13518_v10, %v4182_v9 }
 0x704   :  { %3602 = vrot.lane.b32.xlu0 %v3579_v31, %s13317_s4  ;;  %3549 = vrot.lane.b32.xlu1 %v3526_v58, %s13515_s18  ;;  %v3888_v39 = vadd.f32 %v3874_v63, %v3835_v38  ;;  %v4099_v20 = vadd.f32 %v4085_v62, %v4046_v34  ;;  %v13521_v31 = vld [vmem:[#allocation25_spill] sm:$0xff]  ;;  %v4086_v26 = vsel %vm1015_vm14, %v11667_v57, %v11712_v36 }
 0x705   :  { %v3738_v54 = vmul.f32 %v11635_v49, %v13521_v31 }
 0x706   :  { %v4235_v1 = vpop.permute.xlu0 %4234  ;;  %v3941_v37 = vadd.f32 %v3927_v32, %v3888_v39  ;;  %v4152_v35 = vadd.f32 %v4138_v44, %v4099_v20  ;;  %v13524_v44 = vld [vmem:[#allocation18_spill] sm:$0xff]  ;;  %v4003_v20 = vmul.f32 %v11635_v49, %v13467_v27  ;;  %v4393_v27 = vrot.slane %v11248_v29, %v13483_v2  ;;  %v13527_v2 = vld [vmem:[#allocation44_spill] sm:$0xff] }
 0x707   :  { %v11731_v61 = vpop.permute.xlu1 %4130  ;;  %v4244_v63 = vsel %vm1188_vm6, %v13522_v24, %v4235_v1  ;;  %v4389_v16 = vrot.slane %v11248_v29, %v13524_v44  ;;  %v13534_v44 = vld [vmem:[#allocation37_spill] sm:$0xff] }
 0x708   :  { %3708 = vrot.lane.b32.xlu0 %v3685_v48, %s13323_s30  ;;  %3655 = vrot.lane.b32.xlu1 %v3632_v45, %s13319_s29  ;;  %v3994_v58 = vadd.f32 %v3980_v19, %v3941_v37  ;;  %v4205_v38 = vadd.f32 %v4191_v5, %v4152_v35  ;;  %v4139_v32 = vsel %vm73_vm0, %v4129_v53, %v11731_v61 }
 0x709   :  { %v3844_v48 = vmul.f32 %v11635_v49, %v13327_v51 }
 0x70a   :  { %v4288_v22 = vpop.permute.xlu0 %4287  ;;  %v4047_v47 = vadd.f32 %v4033_v41, %v3994_v58  ;;  %v4258_v34 = vadd.f32 %v4244_v63, %v4205_v38  ;;  %v13525_v58 = vld [vmem:[#allocation55_spill] sm:$0xff]  ;;  %v13529_v38 = vld [vmem:[#allocation32_spill] sm:$0xff] }
 0x70b   :  { %v11747_v40 = vpop.permute.xlu1 %4183  ;;  %v4297_v62 = vsel %vm1246_vm8, %v11079_v33, %v4288_v22 }
 0x70c   :  { %3814 = vrot.lane.b32.xlu0 %v3791_v4, %s13299_s17  ;;  %3761 = vrot.lane.b32.xlu1 %v3738_v54, %s13298_s23  ;;  %v4100_v15 = vadd.f32 %v4086_v26, %v4047_v47  ;;  %v4192_v33 = vsel %vm1130_vm15, %v4182_v9, %v11747_v40  ;;  %v4311_v53 = vadd.f32 %v4297_v62, %v4258_v34  ;;  %v13530_v62 = vld [vmem:[#allocation31_spill] sm:$0xff] }
 0x70d   :  { %v4215_v47 = vmul.f32 %v11635_v49, %v13529_v38 }
 0x70e   :  { %v4341_v57 = vpop.permute.xlu0 %4340  ;;  %v4153_v19 = vadd.f32 %v4139_v32, %v4100_v15  ;;  %v4162_v32 = vmul.f32 %v11635_v49, %v13530_v62 }
 0x70f   :  { %v11764_v45 = vpop.permute.xlu1 %4236  ;;  %v4350_v39 = vsel %vm13523_vm2, %v11147_v18, %v4341_v57  ;;  %v3950_v18 = vmul.f32 %v11635_v49, %v13463_v60  ;;  %v4109_v60 = vmul.f32 %v11635_v49, %v13478_v8  ;;  %v4410_v8 = vmul.f32 %v4393_v27, %v13452_v25  ;;  %vm13537_vm2 = vmmov %vm13528_vm13  ;;  %v13538_v27 = vld [vmem:[#allocation39_spill] sm:$0xff] }
 0x710   :  { %3920 = vrot.lane.b32.xlu0 %v3897_v0, %s13301_s16  ;;  %3867 = vrot.lane.b32.xlu1 %v3844_v48, %s13300_s15  ;;  %v4245_v51 = vsel %vm1188_vm6, %v4235_v1, %v11764_v45  ;;  %v4364_v37 = vadd.f32 %v4350_v39, %v4311_v53  ;;  %v4206_v10 = vadd.f32 %v4192_v33, %v4153_v19  ;;  %v13533_v33 = vld [vmem:[#allocation34_spill] sm:$0xff] }
 0x711   :  { %v4409_v1 = vmul.f32 %v4389_v16, %v13452_v25  ;;  %v4321_v53 = vmul.f32 %v11635_v49, %v13533_v33  ;;  %v4268_v16 = vmul.f32 %v11635_v49, %v13534_v44  ;;  %v13545_v33 = vld [vmem:[#allocation45_spill] sm:$0xff]  ;;  %v13546_v44 = vld [vmem:[#allocation26_spill] sm:$0xff] }
 0x712   :  { %v4489_v9 = vpop.permute.xlu0 %4488  ;;  %v4259_v35 = vadd.f32 %v4245_v51, %v4206_v10  ;;  %v8083_v51 = vld [vmem:[%s12766_s0 + $0x3] ss:$2 sm:$0xff] }
 0x713   :  { %v11780_v5 = vpop.permute.xlu1 %4289  ;;  %v4416_v4 = vadd.f32 %v4409_v1, %v4364_v37  ;;  %v4498_v24 = vsel %vm261_vm1, %v13525_v58, %v4489_v9  ;;  %v13535_v10 = vld [vmem:[#allocation46_spill] sm:$0xff] }
 0x714   :  { %v4298_v41 = vsel %vm1246_vm8, %v4288_v22, %v11780_v5  ;;  %4026 = vrot.lane.b32.xlu0 %v4003_v20, %s13303_s24  ;;  %3973 = vrot.lane.b32.xlu1 %v3950_v18, %s13302_s21  ;;  %v4453_v20 = vrot.slane %v8083_v51, %v13501_v30  ;;  %v13539_v30 = vld [vmem:[#allocation36_spill] sm:$0xff] }
 0x715   :  { %v4312_v54 = vadd.f32 %v4298_v41, %v4259_v35  ;;  %v4512_v26 = vadd.f32 %v4498_v24, %v4416_v4  ;;  %v13540_v4 = vld [vmem:[#allocation43_spill] sm:$0xff] }
 0x716   :  { %v4542_v31 = vpop.permute.xlu0 %4541 }
 0x717   :  { %v11793_v22 = vpop.permute.xlu1 %4342  ;;  %v4551_v7 = vsel %vm13528_vm13, %v13527_v2, %v4542_v31  ;;  %v13543_v2 = vld [vmem:[#allocation38_spill] sm:$0xff]  ;;  %vm13544_vm13 = vmmov %vm13536_vm5 }
 0x718   :  { %v4351_v63 = vsel %vm13526_vm3, %v4341_v57, %v11793_v22  ;;  %4132 = vrot.lane.b32.xlu0 %v4109_v60, %s13167_s2  ;;  %4079 = vrot.lane.b32.xlu1 %v4056_v50, %s13304_s20  ;;  %v13531_v57 = vld [vmem:[#allocation52_spill] sm:$0xff]  ;;  %v4565_v39 = vadd.f32 %v4551_v7, %v4512_v26  ;;  %v4522_v60 = vmul.f32 %v4453_v20, %v13538_v27  ;;  %vm13541_vm3 = vmmov %vm13532_vm4 }
 0x719   :  { %v4365_v29 = vadd.f32 %v4351_v63, %v4312_v54  ;;  %v4469_v50 = vmul.f32 %v4453_v20, %v13539_v30  ;;  %v4575_v7 = vmul.f32 %v4453_v20, %v13543_v2  ;;  %v4695_v27 = vld [vmem:[#allocation2 + $0x38] sm:$0x3f]  ;;  %v13549_v2 = vld [vmem:[#allocation66_spill] sm:$0xff] }
 0x71a   :  { %v4595_v34 = vpop.permute.xlu0 %4594 }
 0x71b   :  { %v11808_v0 = vpop.permute.xlu1 %4490  ;;  %v4417_v48 = vadd.f32 %v4410_v8, %v4365_v29  ;;  %v4604_v15 = vsel %vm13532_vm4, %v13531_v57, %v4595_v34  ;;  %v13542_v29 = vld [vmem:[#allocation40_spill] sm:$0xff]  ;;  %vm13548_vm4 = vcmask 916480  }
 0x71c   :  { %4238 = vrot.lane.b32.xlu0 %v4215_v47, %s13172_s3  ;;  %4185 = vrot.lane.b32.xlu1 %v4162_v32, %s13337_s14  ;;  %v4618_v19 = vadd.f32 %v4604_v15, %v4565_v39  ;;  %v4499_v1 = vsel %vm261_vm1, %v4489_v9, %v11808_v0  ;;  %v4628_v8 = vmul.f32 %v4453_v20, %v13542_v29  ;;  %v13547_v20 = vld [vmem:[#allocation48_spill] sm:$0xff]  ;;  %s13572_s14 = smov 110  }
 0x71d   :  { %v4513_v58 = vadd.f32 %v4499_v1, %v4417_v48 }
 0x71e   :  { %v4648_v18 = vpop.permute.xlu0 %4647 }
 0x71f   :  { %v11822_v37 = vpop.permute.xlu1 %4543  ;;  %v4657_v41 = vsel %vm13536_vm5, %v13535_v10, %v4648_v18  ;;  %vm13551_vm5 = vmmov %vm13548_vm4 }
 0x720   :  { %4344 = vrot.lane.b32.xlu0 %v4321_v53, %s13268_s22  ;;  %4291 = vrot.lane.b32.xlu1 %v4268_v16, %s13338_s19  ;;  %v4671_v49 = vadd.f32 %v4657_v41, %v4618_v19  ;;  %v4552_v35 = vsel %vm13537_vm2, %v4542_v31, %v11822_v37  ;;  %s13576_s19 = smov 79  }
 0x721   :  { %v4566_v31 = vadd.f32 %v4552_v35, %v4513_v58 }
 0x722   :  { %v11835_v54 = vadd.f32 %v4671_v49, %v13540_v4  ;;  %v4707_v63 = vpop.permute.xlu0 %4706 }
 0x723   :  { %v11837_v24 = vpop.permute.xlu1 %4596 }
 0x724   :  { %v4605_v9 = vsel %vm13541_vm3, %v4595_v34, %v11837_v24  ;;  %4545 = vrot.lane.b32.xlu0 %v4522_v60, %s13511_s1  ;;  %4492 = vrot.lane.b32.xlu1 %v4469_v50, %s13080_s25  ;;  %4685 = vst [vmem:[#allocation2 + $0x20] sm:$0x3f] %v11835_v54 }
 0x725   :  { %v4619_v26 = vadd.f32 %v4605_v9, %v4566_v31 }
 0x726   :  { %v11855_v48 = vpop.permute.xlu0 %4710 }
 0x727   :  { %v11846_v38 = vpop.permute.xlu1 %4649 }
 0x728   :  { %v4658_v47 = vsel %vm13544_vm13, %v4648_v18, %v11846_v38  ;;  %4651 = vrot.lane.b32.xlu0 %v4628_v8, %s13515_s18  ;;  %4598 = vrot.lane.b32.xlu1 %v4575_v7, %s13510_s28  ;;  %v3347_v7 = vmul.f32 %v13549_v2, %v13493_v11  ;;  %v7867_v11 = vld [vmem:[%s12771_s5] ss:$8 sps:$4 sm:$0xff]  }
 0x729   :  { %v4672_v62 = vadd.f32 %v4658_v47, %v4619_v26  ;;  %v13550_v26 = vld [vmem:[#allocation68_spill] sm:$0xff] }
 0x72b   :  { %v11853_v32 = vadd.f32 %v4672_v62, %v13540_v4  ;;  %v4709_v34 = vpop.permute.xlu1 %4708  ;;  %v4692_v57 = vld [vmem:[#allocation2 + $0x20] sm:$0x3f] }
 0x72c   :  { %v4721_v15 = vsel %vm261_vm1, %v4707_v63, %v4709_v34  ;;  %v4722_v39 = vsel %vm261_vm1, %v4709_v34, %v11855_v48  ;;  %4712 = vrot.lane.b32.xlu1 %v4692_v57, %s13080_s25 }
 0x72d   :  { %4686 = vst [vmem:[#allocation2 + $0x28] sm:$0x3f] %v11853_v32  ;;  %v11863_v53 = vmax.f32 %v13545_v33, %v4721_v15  ;;  %v11866_v16 = vmax.f32 %v13546_v44, %v4722_v39 }
 0x72f   :  { %4742 = vst [vmem:[#allocation2 + $0x8] sm:$0x3f] %v11863_v53  ;;  %4743 = vst [vmem:[#allocation2 + $0x10] sm:$0x3f] %v11866_v16  ;;  %v4705_v19 = vpop.permute.xlu1 %4704 }
 0x730   :  { %v4720_v51 = vsel %vm261_vm1, %v4705_v19, %v4707_v63  ;;  %v13552_v19 = vld [vmem:[#allocation53_spill] sm:$0xff] }
 0x731   :  { %v11872_v18 = vmax.f32 %v13547_v20, %v4720_v51 }
 0x733   :  { %4741 = vst [vmem:[#allocation2] sm:$0x3f] %v11872_v18 }
 0x734   :  { %v4693_v10 = vld [vmem:[#allocation2 + $0x28] sm:$0x3f] }
 0x735   :  { %4714 = vrot.lane.b32.xlu0 %v4693_v10, %s13080_s25 }
 0x736   :  { %v4749_v41 = vld [vmem:[#allocation2 + $0x8] sm:$0x3f]  ;;  %v4750_v1 = vld [vmem:[#allocation2 + $0x10] sm:$0x3f] }
 0x737   :  { %v7664_v49 = vpack.i.bf16 %v4750_v1, %v4749_v41 }
 0x739   :  { %7665 = vrot.lane.b32.xlu1 %v7664_v49, %s13317_s4 }
 0x73a   :  { %v4748_v35 = vld [vmem:[#allocation2] sm:$0x3f] }
 0x73b   :  { %4764 = vrot.lane.b32.xlu0 %v4748_v35, %s13317_s4  ;;  %v7870_v35 = vld [vmem:[%s12771_s5 + $0x10] ss:$8 sps:$4 sm:$0xff]  }
 0x73f   :  { %4718 = vrot.lane.b32.xlu0 %v4695_v27, %s13080_s25 }
 0x76a   :  { %v7656_v60 = vpop.permute.xlu0 %7655 }
 0x76b   :  { %v7658_v30 = vunpack.i.h.bf16 %v7656_v60  ;;  %v7657_v50 = vunpack.i.l.bf16 %v7656_v60 }
 0x76d   :  { %v3057_v31 = vsel %vm13548_vm4, %v7657_v50, %v7658_v30  ;;  %v3064_v47 = vmax.f32 %v13550_v26, %v7658_v30  ;;  %vm13553_vm4 = vcmask 785408  }
 0x76e   :  { %v7661_v58 = vpop.permute.xlu1 %7660  ;;  %v3391_v9 = vpop.permute.xlu0 %3390  ;;  %v3063_v57 = vmax.f32 %v11620_v21, %v3057_v31 }
 0x76f   :  { %v7663_v63 = vunpack.i.h.bf16 %v7661_v58  ;;  %v7662_v29 = vunpack.i.l.bf16 %v7661_v58  ;;  %v3398_v8 = vsel %vm261_vm1, %v11509_v6, %v3391_v9  ;;  %v7873_v9 = vld [vmem:[%s12771_s5 + $0x20] ss:$8 sps:$4 sm:$0xff]  }
 0x770   :  { %v3412_v39 = vadd.f32 %v3398_v8, %v3347_v7  ;;  %v7876_v7 = vld [vmem:[%s12771_s5 + $0x30] ss:$8 sps:$4 sm:$0xff]  }
 0x771   :  { %v3066_v62 = vmax.f32 %v11595_v23, %v7663_v63  ;;  %v3058_v34 = vsel %vm13551_vm5, %v7662_v29, %v7663_v63  ;;  %v7872_v23 = vld [vmem:[%s12771_s5 + $0x14] ss:$8 sps:$4 sm:$0xff]   ;;  %vm13554_vm5 = vcmask 777216  }
 0x772   :  { %v3065_v15 = vmax.f32 %v11655_v52, %v3058_v34  ;;  %v3444_v33 = vpop.permute.xlu1 %3443  ;;  %v3497_v44 = vpop.permute.xlu0 %3496  ;;  %v7878_v63 = vld [vmem:[%s12771_s5 + $0x34] ss:$8 sps:$4 sm:$0xff]  }
 0x773   :  { %v3451_v51 = vsel %vm13537_vm2, %v13552_v19, %v3444_v33  ;;  %v3068_v6 = vpack.c.bf16 %v3066_v62, %v3064_v47  ;;  %v3504_v21 = vsel %vm13541_vm3, %v11530_v3, %v3497_v44  ;;  %v7875_v3 = vld [vmem:[%s12771_s5 + $0x24] ss:$8 sps:$4 sm:$0xff]   ;;  %vm13555_vm2 = vcmask 760832   ;;  %v7884_v33 = vld [vmem:[%s12771_s5 + $0x54] ss:$8 sps:$4 sm:$0xff]  }
 0x774   :  { %v3067_v20 = vpack.c.bf16 %v3065_v15, %v3063_v57  ;;  %v3465_v10 = vadd.f32 %v3451_v51, %v3412_v39  ;;  %v7881_v47 = vld [vmem:[%s12771_s5 + $0x44] ss:$8 sps:$4 sm:$0xff]   ;;  %v7879_v15 = vld [vmem:[%s12771_s5 + $0x40] ss:$8 sps:$4 sm:$0xff]   ;;  %vm13556_vm3 = vcmask 498688  }
 0x775   :  { %7024 = vmatprep.mubr.msk.bf16.mxu1 %vm73_vm0, %v3068_v6  ;;  %v7882_v6 = vld [vmem:[%s12771_s5 + $0x50] ss:$8 sps:$4 sm:$0xff]  }
 0x776   :  { %v3518_v52 = vadd.f32 %v3504_v21, %v3465_v10  ;;  %v3550_v41 = vpop.permute.xlu1 %3549  ;;  %v3603_v1 = vpop.permute.xlu0 %3602  ;;  %3185 = vmatmul.mubr.bf16.vlgmr.msra.gmra.mrb[4].mxu1 %v3067_v20  ;;  %v7887_v20 = vld [vmem:[%s12771_s5 + $0x64] ss:$8 sps:$4 sm:$0xff]  }
 0x777   :  { %v3557_v49 = vsel %vm13544_vm13, %v11538_v59, %v3550_v41  ;;  %5481 = vmatpush1.bf16.msra.mxu1 %v7867_v11  ;;  %v3610_v60 = vsel %vm13553_vm4, %v11550_v43, %v3603_v1  ;;  %v7890_v1 = vld [vmem:[%s12771_s5 + $0x74] ss:$8 sps:$4 sm:$0xff]  }
 0x778   :  { %v3571_v27 = vadd.f32 %v3557_v49, %v3518_v52  ;;  %5482 = vmatprep.subr.bf16.mxu1 %v7872_v23  ;;  %v7885_v52 = vld [vmem:[%s12771_s5 + $0x60] ss:$8 sps:$4 sm:$0xff]  }
 0x77a   :  { %v3624_v30 = vadd.f32 %v3610_v60, %v3571_v27  ;;  %v3656_v50 = vpop.permute.xlu1 %3655  ;;  %v3709_v58 = vpop.permute.xlu0 %3708 }
 0x77b   :  { %v3663_v59 = vsel %vm13554_vm5, %v11558_v28, %v3656_v50  ;;  %5483 = vmatpush1.bf16.msra.mxu1 %v7870_v35  ;;  %v3716_v43 = vsel %vm609_vm7, %v11563_v55, %v3709_v58  ;;  %vm13562_vm5 = vmmov %vm13553_vm4 }
 0x77c   :  { %v3677_v31 = vadd.f32 %v3663_v59, %v3624_v30  ;;  %5484 = vmatprep.subr.bf16.mxu1 %v7875_v3  ;;  %v7888_v3 = vld [vmem:[%s12771_s5 + $0x70] ss:$8 sps:$4 sm:$0xff]   ;;  %v7893_v30 = vld [vmem:[%s12771_s5 + $0x84] ss:$8 sps:$4 sm:$0xff]  }
 0x77e   :  { %v3730_v29 = vadd.f32 %v3716_v43, %v3677_v31  ;;  %v3762_v8 = vpop.permute.xlu1 %3761  ;;  %v3815_v2 = vpop.permute.xlu0 %3814  ;;  %v7891_v43 = vld [vmem:[%s12771_s5 + $0x80] ss:$8 sps:$4 sm:$0xff]  }
 0x77f   :  { %v3769_v28 = vsel %vm13555_vm2, %v11567_v17, %v3762_v8  ;;  %5485 = vmatpush1.bf16.msra.mxu1 %v7873_v9  ;;  %v3822_v55 = vsel %vm725_vm9, %v11569_v12, %v3815_v2  ;;  %v13557_v9 = vld [vmem:[#allocation75_spill] sm:$0xff]  ;;  %vm13563_vm2 = vmmov %vm13553_vm4 }
 0x780   :  { %v3783_v26 = vadd.f32 %v3769_v28, %v3730_v29  ;;  %5486 = vmatprep.subr.bf16.mxu1 %v7878_v63 }
 0x782   :  { %v3836_v62 = vadd.f32 %v3822_v55, %v3783_v26  ;;  %v3868_v34 = vpop.permute.xlu1 %3867  ;;  %v3921_v57 = vpop.permute.xlu0 %3920  ;;  %v7899_v55 = vld [vmem:[%s12771_s5 + $0xa4] ss:$8 sps:$4 sm:$0xff]  }
 0x783   :  { %v3875_v17 = vsel %vm783_vm10, %v11614_v46, %v3868_v34  ;;  %5487 = vmatpush1.bf16.msra.mxu1 %v7876_v7  ;;  %v3928_v12 = vsel %vm841_vm11, %v11645_v13, %v3921_v57  ;;  %v7897_v57 = vld [vmem:[%s12771_s5 + $0xa0] ss:$8 sps:$4 sm:$0xff]  }
 0x784   :  { %v3889_v39 = vadd.f32 %v3875_v17, %v3836_v62  ;;  %5488 = vmatprep.subr.bf16.mxu1 %v7881_v47 }
 0x786   :  { %v3942_v44 = vadd.f32 %v3928_v12, %v3889_v39  ;;  %v3974_v19 = vpop.permute.xlu1 %3973  ;;  %v4027_v51 = vpop.permute.xlu0 %4026  ;;  %v7902_v39 = vld [vmem:[%s12771_s5 + $0xb4] ss:$8 sps:$4 sm:$0xff]  }
 0x787   :  { %v3981_v46 = vsel %vm899_vm12, %v11672_v42, %v3974_v19  ;;  %5489 = vmatpush1.bf16.msra.mxu1 %v7879_v15  ;;  %v4034_v13 = vsel %vm13556_vm3, %v11692_v56, %v4027_v51  ;;  %vm13564_vm3 = vmmov %vm13563_vm2 }
 0x788   :  { %v3995_v11 = vadd.f32 %v3981_v46, %v3942_v44  ;;  %5490 = vmatprep.subr.bf16.mxu1 %v7884_v33  ;;  %v7900_v44 = vld [vmem:[%s12771_s5 + $0xb0] ss:$8 sps:$4 sm:$0xff]  }
 0x789   :  { %v13561_v46 = vld [vmem:[#allocation72_spill] sm:$0xff] }
 0x78a   :  { %v4048_v10 = vadd.f32 %v4034_v13, %v3995_v11  ;;  %v4080_v23 = vpop.permute.xlu1 %4079  ;;  %v4133_v21 = vpop.permute.xlu0 %4132 }
 0x78b   :  { %v4087_v42 = vsel %vm1015_vm14, %v11712_v36, %v4080_v23  ;;  %5491 = vmatpush1.bf16.msra.mxu1 %v7882_v6  ;;  %v4140_v56 = vsel %vm73_vm0, %v11731_v61, %v4133_v21 }
 0x78c   :  { %v4101_v41 = vadd.f32 %v4087_v42, %v4048_v10  ;;  %5492 = vmatprep.subr.bf16.mxu1 %v7887_v20  ;;  %v7911_v10 = vld [vmem:[%s12771_s5 + $0xe4] ss:$8 sps:$4 sm:$0xff]  }
 0x78e   :  { %v4154_v49 = vadd.f32 %v4140_v56, %v4101_v41  ;;  %v4186_v35 = vpop.permute.xlu1 %4185  ;;  %v4239_v27 = vpop.permute.xlu0 %4238 }
 0x78f   :  { %v4193_v36 = vsel %vm1130_vm15, %v11747_v40, %v4186_v35  ;;  %5493 = vmatpush1.bf16.msra.mxu1 %v7885_v52  ;;  %v4246_v61 = vsel %vm1188_vm6, %v11764_v45, %v4239_v27  ;;  %v8084_v40 = vld [vmem:[%s12766_s0 + $0x3] ss:$2 sm:$0xff]  ;;  %v7896_v45 = vld [vmem:[%s12771_s5 + $0x94] ss:$8 sps:$4 sm:$0xff]   ;;  %vm13558_vm6 = vcmask 228352   ;;  %vm13560_vm15 = vcmask 1022976  }
 0x790   :  { %v4207_v60 = vadd.f32 %v4193_v36, %v4154_v49  ;;  %5494 = vmatprep.subr.bf16.mxu1 %v7890_v1  ;;  %v4397_v31 = vrot.slane %v8084_v40, %v13557_v9  ;;  %v7909_v52 = vld [vmem:[%s12771_s5 + $0xe0] ss:$8 sps:$4 sm:$0xff]   ;;  %v7912_v27 = vld [vmem:[%s12771_s5 + $0xf0] ss:$8 sps:$4 sm:$0xff]   ;;  %s13569_s0 = smov 127  }
 0x791   :  { %v7918_v9 = vld [vmem:[%s12771_s5 + $0x110] ss:$8 sps:$4 sm:$0xff]  }
 0x792   :  { %v4260_v50 = vadd.f32 %v4246_v61, %v4207_v60  ;;  %v4292_v58 = vpop.permute.xlu1 %4291  ;;  %v4345_v59 = vpop.permute.xlu0 %4344  ;;  %v4411_v28 = vmul.f32 %v4397_v31, %v13452_v25  ;;  %v7917_v60 = vld [vmem:[%s12771_s5 + $0x104] ss:$8 sps:$4 sm:$0xff]  }
 0x793   :  { %v4299_v63 = vsel %vm1246_vm8, %v11780_v5, %v4292_v58  ;;  %5495 = vmatpush1.bf16.msra.mxu1 %v7888_v3  ;;  %v4352_v8 = vsel %vm13558_vm6, %v11793_v22, %v4345_v59  ;;  %v7894_v5 = vld [vmem:[%s12771_s5 + $0x90] ss:$8 sps:$4 sm:$0xff]   ;;  %vm13559_vm8 = vcmask 1031168   ;;  %v7915_v59 = vld [vmem:[%s12771_s5 + $0x100] ss:$8 sps:$4 sm:$0xff]   ;;  %vm3193_vm6 = vcmask 253952  }
 0x794   :  { %v4313_v29 = vadd.f32 %v4299_v63, %v4260_v50  ;;  %5496 = vmatprep.subr.bf16.mxu1 %v7893_v30  ;;  %v7923_v31 = vld [vmem:[%s12771_s5 + $0x124] ss:$8 sps:$4 sm:$0xff]   ;;  %v7921_v63 = vld [vmem:[%s12771_s5 + $0x120] ss:$8 sps:$4 sm:$0xff]  }
 0x796   :  { %v4366_v2 = vadd.f32 %v4352_v8, %v4313_v29  ;;  %v4493_v7 = vpop.permute.xlu1 %4492  ;;  %v4546_v26 = vpop.permute.xlu0 %4545  ;;  %v7924_v29 = vld [vmem:[%s12771_s5 + $0x130] ss:$8 sps:$4 sm:$0xff]   ;;  %v7927_v8 = vld [vmem:[%s12771_s5 + $0x140] ss:$8 sps:$4 sm:$0xff]  }
 0x797   :  { %5497 = vmatpush1.bf16.msra.mxu1 %v7891_v43  ;;  %v4500_v62 = vsel %vm261_vm1, %v11808_v0, %v4493_v7  ;;  %v4553_v25 = vsel %vm13559_vm8, %v11822_v37, %v4546_v26  ;;  %v7926_v43 = vld [vmem:[%s12771_s5 + $0x134] ss:$8 sps:$4 sm:$0xff]   ;;  %v7935_v7 = vld [vmem:[%s12771_s5 + $0x164] ss:$8 sps:$4 sm:$0xff]   ;;  %v7933_v26 = vld [vmem:[%s12771_s5 + $0x160] ss:$8 sps:$4 sm:$0xff]  }
 0x798   :  { %v4418_v47 = vadd.f32 %v4411_v28, %v4366_v2  ;;  %5498 = vmatprep.subr.bf16.mxu1 %v7896_v45  ;;  %v7929_v45 = vld [vmem:[%s12771_s5 + $0x144] ss:$8 sps:$4 sm:$0xff]   ;;  %v7932_v2 = vld [vmem:[%s12771_s5 + $0x154] ss:$8 sps:$4 sm:$0xff]   ;;  %v7930_v28 = vld [vmem:[%s12771_s5 + $0x150] ss:$8 sps:$4 sm:$0xff]  }
 0x799   :  { %vm13566_vm8 = vmmov %vm13563_vm2 }
 0x79a   :  { %v4514_v22 = vadd.f32 %v4500_v62, %v4418_v47  ;;  %v4599_v34 = vpop.permute.xlu1 %4598  ;;  %v4652_v15 = vpop.permute.xlu0 %4651  ;;  %v7936_v47 = vld [vmem:[%s12771_s5 + $0x170] ss:$8 sps:$4 sm:$0xff]   ;;  %v7939_v62 = vld [vmem:[%s12771_s5 + $0x180] ss:$8 sps:$4 sm:$0xff]  }
 0x79b   :  { %5499 = vmatpush1.bf16.msra.mxu1 %v7894_v5  ;;  %v4606_v0 = vsel %vm13560_vm15, %v11837_v24, %v4599_v34  ;;  %v4659_v37 = vsel %vm13544_vm13, %v11846_v38, %v4652_v15  ;;  %v7905_v24 = vld [vmem:[%s12771_s5 + $0xc4] ss:$8 sps:$4 sm:$0xff]   ;;  %v7903_v38 = vld [vmem:[%s12771_s5 + $0xc0] ss:$8 sps:$4 sm:$0xff]   ;;  %v7938_v5 = vld [vmem:[%s12771_s5 + $0x174] ss:$8 sps:$4 sm:$0xff]  }
 0x79c   :  { %v4567_v17 = vadd.f32 %v4553_v25, %v4514_v22  ;;  %5500 = vmatprep.subr.bf16.mxu1 %v7899_v55  ;;  %v7941_v55 = vld [vmem:[%s12771_s5 + $0x184] ss:$8 sps:$4 sm:$0xff]   ;;  %v7944_v22 = vld [vmem:[%s12771_s5 + $0x194] ss:$8 sps:$4 sm:$0xff]   ;;  %v7942_v34 = vld [vmem:[%s12771_s5 + $0x190] ss:$8 sps:$4 sm:$0xff]  }
 0x79d   :  { %v7947_v25 = vld [vmem:[%s12771_s5 + $0x1a4] ss:$8 sps:$4 sm:$0xff]   ;;  %v7948_v15 = vld [vmem:[%s12771_s5 + $0x1b0] ss:$8 sps:$4 sm:$0xff]   ;;  %vm13567_vm15 = vmmov %vm13563_vm2 }
 0x79e   :  { %v4620_v33 = vadd.f32 %v4606_v0, %v4567_v17  ;;  %v4713_v12 = vpop.permute.xlu1 %4712  ;;  %v7950_v17 = vld [vmem:[%s12771_s5 + $0x1b4] ss:$8 sps:$4 sm:$0xff]   ;;  %v7951_v0 = vld [vmem:[%s12771_s5 + $0x1c0] ss:$8 sps:$4 sm:$0xff]   ;;  %vm13568_vm13 = vmmov %vm13563_vm2 }
 0x79f   :  { %5501 = vmatpush1.bf16.msra.mxu1 %v7897_v57  ;;  %v4723_v19 = vsel %vm261_vm1, %v11855_v48, %v4713_v12  ;;  %v7908_v48 = vld [vmem:[%s12771_s5 + $0xd4] ss:$8 sps:$4 sm:$0xff]   ;;  %v7945_v57 = vld [vmem:[%s12771_s5 + $0x1a0] ss:$8 sps:$4 sm:$0xff]  }
 0x7a0   :  { %v4673_v51 = vadd.f32 %v4659_v37, %v4620_v33  ;;  %5502 = vmatprep.subr.bf16.mxu1 %v7902_v39  ;;  %v12011_v6 = vmax.f32 %v13561_v46, %v4723_v19  ;;  %v7953_v39 = vld [vmem:[%s12771_s5 + $0x1c4] ss:$8 sps:$4 sm:$0xff]   ;;  %v7956_v33 = vld [vmem:[%s12771_s5 + $0x1d4] ss:$8 sps:$4 sm:$0xff]  }
 0x7a1   :  { %v7959_v37 = vld [vmem:[%s12771_s5 + $0x1e4] ss:$8 sps:$4 sm:$0xff]   ;;  %v7962_v19 = vld [vmem:[%s12771_s5 + $0x1f4] ss:$8 sps:$4 sm:$0xff]  }
 0x7a2   :  { %v12017_v11 = vadd.f32 %v4673_v51, %v13540_v4  ;;  %4744 = vst [vmem:[#allocation2 + $0x18] sm:$0x3f] %v12011_v6  ;;  %v7906_v4 = vld [vmem:[%s12771_s5 + $0xd0] ss:$8 sps:$4 sm:$0xff]   ;;  %v7965_v46 = vld [vmem:[%s12771_s5 + $0x204] ss:$8 sps:$4 sm:$0xff]  }
 0x7a3   :  { %5503 = vmatpush1.bf16.msra.mxu1 %v7900_v44  ;;  %v7957_v44 = vld [vmem:[%s12771_s5 + $0x1e0] ss:$8 sps:$4 sm:$0xff]   ;;  %v7960_v51 = vld [vmem:[%s12771_s5 + $0x1f0] ss:$8 sps:$4 sm:$0xff]  }
 0x7a4   :  { %4687 = vst [vmem:[#allocation2 + $0x30] sm:$0x3f] %v12017_v11  ;;  %5504 = vmatprep.subr.bf16.mxu1 %v7905_v24 }
 0x7a7   :  { %v12027_v20 = vpop.permute.xlu0 %4714  ;;  %5505 = vmatpush1.bf16.msra.mxu1 %v7903_v38 }
 0x7a8   :  { %v4724_v13 = vsel %vm261_vm1, %v4713_v12, %v12027_v20  ;;  %5506 = vmatprep.subr.bf16.mxu1 %v7908_v48  ;;  %v7954_v12 = vld [vmem:[%s12771_s5 + $0x1d0] ss:$8 sps:$4 sm:$0xff]  }
 0x7a9   :  { %v12038_v23 = vmax.f32 %v11835_v54, %v4724_v13  ;;  %v7914_v54 = vld [vmem:[%s12771_s5 + $0xf4] ss:$8 sps:$4 sm:$0xff]  }
 0x7aa   :  { %v4751_v61 = vld [vmem:[#allocation2 + $0x18] sm:$0x3f] }
 0x7ab   :  { %4745 = vst [vmem:[#allocation2 + $0x20] sm:$0x3f] %v12038_v23  ;;  %5507 = vmatpush1.bf16.msra.mxu1 %v7906_v4  ;;  %v4694_v21 = vld [vmem:[#allocation2 + $0x30] sm:$0x3f]  ;;  %v12041_v42 = vpop.permute.xlu1 %7665 }
 0x7ac   :  { %4716 = vrot.lane.b32.xlu1 %v4694_v21, %s13080_s25  ;;  %v7668_v41 = vunpack.i.h.bf16 %v12041_v42  ;;  %v7667_v1 = vunpack.i.l.bf16 %v12041_v42  ;;  %5508 = vmatprep.subr.bf16.mxu1 %v7911_v10  ;;  %v7968_v42 = vld [vmem:[%s12771_s5 + $0x214] ss:$8 sps:$4 sm:$0xff]  }
 0x7ad   :  { %v4765_v56 = vpop.permute.xlu0 %4764 }
 0x7ae   :  { %v4780_v49 = vsel %vm13553_vm4, %v4765_v56, %v7667_v1  ;;  %v4781_v35 = vsel %vm13562_vm5, %v7667_v1, %v7668_v41  ;;  %vm13570_vm4 = vcmask 259072   ;;  %vm13580_vm5 = vcmask 588800  }
 0x7af   :  { %5509 = vmatpush1.bf16.msra.mxu1 %v7909_v52  ;;  %v4795_v36 = vmax.f32 %v11863_v53, %v4781_v35  ;;  %v4794_v3 = vmax.f32 %v11872_v18, %v4780_v49  ;;  %v7920_v53 = vld [vmem:[%s12771_s5 + $0x114] ss:$8 sps:$4 sm:$0xff]  }
 0x7b0   :  { %5510 = vmatprep.subr.bf16.mxu1 %v7914_v54  ;;  %v4755_v18 = vld [vmem:[#allocation2 + $0x38] sm:$0x3f] }
 0x7b1   :  { %v4802_v30 = vpack.c.bf16 %v4795_v36, %v4795_v36  ;;  %v4801_v40 = vpack.c.bf16 %v4794_v3, %v4794_v3  ;;  %v4719_v24 = vpop.permute.xlu0 %4718  ;;  %v7963_v3 = vld [vmem:[%s12771_s5 + $0x200] ss:$8 sps:$4 sm:$0xff]  }
 0x7b2   :  { %v4752_v50 = vld [vmem:[#allocation2 + $0x20] sm:$0x3f] }
 0x7b3   :  { %5511 = vmatpush1.bf16.msra.mxu1 %v7912_v27  ;;  %v7669_v58 = vpack.i.bf16 %v4752_v50, %v4751_v61  ;;  %5512 = vmatprep.mubr.bf16.mxu1 %v4802_v30  ;;  %v7972_v30 = vld [vmem:[%s12771_s5 + $0x230] ss:$8 sps:$4 sm:$0xff]   ;;  %v7977_v61 = vld [vmem:[%s12771_s5 + $0x244] ss:$8 sps:$4 sm:$0xff]   ;;  %v7975_v50 = vld [vmem:[%s12771_s5 + $0x240] ss:$8 sps:$4 sm:$0xff]  }
 0x7b4   :  { %5521 = vmatprep.subr.bf16.mxu1 %v7917_v60  ;;  %v7974_v60 = vld [vmem:[%s12771_s5 + $0x234] ss:$8 sps:$4 sm:$0xff]  }
 0x7b5   :  { %7670 = vrot.lane.b32.xlu1 %v7669_v58, %s13317_s4  ;;  %v7980_v58 = vld [vmem:[%s12771_s5 + $0x254] ss:$8 sps:$4 sm:$0xff]  }
 0x7b6   :  { %5513 = vmatmul.mubr.bf16.vlgmr.msra.gmra.mrb[8].mxu1 %v4801_v40  ;;  %v8191_v40 = vmov 1983009808  }
 0x7b7   :  { %5522 = vmatpush1.bf16.msra.mxu1 %v7915_v59  ;;  %v7978_v59 = vld [vmem:[%s12771_s5 + $0x250] ss:$8 sps:$4 sm:$0xff]  }
 0x7b8   :  { %5523 = vmatprep.subr.bf16.mxu1 %v7920_v53  ;;  %v3197_v53 = vunpack.c.l.s4 %v8191_v40 }
 0x7b9   :  { %4778 = vrot.lane.b32.xlu1 %v4755_v18, %s13317_s4  ;;  %v7983_v18 = vld [vmem:[%s12771_s5 + $0x264] ss:$8 sps:$4 sm:$0xff]  }
 0x7bb   :  { %5524 = vmatpush1.bf16.msra.mxu1 %v7918_v9  ;;  %v7981_v9 = vld [vmem:[%s12771_s5 + $0x260] ss:$8 sps:$4 sm:$0xff]  }
 0x7bc   :  { %5525 = vmatprep.subr.bf16.mxu1 %v7923_v31  ;;  %v3198_v31 = vunpack.c.0.s8 %v3197_v53 }
 0x7bf   :  { %5526 = vmatpush1.bf16.msra.mxu1 %v7921_v63  ;;  %v7986_v63 = vld [vmem:[%s12771_s5 + $0x274] ss:$8 sps:$4 sm:$0xff]  }
 0x7c0   :  { %5527 = vmatprep.subr.bf16.mxu1 %v7926_v43 }
 0x7c3   :  { %5528 = vmatpush1.bf16.msra.mxu1 %v7924_v29  ;;  %v7984_v29 = vld [vmem:[%s12771_s5 + $0x270] ss:$8 sps:$4 sm:$0xff]  }
 0x7c4   :  { %5529 = vmatprep.subr.bf16.mxu1 %v7929_v45  ;;  %v13565_v45 = vld [vmem:[#allocation12_spill] sm:$0xff] }
 0x7c7   :  { %5530 = vmatpush1.bf16.msra.mxu1 %v7927_v8  ;;  %v12236_v8 = vsub.s32 %v3198_v31, %v13565_v45 }
 0x7c8   :  { %5531 = vmatprep.subr.bf16.mxu1 %v7932_v2 }
 0x7cb   :  { %5532 = vmatpush1.bf16.msra.mxu1 %v7930_v28 }
 0x7cc   :  { %5533 = vmatprep.subr.bf16.mxu1 %v7935_v7  ;;  %v7989_v7 = vld [vmem:[%s12771_s5 + $0x284] ss:$8 sps:$4 sm:$0xff]  }
 0x7cf   :  { %5534 = vmatpush1.bf16.msra.mxu1 %v7933_v26 }
 0x7d0   :  { %5535 = vmatprep.subr.bf16.mxu1 %v7938_v5 }
 0x7d3   :  { %5536 = vmatpush1.bf16.msra.mxu1 %v7936_v47 }
 0x7d4   :  { %5537 = vmatprep.subr.bf16.mxu1 %v7941_v55 }
 0x7d7   :  { %5538 = vmatpush1.bf16.msra.mxu1 %v7939_v62  ;;  %v7987_v62 = vld [vmem:[%s12771_s5 + $0x280] ss:$8 sps:$4 sm:$0xff]  }
 0x7d8   :  { %5539 = vmatprep.subr.bf16.mxu1 %v7944_v22  ;;  %v7992_v22 = vld [vmem:[%s12771_s5 + $0x294] ss:$8 sps:$4 sm:$0xff]  }
 0x7db   :  { %5540 = vmatpush1.bf16.msra.mxu1 %v7942_v34 }
 0x7dc   :  { %5541 = vmatprep.subr.bf16.mxu1 %v7947_v25  ;;  %v7990_v25 = vld [vmem:[%s12771_s5 + $0x290] ss:$8 sps:$4 sm:$0xff]  }
 0x7df   :  { %5542 = vmatpush1.bf16.msra.mxu1 %v7945_v57  ;;  %v7995_v57 = vld [vmem:[%s12771_s5 + $0x2a4] ss:$8 sps:$4 sm:$0xff]  }
 0x7e0   :  { %5543 = vmatprep.subr.bf16.mxu1 %v7950_v17  ;;  %v7993_v17 = vld [vmem:[%s12771_s5 + $0x2a0] ss:$8 sps:$4 sm:$0xff]  }
 0x7e3   :  { %5544 = vmatpush1.bf16.msra.mxu1 %v7948_v15  ;;  %v7998_v15 = vld [vmem:[%s12771_s5 + $0x2b4] ss:$8 sps:$4 sm:$0xff]  }
 0x7e4   :  { %5545 = vmatprep.subr.bf16.mxu1 %v7953_v39  ;;  %v7996_v39 = vld [vmem:[%s12771_s5 + $0x2b0] ss:$8 sps:$4 sm:$0xff]  }
 0x7e7   :  { %5546 = vmatpush1.bf16.msra.mxu1 %v7951_v0  ;;  %v8001_v0 = vld [vmem:[%s12771_s5 + $0x2c4] ss:$8 sps:$4 sm:$0xff]  }
 0x7e8   :  { %5547 = vmatprep.subr.bf16.mxu1 %v7956_v33  ;;  %v7999_v33 = vld [vmem:[%s12771_s5 + $0x2c0] ss:$8 sps:$4 sm:$0xff]  }
 0x7eb   :  { %5548 = vmatpush1.bf16.msra.mxu1 %v7954_v12  ;;  %v8004_v12 = vld [vmem:[%s12771_s5 + $0x2d4] ss:$8 sps:$4 sm:$0xff]  }
 0x7ec   :  { %5549 = vmatprep.subr.bf16.mxu1 %v7959_v37  ;;  %v8002_v37 = vld [vmem:[%s12771_s5 + $0x2d0] ss:$8 sps:$4 sm:$0xff]  }
 0x7ef   :  { %5550 = vmatpush1.bf16.msra.mxu1 %v7957_v44  ;;  %v8007_v44 = vld [vmem:[%s12771_s5 + $0x2e4] ss:$8 sps:$4 sm:$0xff]  }
 0x7f0   :  { %5551 = vmatprep.subr.bf16.mxu1 %v7962_v19  ;;  %v8005_v19 = vld [vmem:[%s12771_s5 + $0x2e0] ss:$8 sps:$4 sm:$0xff]  }
 0x7f3   :  { %5552 = vmatpush1.bf16.msra.mxu1 %v7960_v51  ;;  %v8010_v51 = vld [vmem:[%s12771_s5 + $0x2f4] ss:$8 sps:$4 sm:$0xff]  }
 0x7f4   :  { %5562 = vmatprep.subr.bf16.mxu1 %v7965_v46  ;;  %v8008_v46 = vld [vmem:[%s12771_s5 + $0x2f0] ss:$8 sps:$4 sm:$0xff]  }
 0x81e   :  { %v4717_v38 = vpop.permute.xlu1 %4716 }
 0x81f   :  { %v4725_v48 = vsel %vm261_vm1, %v12027_v20, %v4717_v38  ;;  %v4726_v4 = vsel %vm261_vm1, %v4717_v38, %v4719_v24  ;;  %v8013_v24 = vld [vmem:[%s12771_s5 + $0x304] ss:$8 sps:$4 sm:$0xff]  }
 0x820   :  { %v12166_v13 = vmax.f32 %v11853_v32, %v4725_v48  ;;  %v12169_v10 = vmax.f32 %v12017_v11, %v4726_v4 }
 0x822   :  { %4746 = vst [vmem:[#allocation2 + $0x28] sm:$0x3f] %v12166_v13  ;;  %4747 = vst [vmem:[#allocation2 + $0x30] sm:$0x3f] %v12169_v10 }
 0x827   :  { %v12173_v21 = vpop.permute.xlu1 %7670 }
 0x828   :  { %v7673_v52 = vunpack.i.h.bf16 %v12173_v21  ;;  %v7672_v1 = vunpack.i.l.bf16 %v12173_v21  ;;  %v8014_v21 = vld [vmem:[%s12771_s5 + $0x310] ss:$8 sps:$4 sm:$0xff]  }
 0x829   :  { %v4753_v54 = vld [vmem:[#allocation2 + $0x28] sm:$0x3f]  ;;  %v4754_v20 = vld [vmem:[#allocation2 + $0x30] sm:$0x3f] }
 0x82a   :  { %v4782_v32 = vsel %vm13563_vm2, %v7668_v41, %v7672_v1  ;;  %v7674_v56 = vpack.i.bf16 %v4754_v20, %v4753_v54  ;;  %v4783_v11 = vsel %vm13564_vm3, %v7672_v1, %v7673_v52  ;;  %v7969_v41 = vld [vmem:[%s12771_s5 + $0x220] ss:$8 sps:$4 sm:$0xff]   ;;  %vm13581_vm2 = vmmov %vm13570_vm4  ;;  %vm13582_vm3 = vcmask 1031168  }
 0x82b   :  { %v4796_v49 = vmax.f32 %v11866_v16, %v4782_v32  ;;  %v4797_v35 = vmax.f32 %v12011_v6, %v4783_v11  ;;  %v7966_v16 = vld [vmem:[%s12771_s5 + $0x210] ss:$8 sps:$4 sm:$0xff]   ;;  %v7971_v6 = vld [vmem:[%s12771_s5 + $0x224] ss:$8 sps:$4 sm:$0xff]   ;;  %v8011_v11 = vld [vmem:[%s12771_s5 + $0x300] ss:$8 sps:$4 sm:$0xff]  }
 0x82c   :  { %7675 = vrot.lane.b32.xlu0 %v7674_v56, %s13317_s4 }
 0x82d   :  { %v4804_v27 = vpack.c.bf16 %v4797_v35, %v4797_v35  ;;  %v4803_v36 = vpack.c.bf16 %v4796_v49, %v4796_v49  ;;  %v8016_v35 = vld [vmem:[%s12771_s5 + $0x314] ss:$8 sps:$4 sm:$0xff]  }
 0x82f   :  { %5553 = vmatprep.mubr.bf16.mxu1 %v4804_v27  ;;  %v8020_v27 = vld [vmem:[%s12771_s5 + $0x330] ss:$8 sps:$4 sm:$0xff]  }
 0x830   :  { %5554 = vmatmul.mubr.bf16.vlgmr.msra.gmra.mrb[8].mxu1 %v4803_v36  ;;  %v8025_v36 = vld [vmem:[%s12771_s5 + $0x344] ss:$8 sps:$4 sm:$0xff]  }
 0x831   :  { %5563 = vmatpush1.bf16.msra.mxu1 %v7963_v3  ;;  %v8023_v3 = vld [vmem:[%s12771_s5 + $0x340] ss:$8 sps:$4 sm:$0xff]  }
 0x832   :  { %5564 = vmatprep.subr.bf16.mxu1 %v7968_v42  ;;  %v8028_v42 = vld [vmem:[%s12771_s5 + $0x354] ss:$8 sps:$4 sm:$0xff]  }
 0x835   :  { %5565 = vmatpush1.bf16.msra.mxu1 %v7966_v16  ;;  %v8026_v16 = vld [vmem:[%s12771_s5 + $0x350] ss:$8 sps:$4 sm:$0xff]  }
 0x836   :  { %5566 = vmatprep.subr.bf16.mxu1 %v7971_v6  ;;  %v8031_v6 = vld [vmem:[%s12771_s5 + $0x364] ss:$8 sps:$4 sm:$0xff]  }
 0x839   :  { %5567 = vmatpush1.bf16.msra.mxu1 %v7969_v41  ;;  %v4779_v41 = vpop.permute.xlu1 %4778 }
 0x83a   :  { %5568 = vmatprep.subr.bf16.mxu1 %v7974_v60  ;;  %v8029_v60 = vld [vmem:[%s12771_s5 + $0x360] ss:$8 sps:$4 sm:$0xff]  }
 0x83d   :  { %5569 = vmatpush1.bf16.msra.mxu1 %v7972_v30  ;;  %v8034_v30 = vld [vmem:[%s12771_s5 + $0x374] ss:$8 sps:$4 sm:$0xff]  }
 0x83e   :  { %5570 = vmatprep.subr.bf16.mxu1 %v7977_v61 }
 0x841   :  { %5571 = vmatpush1.bf16.msra.mxu1 %v7975_v50  ;;  %v8032_v50 = vld [vmem:[%s12771_s5 + $0x370] ss:$8 sps:$4 sm:$0xff]  }
 0x842   :  { %5572 = vmatprep.subr.bf16.mxu1 %v7980_v58 }
 0x845   :  { %5573 = vmatpush1.bf16.msra.mxu1 %v7978_v59 }
 0x846   :  { %5574 = vmatprep.subr.bf16.mxu1 %v7983_v18 }
 0x849   :  { %v12228_v43 = vpop.f32.mrb[4].mxu1  ;;  %5575 = vmatpush1.bf16.msra.mxu1 %v7981_v9 }
 0x84a   :  { %3194 = vst.msk [vmem:[#allocation5] sm:$0x1] %vm3193_vm6, %v12228_v43  ;;  %v3223_v2 = vcombine.high %v12228_v43, %v12228_v43  ;;  %v3188_v28 = vpop.f32.mrb[5].mxu1  ;;  %5576 = vmatprep.subr.bf16.mxu1 %v7986_v63 }
 0x84b   :  { %v12243_v26 = vpop.f32.mrb[6].mxu1 }
 0x84c   :  { %v12246_v5 = vrot.slane %v3223_v2, %v12236_v8  ;;  %3250 = vst.msk [vmem:[#allocation5 + $0x4] sm:$0x1] %vm3193_vm6, %v12243_v26  ;;  %v3191_v47 = vpop.f32.mrb[7].mxu1  ;;  %v3276_v55 = vcombine.high %v12243_v26, %v12243_v26 }
 0x84d   :  { %5577 = vmatpush1.bf16.msra.mxu1 %v7984_v29 }
 0x84e   :  { %3232 = vst.msk [vmem:[#allocation5 + $0x2] sm:$0x1] %vm3193_vm6, %v12246_v5  ;;  %5578 = vmatprep.subr.bf16.mxu1 %v7989_v7  ;;  %v12261_v34 = vrot.slane %v3276_v55, %v12236_v8 }
 0x850   :  { %3285 = vst.msk [vmem:[#allocation5 + $0x6] sm:$0x1] %vm3193_vm6, %v12261_v34 }
 0x851   :  { %5579 = vmatpush1.bf16.msra.mxu1 %v7987_v62 }
 0x852   :  { %5580 = vmatprep.subr.bf16.mxu1 %v7992_v22 }
 0x855   :  { %5581 = vmatpush1.bf16.msra.mxu1 %v7990_v25 }
 0x856   :  { %5582 = vmatprep.subr.bf16.mxu1 %v7995_v57 }
 0x859   :  { %5583 = vmatpush1.bf16.msra.mxu1 %v7993_v17 }
 0x85a   :  { %5584 = vmatprep.subr.bf16.mxu1 %v7998_v15 }
 0x85d   :  { %5585 = vmatpush1.bf16.msra.mxu1 %v7996_v39 }
 0x85e   :  { %5586 = vmatprep.subr.bf16.mxu1 %v8001_v0 }
 0x861   :  { %5587 = vmatpush1.bf16.msra.mxu1 %v7999_v33 }
 0x862   :  { %5588 = vmatprep.subr.bf16.mxu1 %v8004_v12 }
 0x865   :  { %5589 = vmatpush1.bf16.msra.mxu1 %v8002_v37 }
 0x866   :  { %5590 = vmatprep.subr.bf16.mxu1 %v8007_v44 }
 0x869   :  { %5591 = vmatpush1.bf16.msra.mxu1 %v8005_v19 }
 0x86a   :  { %5592 = vmatprep.subr.bf16.mxu1 %v8010_v51 }
 0x86d   :  { %5593 = vmatpush1.bf16.msra.mxu1 %v8008_v46 }
 0x86e   :  { %5603 = vmatprep.subr.bf16.mxu1 %v8013_v24 }
 0x89e   :  { %v7676_v38 = vpop.permute.xlu0 %7675 }
 0x89f   :  { %v7678_v48 = vunpack.i.h.bf16 %v7676_v38  ;;  %v7677_v4 = vunpack.i.l.bf16 %v7676_v38 }
 0x8a1   :  { %v4784_v1 = vsel %vm13566_vm8, %v7673_v52, %v7677_v4  ;;  %v4785_v54 = vsel %vm13567_vm15, %v7677_v4, %v7678_v48  ;;  %v8022_v52 = vld [vmem:[%s12771_s5 + $0x334] ss:$8 sps:$4 sm:$0xff]   ;;  %v4786_v61 = vsel %vm13568_vm13, %v7678_v48, %v4779_v41  ;;  %vm13583_vm8 = vmmov %vm13581_vm2  ;;  %vm13584_vm15 = vcmask 1022976  }
 0x8a2   :  { %v4798_v20 = vmax.f32 %v12038_v23, %v4784_v1  ;;  %v4799_v32 = vmax.f32 %v12166_v13, %v4785_v54  ;;  %v8019_v23 = vld [vmem:[%s12771_s5 + $0x324] ss:$8 sps:$4 sm:$0xff]   ;;  %v8017_v13 = vld [vmem:[%s12771_s5 + $0x320] ss:$8 sps:$4 sm:$0xff]   ;;  %v4800_v58 = vmax.f32 %v12169_v10, %v4786_v61  ;;  %s13571_s5 = smov 111   ;;  %v5865_v10 = vld [vmem:[#allocation6 + $0x8] sm:$0xff] }
 0x8a3   :  { %7148 = vmatprep.mubr.msk.f32.mxu0 %vm13580_vm5, %v5865_v10  ;;  %vm13585_vm13 = vmmov %vm13581_vm2 }
 0x8a4   :  { %v4806_v56 = vpack.c.bf16 %v4799_v32, %v4799_v32  ;;  %v4805_v49 = vpack.c.bf16 %v4798_v20, %v4798_v20  ;;  %v4807_v59 = vpack.c.bf16 %v4800_v58, %v4800_v58  ;;  %vm13587_vm5 = vmmov %vm13581_vm2 }
 0x8a6   :  { %5594 = vmatprep.mubr.bf16.mxu1 %v4806_v56 }
 0x8a7   :  { %5595 = vmatmul.mubr.bf16.vlgmr.msra.gmra.mrb[8].mxu1 %v4805_v49 }
 0x8a8   :  { %5604 = vmatpush1.bf16.msra.mxu1 %v8011_v11  ;;  %5635 = vmatprep.mubr.bf16.mxu1 %v13491_v14 }
 0x8a9   :  { %5605 = vmatprep.subr.bf16.mxu1 %v8016_v35 }
 0x8ac   :  { %5606 = vmatpush1.bf16.msra.mxu1 %v8014_v21 }
 0x8ad   :  { %5607 = vmatprep.subr.bf16.mxu1 %v8019_v23 }
 0x8b0   :  { %5608 = vmatpush1.bf16.msra.mxu1 %v8017_v13 }
 0x8b1   :  { %5609 = vmatprep.subr.bf16.mxu1 %v8022_v52 }
 0x8b4   :  { %5610 = vmatpush1.bf16.msra.mxu1 %v8020_v27 }
 0x8b5   :  { %5611 = vmatprep.subr.bf16.mxu1 %v8025_v36 }
 0x8b8   :  { %5612 = vmatpush1.bf16.msra.mxu1 %v8023_v3 }
 0x8b9   :  { %5613 = vmatprep.subr.bf16.mxu1 %v8028_v42 }
 0x8bc   :  { %5614 = vmatpush1.bf16.msra.mxu1 %v8026_v16 }
 0x8bd   :  { %5615 = vmatprep.subr.bf16.mxu1 %v8031_v6 }
 0x8c0   :  { %5616 = vmatpush1.bf16.msra.mxu1 %v8029_v60 }
 0x8c1   :  { %5617 = vmatprep.subr.bf16.mxu1 %v8034_v30 }
 0x8c4   :  { %5618 = vmatpush1.bf16.msra.mxu1 %v8032_v50 }
 0x8c7   :  { %5636 = vmatmul.mubr.bf16.vlgmr.msra.gmra.mrb[8].mxu1 %v4807_v59 }
 0x99a   :  { %v5637_v40 = vpop.f32.mrb[8].mxu1 }
 0x99b   :  { %5644 = vst [vmem:[#allocation4] sm:$0x3f] %v5637_v40  ;;  %5648 = vrot.lane.b32.xlu0 %v5637_v40, %s13569_s0  ;;  %v5639_v53 = vpop.f32.mrb[9].mxu1 }
 0x99c   :  { %5645 = vst.msk [vmem:[#allocation4 + $0x8] sm:$0x3f] %vm13570_vm4, %v5639_v53  ;;  %5650 = vrot.lane.b32.xlu1 %v5639_v53, %s13569_s0  ;;  %v5641_v18 = vpop.f32.mrb[10].mxu1  ;;  %vm13586_vm4 = vcmask 1014784  }
 0x99d   :  { %v5642_v9 = vpop.f32.mrb[11].mxu1 }
 0x99f   :  { %5657 = vrot.lane.b32.xlu0 %v5637_v40, %s13511_s1 }
 0x9a0   :  { %5659 = vrot.lane.b32.xlu1 %v5639_v53, %s13511_s1  ;;  %s13573_s1 = smov 109  }
 0x9a2   :  { %v5868_v57 = vld [vmem:[#allocation4] sm:$0xff] }
 0x9a3   :  { %5666 = vrot.lane.b32.xlu0 %v5637_v40, %s13510_s28  ;;  %v5869_v55 = vld [vmem:[#allocation4 + $0x8] sm:$0xff] }
 0x9a4   :  { %5668 = vrot.lane.b32.xlu1 %v5639_v53, %s13510_s28  ;;  %s13574_s28 = smov 108  }
 0x9a7   :  { %5675 = vrot.lane.b32.xlu0 %v5637_v40, %s13515_s18 }
 0x9a8   :  { %5677 = vrot.lane.b32.xlu1 %v5639_v53, %s13515_s18  ;;  %s13575_s18 = smov 80  }
 0x9ab   :  { %5684 = vrot.lane.b32.xlu0 %v5637_v40, %s13503_s13 }
 0x9ac   :  { %5686 = vrot.lane.b32.xlu1 %v5639_v53, %s13503_s13 }
 0x9af   :  { %5693 = vrot.lane.b32.xlu0 %v5637_v40, %s13571_s5 }
 0x9b0   :  { %5695 = vrot.lane.b32.xlu1 %v5639_v53, %s13571_s5  ;;  %s13627_s5 = sld [smem:[#allocation100_spill]] }
 0x9b3   :  { %5702 = vrot.lane.b32.xlu0 %v5637_v40, %s13572_s14 }
 0x9b4   :  { %5704 = vrot.lane.b32.xlu1 %v5639_v53, %s13572_s14  ;;  %s8194_s14 = smov [#allocation9]  }
 0x9b7   :  { %5711 = vrot.lane.b32.xlu0 %v5637_v40, %s13573_s1 }
 0x9b8   :  { %5713 = vrot.lane.b32.xlu1 %v5639_v53, %s13573_s1  ;;  %s6889_s1 = sshll.u32 %s8194_s14, 4  ;;  %s6890_s1 = int_to_ptr.vmem [resolvable:$true] %s6889_s1 }
 0x9b9   :  { %p8112_p9 = scmp.lt.s32.totalorder %s6890_s1, %s6890_s1 }
 0x9bb   :  { %5720 = vrot.lane.b32.xlu0 %v5637_v40, %s13574_s28 }
 0x9bc   :  { %5722 = vrot.lane.b32.xlu1 %v5639_v53, %s13574_s28 }
 0x9bf   :  { %5729 = vrot.lane.b32.xlu0 %v5637_v40, %s13317_s4 }
 0x9c0   :  { %5731 = vrot.lane.b32.xlu1 %v5639_v53, %s13317_s4 }
 0x9c3   :  { %5738 = vrot.lane.b32.xlu0 %v5637_v40, %s13319_s29 }
 0x9c4   :  { %5740 = vrot.lane.b32.xlu1 %v5639_v53, %s13319_s29  ;;  %s13577_s29 = smov 78  }
 0x9c7   :  { %5747 = vrot.lane.b32.xlu0 %v5637_v40, %s13323_s30 }
 0x9c8   :  { %5749 = vrot.lane.b32.xlu1 %v5639_v53, %s13323_s30  ;;  %s13578_s30 = smov 77  }
 0x9cb   :  { %5756 = vrot.lane.b32.xlu0 %v5637_v40, %s13298_s23 }
 0x9cc   :  { %5758 = vrot.lane.b32.xlu1 %v5639_v53, %s13298_s23  ;;  %s13579_s23 = smov 76  }
 0x9cf   :  { %5765 = vrot.lane.b32.xlu0 %v5637_v40, %s13299_s17 }
 0x9d0   :  { %5767 = vrot.lane.b32.xlu1 %v5639_v53, %s13299_s17 }
 0x9d3   :  { %5774 = vrot.lane.b32.xlu0 %v5637_v40, %s13575_s18 }
 0x9d4   :  { %5776 = vrot.lane.b32.xlu1 %v5639_v53, %s13575_s18 }
 0x9d7   :  { %5783 = vrot.lane.b32.xlu0 %v5637_v40, %s13576_s19 }
 0x9d8   :  { %5785 = vrot.lane.b32.xlu1 %v5639_v53, %s13576_s19 }
 0x9db   :  { %5792 = vrot.lane.b32.xlu0 %v5637_v40, %s13577_s29 }
 0x9dc   :  { %5794 = vrot.lane.b32.xlu1 %v5639_v53, %s13577_s29 }
 0x9df   :  { %5801 = vrot.lane.b32.xlu0 %v5637_v40, %s13578_s30 }
 0x9e0   :  { %5803 = vrot.lane.b32.xlu1 %v5639_v53, %s13578_s30 }
 0x9e3   :  { %5810 = vrot.lane.b32.xlu0 %v5637_v40, %s13579_s23 }
 0x9e4   :  { %5812 = vrot.lane.b32.xlu1 %v5639_v53, %s13579_s23 }
 0x9e7   :  { %5819 = vrot.lane.b32.xlu0 %v5637_v40, %s13300_s15 }
 0x9e8   :  { %5821 = vrot.lane.b32.xlu1 %v5639_v53, %s13300_s15 }
 0x9eb   :  { %5828 = vrot.lane.b32.xlu0 %v5637_v40, %s13301_s16 }
 0x9ec   :  { %5830 = vrot.lane.b32.xlu1 %v5639_v53, %s13301_s16 }
 0x9ef   :  { %5837 = vrot.lane.b32.xlu0 %v5637_v40, %s13302_s21 }
 0x9f0   :  { %5839 = vrot.lane.b32.xlu1 %v5639_v53, %s13302_s21 }
 0x9f3   :  { %5846 = vrot.lane.b32.xlu0 %v5637_v40, %s13303_s24 }
 0x9f4   :  { %5848 = vrot.lane.b32.xlu1 %v5639_v53, %s13303_s24 }
 0x9f7   :  { %5855 = vrot.lane.b32.xlu0 %v5637_v40, %s13304_s20 }
 0x9f8   :  { %5857 = vrot.lane.b32.xlu1 %v5639_v53, %s13304_s20 }
 0xa0d   :  { %v5649_v31 = vpop.permute.xlu0 %5648 }
 0xa0e   :  { %v5651_v63 = vpop.permute.xlu1 %5650 }
 0xa0f   :  { %v5652_v29 = vsel %vm261_vm1, %v5649_v31, %v5651_v63  ;;  %5656 = vst.msk [vmem:[#allocation4 + $0x18] sm:$0x3f] %vm13581_vm2, %v5651_v63  ;;  %vm13588_vm2 = vcmask 916480  }
 0xa10   :  { %5655 = vst [vmem:[#allocation4 + $0x10] sm:$0x3f] %v5652_v29 }
 0xa11   :  { %v5658_v45 = vpop.permute.xlu0 %5657 }
 0xa12   :  { %v5660_v2 = vpop.permute.xlu1 %5659 }
 0xa13   :  { %v5661_v28 = vsel %vm13582_vm3, %v5658_v45, %v5660_v2  ;;  %5665 = vst.msk [vmem:[#allocation4 + $0x28] sm:$0x3f] %vm13583_vm8, %v5660_v2  ;;  %vm13589_vm3 = vmmov %vm13587_vm5  ;;  %vm13590_vm8 = vcmask 908288  }
 0xa14   :  { %5664 = vst [vmem:[#allocation4 + $0x20] sm:$0x3f] %v5661_v28 }
 0xa15   :  { %v5667_v7 = vpop.permute.xlu0 %5666 }
 0xa16   :  { %v5669_v47 = vpop.permute.xlu1 %5668  ;;  %v5871_v62 = vld [vmem:[#allocation4 + $0x18] sm:$0xff] }
 0xa17   :  { %v5670_v22 = vsel %vm13584_vm15, %v5667_v7, %v5669_v47  ;;  %5674 = vst.msk [vmem:[#allocation4 + $0x38] sm:$0x3f] %vm13585_vm13, %v5669_v47  ;;  %v7443_v25 = vpack.c.bf16 %v5871_v62, %v5869_v55  ;;  %v5870_v17 = vld [vmem:[#allocation4 + $0x10] sm:$0xff]  ;;  %vm13591_vm15 = vmmov %vm13589_vm3  ;;  %vm13592_vm13 = vcmask 900096  }
 0xa18   :  { %5673 = vst [vmem:[#allocation4 + $0x30] sm:$0x3f] %v5670_v22  ;;  %v7445_v15 = vpack.c.bf16 %v5870_v17, %v5868_v57 }
 0xa19   :  { %v5676_v39 = vpop.permute.xlu0 %5675  ;;  %7444 = vmatprep.subr.bf16.mxu0 %v7443_v25 }
 0xa1a   :  { %v5678_v0 = vpop.permute.xlu1 %5677  ;;  %7446 = vmatpush1.bf16.msra.mxu0 %v7445_v15  ;;  %v5873_v44 = vld [vmem:[#allocation4 + $0x28] sm:$0xff] }
 0xa1b   :  { %v5679_v33 = vsel %vm13586_vm4, %v5676_v39, %v5678_v0  ;;  %5683 = vst.msk [vmem:[#allocation4 + $0x48] sm:$0x3f] %vm13587_vm5, %v5678_v0  ;;  %v5872_v24 = vld [vmem:[#allocation4 + $0x20] sm:$0xff]  ;;  %vm13593_vm4 = vmmov %vm13589_vm3  ;;  %vm13594_vm5 = vcmask 891904  }
 0xa1c   :  { %5682 = vst [vmem:[#allocation4 + $0x40] sm:$0x3f] %v5679_v33 }
 0xa1d   :  { %v5685_v12 = vpop.permute.xlu0 %5684 }
 0xa1e   :  { %v5687_v37 = vpop.permute.xlu1 %5686  ;;  %v5875_v19 = vld [vmem:[#allocation4 + $0x38] sm:$0xff] }
 0xa1f   :  { %v5688_v51 = vsel %vm13588_vm2, %v5685_v12, %v5687_v37  ;;  %5692 = vst.msk [vmem:[#allocation4 + $0x58] sm:$0x3f] %vm13589_vm3, %v5687_v37  ;;  %v7447_v46 = vpack.c.bf16 %v5875_v19, %v5873_v44  ;;  %v5874_v38 = vld [vmem:[#allocation4 + $0x30] sm:$0xff]  ;;  %vm13595_vm2 = vmmov %vm13589_vm3  ;;  %vm13596_vm3 = vcmask 883712  }
 0xa20   :  { %5691 = vst [vmem:[#allocation4 + $0x50] sm:$0x3f] %v5688_v51  ;;  %v7449_v48 = vpack.c.bf16 %v5874_v38, %v5872_v24 }
 0xa21   :  { %v5694_v4 = vpop.permute.xlu0 %5693  ;;  %7448 = vmatprep.subr.bf16.mxu0 %v7447_v46 }
 0xa22   :  { %v5696_v1 = vpop.permute.xlu1 %5695  ;;  %7450 = vmatpush1.bf16.msra.mxu0 %v7449_v48  ;;  %v5877_v56 = vld [vmem:[#allocation4 + $0x48] sm:$0xff] }
 0xa23   :  { %v5697_v54 = vsel %vm13590_vm8, %v5694_v4, %v5696_v1  ;;  %5701 = vst.msk [vmem:[#allocation4 + $0x68] sm:$0x3f] %vm13591_vm15, %v5696_v1  ;;  %v5876_v21 = vld [vmem:[#allocation4 + $0x40] sm:$0xff]  ;;  %vm13597_vm8 = vmmov %vm13595_vm2  ;;  %vm13598_vm15 = vcmask 785408  }
 0xa24   :  { %5700 = vst [vmem:[#allocation4 + $0x60] sm:$0x3f] %v5697_v54 }
 0xa25   :  { %v5703_v20 = vpop.permute.xlu0 %5702 }
 0xa26   :  { %v5705_v32 = vpop.permute.xlu1 %5704  ;;  %v5879_v11 = vld [vmem:[#allocation4 + $0x58] sm:$0xff] }
 0xa27   :  { %v5706_v49 = vsel %vm13592_vm13, %v5703_v20, %v5705_v32  ;;  %5710 = vst.msk [vmem:[#allocation4 + $0x78] sm:$0x3f] %vm13593_vm4, %v5705_v32  ;;  %v7451_v35 = vpack.c.bf16 %v5879_v11, %v5877_v56  ;;  %v5878_v23 = vld [vmem:[#allocation4 + $0x50] sm:$0xff]  ;;  %vm13599_vm13 = vmmov %vm13595_vm2  ;;  %vm13600_vm4 = vcmask 777216  }
 0xa28   :  { %5709 = vst [vmem:[#allocation4 + $0x70] sm:$0x3f] %v5706_v49  ;;  %v7453_v13 = vpack.c.bf16 %v5878_v23, %v5876_v21 }
 0xa29   :  { %v5712_v52 = vpop.permute.xlu0 %5711  ;;  %7452 = vmatprep.subr.bf16.mxu0 %v7451_v35 }
 0xa2a   :  { %v5714_v27 = vpop.permute.xlu1 %5713  ;;  %7454 = vmatpush1.bf16.msra.mxu0 %v7453_v13  ;;  %v5881_v16 = vld [vmem:[#allocation4 + $0x68] sm:$0xff] }
 0xa2b   :  { %v5715_v36 = vsel %vm13594_vm5, %v5712_v52, %v5714_v27  ;;  %5719 = vst.msk [vmem:[#allocation4 + $0x88] sm:$0x3f] %vm13595_vm2, %v5714_v27  ;;  %v5880_v30 = vld [vmem:[#allocation4 + $0x60] sm:$0xff]  ;;  %vm13601_vm5 = vmmov %vm13595_vm2 }
 0xa2c   :  { %5718 = vst [vmem:[#allocation4 + $0x80] sm:$0x3f] %v5715_v36 }
 0xa2d   :  { %v5721_v3 = vpop.permute.xlu0 %5720 }
 0xa2e   :  { %v5723_v42 = vpop.permute.xlu1 %5722  ;;  %v5883_v6 = vld [vmem:[#allocation4 + $0x78] sm:$0xff] }
 0xa2f   :  { %v5724_v41 = vsel %vm13596_vm3, %v5721_v3, %v5723_v42  ;;  %5728 = vst.msk [vmem:[#allocation4 + $0x98] sm:$0x3f] %vm13597_vm8, %v5723_v42  ;;  %v7455_v60 = vpack.c.bf16 %v5883_v6, %v5881_v16  ;;  %v5882_v61 = vld [vmem:[#allocation4 + $0x70] sm:$0xff]  ;;  %vm13602_vm3 = vcmask 760832   ;;  %vm13603_vm8 = vmmov %vm13595_vm2 }
 0xa30   :  { %5727 = vst [vmem:[#allocation4 + $0x90] sm:$0x3f] %v5724_v41  ;;  %v7457_v50 = vpack.c.bf16 %v5882_v61, %v5880_v30 }
 0xa31   :  { %v5730_v58 = vpop.permute.xlu0 %5729  ;;  %7456 = vmatprep.subr.bf16.mxu0 %v7455_v60 }
 0xa32   :  { %v5732_v59 = vpop.permute.xlu1 %5731  ;;  %7458 = vmatpush1.bf16.msra.mxu0 %v7457_v50  ;;  %v5885_v9 = vld [vmem:[#allocation4 + $0x88] sm:$0xff] }
 0xa33   :  { %v5733_v40 = vsel %vm13598_vm15, %v5730_v58, %v5732_v59  ;;  %5737 = vst.msk [vmem:[#allocation4 + $0xa8] sm:$0x3f] %vm13599_vm13, %v5732_v59  ;;  %v5884_v29 = vld [vmem:[#allocation4 + $0x80] sm:$0xff]  ;;  %vm13605_vm15 = vcmask 654336   ;;  %vm13606_vm13 = vmmov %vm13595_vm2 }
 0xa34   :  { %5736 = vst [vmem:[#allocation4 + $0xa0] sm:$0x3f] %v5733_v40 }
 0xa35   :  { %v5739_v53 = vpop.permute.xlu0 %5738 }
 0xa36   :  { %v5741_v18 = vpop.permute.xlu1 %5740  ;;  %v5887_v10 = vld [vmem:[#allocation4 + $0x98] sm:$0xff] }
 0xa37   :  { %v5742_v31 = vsel %vm13600_vm4, %v5739_v53, %v5741_v18  ;;  %5746 = vst.msk [vmem:[#allocation4 + $0xb8] sm:$0x3f] %vm13601_vm5, %v5741_v18  ;;  %v7459_v63 = vpack.c.bf16 %v5887_v10, %v5885_v9  ;;  %v5886_v45 = vld [vmem:[#allocation4 + $0x90] sm:$0xff]  ;;  %vm13608_vm4 = vmmov %vm13595_vm2  ;;  %vm13609_vm5 = vcmask 637952  }
 0xa38   :  { %5745 = vst [vmem:[#allocation4 + $0xb0] sm:$0x3f] %v5742_v31  ;;  %v7461_v2 = vpack.c.bf16 %v5886_v45, %v5884_v29 }
 0xa39   :  { %v5748_v28 = vpop.permute.xlu0 %5747  ;;  %7460 = vmatprep.subr.bf16.mxu0 %v7459_v63 }
 0xa3a   :  { %v5750_v7 = vpop.permute.xlu1 %5749  ;;  %7462 = vmatpush1.bf16.msra.mxu0 %v7461_v2  ;;  %v5889_v22 = vld [vmem:[#allocation4 + $0xa8] sm:$0xff] }
 0xa3b   :  { %v5751_v47 = vsel %vm609_vm7, %v5748_v28, %v5750_v7  ;;  %5755 = vst.msk [vmem:[#allocation4 + $0xc8] sm:$0x3f] %vm13595_vm2, %v5750_v7  ;;  %v5888_v15 = vld [vmem:[#allocation4 + $0xa0] sm:$0xff]  ;;  %vm13604_vm7 = vmmov %vm13595_vm2 }
 0xa3c   :  { %5754 = vst [vmem:[#allocation4 + $0xc0] sm:$0x3f] %v5751_v47 }
 0xa3d   :  { %v5757_v55 = vpop.permute.xlu0 %5756 }
 0xa3e   :  { %v5759_v62 = vpop.permute.xlu1 %5758  ;;  %v5891_v25 = vld [vmem:[#allocation4 + $0xb8] sm:$0xff] }
 0xa3f   :  { %v5760_v57 = vsel %vm13602_vm3, %v5757_v55, %v5759_v62  ;;  %5764 = vst.msk [vmem:[#allocation4 + $0xd8] sm:$0x3f] %vm13603_vm8, %v5759_v62  ;;  %v7463_v17 = vpack.c.bf16 %v5891_v25, %v5889_v22  ;;  %v5890_v39 = vld [vmem:[#allocation4 + $0xb0] sm:$0xff]  ;;  %vm13610_vm3 = vcmask 629760   ;;  %vm13611_vm8 = vmmov %vm13595_vm2 }
 0xa40   :  { %5763 = vst [vmem:[#allocation4 + $0xd0] sm:$0x3f] %v5760_v57  ;;  %v7465_v0 = vpack.c.bf16 %v5890_v39, %v5888_v15 }
 0xa41   :  { %v5766_v33 = vpop.permute.xlu0 %5765  ;;  %7464 = vmatprep.subr.bf16.mxu0 %v7463_v17 }
 0xa42   :  { %v5768_v12 = vpop.permute.xlu1 %5767  ;;  %7466 = vmatpush1.bf16.msra.mxu0 %v7465_v0  ;;  %v5893_v51 = vld [vmem:[#allocation4 + $0xc8] sm:$0xff] }
 0xa43   :  { %v5769_v37 = vsel %vm725_vm9, %v5766_v33, %v5768_v12  ;;  %5773 = vst.msk [vmem:[#allocation4 + $0xe8] sm:$0x3f] %vm13604_vm7, %v5768_v12  ;;  %v5892_v48 = vld [vmem:[#allocation4 + $0xc0] sm:$0xff]  ;;  %vm13607_vm9 = vcmask 646144   ;;  %vm13612_vm7 = vcmask 621568  }
 0xa44   :  { %5772 = vst [vmem:[#allocation4 + $0xe0] sm:$0x3f] %v5769_v37 }
 0xa45   :  { %v5775_v44 = vpop.permute.xlu0 %5774 }
 0xa46   :  { %v5777_v19 = vpop.permute.xlu1 %5776  ;;  %v5895_v46 = vld [vmem:[#allocation4 + $0xd8] sm:$0xff] }
 0xa47   :  { %v5778_v24 = vsel %vm13605_vm15, %v5775_v44, %v5777_v19  ;;  %5782 = vst.msk [vmem:[#allocation4 + $0xf8] sm:$0x3f] %vm13606_vm13, %v5777_v19  ;;  %v7467_v38 = vpack.c.bf16 %v5895_v46, %v5893_v51  ;;  %v5894_v4 = vld [vmem:[#allocation4 + $0xd0] sm:$0xff]  ;;  %vm13613_vm15 = vmmov %vm13595_vm2 }
 0xa48   :  { %5781 = vst [vmem:[#allocation4 + $0xf0] sm:$0x3f] %v5778_v24  ;;  %v7469_v1 = vpack.c.bf16 %v5894_v4, %v5892_v48  ;;  %vm13614_vm13 = vmmov %vm13595_vm2 }
 0xa49   :  { %v5784_v54 = vpop.permute.xlu0 %5783  ;;  %7468 = vmatprep.subr.bf16.mxu0 %v7467_v38 }
 0xa4a   :  { %v5786_v20 = vpop.permute.xlu1 %5785  ;;  %7470 = vmatpush1.bf16.msra.mxu0 %v7469_v1  ;;  %v5897_v49 = vld [vmem:[#allocation4 + $0xe8] sm:$0xff] }
 0xa4b   :  { %v5787_v32 = vsel %vm13607_vm9, %v5784_v54, %v5786_v20  ;;  %5791 = vst.msk [vmem:[#allocation4 + $0x108] sm:$0x3f] %vm13608_vm4, %v5786_v20  ;;  %v5896_v13 = vld [vmem:[#allocation4 + $0xe0] sm:$0xff]  ;;  %vm13615_vm9 = vmmov %vm13595_vm2  ;;  %v5864_v54 = vld [vmem:[#allocation6] sm:$0xff] }
 0xa4c   :  { %5790 = vst [vmem:[#allocation4 + $0x100] sm:$0x3f] %v5787_v32  ;;  %vm13618_vm4 = vmmov %vm13595_vm2  ;;  %v5867_v32 = vld [vmem:[#allocation6 + $0x18] sm:$0xff] }
 0xa4d   :  { %v5793_v56 = vpop.permute.xlu0 %5792 }
 0xa4e   :  { %v5795_v11 = vpop.permute.xlu1 %5794  ;;  %v5899_v35 = vld [vmem:[#allocation4 + $0xf8] sm:$0xff] }
 0xa4f   :  { %v5796_v21 = vsel %vm13609_vm5, %v5793_v56, %v5795_v11  ;;  %5800 = vst.msk [vmem:[#allocation4 + $0x118] sm:$0x3f] %vm13595_vm2, %v5795_v11  ;;  %v7471_v23 = vpack.c.bf16 %v5899_v35, %v5897_v49  ;;  %v5898_v52 = vld [vmem:[#allocation4 + $0xf0] sm:$0xff]  ;;  %v5866_v56 = vld [vmem:[#allocation6 + $0x10] sm:$0xff]  ;;  %vm13623_vm5 = vcmask 916480  }
 0xa50   :  { %5799 = vst [vmem:[#allocation4 + $0x110] sm:$0x3f] %v5796_v21  ;;  %v7473_v27 = vpack.c.bf16 %v5898_v52, %v5896_v13  ;;  %v13621_v49 = vld [vmem:[#allocation49_spill] sm:$0xff]  ;;  %v13622_v52 = vld [vmem:[#allocation51_spill] sm:$0xff] }
 0xa51   :  { %v5802_v36 = vpop.permute.xlu0 %5801  ;;  %7472 = vmatprep.subr.bf16.mxu0 %v7471_v23 }
 0xa52   :  { %v5804_v3 = vpop.permute.xlu1 %5803  ;;  %7474 = vmatpush1.bf16.msra.mxu0 %v7473_v27  ;;  %v5901_v41 = vld [vmem:[#allocation4 + $0x108] sm:$0xff] }
 0xa53   :  { %v5805_v42 = vsel %vm13610_vm3, %v5802_v36, %v5804_v3  ;;  %5809 = vst.msk [vmem:[#allocation4 + $0x128] sm:$0x3f] %vm13611_vm8, %v5804_v3  ;;  %v5900_v50 = vld [vmem:[#allocation4 + $0x100] sm:$0xff]  ;;  %vm3214_vm3 = vcmask 778752   ;;  %vm3221_vm8 = vcmask 1041152  }
 0xa54   :  { %5808 = vst [vmem:[#allocation4 + $0x120] sm:$0x3f] %v5805_v42 }
 0xa55   :  { %v5811_v16 = vpop.permute.xlu0 %5810 }
 0xa56   :  { %v5813_v6 = vpop.permute.xlu1 %5812  ;;  %v5903_v60 = vld [vmem:[#allocation4 + $0x118] sm:$0xff] }
 0xa57   :  { %v5814_v30 = vsel %vm13612_vm7, %v5811_v16, %v5813_v6  ;;  %5818 = vst.msk [vmem:[#allocation4 + $0x138] sm:$0x3f] %vm13613_vm15, %v5813_v6  ;;  %v7475_v61 = vpack.c.bf16 %v5903_v60, %v5901_v41  ;;  %v5902_v58 = vld [vmem:[#allocation4 + $0x110] sm:$0xff]  ;;  %v8035_v6 = vld [vmem:[%s12772_s6] sm:$0xff]   ;;  %v8037_v60 = vld [vmem:[%s12772_s6 + $0x10] sm:$0xff]   ;;  %vm6807_vm7 = vcmask 1043456  }
 0xa58   :  { %5817 = vst [vmem:[#allocation4 + $0x130] sm:$0x3f] %v5814_v30  ;;  %v7477_v59 = vpack.c.bf16 %v5902_v58, %v5900_v50  ;;  %v8036_v41 = vld [vmem:[%s12772_s6 + $0x8] sm:$0xff]   ;;  %v8038_v30 = vld [vmem:[%s12772_s6 + $0x18] sm:$0xff]   ;;  %v8041_v58 = vld [vmem:[%s12772_s6 + $0x30] sm:$0xff]   ;;  %vm6803_vm15 = vcmask 687104  }
 0xa59   :  { %v5820_v40 = vpop.permute.xlu0 %5819  ;;  %7476 = vmatprep.subr.bf16.mxu0 %v7475_v61  ;;  %v8039_v61 = vld [vmem:[%s12772_s6 + $0x20] sm:$0xff]   ;;  %v8040_v50 = vld [vmem:[%s12772_s6 + $0x28] sm:$0xff]  }
 0xa5a   :  { %v5822_v53 = vpop.permute.xlu1 %5821  ;;  %7478 = vmatpush1.bf16.msra.mxu0 %v7477_v59  ;;  %v5905_v31 = vld [vmem:[#allocation4 + $0x128] sm:$0xff] }
 0xa5b   :  { %v5823_v18 = vsel %vm783_vm10, %v5820_v40, %v5822_v53  ;;  %5827 = vst.msk [vmem:[#allocation4 + $0x148] sm:$0x3f] %vm13614_vm13, %v5822_v53  ;;  %v5904_v2 = vld [vmem:[#allocation4 + $0x120] sm:$0xff]  ;;  %vm13616_vm10 = vmmov %vm13595_vm2  ;;  %vm6881_vm13 = vcmask 74752  }
 0xa5c   :  { %5826 = vst [vmem:[#allocation4 + $0x140] sm:$0x3f] %v5823_v18 }
 0xa5d   :  { %v5829_v9 = vpop.permute.xlu0 %5828 }
 0xa5e   :  { %v5831_v10 = vpop.permute.xlu1 %5830  ;;  %v5907_v63 = vld [vmem:[#allocation4 + $0x138] sm:$0xff] }
 0xa5f   :  { %v5832_v29 = vsel %vm841_vm11, %v5829_v9, %v5831_v10  ;;  %5836 = vst.msk [vmem:[#allocation4 + $0x158] sm:$0x3f] %vm13615_vm9, %v5831_v10  ;;  %v7479_v45 = vpack.c.bf16 %v5907_v63, %v5905_v31  ;;  %v5906_v28 = vld [vmem:[#allocation4 + $0x130] sm:$0xff]  ;;  %vm13617_vm11 = vcmask 498688   ;;  %v8042_v10 = vld [vmem:[%s12772_s6 + $0x38] sm:$0xff]  }
 0xa60   :  { %5835 = vst [vmem:[#allocation4 + $0x150] sm:$0x3f] %v5832_v29  ;;  %v7481_v7 = vpack.c.bf16 %v5906_v28, %v5904_v2  ;;  %v8043_v28 = vld [vmem:[%s12772_s6 + $0x40] sm:$0xff]  }
 0xa61   :  { %v5838_v47 = vpop.permute.xlu0 %5837  ;;  %7480 = vmatprep.subr.bf16.mxu0 %v7479_v45 }
 0xa62   :  { %v5840_v55 = vpop.permute.xlu1 %5839  ;;  %7482 = vmatpush1.bf16.msra.mxu0 %v7481_v7  ;;  %v5909_v57 = vld [vmem:[#allocation4 + $0x148] sm:$0xff] }
 0xa63   :  { %v5841_v62 = vsel %vm899_vm12, %v5838_v47, %v5840_v55  ;;  %5845 = vst.msk [vmem:[#allocation4 + $0x168] sm:$0x3f] %vm13616_vm10, %v5840_v55  ;;  %v5908_v0 = vld [vmem:[#allocation4 + $0x140] sm:$0xff]  ;;  %vm13619_vm12 = vmmov %vm13595_vm2  ;;  %v3202_v47 = vrot.slane %v12228_v43, %v12236_v8 }
 0xa64   :  { %5844 = vst [vmem:[#allocation4 + $0x160] sm:$0x3f] %v5841_v62  ;;  %v8044_v62 = vld [vmem:[%s12772_s6 + $0x48] sm:$0xff]   ;;  %vm13624_vm2 = vmmov %vm13623_vm5 }
 0xa65   :  { %v5847_v22 = vpop.permute.xlu0 %5846 }
 0xa66   :  { %v5849_v25 = vpop.permute.xlu1 %5848  ;;  %v5911_v17 = vld [vmem:[#allocation4 + $0x158] sm:$0xff] }
 0xa67   :  { %v5850_v15 = vsel %vm13617_vm11, %v5847_v22, %v5849_v25  ;;  %5854 = vst.msk [vmem:[#allocation4 + $0x178] sm:$0x3f] %vm13618_vm4, %v5849_v25  ;;  %v7483_v39 = vpack.c.bf16 %v5911_v17, %v5909_v57  ;;  %v5910_v33 = vld [vmem:[#allocation4 + $0x150] sm:$0xff]  ;;  %v7025_v25 = vrot.slane %v3202_v47, 9  ;;  %v3258_v57 = vrot.slane %v12243_v26, %v12236_v8 }
 0xa68   :  { %5853 = vst [vmem:[#allocation4 + $0x170] sm:$0x3f] %v5850_v15  ;;  %v7485_v12 = vpack.c.bf16 %v5910_v33, %v5908_v0  ;;  %v7027_v15 = vrot.slane %v12246_v5, 9  ;;  %v3239_v0 = vcombine.high %v12246_v5, %v12246_v5 }
 0xa69   :  { %v5856_v37 = vpop.permute.xlu0 %5855  ;;  %7484 = vmatprep.subr.bf16.mxu0 %v7483_v39  ;;  %v7029_v43 = vrot.slane %v3258_v57, 9  ;;  %v7031_v39 = vrot.slane %v12261_v34, 9  ;;  %v3265_v26 = vcombine.high %v3258_v57, %v3258_v57  ;;  %v8056_v57 = vld [vmem:[%s12773_s7 + $0x90] sm:$0xff]  }
 0xa6a   :  { %v5858_v44 = vpop.permute.xlu1 %5857  ;;  %7486 = vmatpush1.bf16.msra.mxu0 %v7485_v12  ;;  %v5913_v51 = vld [vmem:[#allocation4 + $0x168] sm:$0xff]  ;;  %v3292_v12 = vcombine.high %v12261_v34, %v12261_v34 }
 0xa6b   :  { %v5859_v19 = vsel %vm1015_vm14, %v5856_v37, %v5858_v44  ;;  %5863 = vst.msk [vmem:[#allocation4 + $0x188] sm:$0x3f] %vm13619_vm12, %v5858_v44  ;;  %v5912_v38 = vld [vmem:[#allocation4 + $0x160] sm:$0xff]  ;;  %vm13620_vm14 = vcmask 588800   ;;  %v7030_v37 = vrot.slane %v3265_v26, 9  ;;  %v7028_v44 = vrot.slane %v3239_v0, 9 }
 0xa6c   :  { %5862 = vst [vmem:[#allocation4 + $0x180] sm:$0x3f] %v5859_v19  ;;  %v7032_v19 = vrot.slane %v3292_v12, 9 }
 0xa6e   :  { %v5915_v46 = vld [vmem:[#allocation4 + $0x178] sm:$0xff] }
 0xa6f   :  { %v7487_v24 = vpack.c.bf16 %v5915_v46, %v5913_v51  ;;  %v5914_v48 = vld [vmem:[#allocation4 + $0x170] sm:$0xff] }
 0xa70   :  { %v7489_v4 = vpack.c.bf16 %v5914_v48, %v5912_v38 }
 0xa71   :  { %7488 = vmatprep.subr.bf16.mxu0 %v7487_v24 }
 0xa72   :  { %7490 = vmatpush1.bf16.msra.mxu0 %v7489_v4  ;;  %v5917_v1 = vld [vmem:[#allocation4 + $0x188] sm:$0xff] }
 0xa73   :  { %5972 = vmatprep.subr.mxu0 %v5917_v1  ;;  %v5916_v20 = vld [vmem:[#allocation4 + $0x180] sm:$0xff] }
 0xa76   :  { %5973 = vmatpush1.msra.mxu0 %v5916_v20 }
 0xa77   :  { %5989 = vmatmul.mubr.f32.vlgmr.msra.gmra.mrb[4].mxu0 %v5864_v54  ;;  %6146 = vmatprep.subr.bf16.mxu0 %v13491_v14 }
 0xa78   :  { %7149 = vmatprep.mubr.msk.f32.mxu0 %vm13620_vm14, %v5867_v32  ;;  %6147 = vmatpush1.bf16.msra.mxu0 %v8035_v6 }
 0xa79   :  { %6148 = vmatprep.subr.bf16.mxu0 %v13491_v14 }
 0xa7b   :  { %5995 = vmatmul.mubr.f32.gmra.mrb[6].mxu0 %v5866_v56 }
 0xa7c   :  { %6149 = vmatpush1.bf16.msra.mxu0 %v8036_v41  ;;  %v8045_v41 = vld [vmem:[%s12773_s7 + $0x40] sm:$0xff]  }
 0xa7d   :  { %6150 = vmatprep.subr.bf16.mxu0 %v13491_v14 }
 0xa80   :  { %6151 = vmatpush1.bf16.msra.mxu0 %v8037_v60  ;;  %v8046_v60 = vld [vmem:[%s12773_s7] sm:$0xff]  }
 0xa81   :  { %6152 = vmatprep.subr.bf16.mxu0 %v13491_v14 }
 0xa84   :  { %6153 = vmatpush1.bf16.msra.mxu0 %v8038_v30  ;;  %v8047_v30 = vld [vmem:[%s12773_s7 + $0xc0] sm:$0xff]  }
 0xa85   :  { %6154 = vmatprep.subr.bf16.mxu0 %v13491_v14  ;;  %7287 = vmatprep.subr.bf16.mxu1 %v8047_v30 }
 0xa88   :  { %6155 = vmatpush1.bf16.msra.mxu0 %v8039_v61 }
 0xa89   :  { %6156 = vmatprep.subr.bf16.mxu0 %v13491_v14 }
 0xa8c   :  { %6157 = vmatpush1.bf16.msra.mxu0 %v8040_v50  ;;  %v8048_v50 = vld [vmem:[%s12773_s7 + $0x80] sm:$0xff]  }
 0xa8d   :  { %6158 = vmatprep.subr.bf16.mxu0 %v13491_v14  ;;  %7288 = vmatpush3.bf16.msra.mxu1 %v8048_v50 }
 0xa90   :  { %6159 = vmatpush1.bf16.msra.mxu0 %v8041_v58  ;;  %v8049_v58 = vld [vmem:[%s12773_s7 + $0x48] sm:$0xff]  }
 0xa91   :  { %6160 = vmatprep.subr.bf16.mxu0 %v13491_v14 }
 0xa94   :  { %6161 = vmatpush1.bf16.msra.mxu0 %v8042_v10  ;;  %v8051_v10 = vld [vmem:[%s12773_s7 + $0xc8] sm:$0xff]  }
 0xa95   :  { %6162 = vmatprep.subr.bf16.mxu0 %v13491_v14  ;;  %7289 = vmatprep.subr.bf16.mxu1 %v8051_v10 }
 0xa98   :  { %6163 = vmatpush1.bf16.msra.mxu0 %v8043_v28  ;;  %v8053_v28 = vld [vmem:[%s12773_s7 + $0x50] sm:$0xff]  }
 0xa99   :  { %6164 = vmatprep.subr.bf16.mxu0 %v13491_v14  ;;  %v3210_v14 = vcombine.high %v3202_v47, %v3202_v47 }
 0xa9b   :  { %v7026_v33 = vrot.slane %v3210_v14, 9 }
 0xa9c   :  { %6165 = vmatpush1.bf16.msra.mxu0 %v8044_v62  ;;  %v8055_v62 = vld [vmem:[%s12773_s7 + $0xd0] sm:$0xff]  }
 0xa9d   :  { %7265 = vmatprep.subr.bf16.mxu0 %v8045_v41 }
 0xb4a   :  { %v5990_v11 = vpop.f32.mrb[4].mxu0 }
 0xb4b   :  { %v5991_v35 = vadd.f32 %v5990_v11, %v13621_v49  ;;  %v5992_v21 = vpop.f32.mrb[5].mxu0 }
 0xb4c   :  { %v5993_v23 = vadd.f32 %v5992_v21, %v13621_v49 }
 0xb4d   :  { %6013 = vrot.lane.b32.xlu0 %v5991_v35, %s13569_s0 }
 0xb4e   :  { %6002 = vst.msk [vmem:[#allocation3 + $0x8] sm:$0xff] %vm73_vm0, %v5993_v23  ;;  %v5996_v13 = vpop.f32.mrb[6].mxu0 }
 0xb4f   :  { %v5997_v27 = vadd.f32 %v5996_v13, %v13622_v52  ;;  %v5998_v36 = vpop.f32.mrb[7].mxu0 }
 0xb50   :  { %v5999_v3 = vadd.f32 %v5998_v36, %v13622_v52 }
 0xb51   :  { %6017 = vrot.lane.b32.xlu0 %v5997_v27, %s13569_s0 }
 0xb52   :  { %6004 = vst.msk [vmem:[#allocation3 + $0x18] sm:$0xff] %vm73_vm0, %v5999_v3 }
 0xb55   :  { %v6006_v42 = vld [vmem:[#allocation3 + $0x8] sm:$0xff] }
 0xb56   :  { %6015 = vrot.lane.b32.xlu1 %v6006_v42, %s13569_s0 }
 0xb59   :  { %v6008_v16 = vld [vmem:[#allocation3 + $0x18] sm:$0xff] }
 0xb5a   :  { %6019 = vrot.lane.b32.xlu1 %v6008_v16, %s13569_s0 }
 0xbbf   :  { %v6014_v59 = vpop.permute.xlu0 %6013 }
 0xbc3   :  { %v6018_v31 = vpop.permute.xlu0 %6017 }
 0xbc8   :  { %v6016_v40 = vpop.permute.xlu1 %6015 }
 0xbc9   :  { %v6021_v53 = vsel %vm261_vm1, %v6014_v59, %v6016_v40  ;;  %v6028_v18 = vmax.f32 %v5993_v23, %v6016_v40 }
 0xbca   :  { %v12500_v9 = vmax.f32 %v5991_v35, %v6021_v53 }
 0xbcb   :  { %6032 = vst.msk [vmem:[#allocation3 + $0x8] sm:$0xff] %vm73_vm0, %v6028_v18 }
 0xbcc   :  { %v6020_v63 = vpop.permute.xlu1 %6019 }
 0xbcd   :  { %v6022_v29 = vsel %vm261_vm1, %v6018_v31, %v6020_v63  ;;  %v6030_v45 = vmax.f32 %v5999_v3, %v6020_v63  ;;  %vm3208_vm1 = vcmask 516352  }
 0xbce   :  { %v6029_v2 = vmax.f32 %v5997_v27, %v6022_v29 }
 0xbcf   :  { %6034 = vst.msk [vmem:[#allocation3 + $0x18] sm:$0xff] %vm73_vm0, %v6030_v45 }
 0xbd2   :  { %v6036_v7 = vld [vmem:[#allocation3 + $0x8] sm:$0xff] }
 0xbd3   :  { %v7679_v55 = vpack.i.bf16 %v6036_v7, %v12500_v9 }
 0xbd5   :  { %7680 = vrot.lane.b32.xlu0 %v7679_v55, %s13503_s13  ;;  %v8054_v55 = vld [vmem:[%s12773_s7 + $0x10] sm:$0xff]  }
 0xbd6   :  { %v6038_v22 = vld [vmem:[#allocation3 + $0x18] sm:$0xff] }
 0xbd7   :  { %v7684_v17 = vpack.i.bf16 %v6038_v22, %v6029_v2 }
 0xbd9   :  { %3205 = vrot.lane.b32.xlu0 %v7025_v25, %s13167_s2  ;;  %7685 = vrot.lane.b32.xlu1 %v7684_v17, %s13503_s13  ;;  %v8057_v17 = vld [vmem:[%s12773_s7 + $0x58] sm:$0xff]  }
 0xbdd   :  { %3261 = vrot.lane.b32.xlu0 %v7029_v43, %s13167_s2  ;;  %3235 = vrot.lane.b32.xlu1 %v7027_v15, %s13167_s2  ;;  %v8058_v15 = vld [vmem:[%s12773_s7 + $0x18] sm:$0xff]  }
 0xbe1   :  { %3211 = vrot.lane.b32.xlu0 %v3210_v14, %s13300_s15  ;;  %3288 = vrot.lane.b32.xlu1 %v7031_v39, %s13167_s2  ;;  %v8059_v14 = vld [vmem:[%s12773_s7 + $0xd8] sm:$0xff]  }
 0xbe5   :  { %3266 = vrot.lane.b32.xlu0 %v3265_v26, %s13300_s15  ;;  %3240 = vrot.lane.b32.xlu1 %v3239_v0, %s13300_s15  ;;  %v8060_v26 = vld [vmem:[%s12773_s7 + $0x98] sm:$0xff]   ;;  %v8061_v0 = vld [vmem:[%s12773_s7 + $0x60] sm:$0xff]  }
 0xbe9   :  { %3218 = vrot.lane.b32.xlu0 %v7026_v33, %s13317_s4  ;;  %3293 = vrot.lane.b32.xlu1 %v3292_v12, %s13300_s15  ;;  %v8062_v12 = vld [vmem:[%s12773_s7 + $0x20] sm:$0xff]  }
 0xbed   :  { %3272 = vrot.lane.b32.xlu0 %v7030_v37, %s13317_s4  ;;  %3246 = vrot.lane.b32.xlu1 %v7028_v44, %s13317_s4  ;;  %v8063_v37 = vld [vmem:[%s12773_s7 + $0xe0] sm:$0xff]  }
 0xbee   :  { %v8064_v44 = vld [vmem:[%s12773_s7 + $0xa0] sm:$0xff]  }
 0xbf1   :  { %3299 = vrot.lane.b32.xlu1 %v7032_v19, %s13317_s4 }
 0xc47   :  { %v7681_v5 = vpop.permute.xlu0 %7680 }
 0xc48   :  { %v7683_v51 = vunpack.i.h.bf16 %v7681_v5  ;;  %v7682_v46 = vunpack.i.l.bf16 %v7681_v5  ;;  %v8065_v5 = vld [vmem:[%s12773_s7 + $0x68] sm:$0xff]  }
 0xc4a   :  { %v6051_v34 = vsel %vm13623_vm5, %v7682_v46, %v7683_v51  ;;  %v6058_v1 = vmax.f32 %v6028_v18, %v7683_v51  ;;  %v8067_v51 = vld [vmem:[%s12773_s7 + $0xe8] sm:$0xff]  }
 0xc4b   :  { %v7686_v24 = vpop.permute.xlu1 %7685  ;;  %v3206_v38 = vpop.permute.xlu0 %3205  ;;  %v6057_v32 = vmax.f32 %v12500_v9, %v6051_v34  ;;  %v8050_v9 = vld [vmem:[%s12773_s7 + $0x8] sm:$0xff]  }
 0xc4c   :  { %v7688_v48 = vunpack.i.h.bf16 %v7686_v24  ;;  %v7687_v4 = vunpack.i.l.bf16 %v7686_v24  ;;  %3209 = vst.msk [vmem:[#allocation5] sm:$0x1] %vm3208_vm1, %v3206_v38  ;;  %v8066_v46 = vld [vmem:[%s12773_s7 + $0x28] sm:$0xff]   ;;  %v8069_v38 = vld [vmem:[%s12773_s7 + $0x70] sm:$0xff]  }
 0xc4d   :  { %v8068_v34 = vld [vmem:[%s12773_s7 + $0xa8] sm:$0xff]  }
 0xc4e   :  { %v6060_v54 = vmax.f32 %v6030_v45, %v7688_v48  ;;  %v6052_v20 = vsel %vm13624_vm2, %v7687_v4, %v7688_v48  ;;  %v8071_v4 = vld [vmem:[%s12773_s7 + $0xf0] sm:$0xff]  }
 0xc4f   :  { %v6059_v56 = vmax.f32 %v6029_v2, %v6052_v20  ;;  %v3236_v11 = vpop.permute.xlu1 %3235  ;;  %v3262_v49 = vpop.permute.xlu0 %3261  ;;  %v8052_v2 = vld [vmem:[%s12773_s7 + $0x88] sm:$0xff]   ;;  %v8073_v20 = vld [vmem:[%s12773_s7 + $0x78] sm:$0xff]  }
 0xc50   :  { %v6062_v35 = vpack.c.bf16 %v6060_v54, %v6058_v1  ;;  %3238 = vst.msk [vmem:[#allocation5 + $0x2] sm:$0x1] %vm3208_vm1, %v3236_v11  ;;  %3264 = vst.msk [vmem:[#allocation5 + $0x4] sm:$0x1] %vm3208_vm1, %v3262_v49  ;;  %7290 = vmatpush3.bf16.msra.mxu1 %v8052_v2  ;;  %v8070_v1 = vld [vmem:[%s12773_s7 + $0x30] sm:$0xff]   ;;  %v8075_v11 = vld [vmem:[%s12773_s7 + $0xf8] sm:$0xff]  }
 0xc51   :  { %v6061_v21 = vpack.c.bf16 %v6059_v56, %v6057_v32  ;;  %7291 = vmatprep.subr.bf16.mxu1 %v8055_v62  ;;  %v8072_v32 = vld [vmem:[%s12773_s7 + $0xb0] sm:$0xff]   ;;  %v8074_v49 = vld [vmem:[%s12773_s7 + $0x38] sm:$0xff]  }
 0xc52   :  { %7160 = vmatprep.mubr.msk.bf16.mxu0 %vm73_vm0, %v6062_v35  ;;  %v7257_v2 = vld [vmem:[%s12775_s9 + $0x18] sm:$0xff]   ;;  %vm8193_vm0 = vmmov 0  }
 0xc53   :  { %v3289_v23 = vpop.permute.xlu1 %3288  ;;  %v3212_v13 = vpop.permute.xlu0 %3211  ;;  %6179 = vmatmul.mubr.bf16.vlgmr.msra.gmra.mrb[8].mxu0 %v6061_v21  ;;  %v8076_v21 = vld [vmem:[%s12773_s7 + $0xb8] sm:$0xff]  }
 0xc54   :  { %3291 = vst.msk [vmem:[#allocation5 + $0x6] sm:$0x1] %vm3208_vm1, %v3289_v23  ;;  %7266 = vmatpush3.bf16.msra.mxu0 %v8046_v60  ;;  %7292 = vmatpush3.bf16.msra.mxu1 %v8056_v57  ;;  %v8192_v23 = vmov 0.0|0.0   ;;  %v7261_v57 = vld [vmem:[%s12777_s11 + $0x8] sm:$0xff]  }
 0xc55   :  { %3215 = vst.msk [vmem:[#allocation5] sm:$0x1] %vm3214_vm3, %v3212_v13  ;;  %7267 = vmatprep.subr.bf16.mxu0 %v8049_v58  ;;  %7293 = vmatprep.subr.bf16.mxu1 %v8059_v14 }
 0xc57   :  { %v3241_v52 = vpop.permute.xlu1 %3240  ;;  %v3267_v27 = vpop.permute.xlu0 %3266 }
 0xc58   :  { %3243 = vst.msk [vmem:[#allocation5 + $0x2] sm:$0x1] %vm3214_vm3, %v3241_v52  ;;  %3269 = vst.msk [vmem:[#allocation5 + $0x4] sm:$0x1] %vm3214_vm3, %v3267_v27  ;;  %7268 = vmatpush3.bf16.msra.mxu0 %v8050_v9  ;;  %7294 = vmatpush3.bf16.msra.mxu1 %v8060_v26 }
 0xc59   :  { %7269 = vmatprep.subr.bf16.mxu0 %v8053_v28  ;;  %7295 = vmatprep.subr.bf16.mxu1 %v8063_v37  ;;  %v7258_v28 = vld [vmem:[%s12775_s9 + $0x20] sm:$0xff]  }
 0xc5b   :  { %v3294_v36 = vpop.permute.xlu1 %3293  ;;  %v3219_v3 = vpop.permute.xlu0 %3218 }
 0xc5c   :  { %3296 = vst.msk [vmem:[#allocation5 + $0x6] sm:$0x1] %vm3214_vm3, %v3294_v36  ;;  %7270 = vmatpush3.bf16.msra.mxu0 %v8054_v55  ;;  %7296 = vmatpush3.bf16.msra.mxu1 %v8064_v44  ;;  %v6677_v55 = vld [vmem:[%s12775_s9 + $0x38] sm:$0xf] }
 0xc5d   :  { %3222 = vst.msk [vmem:[#allocation5] sm:$0x1] %vm3221_vm8, %v3219_v3  ;;  %7271 = vmatprep.subr.bf16.mxu0 %v8057_v17  ;;  %7297 = vmatprep.subr.bf16.mxu1 %v8067_v51  ;;  %v6692_v62 = vunpack.c.l.bf16 %v6677_v55  ;;  %v7262_v17 = vld [vmem:[%s12777_s11 + $0x10] sm:$0xff]  }
 0xc5f   :  { %v3247_v42 = vpop.permute.xlu1 %3246  ;;  %v3273_v16 = vpop.permute.xlu0 %3272 }
 0xc60   :  { %3249 = vst.msk [vmem:[#allocation5 + $0x2] sm:$0x1] %vm3221_vm8, %v3247_v42  ;;  %3275 = vst.msk [vmem:[#allocation5 + $0x4] sm:$0x1] %vm3221_vm8, %v3273_v16  ;;  %7272 = vmatpush3.bf16.msra.mxu0 %v8058_v15  ;;  %7298 = vmatpush3.bf16.msra.mxu1 %v8068_v34  ;;  %v7264_v15 = vld [vmem:[%s12777_s11 + $0x20] sm:$0xff]  }
 0xc61   :  { %7273 = vmatprep.subr.bf16.mxu0 %v8061_v0  ;;  %7299 = vmatprep.subr.bf16.mxu1 %v8071_v4 }
 0xc63   :  { %v3300_v6 = vpop.permute.xlu1 %3299 }
 0xc64   :  { %3302 = vst.msk [vmem:[#allocation5 + $0x6] sm:$0x1] %vm3221_vm8, %v3300_v6  ;;  %7274 = vmatpush3.bf16.msra.mxu0 %v8062_v12  ;;  %7300 = vmatpush3.bf16.msra.mxu1 %v8072_v32 }
 0xc65   :  { %7275 = vmatprep.subr.bf16.mxu0 %v8065_v5  ;;  %7301 = vmatprep.subr.bf16.mxu1 %v8075_v11 }
 0xc68   :  { %7276 = vmatpush3.bf16.msra.mxu0 %v8066_v46  ;;  %7302 = vmatpush3.bf16.msra.mxu1 %v8076_v21 }
 0xc69   :  { %7277 = vmatprep.subr.bf16.mxu0 %v8069_v38  ;;  %7512 = vmatprep.subr.bf16.mxu1 %v8192_v23  ;;  %v6784_v38 = vld [vmem:[%s12777_s11 + $0x28] sm:$0x3] }
 0xc6a   :  { %v6795_v34 = vunpack.c.l.bf16 %v6784_v38 }
 0xc6c   :  { %7278 = vmatpush3.bf16.msra.mxu0 %v8070_v1 }
 0xc6d   :  { %7279 = vmatprep.subr.bf16.mxu0 %v8073_v20  ;;  %v7204_v20 = vld [vmem:[%s13627_s5] ss:$0 sm:$0xff] }
 0xc70   :  { %7280 = vmatpush3.bf16.msra.mxu0 %v8074_v49 }
 0xc71   :  { %7491 = vmatprep.subr.bf16.mxu0 %v8192_v23 }
 0xd26   :  { %v6180_v61 = vpop.f32.mrb[8].mxu0 }
 0xd27   :  { %6187 = vst.msk [vmem:[#allocation5 + $0x1] sm:$0x1] %vm3193_vm6, %v6180_v61  ;;  %v6195_v59 = vrot.slane %v6180_v61, %v12236_v8  ;;  %v6213_v40 = vcombine.high %v6180_v61, %v6180_v61  ;;  %v6182_v53 = vpop.f32.mrb[9].mxu0 }
 0xd28   :  { %v6183_v18 = vpop.f32.mrb[10].mxu0 }
 0xd29   :  { %v7161_v31 = vrot.slane %v6195_v59, 9  ;;  %v6220_v63 = vrot.slane %v6213_v40, %v12236_v8  ;;  %6240 = vst.msk [vmem:[#allocation5 + $0x5] sm:$0x1] %vm3193_vm6, %v6183_v18  ;;  %v6185_v29 = vpop.f32.mrb[11].mxu0  ;;  %v6266_v45 = vcombine.high %v6183_v18, %v6183_v18  ;;  %v6202_v22 = vcombine.high %v6195_v59, %v6195_v59 }
 0xd2a   :  { %v6248_v25 = vrot.slane %v6183_v18, %v12236_v8 }
 0xd2b   :  { %6222 = vst.msk [vmem:[#allocation5 + $0x3] sm:$0x1] %vm3193_vm6, %v6220_v63  ;;  %6198 = vrot.lane.b32.xlu0 %v7161_v31, %s13167_s2  ;;  %v7163_v7 = vrot.slane %v6220_v63, 9  ;;  %v6273_v47 = vrot.slane %v6266_v45, %v12236_v8  ;;  %v6229_v43 = vcombine.high %v6220_v63, %v6220_v63  ;;  %v7162_v48 = vrot.slane %v6202_v22, 9  ;;  %v7208_v31 = vld [vmem:[%s12775_s9] sm:$0xff]   ;;  %v7256_v45 = vld [vmem:[%s12775_s9 + $0x10] sm:$0xff]  }
 0xd2c   :  { %v7165_v39 = vrot.slane %v6248_v25, 9  ;;  %v6255_v19 = vcombine.high %v6248_v25, %v6248_v25  ;;  %v7236_v25 = vld [vmem:[%s12777_s11] sm:$0xff]  }
 0xd2d   :  { %6225 = vrot.lane.b32.xlu1 %v7163_v7, %s13167_s2  ;;  %6275 = vst.msk [vmem:[#allocation5 + $0x7] sm:$0x1] %vm3193_vm6, %v6273_v47  ;;  %v7167_v33 = vrot.slane %v6273_v47, 9  ;;  %v6282_v24 = vcombine.high %v6273_v47, %v6273_v47  ;;  %v7164_v54 = vrot.slane %v6229_v43, 9  ;;  %v7259_v7 = vld [vmem:[%s12775_s9 + $0x28] sm:$0xff]   ;;  %v7260_v47 = vld [vmem:[%s12775_s9 + $0x30] sm:$0xff]  }
 0xd2e   :  { %v7166_v56 = vrot.slane %v6255_v19, 9  ;;  %vm6700_vm6 = vcmask 982016  }
 0xd2f   :  { %6203 = vrot.lane.b32.xlu0 %v6202_v22, %s13300_s15  ;;  %v7168_v35 = vrot.slane %v6282_v24, 9  ;;  %v13625_v22 = vmov 0.0  }
 0xd31   :  { %6230 = vrot.lane.b32.xlu1 %v6229_v43, %s13300_s15  ;;  %v7263_v43 = vld [vmem:[%s12777_s11 + $0x18] sm:$0xff]   ;;  %s8107_s11 = scalar_lea.vmem %s6890_s1, 32 }
 0xd32   :  { %p8108_p8 = scmp.ne.s32.totalorder %s6890_s1, %s8107_s11  ;;  %p8113_p10 = scmp.lt.s32.totalorder %s8107_s11, %s8107_s11 }
 0xd33   :  { %6251 = vrot.lane.b32.xlu0 %v7165_v39, %s13167_s2  ;;  %v7169_v39 = vld [vmem:[%s12774_s8] ss:$0 sm:$0xff] }
 0xd34   :  { %p8114_p11 = por %p8113_p10, %p8112_p9 }
 0xd35   :  { %6278 = vrot.lane.b32.xlu1 %v7167_v33, %s13167_s2 }
 0xd36   :  { %p8115_p12 = pnand %p8114_p11, %p8108_p8 }
 0xd37   :  { %6256 = vrot.lane.b32.xlu0 %v6255_v19, %s13300_s15 }
 0xd39   :  { %6283 = vrot.lane.b32.xlu1 %v6282_v24, %s13300_s15 }
 0xd3b   :  { %6209 = vrot.lane.b32.xlu0 %v7162_v48, %s13317_s4  ;;  %v7202_v48 = vld [vmem:[%s13626_s10] ss:$0 sm:$0xff] }
 0xd3d   :  { %6236 = vrot.lane.b32.xlu1 %v7164_v54, %s13317_s4 }
 0xd3f   :  { %6262 = vrot.lane.b32.xlu0 %v7166_v56, %s13317_s4 }
 0xd41   :  { %6289 = vrot.lane.b32.xlu1 %v7168_v35, %s13317_s4 }
 0xd9d   :  { %v6199_v13 = vpop.permute.xlu0 %6198 }
 0xd9e   :  { %6201 = vst.msk [vmem:[#allocation5 + $0x1] sm:$0x1] %vm3208_vm1, %v6199_v13 }
 0xd9f   :  { %v6226_v52 = vpop.permute.xlu1 %6225 }
 0xda0   :  { %6228 = vst.msk [vmem:[#allocation5 + $0x3] sm:$0x1] %vm3208_vm1, %v6226_v52 }
 0xda1   :  { %v6204_v27 = vpop.permute.xlu0 %6203 }
 0xda2   :  { %6206 = vst.msk [vmem:[#allocation5 + $0x1] sm:$0x1] %vm3214_vm3, %v6204_v27 }
 0xda3   :  { %v6231_v36 = vpop.permute.xlu1 %6230 }
 0xda4   :  { %6233 = vst.msk [vmem:[#allocation5 + $0x3] sm:$0x1] %vm3214_vm3, %v6231_v36 }
 0xda5   :  { %v6252_v3 = vpop.permute.xlu0 %6251 }
 0xda6   :  { %6254 = vst.msk [vmem:[#allocation5 + $0x5] sm:$0x1] %vm3208_vm1, %v6252_v3 }
 0xda7   :  { %v6279_v42 = vpop.permute.xlu1 %6278 }
 0xda8   :  { %6281 = vst.msk [vmem:[#allocation5 + $0x7] sm:$0x1] %vm3208_vm1, %v6279_v42 }
 0xda9   :  { %v6257_v16 = vpop.permute.xlu0 %6256 }
 0xdaa   :  { %6259 = vst.msk [vmem:[#allocation5 + $0x5] sm:$0x1] %vm3214_vm3, %v6257_v16 }
 0xdab   :  { %v6284_v6 = vpop.permute.xlu1 %6283 }
 0xdac   :  { %6286 = vst.msk [vmem:[#allocation5 + $0x7] sm:$0x1] %vm3214_vm3, %v6284_v6 }
 0xdad   :  { %v6210_v41 = vpop.permute.xlu0 %6209 }
 0xdae   :  { %6212 = vst.msk [vmem:[#allocation5 + $0x1] sm:$0x1] %vm3221_vm8, %v6210_v41 }
 0xdaf   :  { %v6237_v60 = vpop.permute.xlu1 %6236 }
 0xdb0   :  { %6239 = vst.msk [vmem:[#allocation5 + $0x3] sm:$0x1] %vm3221_vm8, %v6237_v60 }
 0xdb1   :  { %v6263_v30 = vpop.permute.xlu0 %6262 }
 0xdb2   :  { %6265 = vst.msk [vmem:[#allocation5 + $0x5] sm:$0x1] %vm3221_vm8, %v6263_v30 }
 0xdb3   :  { %v6290_v61 = vpop.permute.xlu1 %6289 }
 0xdb4   :  { %6292 = vst.msk [vmem:[#allocation5 + $0x7] sm:$0x1] %vm3221_vm8, %v6290_v61 }
 0xdbb   :  { %v6293_v50 = vld [vmem:[#allocation5] sm:$0xff] }
 0xdbc   :  { %v6302_v58 = vrot.slane %v6293_v50, %v12236_v8  ;;  %v6295_v59 = vcombine.high %v6293_v50, %v6293_v50 }
 0xdbe   :  { %v6310_v40 = vcombine.high %v6302_v58, %v6302_v58  ;;  %v6309_v53 = vrot.slane %v6295_v59, %v12236_v8  ;;  %v6316_v10 = vpack.c.bf16 %v6302_v58, %v6302_v58  ;;  %v7255_v8 = vld [vmem:[%s12775_s9 + $0x8] sm:$0xff]  }
 0xdc0   :  { %v6317_v18 = vpack.c.bf16 %v6310_v40, %v6310_v40  ;;  %v6311_v9 = vcombine.high %v6309_v53, %v6309_v53  ;;  %v6318_v29 = vpack.c.bf16 %v6309_v53, %v6309_v53 }
 0xdc2   :  { %6615 = vmatprep.mubr.bf16.mxu0 %v6317_v18  ;;  %v6319_v63 = vpack.c.bf16 %v6311_v9, %v6311_v9 }
 0xdc3   :  { %6616 = vmatmul.mubr.bf16.vlgmr.msra.gmra.mrb[12].mxu0 %v6316_v10 }
 0xdc4   :  { %6655 = vmatprep.mubr.bf16.mxu1 %v6319_v63  ;;  %7493 = vmatpush3.bf16.msra.mxu0 %v7208_v31 }
 0xdc5   :  { %6656 = vmatmul.mubr.bf16.vlgmr.msra.gmra.mrb[12].mxu1 %v6318_v29  ;;  %7494 = vmatprep.subr.bf16.mxu0 %v8192_v23 }
 0xdc6   :  { %7367 = vmatprep.mubr.msk.f32.mxu0 %vm8193_vm0, %v13625_v22  ;;  %7392 = vmatprep.mubr.msk.f32.mxu1 %vm8193_vm0, %v13625_v22 }
 0xdc7   :  { %7514 = vmatpush3.bf16.msra.mxu1 %v7236_v25 }
 0xdc8   :  { %7496 = vmatpush3.bf16.msra.mxu0 %v7255_v8  ;;  %7515 = vmatprep.subr.bf16.mxu1 %v8192_v23 }
 0xdc9   :  { %7497 = vmatprep.subr.bf16.mxu0 %v8192_v23 }
 0xdcb   :  { %7517 = vmatpush3.bf16.msra.mxu1 %v7261_v57 }
 0xdcc   :  { %7499 = vmatpush3.bf16.msra.mxu0 %v7256_v45  ;;  %7518 = vmatprep.subr.bf16.mxu1 %v8192_v23 }
 0xdcd   :  { %7500 = vmatprep.subr.bf16.mxu0 %v8192_v23 }
 0xdcf   :  { %7520 = vmatpush3.bf16.msra.mxu1 %v7262_v17 }
 0xdd0   :  { %7502 = vmatpush3.bf16.msra.mxu0 %v7257_v2  ;;  %7521 = vmatprep.subr.bf16.mxu1 %v8192_v23 }
 0xdd1   :  { %7503 = vmatprep.subr.bf16.mxu0 %v8192_v23 }
 0xdd3   :  { %7523 = vmatpush3.bf16.msra.mxu1 %v7263_v43 }
 0xdd4   :  { %7505 = vmatpush3.bf16.msra.mxu0 %v7258_v28  ;;  %7524 = vmatprep.subr.bf16.mxu1 %v8192_v23 }
 0xdd5   :  { %7506 = vmatprep.subr.bf16.mxu0 %v8192_v23 }
 0xdd7   :  { %7526 = vmatpush3.bf16.msra.mxu1 %v7264_v15 }
 0xdd8   :  { %7508 = vmatpush3.bf16.msra.mxu0 %v7259_v7  ;;  %7390 = vmatprep.subr.mxu1 %v13625_v22 }
 0xdd9   :  { %7509 = vmatprep.subr.bf16.mxu0 %v8192_v23 }
 0xddb   :  { %7391 = vmatpush3.msk.msra.mxu1 %vm6807_vm7, %v6795_v34 }
 0xddc   :  { %7511 = vmatpush3.bf16.msra.mxu0 %v7260_v47 }
 0xddd   :  { %7365 = vmatprep.subr.mxu0 %v13625_v22 }
 0xde0   :  { %7366 = vmatpush3.msra.mxu0 %v6692_v62 }
 0xe96   :  { %v7281_v14 = vpop.f32.mrb[12].mxu0 }
 0xe97   :  { %v7282_v26 = vpop.f32.mrb[13].mxu0 }
 0xe98   :  { %v7283_v0 = vadd.f32 %v7282_v26, %v7281_v14  ;;  %v7284_v33 = vpop.f32.mrb[14].mxu0  ;;  %v7303_v12 = vpop.f32.mrb[12].mxu1 }
 0xe99   :  { %v7285_v37 = vpop.f32.mrb[15].mxu0  ;;  %v7304_v44 = vpop.f32.mrb[13].mxu1 }
 0xe9a   :  { %v6618_v19 = vadd.f32 %v7283_v0, %v7169_v39  ;;  %v7305_v5 = vadd.f32 %v7304_v44, %v7303_v12  ;;  %v7306_v51 = vpop.f32.mrb[14].mxu1 }
 0xe9b   :  { %v7307_v46 = vpop.f32.mrb[15].mxu1 }
 0xe9c   :  { %v6658_v24 = vadd.f32 %v7305_v5, %v6618_v19 }
 0xe9e   :  { %7368 = vmatmul.mubr.msk.f32.vlgmr.msra.gmra.mrb[16].mxu0 %vm6700_vm6, %v6658_v24 }
 0xf71   :  { %v6770_v4 = vpop.f32.mrb[16].mxu0 }
 0xf72   :  { %v6771_v1 = vadd.f32 %v7202_v48, %v6770_v4  ;;  %v7369_v54 = vpop.f32.mrb[17].mxu0 }
 0xf74   :  { %7393 = vmatmul.mubr.msk.f32.vlgmr.msra.gmra.mrb[16].mxu1 %vm6803_vm15, %v6771_v1 }
0x1047   :  { %v6877_v32 = vpop.f32.mrb[16].mxu1 }
0x1048   :  { %v6878_v56 = vadd.f32 %v7204_v20, %v6877_v32  ;;  %v7394_v11 = vpop.f32.mrb[17].mxu1 }
0x104a   :  { %6882 = vst.msk [vmem:[#allocation9] sm:$0x3] %vm6881_vm13, %v6878_v56 }
0x104b   :  { %8118 = shalt.err (!%p8115_p12)
}
0x104c   :  { %s13628_s19 = sld [smem:[#allocation101_spill]] }
0x1052   :  { %s8119_s2 = scalar_lea.hbm %s13628_s19, 32 }
0x1053   :  { %p8120_p13 = scmp.ne.s32.totalorder %s13628_s19, %s8119_s2  ;;  %p8123_p0 = scmp.lt.u32.totalorder %s8119_s2, %s13628_s19 }
0x1055   :  { %p8125_p1 = pnand %p8123_p0, %p8120_p13 }
0x1057   :  { %8128 = shalt.err (!%p8125_p1)
}
0x1058   :  { %6892 = dma.vmem_to_hbm [thread:$0]  %s6890_s1, 32, %s13628_s19, [#allocation8]  }
0x1059   :  { %8131 = dma.done.wait [#allocation8], 32  }
0x105a   :  { %8132 = vsyncadd [#allocation8], 4294967264 }
0x105b   :  { %6896 = vsyncpa [#allocation7], 1 }
0x105c   :  { %6897 = vsyncpa [#allocation8], 1 }

</bundles_post_ra>
